<compile_context>
chip_gen: v7x
topology: tpu7x:2x2x1
jax: 0.10.0
libtpu: 0.0.40
codegen_flags: <defaults>
</compile_context>

<pallas_src>
import functools

import jax
import jax.numpy as jnp
from jax.experimental import pallas as pl
from jax.experimental.pallas import tpu as pltpu


# ----------------------------------------------------------------------------
# Generic matmul + bias kernel (used for the per-layer x-projection).
# ----------------------------------------------------------------------------
def dense_kernel(x_ref, w_ref, b_ref, o_ref):
    y = jnp.dot(x_ref[...].astype(jnp.bfloat16), w_ref[...],
                preferred_element_type=jnp.float32)
    o_ref[...] = (y + b_ref[...]).astype(o_ref.dtype)


def dense(x, w, b, tile_m=256):
    M, K = x.shape
    N = w.shape[1]
    if M % tile_m != 0:
        tile_m = M
    return pl.pallas_call(
        dense_kernel,
        out_shape=jax.ShapeDtypeStruct((M, N), jnp.float32),
        grid=(M // tile_m,),
        in_specs=[pl.BlockSpec((tile_m, K), lambda i: (i, 0)),
                  pl.BlockSpec((K, N), lambda i: (0, 0)),
                  pl.BlockSpec((1, N), lambda i: (0, 0))],
        out_specs=pl.BlockSpec((tile_m, N), lambda i: (i, 0)),
        compiler_params=pltpu.CompilerParams(
            dimension_semantics=("parallel",)),
    )(x, w, b.reshape(1, -1))


def conv_x_projection(seq, wx_flat, b, k, pad):
    """Precompute Wx*x_t + b for every step: (B,T,H,W,Cin) -> (B,T,H*W,4*Ch)."""
    B, T, H, W, Cin = seq.shape
    xp = jnp.pad(seq, ((0, 0), (0, 0), (pad, pad), (pad, pad), (0, 0)))
    cols = [xp[:, :, ky:ky + H, kx:kx + W, :]
            for ky in range(k) for kx in range(k)]
    cols = jnp.stack(cols, axis=4)                       # (B,T,H,W,kk,Cin)
    cols = cols.reshape(B * T * H * W, k * k * Cin)      # im2col LHS (XLA glue)
    gx = dense(cols, wx_flat, b)                         # one big MXU matmul
    C4 = wx_flat.shape[1]
    return gx.reshape(B, T, H * W, C4)


# ----------------------------------------------------------------------------
# Fused ConvLSTM recurrence: one kernel per layer, grid = (B, T).
#   it = sigmoid(gx_i + Whi*h + Wci.c)
#   ft = sigmoid(gx_f + Whf*h + Wcf.c)
#   ct = ft.c + it.tanh(gx_c + Whc*h)
#   ot = sigmoid(gx_o + Who*h + Wco.ct)
#   ht = ot.tanh(ct)
# gx = precomputed x-projection (+bias), gate order i,f,c,o along channels.
# h is kept zero-halo-padded in VMEM scratch; the kernel also emits the
# padded h_t slab used by the fused space-to-depth downsample.
# ----------------------------------------------------------------------------
def convlstm_seq_kernel(gx_ref, wh_ref, wci_ref, wcf_ref, wco_ref,
                        hs_ref, hpad_ref, c_ref, acc_ref,
                        *, H, W, Ch, k, pad):
    t = pl.program_id(1)

    @pl.when(t == 0)
    def _init():
        hpad_ref[...] = jnp.zeros_like(hpad_ref)   # halo stays zero forever
        c_ref[...] = jnp.zeros_like(c_ref)

    # Gate pre-activations: start from the streamed-in x projection, then add
    # the k*k shifted-tap recurrent matmuls (bf16 operands, f32 accumulation
    # into a VMEM scratch so the (HW, 4Ch) accumulator never hogs vregs).
    acc_ref[...] = gx_ref[...]
    for tap in range(k * k):
        ky, kx = tap // k, tap % k
        hs = hpad_ref[ky:ky + H, kx:kx + W, :]
        hs = hs.reshape(H * W, Ch).astype(jnp.bfloat16)
        acc_ref[...] += jnp.dot(hs, wh_ref[tap],
                                preferred_element_type=jnp.float32)

    acc = acc_ref[...]
    c = c_ref[...]
    it = jax.nn.sigmoid(acc[:, 0 * Ch:1 * Ch] + wci_ref[...] * c)
    ft = jax.nn.sigmoid(acc[:, 1 * Ch:2 * Ch] + wcf_ref[...] * c)
    ct = ft * c + it * jnp.tanh(acc[:, 2 * Ch:3 * Ch])
    ot = jax.nn.sigmoid(acc[:, 3 * Ch:4 * Ch] + wco_ref[...] * ct)
    ht = ot * jnp.tanh(ct)

    c_ref[...] = ct
    hpad_ref[pad:pad + H, pad:pad + W, :] = ht.reshape(H, W, Ch)

    # Emit h_t zero-padded by 1 (what the stride-2 4x4 downsample needs).
    if pad == 1:
        hs_ref[...] = hpad_ref[...]
    else:
        hs_ref[...] = hpad_ref[pad - 1:pad + H + 1, pad - 1:pad + W + 1, :]


def convlstm_layer(gx, cell, B, T, H, W, Ch, k, pad):
    assert pad >= 1, "fused downsample path assumes kernel_size >= 3 (odd)"
    kk = k * k
    HW = H * W
    Hd, Wd = H + 2, W + 2
    flops = int(B * T * (2 * kk * HW * Ch * 4 * Ch + 12 * HW * 4 * Ch))
    trans = int(B * T * 5 * HW * Ch)
    bytes_acc = int(B * T * 4 * (HW * 4 * Ch + Hd * Wd * Ch)
                    + kk * Ch * 4 * Ch * 2)
    return pl.pallas_call(
        functools.partial(convlstm_seq_kernel, H=H, W=W, Ch=Ch, k=k, pad=pad),
        out_shape=jax.ShapeDtypeStruct((B, T, Hd, Wd, Ch), jnp.float32),
        grid=(B, T),
        in_specs=[
            pl.BlockSpec((None, None, HW, 4 * Ch), lambda b, t: (b, t, 0, 0)),
            pl.BlockSpec((kk, Ch, 4 * Ch), lambda b, t: (0, 0, 0)),   # resident
            pl.BlockSpec((HW, Ch), lambda b, t: (0, 0)),              # resident
            pl.BlockSpec((HW, Ch), lambda b, t: (0, 0)),              # resident
            pl.BlockSpec((HW, Ch), lambda b, t: (0, 0)),              # resident
        ],
        out_specs=pl.BlockSpec((None, None, Hd, Wd, Ch),
                               lambda b, t: (b, t, 0, 0, 0)),
        scratch_shapes=[
            pltpu.VMEM((H + 2 * pad, W + 2 * pad, Ch), jnp.float32),  # h (padded)
            pltpu.VMEM((HW, Ch), jnp.float32),                        # c
            pltpu.VMEM((HW, 4 * Ch), jnp.float32),                    # gate acc
        ],
        compiler_params=pltpu.CompilerParams(
            dimension_semantics=("parallel", "arbitrary")),
        cost_estimate=pl.CostEstimate(flops=flops, transcendentals=trans,
                                      bytes_accessed=bytes_acc),
    )(gx, cell["wh"], cell["wci"], cell["wcf"], cell["wco"])


# ----------------------------------------------------------------------------
# Downsampling Conv2d(Ch, Ch, kernel=4, stride=2, padding=1), reformulated as a
# 2x2 stride-1 conv over the space-to-depth view of the padded input
# (4 shifted matmuls with contraction depth K = 4*Ch = 128).
# ----------------------------------------------------------------------------
def downsample_kernel(s2d_ref, wd_ref, bd_ref, o_ref, *, Ho, Wo, Ch):
    acc = jnp.zeros((Ho * Wo, Ch), jnp.float32)
    for dy in range(2):
        for dx in range(2):
            xs = s2d_ref[dy:dy + Ho, dx:dx + Wo, :]
            xs = xs.reshape(Ho * Wo, 4 * Ch).astype(jnp.bfloat16)
            acc = acc + jnp.dot(xs, wd_ref[dy * 2 + dx],
                                preferred_element_type=jnp.float32)
    acc = acc + bd_ref[...]
    o_ref[...] = acc.reshape(Ho, Wo, Ch)


def downsample(hs_pad, wd, bd):
    """hs_pad: (B, T, H+2, W+2, Ch) padded hidden states -> (B, T, H//2, W//2, Ch)."""
    B, T, Hp2, Wp2, Ch = hs_pad.shape
    Ho, Wo = Hp2 // 2 - 1, Wp2 // 2 - 1
    # space-to-depth (pure reshape/transpose XLA glue, element-count preserving)
    s2d = hs_pad.reshape(B * T, Ho + 1, 2, Wo + 1, 2, Ch)
    s2d = jnp.transpose(s2d, (0, 1, 3, 2, 4, 5)).reshape(
        B * T, Ho + 1, Wo + 1, 4 * Ch)
    out = pl.pallas_call(
        functools.partial(downsample_kernel, Ho=Ho, Wo=Wo, Ch=Ch),
        out_shape=jax.ShapeDtypeStruct((B * T, Ho, Wo, Ch), jnp.float32),
        grid=(B * T,),
        in_specs=[
            pl.BlockSpec((None, Ho + 1, Wo + 1, 4 * Ch),
                         lambda i: (i, 0, 0, 0)),
            pl.BlockSpec((4, 4 * Ch, Ch), lambda i: (0, 0, 0)),       # resident
            pl.BlockSpec((1, Ch), lambda i: (0, 0)),                  # resident
        ],
        out_specs=pl.BlockSpec((None, Ho, Wo, Ch), lambda i: (i, 0, 0, 0)),
        compiler_params=pltpu.CompilerParams(
            dimension_semantics=("parallel",)),
    )(s2d, wd, bd)
    return out.reshape(B, T, Ho, Wo, Ch)


# ----------------------------------------------------------------------------
# Fused head: Linear -> ReLU -> Linear -> Sigmoid in a single kernel.
# The NCHW-flatten permutation is folded into fc1_w at init time.
# ----------------------------------------------------------------------------
def head_kernel(f_ref, w1_ref, b1_ref, w2_ref, b2_ref, o_ref):
    h = jnp.dot(f_ref[...].astype(jnp.bfloat16), w1_ref[...],
                preferred_element_type=jnp.float32) + b1_ref[...]
    h = jnp.maximum(h, 0.0)
    y = jnp.dot(h.astype(jnp.bfloat16), w2_ref[...],
                preferred_element_type=jnp.float32) + b2_ref[...]
    o_ref[...] = jax.nn.sigmoid(y)


def head(feat, w1, b1, w2, b2):
    M = feat.shape[0]
    vspec = pl.BlockSpec(memory_space=pltpu.MemorySpace.VMEM)
    return pl.pallas_call(
        head_kernel,
        out_shape=jax.ShapeDtypeStruct((M, 2), jnp.float32),
        in_specs=[vspec] * 5,
        out_specs=vspec,
    )(feat, w1, b1.reshape(1, -1), w2, b2.reshape(1, -1))


# ----------------------------------------------------------------------------
# Parameter init (deterministic, synthetic).  Peephole weights Wci/Wcf/Wco are
# zero-initialized exactly as in the torch module.  Weights are generated in
# torch layout and pre-transposed once into kernel-friendly layouts.
# ----------------------------------------------------------------------------
def init_params(key, input_channels, hidden, kernel_size, num_layers, image_size):
    k = kernel_size
    kk = k * k
    cin_list = [input_channels] + [hidden] * (num_layers - 1)
    cells, downs = [], []
    for i in range(num_layers):
        cin = cin_list[i]
        Hl, Wl = image_size[0] // 2 ** i, image_size[1] // 2 ** i
        ks = jax.random.split(jax.random.fold_in(key, i), 6)
        # torch layout: (gate, Cout, Cin, kH, kW); gate order i, f, c, o
        wx_t = jax.random.normal(ks[0], (4, hidden, cin, k, k), jnp.float32) * 0.05
        wh_t = jax.random.normal(ks[1], (4, hidden, hidden, k, k), jnp.float32) * 0.05
        bx_t = jax.random.normal(ks[2], (4, hidden), jnp.float32) * 0.05
        # im2col x-projection weight: (kk*Cin, 4*hidden), tap-major / Cin-minor
        wx = jnp.transpose(wx_t, (3, 4, 2, 0, 1)).reshape(kk * cin, 4 * hidden)
        wx = wx.astype(jnp.bfloat16)
        # per-tap recurrent weight: (kk, Ch, 4*hidden) bf16 MXU operand
        wh = jnp.transpose(wh_t, (3, 4, 2, 0, 1)).reshape(kk, hidden, 4 * hidden)
        wh = wh.astype(jnp.bfloat16)
        b = bx_t.reshape(1, 4 * hidden)
        zeros_peep = jnp.zeros((Hl * Wl, hidden), jnp.float32)  # torch zeros_(Wci)
        cells.append(dict(wx=wx, wh=wh, b=b,
                          wci=zeros_peep, wcf=zeros_peep, wco=zeros_peep))
        # downsample conv: torch (Co, Ci, 4, 4) -> space-to-depth block form
        # (dy*2+dx, (py*2+px)*Ci + ci, Co)
        wd_t = jax.random.normal(ks[3], (hidden, hidden, 4, 4), jnp.float32) * 0.05
        wd = jnp.transpose(wd_t, (2, 3, 1, 0))               # (ky, kx, Ci, Co)
        wd = wd.reshape(2, 2, 2, 2, hidden, hidden)          # (dy,py,dx,px,Ci,Co)
        wd = jnp.transpose(wd, (0, 2, 1, 3, 4, 5)).reshape(4, 4 * hidden, hidden)
        wd = wd.astype(jnp.bfloat16)
        bd = jax.random.normal(ks[4], (hidden,), jnp.float32) * 0.05
        downs.append(dict(w=wd, b=bd.reshape(1, hidden)))

    Hf, Wf = image_size[0] // 2 ** num_layers, image_size[1] // 2 ** num_layers
    kf = jax.random.split(jax.random.fold_in(key, 10_000), 4)
    # fc1 generated in torch NCHW-flatten layout, then its rows are permuted to
    # NHWC order so the per-forward transpose is folded into the weight.
    fc1_w_nchw = jax.random.normal(kf[0], (hidden * Hf * Wf, hidden),
                                   jnp.float32) * 0.05
    fc1_w = jnp.transpose(fc1_w_nchw.reshape(hidden, Hf, Wf, hidden),
                          (1, 2, 0, 3)).reshape(Hf * Wf * hidden, hidden)
    fc1_w = fc1_w.astype(jnp.bfloat16)
    fc1_b = jax.random.normal(kf[1], (hidden,), jnp.float32) * 0.05
    fc2_w = (jax.random.normal(kf[2], (hidden, 2), jnp.float32) * 0.05
             ).astype(jnp.bfloat16)
    fc2_b = jax.random.normal(kf[3], (2,), jnp.float32) * 0.05
    return dict(cells=cells, down=downs,
                fc1_w=fc1_w, fc1_b=fc1_b, fc2_w=fc2_w, fc2_b=fc2_b)


# ----------------------------------------------------------------------------
# Full forward.
# ----------------------------------------------------------------------------
def conv_lstm_forward(x_seq, params, hidden, kernel_size, num_layers, image_size):
    # x_seq: (T, B, H, W, Cin)  -- the torch module consumes a list of T NCHW frames.
    T, B = x_seq.shape[0], x_seq.shape[1]
    pad = kernel_size // 2
    seq = jnp.transpose(x_seq, (1, 0, 2, 3, 4))   # (B, T, H, W, Cin), batch-major

    for i in range(num_layers):
        Hl, Wl = image_size[0] // 2 ** i, image_size[1] // 2 ** i
        cell = params["cells"][i]
        # 1) precompute all input projections (one big matmul kernel)
        gx = conv_x_projection(seq, cell["wx"], cell["b"], kernel_size, pad)
        # 2) fused T-step recurrence (h/c resident in VMEM scratch)
        # TODO(synk): FirstListCollector/RNNProgressive plumbing is not fully
        # specified; we keep all T per-step hidden states (assuming the dropped
        # first element is the injected initial state).
        hs_pad = convlstm_layer(gx, cell, B, T, Hl, Wl, hidden, kernel_size, pad)
        # 3) stride-2 downsample conv on every step (space-to-depth form)
        d = params["down"][i]
        seq = downsample(hs_pad, d["w"], d["b"])

    # Fused head: flatten (NCHW permutation already folded into fc1_w rows).
    feat = seq.reshape(B * T, -1)
    out = head(feat, params["fc1_w"], params["fc1_b"],
               params["fc2_w"], params["fc2_b"])
    out = out.reshape(B, T, 2)
    return jnp.transpose(out, (1, 0, 2))          # (T, B, 2)


if __name__ == "__main__":
    key = jax.random.PRNGKey(0)
    B, T = 2, 4
    Cin, hidden, ksize, num_layers = 4, 32, 3, 2
    image_size = (16, 16)   # 16 -> 8 -> 4, so the final Linear sees hidden*4*4

    params = init_params(key, Cin, hidden, ksize, num_layers, image_size)
    x = jax.random.normal(jax.random.fold_in(key, 7),
                          (T, B, image_size[0], image_size[1], Cin), jnp.float32)

    fwd = jax.jit(lambda xx, pp: conv_lstm_forward(
        xx, pp, hidden, ksize, num_layers, image_size))
    out = fwd(x, params)
    jax.block_until_ready(out)
    assert out.shape == (T, B, 2)
    assert bool(jnp.all(jnp.isfinite(out)))
    print("KERNEL_OK")
</pallas_src>

<mosaic_0001>
module attributes {stable_mosaic.version = 11 : i64} {
  func.func @dense_kernel(%arg0: i32, %arg1: memref<256x36xf32, #tpu.memory_space<vmem>>, %arg2: memref<36x128xbf16, #tpu.memory_space<vmem>>, %arg3: memref<1x128xf32, #tpu.memory_space<vmem>>, %arg4: memref<256x128xf32, #tpu.memory_space<vmem>>) attributes {dimension_semantics = [#tpu.dimension_semantics<parallel>], iteration_bounds = array<i64: 8>, scalar_prefetch = 0 : i64, scratch_operands = 0 : i64, tpu.core_type = #tpu.core_type<tc>, window_params = [{transform_indices = @transform_0, window_bounds = array<i64: 256, 36>}, {pipeline_mode = #tpu.pipeline_mode<synchronous>, transform_indices = @transform_1, window_bounds = array<i64: 36, 128>}, {pipeline_mode = #tpu.pipeline_mode<synchronous>, transform_indices = @transform_2, window_bounds = array<i64: 1, 128>}, {transform_indices = @transform_3, window_bounds = array<i64: 256, 128>}]} {
    %c0 = arith.constant 0 : index
    %c0_0 = arith.constant 0 : index
    %0 = vector.load %arg1[%c0, %c0_0] : memref<256x36xf32, #tpu.memory_space<vmem>>, vector<256x36xf32>
    %1 = arith.truncf %0 : vector<256x36xf32> to vector<256x36xbf16>
    %c0_1 = arith.constant 0 : index
    %c0_2 = arith.constant 0 : index
    %2 = vector.load %arg2[%c0_1, %c0_2] : memref<36x128xbf16, #tpu.memory_space<vmem>>, vector<36x128xbf16>
    %cst = arith.constant dense<0.000000e+00> : vector<256x128xf32>
    %3 = tpu.matmul %1, %2, %cst {dimension_numbers = #tpu.dot_dimension_numbers<[1], [0], [0], [1], [0, 0, 1, 1], [], []>} : vector<256x36xbf16>, vector<36x128xbf16>, vector<256x128xf32> -> vector<256x128xf32>
    %c0_3 = arith.constant 0 : index
    %c0_4 = arith.constant 0 : index
    %4 = vector.load %arg3[%c0_3, %c0_4] : memref<1x128xf32, #tpu.memory_space<vmem>>, vector<1x128xf32>
    %5 = vector.broadcast %4 : vector<1x128xf32> to vector<256x128xf32>
    %6 = arith.addf %3, %5 : vector<256x128xf32>
    %c0_5 = arith.constant 0 : index
    %c0_6 = arith.constant 0 : index
    %7 = vector.load %arg4[%c0_5, %c0_6] : memref<256x128xf32, #tpu.memory_space<vmem>>, vector<256x128xf32>
    tpu.vector_store %arg4[%c0_5, %c0_6], %6 {strides = array<i32>} : memref<256x128xf32, #tpu.memory_space<vmem>>, vector<256x128xf32>,
    return
  }
  func.func @transform_0(%arg0: i32) -> (i32, i32) {
    %c0_i32 = arith.constant 0 : i32
    %c0_i32_0 = arith.constant 0 : i32
    return %arg0, %c0_i32 : i32, i32
  }
  func.func @transform_1(%arg0: i32) -> (i32, i32) {
    %c0_i32 = arith.constant 0 : i32
    %c0_i32_0 = arith.constant 0 : i32
    %c0_i32_1 = arith.constant 0 : i32
    return %c0_i32, %c0_i32_0 : i32, i32
  }
  func.func @transform_2(%arg0: i32) -> (i32, i32) {
    %c0_i32 = arith.constant 0 : i32
    %c0_i32_0 = arith.constant 0 : i32
    %c0_i32_1 = arith.constant 0 : i32
    return %c0_i32, %c0_i32_0 : i32, i32
  }
  func.func @transform_3(%arg0: i32) -> (i32, i32) {
    %c0_i32 = arith.constant 0 : i32
    %c0_i32_0 = arith.constant 0 : i32
    return %arg0, %c0_i32 : i32, i32
  }
}

module attributes {stable_mosaic.version = 11 : i64} {
  func.func @convlstm_seq_kernel(%arg0: i32, %arg1: i32, %arg2: memref<1x1x256x128xf32, #tpu.memory_space<vmem>>, %arg3: memref<9x32x128xbf16, #tpu.memory_space<vmem>>, %arg4: memref<256x32xf32, #tpu.memory_space<vmem>>, %arg5: memref<256x32xf32, #tpu.memory_space<vmem>>, %arg6: memref<256x32xf32, #tpu.memory_space<vmem>>, %arg7: memref<1x1x18x18x32xf32, #tpu.memory_space<vmem>>, %arg8: memref<18x18x32xf32, #tpu.memory_space<vmem>>, %arg9: memref<256x32xf32, #tpu.memory_space<vmem>>, %arg10: memref<256x128xf32, #tpu.memory_space<vmem>>) attributes {dimension_semantics = [#tpu.dimension_semantics<parallel>, #tpu.dimension_semantics<arbitrary>], iteration_bounds = array<i64: 2, 4>, scalar_prefetch = 0 : i64, scratch_operands = 3 : i64, tpu.core_type = #tpu.core_type<tc>, window_params = [{transform_indices = @transform_0, window_bounds = array<i64: 1, 1, 256, 128>}, {pipeline_mode = #tpu.pipeline_mode<synchronous>, transform_indices = @transform_1, window_bounds = array<i64: 9, 32, 128>}, {pipeline_mode = #tpu.pipeline_mode<synchronous>, transform_indices = @transform_2, window_bounds = array<i64: 256, 32>}, {pipeline_mode = #tpu.pipeline_mode<synchronous>, transform_indices = @transform_3, window_bounds = array<i64: 256, 32>}, {pipeline_mode = #tpu.pipeline_mode<synchronous>, transform_indices = @transform_4, window_bounds = array<i64: 256, 32>}, {transform_indices = @transform_5, window_bounds = array<i64: 1, 1, 18, 18, 32>}]} {
    %c0_i32 = arith.constant 0 : i32
    %0 = arith.cmpi eq, %arg1, %c0_i32 : i32
    %1 = arith.extui %0 : i1 to i32
    %c0_i32_0 = arith.constant 0 : i32
    %2 = arith.cmpi ne, %1, %c0_i32_0 : i32
    scf.if %2 {
      %cst_122 = arith.constant 0.000000e+00 : f32
      %130 = vector.broadcast %cst_122 : f32 to vector<18x18x32xf32>
      %c0_123 = arith.constant 0 : index
      %c0_124 = arith.constant 0 : index
      %c0_125 = arith.constant 0 : index
      %131 = vector.load %arg8[%c0_123, %c0_124, %c0_125] : memref<18x18x32xf32, #tpu.memory_space<vmem>>, vector<18x18x32xf32>
      tpu.vector_store %arg8[%c0_123, %c0_124, %c0_125], %130 {strides = array<i32>} : memref<18x18x32xf32, #tpu.memory_space<vmem>>, vector<18x18x32xf32>,
      %cst_126 = arith.constant 0.000000e+00 : f32
      %132 = vector.broadcast %cst_126 : f32 to vector<256x32xf32>
      %c0_127 = arith.constant 0 : index
      %c0_128 = arith.constant 0 : index
      %133 = vector.load %arg9[%c0_127, %c0_128] : memref<256x32xf32, #tpu.memory_space<vmem>>, vector<256x32xf32>
      tpu.vector_store %arg9[%c0_127, %c0_128], %132 {strides = array<i32>} : memref<256x32xf32, #tpu.memory_space<vmem>>, vector<256x32xf32>,
    } else {
    }
    %c0 = arith.constant 0 : index
    %c0_1 = arith.constant 0 : index
    %c0_2 = arith.constant 0 : index
    %c0_3 = arith.constant 0 : index
    %3 = vector.load %arg2[%c0, %c0_1, %c0_2, %c0_3] : memref<1x1x256x128xf32, #tpu.memory_space<vmem>>, vector<1x1x256x128xf32>
    %4 = vector.shape_cast %3 : vector<1x1x256x128xf32> to vector<256x128xf32>
    %c0_4 = arith.constant 0 : index
    %c0_5 = arith.constant 0 : index
    %5 = vector.load %arg10[%c0_4, %c0_5] : memref<256x128xf32, #tpu.memory_space<vmem>>, vector<256x128xf32>
    tpu.vector_store %arg10[%c0_4, %c0_5], %4 {strides = array<i32>} : memref<256x128xf32, #tpu.memory_space<vmem>>, vector<256x128xf32>,
    %c0_6 = arith.constant 0 : index
    %c0_7 = arith.constant 0 : index
    %c0_8 = arith.constant 0 : index
    %6 = vector.load %arg8[%c0_6, %c0_7, %c0_8] : memref<18x18x32xf32, #tpu.memory_space<vmem>>, vector<16x16x32xf32>
    %7 = vector.shape_cast %6 : vector<16x16x32xf32> to vector<256x32xf32>
    %8 = arith.truncf %7 : vector<256x32xf32> to vector<256x32xbf16>
    %c0_9 = arith.constant 0 : index
    %c0_10 = arith.constant 0 : index
    %9 = vector.load %arg10[%c0_9, %c0_10] : memref<256x128xf32, #tpu.memory_space<vmem>>, vector<256x128xf32>
    %c0_11 = arith.constant 0 : index
    %c0_12 = arith.constant 0 : index
    %c0_13 = arith.constant 0 : index
    %10 = vector.load %arg3[%c0_11, %c0_12, %c0_13] : memref<9x32x128xbf16, #tpu.memory_space<vmem>>, vector<1x32x128xbf16>
    %11 = vector.shape_cast %10 : vector<1x32x128xbf16> to vector<32x128xbf16>
    %cst = arith.constant dense<0.000000e+00> : vector<256x128xf32>
    %12 = tpu.matmul %8, %11, %cst {dimension_numbers = #tpu.dot_dimension_numbers<[1], [0], [0], [1], [0, 0, 1, 1], [], []>} : vector<256x32xbf16>, vector<32x128xbf16>, vector<256x128xf32> -> vector<256x128xf32>
    %13 = arith.addf %9, %12 : vector<256x128xf32>
    %c0_14 = arith.constant 0 : index
    %c0_15 = arith.constant 0 : index
    %14 = vector.load %arg10[%c0_14, %c0_15] : memref<256x128xf32, #tpu.memory_space<vmem>>, vector<256x128xf32>
    tpu.vector_store %arg10[%c0_14, %c0_15], %13 {strides = array<i32>} : memref<256x128xf32, #tpu.memory_space<vmem>>, vector<256x128xf32>,
    %c0_16 = arith.constant 0 : index
    %c1 = arith.constant 1 : index
    %c0_17 = arith.constant 0 : index
    %15 = vector.load %arg8[%c0_16, %c1, %c0_17] : memref<18x18x32xf32, #tpu.memory_space<vmem>>, vector<16x16x32xf32>
    %16 = vector.shape_cast %15 : vector<16x16x32xf32> to vector<256x32xf32>
    %17 = arith.truncf %16 : vector<256x32xf32> to vector<256x32xbf16>
    %c0_18 = arith.constant 0 : index
    %c0_19 = arith.constant 0 : index
    %18 = vector.load %arg10[%c0_18, %c0_19] : memref<256x128xf32, #tpu.memory_space<vmem>>, vector<256x128xf32>
    %c1_20 = arith.constant 1 : index
    %c0_21 = arith.constant 0 : index
    %c0_22 = arith.constant 0 : index
    %19 = vector.load %arg3[%c1_20, %c0_21, %c0_22] : memref<9x32x128xbf16, #tpu.memory_space<vmem>>, vector<1x32x128xbf16>
    %20 = vector.shape_cast %19 : vector<1x32x128xbf16> to vector<32x128xbf16>
    %cst_23 = arith.constant dense<0.000000e+00> : vector<256x128xf32>
    %21 = tpu.matmul %17, %20, %cst_23 {dimension_numbers = #tpu.dot_dimension_numbers<[1], [0], [0], [1], [0, 0, 1, 1], [], []>} : vector<256x32xbf16>, vector<32x128xbf16>, vector<256x128xf32> -> vector<256x128xf32>
    %22 = arith.addf %18, %21 : vector<256x128xf32>
    %c0_24 = arith.constant 0 : index
    %c0_25 = arith.constant 0 : index
    %23 = vector.load %arg10[%c0_24, %c0_25] : memref<256x128xf32, #tpu.memory_space<vmem>>, vector<256x128xf32>
    tpu.vector_store %arg10[%c0_24, %c0_25], %22 {strides = array<i32>} : memref<256x128xf32, #tpu.memory_space<vmem>>, vector<256x128xf32>,
    %c0_26 = arith.constant 0 : index
    %c2 = arith.constant 2 : index
    %c0_27 = arith.constant 0 : index
    %24 = vector.load %arg8[%c0_26, %c2, %c0_27] : memref<18x18x32xf32, #tpu.memory_space<vmem>>, vector<16x16x32xf32>
    %25 = vector.shape_cast %24 : vector<16x16x32xf32> to vector<256x32xf32>
    %26 = arith.truncf %25 : vector<256x32xf32> to vector<256x32xbf16>
    %c0_28 = arith.constant 0 : index
    %c0_29 = arith.constant 0 : index
    %27 = vector.load %arg10[%c0_28, %c0_29] : memref<256x128xf32, #tpu.memory_space<vmem>>, vector<256x128xf32>
    %c2_30 = arith.constant 2 : index
    %c0_31 = arith.constant 0 : index
    %c0_32 = arith.constant 0 : index
    %28 = vector.load %arg3[%c2_30, %c0_31, %c0_32] : memref<9x32x128xbf16, #tpu.memory_space<vmem>>, vector<1x32x128xbf16>
    %29 = vector.shape_cast %28 : vector<1x32x128xbf16> to vector<32x128xbf16>
    %cst_33 = arith.constant dense<0.000000e+00> : vector<256x128xf32>
    %30 = tpu.matmul %26, %29, %cst_33 {dimension_numbers = #tpu.dot_dimension_numbers<[1], [0], [0], [1], [0, 0, 1, 1], [], []>} : vector<256x32xbf16>, vector<32x128xbf16>, vector<256x128xf32> -> vector<256x128xf32>
    %31 = arith.addf %27, %30 : vector<256x128xf32>
    %c0_34 = arith.constant 0 : index
    %c0_35 = arith.constant 0 : index
    %32 = vector.load %arg10[%c0_34, %c0_35] : memref<256x128xf32, #tpu.memory_space<vmem>>, vector<256x128xf32>
    tpu.vector_store %arg10[%c0_34, %c0_35], %31 {strides = array<i32>} : memref<256x128xf32, #tpu.memory_space<vmem>>, vector<256x128xf32>,
    %c1_36 = arith.constant 1 : index
    %c0_37 = arith.constant 0 : index
    %c0_38 = arith.constant 0 : index
    %33 = vector.load %arg8[%c1_36, %c0_37, %c0_38] : memref<18x18x32xf32, #tpu.memory_space<vmem>>, vector<16x16x32xf32>
    %34 = vector.shape_cast %33 : vector<16x16x32xf32> to vector<256x32xf32>
    %35 = arith.truncf %34 : vector<256x32xf32> to vector<256x32xbf16>
    %c0_39 = arith.constant 0 : index
    %c0_40 = arith.constant 0 : index
    %36 = vector.load %arg10[%c0_39, %c0_40] : memref<256x128xf32, #tpu.memory_space<vmem>>, vector<256x128xf32>
    %c3 = arith.constant 3 : index
    %c0_41 = arith.constant 0 : index
    %c0_42 = arith.constant 0 : index
    %37 = vector.load %arg3[%c3, %c0_41, %c0_42] : memref<9x32x128xbf16, #tpu.memory_space<vmem>>, vector<1x32x128xbf16>
    %38 = vector.shape_cast %37 : vector<1x32x128xbf16> to vector<32x128xbf16>
    %cst_43 = arith.constant dense<0.000000e+00> : vector<256x128xf32>
    %39 = tpu.matmul %35, %38, %cst_43 {dimension_numbers = #tpu.dot_dimension_numbers<[1], [0], [0], [1], [0, 0, 1, 1], [], []>} : vector<256x32xbf16>, vector<32x128xbf16>, vector<256x128xf32> -> vector<256x128xf32>
    %40 = arith.addf %36, %39 : vector<256x128xf32>
    %c0_44 = arith.constant 0 : index
    %c0_45 = arith.constant 0 : index
    %41 = vector.load %arg10[%c0_44, %c0_45] : memref<256x128xf32, #tpu.memory_space<vmem>>, vector<256x128xf32>
    tpu.vector_store %arg10[%c0_44, %c0_45], %40 {strides = array<i32>} : memref<256x128xf32, #tpu.memory_space<vmem>>, vector<256x128xf32>,
    %c1_46 = arith.constant 1 : index
    %c1_47 = arith.constant 1 : index
    %c0_48 = arith.constant 0 : index
    %42 = vector.load %arg8[%c1_46, %c1_47, %c0_48] : memref<18x18x32xf32, #tpu.memory_space<vmem>>, vector<16x16x32xf32>
    %43 = vector.shape_cast %42 : vector<16x16x32xf32> to vector<256x32xf32>
    %44 = arith.truncf %43 : vector<256x32xf32> to vector<256x32xbf16>
    %c0_49 = arith.constant 0 : index
    %c0_50 = arith.constant 0 : index
    %45 = vector.load %arg10[%c0_49, %c0_50] : memref<256x128xf32, #tpu.memory_space<vmem>>, vector<256x128xf32>
    %c4 = arith.constant 4 : index
    %c0_51 = arith.constant 0 : index
    %c0_52 = arith.constant 0 : index
    %46 = vector.load %arg3[%c4, %c0_51, %c0_52] : memref<9x32x128xbf16, #tpu.memory_space<vmem>>, vector<1x32x128xbf16>
    %47 = vector.shape_cast %46 : vector<1x32x128xbf16> to vector<32x128xbf16>
    %cst_53 = arith.constant dense<0.000000e+00> : vector<256x128xf32>
    %48 = tpu.matmul %44, %47, %cst_53 {dimension_numbers = #tpu.dot_dimension_numbers<[1], [0], [0], [1], [0, 0, 1, 1], [], []>} : vector<256x32xbf16>, vector<32x128xbf16>, vector<256x128xf32> -> vector<256x128xf32>
    %49 = arith.addf %45, %48 : vector<256x128xf32>
    %c0_54 = arith.constant 0 : index
    %c0_55 = arith.constant 0 : index
    %50 = vector.load %arg10[%c0_54, %c0_55] : memref<256x128xf32, #tpu.memory_space<vmem>>, vector<256x128xf32>
    tpu.vector_store %arg10[%c0_54, %c0_55], %49 {strides = array<i32>} : memref<256x128xf32, #tpu.memory_space<vmem>>, vector<256x128xf32>,
    %c1_56 = arith.constant 1 : index
    %c2_57 = arith.constant 2 : index
    %c0_58 = arith.constant 0 : index
    %51 = vector.load %arg8[%c1_56, %c2_57, %c0_58] : memref<18x18x32xf32, #tpu.memory_space<vmem>>, vector<16x16x32xf32>
    %52 = vector.shape_cast %51 : vector<16x16x32xf32> to vector<256x32xf32>
    %53 = arith.truncf %52 : vector<256x32xf32> to vector<256x32xbf16>
    %c0_59 = arith.constant 0 : index
    %c0_60 = arith.constant 0 : index
    %54 = vector.load %arg10[%c0_59, %c0_60] : memref<256x128xf32, #tpu.memory_space<vmem>>, vector<256x128xf32>
    %c5 = arith.constant 5 : index
    %c0_61 = arith.constant 0 : index
    %c0_62 = arith.constant 0 : index
    %55 = vector.load %arg3[%c5, %c0_61, %c0_62] : memref<9x32x128xbf16, #tpu.memory_space<vmem>>, vector<1x32x128xbf16>
    %56 = vector.shape_cast %55 : vector<1x32x128xbf16> to vector<32x128xbf16>
    %cst_63 = arith.constant dense<0.000000e+00> : vector<256x128xf32>
    %57 = tpu.matmul %53, %56, %cst_63 {dimension_numbers = #tpu.dot_dimension_numbers<[1], [0], [0], [1], [0, 0, 1, 1], [], []>} : vector<256x32xbf16>, vector<32x128xbf16>, vector<256x128xf32> -> vector<256x128xf32>
    %58 = arith.addf %54, %57 : vector<256x128xf32>
    %c0_64 = arith.constant 0 : index
    %c0_65 = arith.constant 0 : index
    %59 = vector.load %arg10[%c0_64, %c0_65] : memref<256x128xf32, #tpu.memory_space<vmem>>, vector<256x128xf32>
    tpu.vector_store %arg10[%c0_64, %c0_65], %58 {strides = array<i32>} : memref<256x128xf32, #tpu.memory_space<vmem>>, vector<256x128xf32>,
    %c2_66 = arith.constant 2 : index
    %c0_67 = arith.constant 0 : index
    %c0_68 = arith.constant 0 : index
    %60 = vector.load %arg8[%c2_66, %c0_67, %c0_68] : memref<18x18x32xf32, #tpu.memory_space<vmem>>, vector<16x16x32xf32>
    %61 = vector.shape_cast %60 : vector<16x16x32xf32> to vector<256x32xf32>
    %62 = arith.truncf %61 : vector<256x32xf32> to vector<256x32xbf16>
    %c0_69 = arith.constant 0 : index
    %c0_70 = arith.constant 0 : index
    %63 = vector.load %arg10[%c0_69, %c0_70] : memref<256x128xf32, #tpu.memory_space<vmem>>, vector<256x128xf32>
    %c6 = arith.constant 6 : index
    %c0_71 = arith.constant 0 : index
    %c0_72 = arith.constant 0 : index
    %64 = vector.load %arg3[%c6, %c0_71, %c0_72] : memref<9x32x128xbf16, #tpu.memory_space<vmem>>, vector<1x32x128xbf16>
    %65 = vector.shape_cast %64 : vector<1x32x128xbf16> to vector<32x128xbf16>
    %cst_73 = arith.constant dense<0.000000e+00> : vector<256x128xf32>
    %66 = tpu.matmul %62, %65, %cst_73 {dimension_numbers = #tpu.dot_dimension_numbers<[1], [0], [0], [1], [0, 0, 1, 1], [], []>} : vector<256x32xbf16>, vector<32x128xbf16>, vector<256x128xf32> -> vector<256x128xf32>
    %67 = arith.addf %63, %66 : vector<256x128xf32>
    %c0_74 = arith.constant 0 : index
    %c0_75 = arith.constant 0 : index
    %68 = vector.load %arg10[%c0_74, %c0_75] : memref<256x128xf32, #tpu.memory_space<vmem>>, vector<256x128xf32>
    tpu.vector_store %arg10[%c0_74, %c0_75], %67 {strides = array<i32>} : memref<256x128xf32, #tpu.memory_space<vmem>>, vector<256x128xf32>,
    %c2_76 = arith.constant 2 : index
    %c1_77 = arith.constant 1 : index
    %c0_78 = arith.constant 0 : index
    %69 = vector.load %arg8[%c2_76, %c1_77, %c0_78] : memref<18x18x32xf32, #tpu.memory_space<vmem>>, vector<16x16x32xf32>
    %70 = vector.shape_cast %69 : vector<16x16x32xf32> to vector<256x32xf32>
    %71 = arith.truncf %70 : vector<256x32xf32> to vector<256x32xbf16>
    %c0_79 = arith.constant 0 : index
    %c0_80 = arith.constant 0 : index
    %72 = vector.load %arg10[%c0_79, %c0_80] : memref<256x128xf32, #tpu.memory_space<vmem>>, vector<256x128xf32>
    %c7 = arith.constant 7 : index
    %c0_81 = arith.constant 0 : index
    %c0_82 = arith.constant 0 : index
    %73 = vector.load %arg3[%c7, %c0_81, %c0_82] : memref<9x32x128xbf16, #tpu.memory_space<vmem>>, vector<1x32x128xbf16>
    %74 = vector.shape_cast %73 : vector<1x32x128xbf16> to vector<32x128xbf16>
    %cst_83 = arith.constant dense<0.000000e+00> : vector<256x128xf32>
    %75 = tpu.matmul %71, %74, %cst_83 {dimension_numbers = #tpu.dot_dimension_numbers<[1], [0], [0], [1], [0, 0, 1, 1], [], []>} : vector<256x32xbf16>, vector<32x128xbf16>, vector<256x128xf32> -> vector<256x128xf32>
    %76 = arith.addf %72, %75 : vector<256x128xf32>
    %c0_84 = arith.constant 0 : index
    %c0_85 = arith.constant 0 : index
    %77 = vector.load %arg10[%c0_84, %c0_85] : memref<256x128xf32, #tpu.memory_space<vmem>>, vector<256x128xf32>
    tpu.vector_store %arg10[%c0_84, %c0_85], %76 {strides = array<i32>} : memref<256x128xf32, #tpu.memory_space<vmem>>, vector<256x128xf32>,
    %c2_86 = arith.constant 2 : index
    %c2_87 = arith.constant 2 : index
    %c0_88 = arith.constant 0 : index
    %78 = vector.load %arg8[%c2_86, %c2_87, %c0_88] : memref<18x18x32xf32, #tpu.memory_space<vmem>>, vector<16x16x32xf32>
    %79 = vector.shape_cast %78 : vector<16x16x32xf32> to vector<256x32xf32>
    %80 = arith.truncf %79 : vector<256x32xf32> to vector<256x32xbf16>
    %c0_89 = arith.constant 0 : index
    %c0_90 = arith.constant 0 : index
    %81 = vector.load %arg10[%c0_89, %c0_90] : memref<256x128xf32, #tpu.memory_space<vmem>>, vector<256x128xf32>
    %c8 = arith.constant 8 : index
    %c0_91 = arith.constant 0 : index
    %c0_92 = arith.constant 0 : index
    %82 = vector.load %arg3[%c8, %c0_91, %c0_92] : memref<9x32x128xbf16, #tpu.memory_space<vmem>>, vector<1x32x128xbf16>
    %83 = vector.shape_cast %82 : vector<1x32x128xbf16> to vector<32x128xbf16>
    %cst_93 = arith.constant dense<0.000000e+00> : vector<256x128xf32>
    %84 = tpu.matmul %80, %83, %cst_93 {dimension_numbers = #tpu.dot_dimension_numbers<[1], [0], [0], [1], [0, 0, 1, 1], [], []>} : vector<256x32xbf16>, vector<32x128xbf16>, vector<256x128xf32> -> vector<256x128xf32>
    %85 = arith.addf %81, %84 : vector<256x128xf32>
    %c0_94 = arith.constant 0 : index
    %c0_95 = arith.constant 0 : index
    %86 = vector.load %arg10[%c0_94, %c0_95] : memref<256x128xf32, #tpu.memory_space<vmem>>, vector<256x128xf32>
    tpu.vector_store %arg10[%c0_94, %c0_95], %85 {strides = array<i32>} : memref<256x128xf32, #tpu.memory_space<vmem>>, vector<256x128xf32>,
    %c0_96 = arith.constant 0 : index
    %c0_97 = arith.constant 0 : index
    %87 = vector.load %arg10[%c0_96, %c0_97] : memref<256x128xf32, #tpu.memory_space<vmem>>, vector<256x128xf32>
    %c0_98 = arith.constant 0 : index
    %c0_99 = arith.constant 0 : index
    %88 = vector.load %arg9[%c0_98, %c0_99] : memref<256x32xf32, #tpu.memory_space<vmem>>, vector<256x32xf32>
    %89 = vector.extract_strided_slice %87 {offsets = [0, 0], sizes = [256, 32], strides = [1, 1]} : vector<256x128xf32> to vector<256x32xf32>
    %c0_100 = arith.constant 0 : index
    %c0_101 = arith.constant 0 : index
    %90 = vector.load %arg4[%c0_100, %c0_101] : memref<256x32xf32, #tpu.memory_space<vmem>>, vector<256x32xf32>
    %91 = arith.mulf %90, %88 : vector<256x32xf32>
    %92 = arith.addf %89, %91 : vector<256x32xf32>
    %93 = arith.negf %92 : vector<256x32xf32>
    %94 = math.exp %93 : vector<256x32xf32>
    %cst_102 = arith.constant 1.000000e+00 : f32
    %95 = vector.broadcast %cst_102 : f32 to vector<256x32xf32>
    %96 = arith.addf %95, %94 : vector<256x32xf32>
    %97 = arith.divf %95, %96 : vector<256x32xf32>
    %98 = vector.extract_strided_slice %87 {offsets = [0, 32], sizes = [256, 32], strides = [1, 1]} : vector<256x128xf32> to vector<256x32xf32>
    %c0_103 = arith.constant 0 : index
    %c0_104 = arith.constant 0 : index
    %99 = vector.load %arg5[%c0_103, %c0_104] : memref<256x32xf32, #tpu.memory_space<vmem>>, vector<256x32xf32>
    %100 = arith.mulf %99, %88 : vector<256x32xf32>
    %101 = arith.addf %98, %100 : vector<256x32xf32>
    %102 = arith.negf %101 : vector<256x32xf32>
    %103 = math.exp %102 : vector<256x32xf32>
    %cst_105 = arith.constant 1.000000e+00 : f32
    %104 = vector.broadcast %cst_105 : f32 to vector<256x32xf32>
    %105 = arith.addf %104, %103 : vector<256x32xf32>
    %106 = arith.divf %104, %105 : vector<256x32xf32>
    %107 = arith.mulf %106, %88 : vector<256x32xf32>
    %108 = vector.extract_strided_slice %87 {offsets = [0, 64], sizes = [256, 32], strides = [1, 1]} : vector<256x128xf32> to vector<256x32xf32>
    %109 = math.tanh %108 : vector<256x32xf32>
    %110 = arith.mulf %97, %109 : vector<256x32xf32>
    %111 = arith.addf %107, %110 : vector<256x32xf32>
    %112 = vector.extract_strided_slice %87 {offsets = [0, 96], sizes = [256, 32], strides = [1, 1]} : vector<256x128xf32> to vector<256x32xf32>
    %c0_106 = arith.constant 0 : index
    %c0_107 = arith.constant 0 : index
    %113 = vector.load %arg6[%c0_106, %c0_107] : memref<256x32xf32, #tpu.memory_space<vmem>>, vector<256x32xf32>
    %114 = arith.mulf %113, %111 : vector<256x32xf32>
    %115 = arith.addf %112, %114 : vector<256x32xf32>
    %116 = arith.negf %115 : vector<256x32xf32>
    %117 = math.exp %116 : vector<256x32xf32>
    %cst_108 = arith.constant 1.000000e+00 : f32
    %118 = vector.broadcast %cst_108 : f32 to vector<256x32xf32>
    %119 = arith.addf %118, %117 : vector<256x32xf32>
    %120 = arith.divf %118, %119 : vector<256x32xf32>
    %121 = math.tanh %111 : vector<256x32xf32>
    %122 = arith.mulf %120, %121 : vector<256x32xf32>
    %c0_109 = arith.constant 0 : index
    %c0_110 = arith.constant 0 : index
    %123 = vector.load %arg9[%c0_109, %c0_110] : memref<256x32xf32, #tpu.memory_space<vmem>>, vector<256x32xf32>
    tpu.vector_store %arg9[%c0_109, %c0_110], %111 {strides = array<i32>} : memref<256x32xf32, #tpu.memory_space<vmem>>, vector<256x32xf32>,
    %124 = vector.shape_cast %122 : vector<256x32xf32> to vector<16x16x32xf32>
    %c1_111 = arith.constant 1 : index
    %c1_112 = arith.constant 1 : index
    %c0_113 = arith.constant 0 : index
    %125 = vector.load %arg8[%c1_111, %c1_112, %c0_113] : memref<18x18x32xf32, #tpu.memory_space<vmem>>, vector<16x16x32xf32>
    tpu.vector_store %arg8[%c1_111, %c1_112, %c0_113], %124 {strides = array<i32>} : memref<18x18x32xf32, #tpu.memory_space<vmem>>, vector<16x16x32xf32>,
    %c0_114 = arith.constant 0 : index
    %c0_115 = arith.constant 0 : index
    %c0_116 = arith.constant 0 : index
    %126 = vector.load %arg8[%c0_114, %c0_115, %c0_116] : memref<18x18x32xf32, #tpu.memory_space<vmem>>, vector<18x18x32xf32>
    %c0_117 = arith.constant 0 : index
    %c0_118 = arith.constant 0 : index
    %c0_119 = arith.constant 0 : index
    %c0_120 = arith.constant 0 : index
    %c0_121 = arith.constant 0 : index
    %127 = vector.load %arg7[%c0_117, %c0_118, %c0_119, %c0_120, %c0_121] : memref<1x1x18x18x32xf32, #tpu.memory_space<vmem>>, vector<1x1x18x18x32xf32>
    %128 = vector.shape_cast %127 : vector<1x1x18x18x32xf32> to vector<18x18x32xf32>
    %129 = vector.shape_cast %126 : vector<18x18x32xf32> to vector<1x1x18x18x32xf32>
    tpu.vector_store %arg7[%c0_117, %c0_118, %c0_119, %c0_120, %c0_121], %129 {strides = array<i32>} : memref<1x1x18x18x32xf32, #tpu.memory_space<vmem>>, vector<1x1x18x18x32xf32>,
    return
  }
  func.func @transform_0(%arg0: i32, %arg1: i32) -> (i32, i32, i32, i32) {
    %c0_i32 = arith.constant 0 : i32
    %c0_i32_0 = arith.constant 0 : i32
    %c0_i32_1 = arith.constant 0 : i32
    return %arg0, %arg1, %c0_i32, %c0_i32_0 : i32, i32, i32, i32
  }
  func.func @transform_1(%arg0: i32, %arg1: i32) -> (i32, i32, i32) {
    %c0_i32 = arith.constant 0 : i32
    %c0_i32_0 = arith.constant 0 : i32
    %c0_i32_1 = arith.constant 0 : i32
    %c0_i32_2 = arith.constant 0 : i32
    return %c0_i32, %c0_i32_0, %c0_i32_1 : i32, i32, i32
  }
  func.func @transform_2(%arg0: i32, %arg1: i32) -> (i32, i32) {
    %c0_i32 = arith.constant 0 : i32
    %c0_i32_0 = arith.constant 0 : i32
    %c0_i32_1 = arith.constant 0 : i32
    return %c0_i32, %c0_i32_0 : i32, i32
  }
  func.func @transform_3(%arg0: i32, %arg1: i32) -> (i32, i32) {
    %c0_i32 = arith.constant 0 : i32
    %c0_i32_0 = arith.constant 0 : i32
    %c0_i32_1 = arith.constant 0 : i32
    return %c0_i32, %c0_i32_0 : i32, i32
  }
  func.func @transform_4(%arg0: i32, %arg1: i32) -> (i32, i32) {
    %c0_i32 = arith.constant 0 : i32
    %c0_i32_0 = arith.constant 0 : i32
    %c0_i32_1 = arith.constant 0 : i32
    return %c0_i32, %c0_i32_0 : i32, i32
  }
  func.func @transform_5(%arg0: i32, %arg1: i32) -> (i32, i32, i32, i32, i32) {
    %c0_i32 = arith.constant 0 : i32
    %c0_i32_0 = arith.constant 0 : i32
    %c0_i32_1 = arith.constant 0 : i32
    %c0_i32_2 = arith.constant 0 : i32
    return %arg0, %arg1, %c0_i32, %c0_i32_0, %c0_i32_1 : i32, i32, i32, i32, i32
  }
}

module attributes {stable_mosaic.version = 11 : i64} {
  func.func @downsample_kernel(%arg0: i32, %arg1: memref<1x9x9x128xf32, #tpu.memory_space<vmem>>, %arg2: memref<4x128x32xbf16, #tpu.memory_space<vmem>>, %arg3: memref<1x32xf32, #tpu.memory_space<vmem>>, %arg4: memref<1x8x8x32xf32, #tpu.memory_space<vmem>>) attributes {dimension_semantics = [#tpu.dimension_semantics<parallel>], iteration_bounds = array<i64: 8>, scalar_prefetch = 0 : i64, scratch_operands = 0 : i64, tpu.core_type = #tpu.core_type<tc>, window_params = [{transform_indices = @transform_0, window_bounds = array<i64: 1, 9, 9, 128>}, {pipeline_mode = #tpu.pipeline_mode<synchronous>, transform_indices = @transform_1, window_bounds = array<i64: 4, 128, 32>}, {pipeline_mode = #tpu.pipeline_mode<synchronous>, transform_indices = @transform_2, window_bounds = array<i64: 1, 32>}, {transform_indices = @transform_3, window_bounds = array<i64: 1, 8, 8, 32>}]} {
    %cst = arith.constant 0.000000e+00 : f32
    %0 = vector.broadcast %cst : f32 to vector<64x32xf32>
    %c0 = arith.constant 0 : index
    %c0_0 = arith.constant 0 : index
    %c0_1 = arith.constant 0 : index
    %c0_2 = arith.constant 0 : index
    %1 = vector.load %arg1[%c0, %c0_0, %c0_1, %c0_2] : memref<1x9x9x128xf32, #tpu.memory_space<vmem>>, vector<1x8x8x128xf32>
    %2 = vector.shape_cast %1 : vector<1x8x8x128xf32> to vector<8x8x128xf32>
    %3 = vector.shape_cast %2 : vector<8x8x128xf32> to vector<64x128xf32>
    %4 = arith.truncf %3 : vector<64x128xf32> to vector<64x128xbf16>
    %c0_3 = arith.constant 0 : index
    %c0_4 = arith.constant 0 : index
    %c0_5 = arith.constant 0 : index
    %5 = vector.load %arg2[%c0_3, %c0_4, %c0_5] : memref<4x128x32xbf16, #tpu.memory_space<vmem>>, vector<1x128x32xbf16>
    %6 = vector.shape_cast %5 : vector<1x128x32xbf16> to vector<128x32xbf16>
    %cst_6 = arith.constant dense<0.000000e+00> : vector<64x32xf32>
    %7 = tpu.matmul %4, %6, %cst_6 {dimension_numbers = #tpu.dot_dimension_numbers<[1], [0], [0], [1], [0, 0, 1, 1], [], []>} : vector<64x128xbf16>, vector<128x32xbf16>, vector<64x32xf32> -> vector<64x32xf32>
    %8 = arith.addf %0, %7 : vector<64x32xf32>
    %c0_7 = arith.constant 0 : index
    %c0_8 = arith.constant 0 : index
    %c1 = arith.constant 1 : index
    %c0_9 = arith.constant 0 : index
    %9 = vector.load %arg1[%c0_7, %c0_8, %c1, %c0_9] : memref<1x9x9x128xf32, #tpu.memory_space<vmem>>, vector<1x8x8x128xf32>
    %10 = vector.shape_cast %9 : vector<1x8x8x128xf32> to vector<8x8x128xf32>
    %11 = vector.shape_cast %10 : vector<8x8x128xf32> to vector<64x128xf32>
    %12 = arith.truncf %11 : vector<64x128xf32> to vector<64x128xbf16>
    %c1_10 = arith.constant 1 : index
    %c0_11 = arith.constant 0 : index
    %c0_12 = arith.constant 0 : index
    %13 = vector.load %arg2[%c1_10, %c0_11, %c0_12] : memref<4x128x32xbf16, #tpu.memory_space<vmem>>, vector<1x128x32xbf16>
    %14 = vector.shape_cast %13 : vector<1x128x32xbf16> to vector<128x32xbf16>
    %cst_13 = arith.constant dense<0.000000e+00> : vector<64x32xf32>
    %15 = tpu.matmul %12, %14, %cst_13 {dimension_numbers = #tpu.dot_dimension_numbers<[1], [0], [0], [1], [0, 0, 1, 1], [], []>} : vector<64x128xbf16>, vector<128x32xbf16>, vector<64x32xf32> -> vector<64x32xf32>
    %16 = arith.addf %8, %15 : vector<64x32xf32>
    %c0_14 = arith.constant 0 : index
    %c1_15 = arith.constant 1 : index
    %c0_16 = arith.constant 0 : index
    %c0_17 = arith.constant 0 : index
    %17 = vector.load %arg1[%c0_14, %c1_15, %c0_16, %c0_17] : memref<1x9x9x128xf32, #tpu.memory_space<vmem>>, vector<1x8x8x128xf32>
    %18 = vector.shape_cast %17 : vector<1x8x8x128xf32> to vector<8x8x128xf32>
    %19 = vector.shape_cast %18 : vector<8x8x128xf32> to vector<64x128xf32>
    %20 = arith.truncf %19 : vector<64x128xf32> to vector<64x128xbf16>
    %c2 = arith.constant 2 : index
    %c0_18 = arith.constant 0 : index
    %c0_19 = arith.constant 0 : index
    %21 = vector.load %arg2[%c2, %c0_18, %c0_19] : memref<4x128x32xbf16, #tpu.memory_space<vmem>>, vector<1x128x32xbf16>
    %22 = vector.shape_cast %21 : vector<1x128x32xbf16> to vector<128x32xbf16>
    %cst_20 = arith.constant dense<0.000000e+00> : vector<64x32xf32>
    %23 = tpu.matmul %20, %22, %cst_20 {dimension_numbers = #tpu.dot_dimension_numbers<[1], [0], [0], [1], [0, 0, 1, 1], [], []>} : vector<64x128xbf16>, vector<128x32xbf16>, vector<64x32xf32> -> vector<64x32xf32>
    %24 = arith.addf %16, %23 : vector<64x32xf32>
    %c0_21 = arith.constant 0 : index
    %c1_22 = arith.constant 1 : index
    %c1_23 = arith.constant 1 : index
    %c0_24 = arith.constant 0 : index
    %25 = vector.load %arg1[%c0_21, %c1_22, %c1_23, %c0_24] : memref<1x9x9x128xf32, #tpu.memory_space<vmem>>, vector<1x8x8x128xf32>
    %26 = vector.shape_cast %25 : vector<1x8x8x128xf32> to vector<8x8x128xf32>
    %27 = vector.shape_cast %26 : vector<8x8x128xf32> to vector<64x128xf32>
    %28 = arith.truncf %27 : vector<64x128xf32> to vector<64x128xbf16>
    %c3 = arith.constant 3 : index
    %c0_25 = arith.constant 0 : index
    %c0_26 = arith.constant 0 : index
    %29 = vector.load %arg2[%c3, %c0_25, %c0_26] : memref<4x128x32xbf16, #tpu.memory_space<vmem>>, vector<1x128x32xbf16>
    %30 = vector.shape_cast %29 : vector<1x128x32xbf16> to vector<128x32xbf16>
    %cst_27 = arith.constant dense<0.000000e+00> : vector<64x32xf32>
    %31 = tpu.matmul %28, %30, %cst_27 {dimension_numbers = #tpu.dot_dimension_numbers<[1], [0], [0], [1], [0, 0, 1, 1], [], []>} : vector<64x128xbf16>, vector<128x32xbf16>, vector<64x32xf32> -> vector<64x32xf32>
    %32 = arith.addf %24, %31 : vector<64x32xf32>
    %c0_28 = arith.constant 0 : index
    %c0_29 = arith.constant 0 : index
    %33 = vector.load %arg3[%c0_28, %c0_29] : memref<1x32xf32, #tpu.memory_space<vmem>>, vector<1x32xf32>
    %34 = vector.broadcast %33 : vector<1x32xf32> to vector<64x32xf32>
    %35 = arith.addf %32, %34 : vector<64x32xf32>
    %36 = vector.shape_cast %35 : vector<64x32xf32> to vector<8x8x32xf32>
    %c0_30 = arith.constant 0 : index
    %c0_31 = arith.constant 0 : index
    %c0_32 = arith.constant 0 : index
    %c0_33 = arith.constant 0 : index
    %37 = vector.load %arg4[%c0_30, %c0_31, %c0_32, %c0_33] : memref<1x8x8x32xf32, #tpu.memory_space<vmem>>, vector<1x8x8x32xf32>
    %38 = vector.shape_cast %37 : vector<1x8x8x32xf32> to vector<8x8x32xf32>
    %39 = vector.shape_cast %36 : vector<8x8x32xf32> to vector<1x8x8x32xf32>
    tpu.vector_store %arg4[%c0_30, %c0_31, %c0_32, %c0_33], %39 {strides = array<i32>} : memref<1x8x8x32xf32, #tpu.memory_space<vmem>>, vector<1x8x8x32xf32>,
    return
  }
  func.func @transform_0(%arg0: i32) -> (i32, i32, i32, i32) {
    %c0_i32 = arith.constant 0 : i32
    %c0_i32_0 = arith.constant 0 : i32
    %c0_i32_1 = arith.constant 0 : i32
    %c0_i32_2 = arith.constant 0 : i32
    return %arg0, %c0_i32, %c0_i32_0, %c0_i32_1 : i32, i32, i32, i32
  }
  func.func @transform_1(%arg0: i32) -> (i32, i32, i32) {
    %c0_i32 = arith.constant 0 : i32
    %c0_i32_0 = arith.constant 0 : i32
    %c0_i32_1 = arith.constant 0 : i32
    %c0_i32_2 = arith.constant 0 : i32
    return %c0_i32, %c0_i32_0, %c0_i32_1 : i32, i32, i32
  }
  func.func @transform_2(%arg0: i32) -> (i32, i32) {
    %c0_i32 = arith.constant 0 : i32
    %c0_i32_0 = arith.constant 0 : i32
    %c0_i32_1 = arith.constant 0 : i32
    return %c0_i32, %c0_i32_0 : i32, i32
  }
  func.func @transform_3(%arg0: i32) -> (i32, i32, i32, i32) {
    %c0_i32 = arith.constant 0 : i32
    %c0_i32_0 = arith.constant 0 : i32
    %c0_i32_1 = arith.constant 0 : i32
    %c0_i32_2 = arith.constant 0 : i32
    return %arg0, %c0_i32, %c0_i32_0, %c0_i32_1 : i32, i32, i32, i32
  }
}

module attributes {stable_mosaic.version = 11 : i64} {
  func.func @dense_kernel(%arg0: i32, %arg1: memref<256x288xf32, #tpu.memory_space<vmem>>, %arg2: memref<288x128xbf16, #tpu.memory_space<vmem>>, %arg3: memref<1x128xf32, #tpu.memory_space<vmem>>, %arg4: memref<256x128xf32, #tpu.memory_space<vmem>>) attributes {dimension_semantics = [#tpu.dimension_semantics<parallel>], iteration_bounds = array<i64: 2>, scalar_prefetch = 0 : i64, scratch_operands = 0 : i64, tpu.core_type = #tpu.core_type<tc>, window_params = [{transform_indices = @transform_0, window_bounds = array<i64: 256, 288>}, {pipeline_mode = #tpu.pipeline_mode<synchronous>, transform_indices = @transform_1, window_bounds = array<i64: 288, 128>}, {pipeline_mode = #tpu.pipeline_mode<synchronous>, transform_indices = @transform_2, window_bounds = array<i64: 1, 128>}, {transform_indices = @transform_3, window_bounds = array<i64: 256, 128>}]} {
    %c0 = arith.constant 0 : index
    %c0_0 = arith.constant 0 : index
    %0 = vector.load %arg1[%c0, %c0_0] : memref<256x288xf32, #tpu.memory_space<vmem>>, vector<256x288xf32>
    %1 = arith.truncf %0 : vector<256x288xf32> to vector<256x288xbf16>
    %c0_1 = arith.constant 0 : index
    %c0_2 = arith.constant 0 : index
    %2 = vector.load %arg2[%c0_1, %c0_2] : memref<288x128xbf16, #tpu.memory_space<vmem>>, vector<288x128xbf16>
    %cst = arith.constant dense<0.000000e+00> : vector<256x128xf32>
    %3 = tpu.matmul %1, %2, %cst {dimension_numbers = #tpu.dot_dimension_numbers<[1], [0], [0], [1], [0, 0, 1, 1], [], []>} : vector<256x288xbf16>, vector<288x128xbf16>, vector<256x128xf32> -> vector<256x128xf32>
    %c0_3 = arith.constant 0 : index
    %c0_4 = arith.constant 0 : index
    %4 = vector.load %arg3[%c0_3, %c0_4] : memref<1x128xf32, #tpu.memory_space<vmem>>, vector<1x128xf32>
    %5 = vector.broadcast %4 : vector<1x128xf32> to vector<256x128xf32>
    %6 = arith.addf %3, %5 : vector<256x128xf32>
    %c0_5 = arith.constant 0 : index
    %c0_6 = arith.constant 0 : index
    %7 = vector.load %arg4[%c0_5, %c0_6] : memref<256x128xf32, #tpu.memory_space<vmem>>, vector<256x128xf32>
    tpu.vector_store %arg4[%c0_5, %c0_6], %6 {strides = array<i32>} : memref<256x128xf32, #tpu.memory_space<vmem>>, vector<256x128xf32>,
    return
  }
  func.func @transform_0(%arg0: i32) -> (i32, i32) {
    %c0_i32 = arith.constant 0 : i32
    %c0_i32_0 = arith.constant 0 : i32
    return %arg0, %c0_i32 : i32, i32
  }
  func.func @transform_1(%arg0: i32) -> (i32, i32) {
    %c0_i32 = arith.constant 0 : i32
    %c0_i32_0 = arith.constant 0 : i32
    %c0_i32_1 = arith.constant 0 : i32
    return %c0_i32, %c0_i32_0 : i32, i32
  }
  func.func @transform_2(%arg0: i32) -> (i32, i32) {
    %c0_i32 = arith.constant 0 : i32
    %c0_i32_0 = arith.constant 0 : i32
    %c0_i32_1 = arith.constant 0 : i32
    return %c0_i32, %c0_i32_0 : i32, i32
  }
  func.func @transform_3(%arg0: i32) -> (i32, i32) {
    %c0_i32 = arith.constant 0 : i32
    %c0_i32_0 = arith.constant 0 : i32
    return %arg0, %c0_i32 : i32, i32
  }
}

module attributes {stable_mosaic.version = 11 : i64} {
  func.func @convlstm_seq_kernel(%arg0: i32, %arg1: i32, %arg2: memref<1x1x64x128xf32, #tpu.memory_space<vmem>>, %arg3: memref<9x32x128xbf16, #tpu.memory_space<vmem>>, %arg4: memref<64x32xf32, #tpu.memory_space<vmem>>, %arg5: memref<64x32xf32, #tpu.memory_space<vmem>>, %arg6: memref<64x32xf32, #tpu.memory_space<vmem>>, %arg7: memref<1x1x10x10x32xf32, #tpu.memory_space<vmem>>, %arg8: memref<10x10x32xf32, #tpu.memory_space<vmem>>, %arg9: memref<64x32xf32, #tpu.memory_space<vmem>>, %arg10: memref<64x128xf32, #tpu.memory_space<vmem>>) attributes {dimension_semantics = [#tpu.dimension_semantics<parallel>, #tpu.dimension_semantics<arbitrary>], iteration_bounds = array<i64: 2, 4>, scalar_prefetch = 0 : i64, scratch_operands = 3 : i64, tpu.core_type = #tpu.core_type<tc>, window_params = [{transform_indices = @transform_0, window_bounds = array<i64: 1, 1, 64, 128>}, {pipeline_mode = #tpu.pipeline_mode<synchronous>, transform_indices = @transform_1, window_bounds = array<i64: 9, 32, 128>}, {pipeline_mode = #tpu.pipeline_mode<synchronous>, transform_indices = @transform_2, window_bounds = array<i64: 64, 32>}, {pipeline_mode = #tpu.pipeline_mode<synchronous>, transform_indices = @transform_3, window_bounds = array<i64: 64, 32>}, {pipeline_mode = #tpu.pipeline_mode<synchronous>, transform_indices = @transform_4, window_bounds = array<i64: 64, 32>}, {transform_indices = @transform_5, window_bounds = array<i64: 1, 1, 10, 10, 32>}]} {
    %c0_i32 = arith.constant 0 : i32
    %0 = arith.cmpi eq, %arg1, %c0_i32 : i32
    %1 = arith.extui %0 : i1 to i32
    %c0_i32_0 = arith.constant 0 : i32
    %2 = arith.cmpi ne, %1, %c0_i32_0 : i32
    scf.if %2 {
      %cst_122 = arith.constant 0.000000e+00 : f32
      %130 = vector.broadcast %cst_122 : f32 to vector<10x10x32xf32>
      %c0_123 = arith.constant 0 : index
      %c0_124 = arith.constant 0 : index
      %c0_125 = arith.constant 0 : index
      %131 = vector.load %arg8[%c0_123, %c0_124, %c0_125] : memref<10x10x32xf32, #tpu.memory_space<vmem>>, vector<10x10x32xf32>
      tpu.vector_store %arg8[%c0_123, %c0_124, %c0_125], %130 {strides = array<i32>} : memref<10x10x32xf32, #tpu.memory_space<vmem>>, vector<10x10x32xf32>,
      %cst_126 = arith.constant 0.000000e+00 : f32
      %132 = vector.broadcast %cst_126 : f32 to vector<64x32xf32>
      %c0_127 = arith.constant 0 : index
      %c0_128 = arith.constant 0 : index
      %133 = vector.load %arg9[%c0_127, %c0_128] : memref<64x32xf32, #tpu.memory_space<vmem>>, vector<64x32xf32>
      tpu.vector_store %arg9[%c0_127, %c0_128], %132 {strides = array<i32>} : memref<64x32xf32, #tpu.memory_space<vmem>>, vector<64x32xf32>,
    } else {
    }
    %c0 = arith.constant 0 : index
    %c0_1 = arith.constant 0 : index
    %c0_2 = arith.constant 0 : index
    %c0_3 = arith.constant 0 : index
    %3 = vector.load %arg2[%c0, %c0_1, %c0_2, %c0_3] : memref<1x1x64x128xf32, #tpu.memory_space<vmem>>, vector<1x1x64x128xf32>
    %4 = vector.shape_cast %3 : vector<1x1x64x128xf32> to vector<64x128xf32>
    %c0_4 = arith.constant 0 : index
    %c0_5 = arith.constant 0 : index
    %5 = vector.load %arg10[%c0_4, %c0_5] : memref<64x128xf32, #tpu.memory_space<vmem>>, vector<64x128xf32>
    tpu.vector_store %arg10[%c0_4, %c0_5], %4 {strides = array<i32>} : memref<64x128xf32, #tpu.memory_space<vmem>>, vector<64x128xf32>,
    %c0_6 = arith.constant 0 : index
    %c0_7 = arith.constant 0 : index
    %c0_8 = arith.constant 0 : index
    %6 = vector.load %arg8[%c0_6, %c0_7, %c0_8] : memref<10x10x32xf32, #tpu.memory_space<vmem>>, vector<8x8x32xf32>
    %7 = vector.shape_cast %6 : vector<8x8x32xf32> to vector<64x32xf32>
    %8 = arith.truncf %7 : vector<64x32xf32> to vector<64x32xbf16>
    %c0_9 = arith.constant 0 : index
    %c0_10 = arith.constant 0 : index
    %9 = vector.load %arg10[%c0_9, %c0_10] : memref<64x128xf32, #tpu.memory_space<vmem>>, vector<64x128xf32>
    %c0_11 = arith.constant 0 : index
    %c0_12 = arith.constant 0 : index
    %c0_13 = arith.constant 0 : index
    %10 = vector.load %arg3[%c0_11, %c0_12, %c0_13] : memref<9x32x128xbf16, #tpu.memory_space<vmem>>, vector<1x32x128xbf16>
    %11 = vector.shape_cast %10 : vector<1x32x128xbf16> to vector<32x128xbf16>
    %cst = arith.constant dense<0.000000e+00> : vector<64x128xf32>
    %12 = tpu.matmul %8, %11, %cst {dimension_numbers = #tpu.dot_dimension_numbers<[1], [0], [0], [1], [0, 0, 1, 1], [], []>} : vector<64x32xbf16>, vector<32x128xbf16>, vector<64x128xf32> -> vector<64x128xf32>
    %13 = arith.addf %9, %12 : vector<64x128xf32>
    %c0_14 = arith.constant 0 : index
    %c0_15 = arith.constant 0 : index
    %14 = vector.load %arg10[%c0_14, %c0_15] : memref<64x128xf32, #tpu.memory_space<vmem>>, vector<64x128xf32>
    tpu.vector_store %arg10[%c0_14, %c0_15], %13 {strides = array<i32>} : memref<64x128xf32, #tpu.memory_space<vmem>>, vector<64x128xf32>,
    %c0_16 = arith.constant 0 : index
    %c1 = arith.constant 1 : index
    %c0_17 = arith.constant 0 : index
    %15 = vector.load %arg8[%c0_16, %c1, %c0_17] : memref<10x10x32xf32, #tpu.memory_space<vmem>>, vector<8x8x32xf32>
    %16 = vector.shape_cast %15 : vector<8x8x32xf32> to vector<64x32xf32>
    %17 = arith.truncf %16 : vector<64x32xf32> to vector<64x32xbf16>
    %c0_18 = arith.constant 0 : index
    %c0_19 = arith.constant 0 : index
    %18 = vector.load %arg10[%c0_18, %c0_19] : memref<64x128xf32, #tpu.memory_space<vmem>>, vector<64x128xf32>
    %c1_20 = arith.constant 1 : index
    %c0_21 = arith.constant 0 : index
    %c0_22 = arith.constant 0 : index
    %19 = vector.load %arg3[%c1_20, %c0_21, %c0_22] : memref<9x32x128xbf16, #tpu.memory_space<vmem>>, vector<1x32x128xbf16>
    %20 = vector.shape_cast %19 : vector<1x32x128xbf16> to vector<32x128xbf16>
    %cst_23 = arith.constant dense<0.000000e+00> : vector<64x128xf32>
    %21 = tpu.matmul %17, %20, %cst_23 {dimension_numbers = #tpu.dot_dimension_numbers<[1], [0], [0], [1], [0, 0, 1, 1], [], []>} : vector<64x32xbf16>, vector<32x128xbf16>, vector<64x128xf32> -> vector<64x128xf32>
    %22 = arith.addf %18, %21 : vector<64x128xf32>
    %c0_24 = arith.constant 0 : index
    %c0_25 = arith.constant 0 : index
    %23 = vector.load %arg10[%c0_24, %c0_25] : memref<64x128xf32, #tpu.memory_space<vmem>>, vector<64x128xf32>
    tpu.vector_store %arg10[%c0_24, %c0_25], %22 {strides = array<i32>} : memref<64x128xf32, #tpu.memory_space<vmem>>, vector<64x128xf32>,
    %c0_26 = arith.constant 0 : index
    %c2 = arith.constant 2 : index
    %c0_27 = arith.constant 0 : index
    %24 = vector.load %arg8[%c0_26, %c2, %c0_27] : memref<10x10x32xf32, #tpu.memory_space<vmem>>, vector<8x8x32xf32>
    %25 = vector.shape_cast %24 : vector<8x8x32xf32> to vector<64x32xf32>
    %26 = arith.truncf %25 : vector<64x32xf32> to vector<64x32xbf16>
    %c0_28 = arith.constant 0 : index
    %c0_29 = arith.constant 0 : index
    %27 = vector.load %arg10[%c0_28, %c0_29] : memref<64x128xf32, #tpu.memory_space<vmem>>, vector<64x128xf32>
    %c2_30 = arith.constant 2 : index
    %c0_31 = arith.constant 0 : index
    %c0_32 = arith.constant 0 : index
    %28 = vector.load %arg3[%c2_30, %c0_31, %c0_32] : memref<9x32x128xbf16, #tpu.memory_space<vmem>>, vector<1x32x128xbf16>
    %29 = vector.shape_cast %28 : vector<1x32x128xbf16> to vector<32x128xbf16>
    %cst_33 = arith.constant dense<0.000000e+00> : vector<64x128xf32>
    %30 = tpu.matmul %26, %29, %cst_33 {dimension_numbers = #tpu.dot_dimension_numbers<[1], [0], [0], [1], [0, 0, 1, 1], [], []>} : vector<64x32xbf16>, vector<32x128xbf16>, vector<64x128xf32> -> vector<64x128xf32>
    %31 = arith.addf %27, %30 : vector<64x128xf32>
    %c0_34 = arith.constant 0 : index
    %c0_35 = arith.constant 0 : index
    %32 = vector.load %arg10[%c0_34, %c0_35] : memref<64x128xf32, #tpu.memory_space<vmem>>, vector<64x128xf32>
    tpu.vector_store %arg10[%c0_34, %c0_35], %31 {strides = array<i32>} : memref<64x128xf32, #tpu.memory_space<vmem>>, vector<64x128xf32>,
    %c1_36 = arith.constant 1 : index
    %c0_37 = arith.constant 0 : index
    %c0_38 = arith.constant 0 : index
    %33 = vector.load %arg8[%c1_36, %c0_37, %c0_38] : memref<10x10x32xf32, #tpu.memory_space<vmem>>, vector<8x8x32xf32>
    %34 = vector.shape_cast %33 : vector<8x8x32xf32> to vector<64x32xf32>
    %35 = arith.truncf %34 : vector<64x32xf32> to vector<64x32xbf16>
    %c0_39 = arith.constant 0 : index
    %c0_40 = arith.constant 0 : index
    %36 = vector.load %arg10[%c0_39, %c0_40] : memref<64x128xf32, #tpu.memory_space<vmem>>, vector<64x128xf32>
    %c3 = arith.constant 3 : index
    %c0_41 = arith.constant 0 : index
    %c0_42 = arith.constant 0 : index
    %37 = vector.load %arg3[%c3, %c0_41, %c0_42] : memref<9x32x128xbf16, #tpu.memory_space<vmem>>, vector<1x32x128xbf16>
    %38 = vector.shape_cast %37 : vector<1x32x128xbf16> to vector<32x128xbf16>
    %cst_43 = arith.constant dense<0.000000e+00> : vector<64x128xf32>
    %39 = tpu.matmul %35, %38, %cst_43 {dimension_numbers = #tpu.dot_dimension_numbers<[1], [0], [0], [1], [0, 0, 1, 1], [], []>} : vector<64x32xbf16>, vector<32x128xbf16>, vector<64x128xf32> -> vector<64x128xf32>
    %40 = arith.addf %36, %39 : vector<64x128xf32>
    %c0_44 = arith.constant 0 : index
    %c0_45 = arith.constant 0 : index
    %41 = vector.load %arg10[%c0_44, %c0_45] : memref<64x128xf32, #tpu.memory_space<vmem>>, vector<64x128xf32>
    tpu.vector_store %arg10[%c0_44, %c0_45], %40 {strides = array<i32>} : memref<64x128xf32, #tpu.memory_space<vmem>>, vector<64x128xf32>,
    %c1_46 = arith.constant 1 : index
    %c1_47 = arith.constant 1 : index
    %c0_48 = arith.constant 0 : index
    %42 = vector.load %arg8[%c1_46, %c1_47, %c0_48] : memref<10x10x32xf32, #tpu.memory_space<vmem>>, vector<8x8x32xf32>
    %43 = vector.shape_cast %42 : vector<8x8x32xf32> to vector<64x32xf32>
    %44 = arith.truncf %43 : vector<64x32xf32> to vector<64x32xbf16>
    %c0_49 = arith.constant 0 : index
    %c0_50 = arith.constant 0 : index
    %45 = vector.load %arg10[%c0_49, %c0_50] : memref<64x128xf32, #tpu.memory_space<vmem>>, vector<64x128xf32>
    %c4 = arith.constant 4 : index
    %c0_51 = arith.constant 0 : index
    %c0_52 = arith.constant 0 : index
    %46 = vector.load %arg3[%c4, %c0_51, %c0_52] : memref<9x32x128xbf16, #tpu.memory_space<vmem>>, vector<1x32x128xbf16>
    %47 = vector.shape_cast %46 : vector<1x32x128xbf16> to vector<32x128xbf16>
    %cst_53 = arith.constant dense<0.000000e+00> : vector<64x128xf32>
    %48 = tpu.matmul %44, %47, %cst_53 {dimension_numbers = #tpu.dot_dimension_numbers<[1], [0], [0], [1], [0, 0, 1, 1], [], []>} : vector<64x32xbf16>, vector<32x128xbf16>, vector<64x128xf32> -> vector<64x128xf32>
    %49 = arith.addf %45, %48 : vector<64x128xf32>
    %c0_54 = arith.constant 0 : index
    %c0_55 = arith.constant 0 : index
    %50 = vector.load %arg10[%c0_54, %c0_55] : memref<64x128xf32, #tpu.memory_space<vmem>>, vector<64x128xf32>
    tpu.vector_store %arg10[%c0_54, %c0_55], %49 {strides = array<i32>} : memref<64x128xf32, #tpu.memory_space<vmem>>, vector<64x128xf32>,
    %c1_56 = arith.constant 1 : index
    %c2_57 = arith.constant 2 : index
    %c0_58 = arith.constant 0 : index
    %51 = vector.load %arg8[%c1_56, %c2_57, %c0_58] : memref<10x10x32xf32, #tpu.memory_space<vmem>>, vector<8x8x32xf32>
    %52 = vector.shape_cast %51 : vector<8x8x32xf32> to vector<64x32xf32>
    %53 = arith.truncf %52 : vector<64x32xf32> to vector<64x32xbf16>
    %c0_59 = arith.constant 0 : index
    %c0_60 = arith.constant 0 : index
    %54 = vector.load %arg10[%c0_59, %c0_60] : memref<64x128xf32, #tpu.memory_space<vmem>>, vector<64x128xf32>
    %c5 = arith.constant 5 : index
    %c0_61 = arith.constant 0 : index
    %c0_62 = arith.constant 0 : index
    %55 = vector.load %arg3[%c5, %c0_61, %c0_62] : memref<9x32x128xbf16, #tpu.memory_space<vmem>>, vector<1x32x128xbf16>
    %56 = vector.shape_cast %55 : vector<1x32x128xbf16> to vector<32x128xbf16>
    %cst_63 = arith.constant dense<0.000000e+00> : vector<64x128xf32>
    %57 = tpu.matmul %53, %56, %cst_63 {dimension_numbers = #tpu.dot_dimension_numbers<[1], [0], [0], [1], [0, 0, 1, 1], [], []>} : vector<64x32xbf16>, vector<32x128xbf16>, vector<64x128xf32> -> vector<64x128xf32>
    %58 = arith.addf %54, %57 : vector<64x128xf32>
    %c0_64 = arith.constant 0 : index
    %c0_65 = arith.constant 0 : index
    %59 = vector.load %arg10[%c0_64, %c0_65] : memref<64x128xf32, #tpu.memory_space<vmem>>, vector<64x128xf32>
    tpu.vector_store %arg10[%c0_64, %c0_65], %58 {strides = array<i32>} : memref<64x128xf32, #tpu.memory_space<vmem>>, vector<64x128xf32>,
    %c2_66 = arith.constant 2 : index
    %c0_67 = arith.constant 0 : index
    %c0_68 = arith.constant 0 : index
    %60 = vector.load %arg8[%c2_66, %c0_67, %c0_68] : memref<10x10x32xf32, #tpu.memory_space<vmem>>, vector<8x8x32xf32>
    %61 = vector.shape_cast %60 : vector<8x8x32xf32> to vector<64x32xf32>
    %62 = arith.truncf %61 : vector<64x32xf32> to vector<64x32xbf16>
    %c0_69 = arith.constant 0 : index
    %c0_70 = arith.constant 0 : index
    %63 = vector.load %arg10[%c0_69, %c0_70] : memref<64x128xf32, #tpu.memory_space<vmem>>, vector<64x128xf32>
    %c6 = arith.constant 6 : index
    %c0_71 = arith.constant 0 : index
    %c0_72 = arith.constant 0 : index
    %64 = vector.load %arg3[%c6, %c0_71, %c0_72] : memref<9x32x128xbf16, #tpu.memory_space<vmem>>, vector<1x32x128xbf16>
    %65 = vector.shape_cast %64 : vector<1x32x128xbf16> to vector<32x128xbf16>
    %cst_73 = arith.constant dense<0.000000e+00> : vector<64x128xf32>
    %66 = tpu.matmul %62, %65, %cst_73 {dimension_numbers = #tpu.dot_dimension_numbers<[1], [0], [0], [1], [0, 0, 1, 1], [], []>} : vector<64x32xbf16>, vector<32x128xbf16>, vector<64x128xf32> -> vector<64x128xf32>
    %67 = arith.addf %63, %66 : vector<64x128xf32>
    %c0_74 = arith.constant 0 : index
    %c0_75 = arith.constant 0 : index
    %68 = vector.load %arg10[%c0_74, %c0_75] : memref<64x128xf32, #tpu.memory_space<vmem>>, vector<64x128xf32>
    tpu.vector_store %arg10[%c0_74, %c0_75], %67 {strides = array<i32>} : memref<64x128xf32, #tpu.memory_space<vmem>>, vector<64x128xf32>,
    %c2_76 = arith.constant 2 : index
    %c1_77 = arith.constant 1 : index
    %c0_78 = arith.constant 0 : index
    %69 = vector.load %arg8[%c2_76, %c1_77, %c0_78] : memref<10x10x32xf32, #tpu.memory_space<vmem>>, vector<8x8x32xf32>
    %70 = vector.shape_cast %69 : vector<8x8x32xf32> to vector<64x32xf32>
    %71 = arith.truncf %70 : vector<64x32xf32> to vector<64x32xbf16>
    %c0_79 = arith.constant 0 : index
    %c0_80 = arith.constant 0 : index
    %72 = vector.load %arg10[%c0_79, %c0_80] : memref<64x128xf32, #tpu.memory_space<vmem>>, vector<64x128xf32>
    %c7 = arith.constant 7 : index
    %c0_81 = arith.constant 0 : index
    %c0_82 = arith.constant 0 : index
    %73 = vector.load %arg3[%c7, %c0_81, %c0_82] : memref<9x32x128xbf16, #tpu.memory_space<vmem>>, vector<1x32x128xbf16>
    %74 = vector.shape_cast %73 : vector<1x32x128xbf16> to vector<32x128xbf16>
    %cst_83 = arith.constant dense<0.000000e+00> : vector<64x128xf32>
    %75 = tpu.matmul %71, %74, %cst_83 {dimension_numbers = #tpu.dot_dimension_numbers<[1], [0], [0], [1], [0, 0, 1, 1], [], []>} : vector<64x32xbf16>, vector<32x128xbf16>, vector<64x128xf32> -> vector<64x128xf32>
    %76 = arith.addf %72, %75 : vector<64x128xf32>
    %c0_84 = arith.constant 0 : index
    %c0_85 = arith.constant 0 : index
    %77 = vector.load %arg10[%c0_84, %c0_85] : memref<64x128xf32, #tpu.memory_space<vmem>>, vector<64x128xf32>
    tpu.vector_store %arg10[%c0_84, %c0_85], %76 {strides = array<i32>} : memref<64x128xf32, #tpu.memory_space<vmem>>, vector<64x128xf32>,
    %c2_86 = arith.constant 2 : index
    %c2_87 = arith.constant 2 : index
    %c0_88 = arith.constant 0 : index
    %78 = vector.load %arg8[%c2_86, %c2_87, %c0_88] : memref<10x10x32xf32, #tpu.memory_space<vmem>>, vector<8x8x32xf32>
    %79 = vector.shape_cast %78 : vector<8x8x32xf32> to vector<64x32xf32>
    %80 = arith.truncf %79 : vector<64x32xf32> to vector<64x32xbf16>
    %c0_89 = arith.constant 0 : index
    %c0_90 = arith.constant 0 : index
    %81 = vector.load %arg10[%c0_89, %c0_90] : memref<64x128xf32, #tpu.memory_space<vmem>>, vector<64x128xf32>
    %c8 = arith.constant 8 : index
    %c0_91 = arith.constant 0 : index
    %c0_92 = arith.constant 0 : index
    %82 = vector.load %arg3[%c8, %c0_91, %c0_92] : memref<9x32x128xbf16, #tpu.memory_space<vmem>>, vector<1x32x128xbf16>
    %83 = vector.shape_cast %82 : vector<1x32x128xbf16> to vector<32x128xbf16>
    %cst_93 = arith.constant dense<0.000000e+00> : vector<64x128xf32>
    %84 = tpu.matmul %80, %83, %cst_93 {dimension_numbers = #tpu.dot_dimension_numbers<[1], [0], [0], [1], [0, 0, 1, 1], [], []>} : vector<64x32xbf16>, vector<32x128xbf16>, vector<64x128xf32> -> vector<64x128xf32>
    %85 = arith.addf %81, %84 : vector<64x128xf32>
    %c0_94 = arith.constant 0 : index
    %c0_95 = arith.constant 0 : index
    %86 = vector.load %arg10[%c0_94, %c0_95] : memref<64x128xf32, #tpu.memory_space<vmem>>, vector<64x128xf32>
    tpu.vector_store %arg10[%c0_94, %c0_95], %85 {strides = array<i32>} : memref<64x128xf32, #tpu.memory_space<vmem>>, vector<64x128xf32>,
    %c0_96 = arith.constant 0 : index
    %c0_97 = arith.constant 0 : index
    %87 = vector.load %arg10[%c0_96, %c0_97] : memref<64x128xf32, #tpu.memory_space<vmem>>, vector<64x128xf32>
    %c0_98 = arith.constant 0 : index
    %c0_99 = arith.constant 0 : index
    %88 = vector.load %arg9[%c0_98, %c0_99] : memref<64x32xf32, #tpu.memory_space<vmem>>, vector<64x32xf32>
    %89 = vector.extract_strided_slice %87 {offsets = [0, 0], sizes = [64, 32], strides = [1, 1]} : vector<64x128xf32> to vector<64x32xf32>
    %c0_100 = arith.constant 0 : index
    %c0_101 = arith.constant 0 : index
    %90 = vector.load %arg4[%c0_100, %c0_101] : memref<64x32xf32, #tpu.memory_space<vmem>>, vector<64x32xf32>
    %91 = arith.mulf %90, %88 : vector<64x32xf32>
    %92 = arith.addf %89, %91 : vector<64x32xf32>
    %93 = arith.negf %92 : vector<64x32xf32>
    %94 = math.exp %93 : vector<64x32xf32>
    %cst_102 = arith.constant 1.000000e+00 : f32
    %95 = vector.broadcast %cst_102 : f32 to vector<64x32xf32>
    %96 = arith.addf %95, %94 : vector<64x32xf32>
    %97 = arith.divf %95, %96 : vector<64x32xf32>
    %98 = vector.extract_strided_slice %87 {offsets = [0, 32], sizes = [64, 32], strides = [1, 1]} : vector<64x128xf32> to vector<64x32xf32>
    %c0_103 = arith.constant 0 : index
    %c0_104 = arith.constant 0 : index
    %99 = vector.load %arg5[%c0_103, %c0_104] : memref<64x32xf32, #tpu.memory_space<vmem>>, vector<64x32xf32>
    %100 = arith.mulf %99, %88 : vector<64x32xf32>
    %101 = arith.addf %98, %100 : vector<64x32xf32>
    %102 = arith.negf %101 : vector<64x32xf32>
    %103 = math.exp %102 : vector<64x32xf32>
    %cst_105 = arith.constant 1.000000e+00 : f32
    %104 = vector.broadcast %cst_105 : f32 to vector<64x32xf32>
    %105 = arith.addf %104, %103 : vector<64x32xf32>
    %106 = arith.divf %104, %105 : vector<64x32xf32>
    %107 = arith.mulf %106, %88 : vector<64x32xf32>
    %108 = vector.extract_strided_slice %87 {offsets = [0, 64], sizes = [64, 32], strides = [1, 1]} : vector<64x128xf32> to vector<64x32xf32>
    %109 = math.tanh %108 : vector<64x32xf32>
    %110 = arith.mulf %97, %109 : vector<64x32xf32>
    %111 = arith.addf %107, %110 : vector<64x32xf32>
    %112 = vector.extract_strided_slice %87 {offsets = [0, 96], sizes = [64, 32], strides = [1, 1]} : vector<64x128xf32> to vector<64x32xf32>
    %c0_106 = arith.constant 0 : index
    %c0_107 = arith.constant 0 : index
    %113 = vector.load %arg6[%c0_106, %c0_107] : memref<64x32xf32, #tpu.memory_space<vmem>>, vector<64x32xf32>
    %114 = arith.mulf %113, %111 : vector<64x32xf32>
    %115 = arith.addf %112, %114 : vector<64x32xf32>
    %116 = arith.negf %115 : vector<64x32xf32>
    %117 = math.exp %116 : vector<64x32xf32>
    %cst_108 = arith.constant 1.000000e+00 : f32
    %118 = vector.broadcast %cst_108 : f32 to vector<64x32xf32>
    %119 = arith.addf %118, %117 : vector<64x32xf32>
    %120 = arith.divf %118, %119 : vector<64x32xf32>
    %121 = math.tanh %111 : vector<64x32xf32>
    %122 = arith.mulf %120, %121 : vector<64x32xf32>
    %c0_109 = arith.constant 0 : index
    %c0_110 = arith.constant 0 : index
    %123 = vector.load %arg9[%c0_109, %c0_110] : memref<64x32xf32, #tpu.memory_space<vmem>>, vector<64x32xf32>
    tpu.vector_store %arg9[%c0_109, %c0_110], %111 {strides = array<i32>} : memref<64x32xf32, #tpu.memory_space<vmem>>, vector<64x32xf32>,
    %124 = vector.shape_cast %122 : vector<64x32xf32> to vector<8x8x32xf32>
    %c1_111 = arith.constant 1 : index
    %c1_112 = arith.constant 1 : index
    %c0_113 = arith.constant 0 : index
    %125 = vector.load %arg8[%c1_111, %c1_112, %c0_113] : memref<10x10x32xf32, #tpu.memory_space<vmem>>, vector<8x8x32xf32>
    tpu.vector_store %arg8[%c1_111, %c1_112, %c0_113], %124 {strides = array<i32>} : memref<10x10x32xf32, #tpu.memory_space<vmem>>, vector<8x8x32xf32>,
    %c0_114 = arith.constant 0 : index
    %c0_115 = arith.constant 0 : index
    %c0_116 = arith.constant 0 : index
    %126 = vector.load %arg8[%c0_114, %c0_115, %c0_116] : memref<10x10x32xf32, #tpu.memory_space<vmem>>, vector<10x10x32xf32>
    %c0_117 = arith.constant 0 : index
    %c0_118 = arith.constant 0 : index
    %c0_119 = arith.constant 0 : index
    %c0_120 = arith.constant 0 : index
    %c0_121 = arith.constant 0 : index
    %127 = vector.load %arg7[%c0_117, %c0_118, %c0_119, %c0_120, %c0_121] : memref<1x1x10x10x32xf32, #tpu.memory_space<vmem>>, vector<1x1x10x10x32xf32>
    %128 = vector.shape_cast %127 : vector<1x1x10x10x32xf32> to vector<10x10x32xf32>
    %129 = vector.shape_cast %126 : vector<10x10x32xf32> to vector<1x1x10x10x32xf32>
    tpu.vector_store %arg7[%c0_117, %c0_118, %c0_119, %c0_120, %c0_121], %129 {strides = array<i32>} : memref<1x1x10x10x32xf32, #tpu.memory_space<vmem>>, vector<1x1x10x10x32xf32>,
    return
  }
  func.func @transform_0(%arg0: i32, %arg1: i32) -> (i32, i32, i32, i32) {
    %c0_i32 = arith.constant 0 : i32
    %c0_i32_0 = arith.constant 0 : i32
    %c0_i32_1 = arith.constant 0 : i32
    return %arg0, %arg1, %c0_i32, %c0_i32_0 : i32, i32, i32, i32
  }
  func.func @transform_1(%arg0: i32, %arg1: i32) -> (i32, i32, i32) {
    %c0_i32 = arith.constant 0 : i32
    %c0_i32_0 = arith.constant 0 : i32
    %c0_i32_1 = arith.constant 0 : i32
    %c0_i32_2 = arith.constant 0 : i32
    return %c0_i32, %c0_i32_0, %c0_i32_1 : i32, i32, i32
  }
  func.func @transform_2(%arg0: i32, %arg1: i32) -> (i32, i32) {
    %c0_i32 = arith.constant 0 : i32
    %c0_i32_0 = arith.constant 0 : i32
    %c0_i32_1 = arith.constant 0 : i32
    return %c0_i32, %c0_i32_0 : i32, i32
  }
  func.func @transform_3(%arg0: i32, %arg1: i32) -> (i32, i32) {
    %c0_i32 = arith.constant 0 : i32
    %c0_i32_0 = arith.constant 0 : i32
    %c0_i32_1 = arith.constant 0 : i32
    return %c0_i32, %c0_i32_0 : i32, i32
  }
  func.func @transform_4(%arg0: i32, %arg1: i32) -> (i32, i32) {
    %c0_i32 = arith.constant 0 : i32
    %c0_i32_0 = arith.constant 0 : i32
    %c0_i32_1 = arith.constant 0 : i32
    return %c0_i32, %c0_i32_0 : i32, i32
  }
  func.func @transform_5(%arg0: i32, %arg1: i32) -> (i32, i32, i32, i32, i32) {
    %c0_i32 = arith.constant 0 : i32
    %c0_i32_0 = arith.constant 0 : i32
    %c0_i32_1 = arith.constant 0 : i32
    %c0_i32_2 = arith.constant 0 : i32
    return %arg0, %arg1, %c0_i32, %c0_i32_0, %c0_i32_1 : i32, i32, i32, i32, i32
  }
}

module attributes {stable_mosaic.version = 11 : i64} {
  func.func @downsample_kernel(%arg0: i32, %arg1: memref<1x5x5x128xf32, #tpu.memory_space<vmem>>, %arg2: memref<4x128x32xbf16, #tpu.memory_space<vmem>>, %arg3: memref<1x32xf32, #tpu.memory_space<vmem>>, %arg4: memref<1x4x4x32xf32, #tpu.memory_space<vmem>>) attributes {dimension_semantics = [#tpu.dimension_semantics<parallel>], iteration_bounds = array<i64: 8>, scalar_prefetch = 0 : i64, scratch_operands = 0 : i64, tpu.core_type = #tpu.core_type<tc>, window_params = [{transform_indices = @transform_0, window_bounds = array<i64: 1, 5, 5, 128>}, {pipeline_mode = #tpu.pipeline_mode<synchronous>, transform_indices = @transform_1, window_bounds = array<i64: 4, 128, 32>}, {pipeline_mode = #tpu.pipeline_mode<synchronous>, transform_indices = @transform_2, window_bounds = array<i64: 1, 32>}, {transform_indices = @transform_3, window_bounds = array<i64: 1, 4, 4, 32>}]} {
    %cst = arith.constant 0.000000e+00 : f32
    %0 = vector.broadcast %cst : f32 to vector<16x32xf32>
    %c0 = arith.constant 0 : index
    %c0_0 = arith.constant 0 : index
    %c0_1 = arith.constant 0 : index
    %c0_2 = arith.constant 0 : index
    %1 = vector.load %arg1[%c0, %c0_0, %c0_1, %c0_2] : memref<1x5x5x128xf32, #tpu.memory_space<vmem>>, vector<1x4x4x128xf32>
    %2 = vector.shape_cast %1 : vector<1x4x4x128xf32> to vector<4x4x128xf32>
    %3 = vector.shape_cast %2 : vector<4x4x128xf32> to vector<16x128xf32>
    %4 = arith.truncf %3 : vector<16x128xf32> to vector<16x128xbf16>
    %c0_3 = arith.constant 0 : index
    %c0_4 = arith.constant 0 : index
    %c0_5 = arith.constant 0 : index
    %5 = vector.load %arg2[%c0_3, %c0_4, %c0_5] : memref<4x128x32xbf16, #tpu.memory_space<vmem>>, vector<1x128x32xbf16>
    %6 = vector.shape_cast %5 : vector<1x128x32xbf16> to vector<128x32xbf16>
    %cst_6 = arith.constant dense<0.000000e+00> : vector<16x32xf32>
    %7 = tpu.matmul %4, %6, %cst_6 {dimension_numbers = #tpu.dot_dimension_numbers<[1], [0], [0], [1], [0, 0, 1, 1], [], []>} : vector<16x128xbf16>, vector<128x32xbf16>, vector<16x32xf32> -> vector<16x32xf32>
    %8 = arith.addf %0, %7 : vector<16x32xf32>
    %c0_7 = arith.constant 0 : index
    %c0_8 = arith.constant 0 : index
    %c1 = arith.constant 1 : index
    %c0_9 = arith.constant 0 : index
    %9 = vector.load %arg1[%c0_7, %c0_8, %c1, %c0_9] : memref<1x5x5x128xf32, #tpu.memory_space<vmem>>, vector<1x4x4x128xf32>
    %10 = vector.shape_cast %9 : vector<1x4x4x128xf32> to vector<4x4x128xf32>
    %11 = vector.shape_cast %10 : vector<4x4x128xf32> to vector<16x128xf32>
    %12 = arith.truncf %11 : vector<16x128xf32> to vector<16x128xbf16>
    %c1_10 = arith.constant 1 : index
    %c0_11 = arith.constant 0 : index
    %c0_12 = arith.constant 0 : index
    %13 = vector.load %arg2[%c1_10, %c0_11, %c0_12] : memref<4x128x32xbf16, #tpu.memory_space<vmem>>, vector<1x128x32xbf16>
    %14 = vector.shape_cast %13 : vector<1x128x32xbf16> to vector<128x32xbf16>
    %cst_13 = arith.constant dense<0.000000e+00> : vector<16x32xf32>
    %15 = tpu.matmul %12, %14, %cst_13 {dimension_numbers = #tpu.dot_dimension_numbers<[1], [0], [0], [1], [0, 0, 1, 1], [], []>} : vector<16x128xbf16>, vector<128x32xbf16>, vector<16x32xf32> -> vector<16x32xf32>
    %16 = arith.addf %8, %15 : vector<16x32xf32>
    %c0_14 = arith.constant 0 : index
    %c1_15 = arith.constant 1 : index
    %c0_16 = arith.constant 0 : index
    %c0_17 = arith.constant 0 : index
    %17 = vector.load %arg1[%c0_14, %c1_15, %c0_16, %c0_17] : memref<1x5x5x128xf32, #tpu.memory_space<vmem>>, vector<1x4x4x128xf32>
    %18 = vector.shape_cast %17 : vector<1x4x4x128xf32> to vector<4x4x128xf32>
    %19 = vector.shape_cast %18 : vector<4x4x128xf32> to vector<16x128xf32>
    %20 = arith.truncf %19 : vector<16x128xf32> to vector<16x128xbf16>
    %c2 = arith.constant 2 : index
    %c0_18 = arith.constant 0 : index
    %c0_19 = arith.constant 0 : index
    %21 = vector.load %arg2[%c2, %c0_18, %c0_19] : memref<4x128x32xbf16, #tpu.memory_space<vmem>>, vector<1x128x32xbf16>
    %22 = vector.shape_cast %21 : vector<1x128x32xbf16> to vector<128x32xbf16>
    %cst_20 = arith.constant dense<0.000000e+00> : vector<16x32xf32>
    %23 = tpu.matmul %20, %22, %cst_20 {dimension_numbers = #tpu.dot_dimension_numbers<[1], [0], [0], [1], [0, 0, 1, 1], [], []>} : vector<16x128xbf16>, vector<128x32xbf16>, vector<16x32xf32> -> vector<16x32xf32>
    %24 = arith.addf %16, %23 : vector<16x32xf32>
    %c0_21 = arith.constant 0 : index
    %c1_22 = arith.constant 1 : index
    %c1_23 = arith.constant 1 : index
    %c0_24 = arith.constant 0 : index
    %25 = vector.load %arg1[%c0_21, %c1_22, %c1_23, %c0_24] : memref<1x5x5x128xf32, #tpu.memory_space<vmem>>, vector<1x4x4x128xf32>
    %26 = vector.shape_cast %25 : vector<1x4x4x128xf32> to vector<4x4x128xf32>
    %27 = vector.shape_cast %26 : vector<4x4x128xf32> to vector<16x128xf32>
    %28 = arith.truncf %27 : vector<16x128xf32> to vector<16x128xbf16>
    %c3 = arith.constant 3 : index
    %c0_25 = arith.constant 0 : index
    %c0_26 = arith.constant 0 : index
    %29 = vector.load %arg2[%c3, %c0_25, %c0_26] : memref<4x128x32xbf16, #tpu.memory_space<vmem>>, vector<1x128x32xbf16>
    %30 = vector.shape_cast %29 : vector<1x128x32xbf16> to vector<128x32xbf16>
    %cst_27 = arith.constant dense<0.000000e+00> : vector<16x32xf32>
    %31 = tpu.matmul %28, %30, %cst_27 {dimension_numbers = #tpu.dot_dimension_numbers<[1], [0], [0], [1], [0, 0, 1, 1], [], []>} : vector<16x128xbf16>, vector<128x32xbf16>, vector<16x32xf32> -> vector<16x32xf32>
    %32 = arith.addf %24, %31 : vector<16x32xf32>
    %c0_28 = arith.constant 0 : index
    %c0_29 = arith.constant 0 : index
    %33 = vector.load %arg3[%c0_28, %c0_29] : memref<1x32xf32, #tpu.memory_space<vmem>>, vector<1x32xf32>
    %34 = vector.broadcast %33 : vector<1x32xf32> to vector<16x32xf32>
    %35 = arith.addf %32, %34 : vector<16x32xf32>
    %36 = vector.shape_cast %35 : vector<16x32xf32> to vector<4x4x32xf32>
    %c0_30 = arith.constant 0 : index
    %c0_31 = arith.constant 0 : index
    %c0_32 = arith.constant 0 : index
    %c0_33 = arith.constant 0 : index
    %37 = vector.load %arg4[%c0_30, %c0_31, %c0_32, %c0_33] : memref<1x4x4x32xf32, #tpu.memory_space<vmem>>, vector<1x4x4x32xf32>
    %38 = vector.shape_cast %37 : vector<1x4x4x32xf32> to vector<4x4x32xf32>
    %39 = vector.shape_cast %36 : vector<4x4x32xf32> to vector<1x4x4x32xf32>
    tpu.vector_store %arg4[%c0_30, %c0_31, %c0_32, %c0_33], %39 {strides = array<i32>} : memref<1x4x4x32xf32, #tpu.memory_space<vmem>>, vector<1x4x4x32xf32>,
    return
  }
  func.func @transform_0(%arg0: i32) -> (i32, i32, i32, i32) {
    %c0_i32 = arith.constant 0 : i32
    %c0_i32_0 = arith.constant 0 : i32
    %c0_i32_1 = arith.constant 0 : i32
    %c0_i32_2 = arith.constant 0 : i32
    return %arg0, %c0_i32, %c0_i32_0, %c0_i32_1 : i32, i32, i32, i32
  }
  func.func @transform_1(%arg0: i32) -> (i32, i32, i32) {
    %c0_i32 = arith.constant 0 : i32
    %c0_i32_0 = arith.constant 0 : i32
    %c0_i32_1 = arith.constant 0 : i32
    %c0_i32_2 = arith.constant 0 : i32
    return %c0_i32, %c0_i32_0, %c0_i32_1 : i32, i32, i32
  }
  func.func @transform_2(%arg0: i32) -> (i32, i32) {
    %c0_i32 = arith.constant 0 : i32
    %c0_i32_0 = arith.constant 0 : i32
    %c0_i32_1 = arith.constant 0 : i32
    return %c0_i32, %c0_i32_0 : i32, i32
  }
  func.func @transform_3(%arg0: i32) -> (i32, i32, i32, i32) {
    %c0_i32 = arith.constant 0 : i32
    %c0_i32_0 = arith.constant 0 : i32
    %c0_i32_1 = arith.constant 0 : i32
    %c0_i32_2 = arith.constant 0 : i32
    return %arg0, %c0_i32, %c0_i32_0, %c0_i32_1 : i32, i32, i32, i32
  }
}

module attributes {stable_mosaic.version = 11 : i64} {
  func.func @head_kernel(%arg0: memref<8x512xf32, #tpu.memory_space<vmem>>, %arg1: memref<512x32xbf16, #tpu.memory_space<vmem>>, %arg2: memref<1x32xf32, #tpu.memory_space<vmem>>, %arg3: memref<32x2xbf16, #tpu.memory_space<vmem>>, %arg4: memref<1x2xf32, #tpu.memory_space<vmem>>, %arg5: memref<8x2xf32, #tpu.memory_space<vmem>>) attributes {dimension_semantics = [], scalar_prefetch = 0 : i64, scratch_operands = 0 : i64, tpu.core_type = #tpu.core_type<tc>} {
    %c0 = arith.constant 0 : index
    %c0_0 = arith.constant 0 : index
    %0 = vector.load %arg0[%c0, %c0_0] : memref<8x512xf32, #tpu.memory_space<vmem>>, vector<8x512xf32>
    %1 = arith.truncf %0 : vector<8x512xf32> to vector<8x512xbf16>
    %c0_1 = arith.constant 0 : index
    %c0_2 = arith.constant 0 : index
    %2 = vector.load %arg1[%c0_1, %c0_2] : memref<512x32xbf16, #tpu.memory_space<vmem>>, vector<512x32xbf16>
    %cst = arith.constant dense<0.000000e+00> : vector<8x32xf32>
    %3 = tpu.matmul %1, %2, %cst {dimension_numbers = #tpu.dot_dimension_numbers<[1], [0], [0], [1], [0, 0, 1, 1], [], []>} : vector<8x512xbf16>, vector<512x32xbf16>, vector<8x32xf32> -> vector<8x32xf32>
    %c0_3 = arith.constant 0 : index
    %c0_4 = arith.constant 0 : index
    %4 = vector.load %arg2[%c0_3, %c0_4] : memref<1x32xf32, #tpu.memory_space<vmem>>, vector<1x32xf32>
    %5 = vector.broadcast %4 : vector<1x32xf32> to vector<8x32xf32>
    %6 = arith.addf %3, %5 : vector<8x32xf32>
    %cst_5 = arith.constant 0.000000e+00 : f32
    %7 = vector.broadcast %cst_5 : f32 to vector<8x32xf32>
    %8 = arith.maximumf %6, %7 : vector<8x32xf32>
    %9 = arith.truncf %8 : vector<8x32xf32> to vector<8x32xbf16>
    %c0_6 = arith.constant 0 : index
    %c0_7 = arith.constant 0 : index
    %10 = vector.load %arg3[%c0_6, %c0_7] : memref<32x2xbf16, #tpu.memory_space<vmem>>, vector<32x2xbf16>
    %cst_8 = arith.constant dense<0.000000e+00> : vector<8x2xf32>
    %11 = tpu.matmul %9, %10, %cst_8 {dimension_numbers = #tpu.dot_dimension_numbers<[1], [0], [0], [1], [0, 0, 1, 1], [], []>} : vector<8x32xbf16>, vector<32x2xbf16>, vector<8x2xf32> -> vector<8x2xf32>
    %c0_9 = arith.constant 0 : index
    %c0_10 = arith.constant 0 : index
    %12 = vector.load %arg4[%c0_9, %c0_10] : memref<1x2xf32, #tpu.memory_space<vmem>>, vector<1x2xf32>
    %13 = vector.broadcast %12 : vector<1x2xf32> to vector<8x2xf32>
    %14 = arith.addf %11, %13 : vector<8x2xf32>
    %15 = arith.negf %14 : vector<8x2xf32>
    %16 = math.exp %15 : vector<8x2xf32>
    %cst_11 = arith.constant 1.000000e+00 : f32
    %17 = vector.broadcast %cst_11 : f32 to vector<8x2xf32>
    %18 = arith.addf %17, %16 : vector<8x2xf32>
    %19 = arith.divf %17, %18 : vector<8x2xf32>
    %c0_12 = arith.constant 0 : index
    %c0_13 = arith.constant 0 : index
    %20 = vector.load %arg5[%c0_12, %c0_13] : memref<8x2xf32, #tpu.memory_space<vmem>>, vector<8x2xf32>
    tpu.vector_store %arg5[%c0_12, %c0_13], %19 {strides = array<i32>} : memref<8x2xf32, #tpu.memory_space<vmem>>, vector<8x2xf32>,
    return
  }
}

</mosaic_0001>

<bundles_post_ra>
// kernel: _lambda_.7
= control target key start
LH: loop header
LB: loop body
LE: loop exit
PB: predicated region body
PF: predicated region fallthrough
CT: control target
= control target key end

     0   :  { %s687_s12 = smov 0   ;;  %s841_s0 = inlined_call_operand.vmem [shape: f32[2048,36], index: 0, kind: input, shape index: {}]   ;;  %s842_s1 = inlined_call_operand.vmem [shape: bf16[36,128], index: 1, kind: input, shape index: {}]   ;;  %s843_s2 = inlined_call_operand.vmem [shape: f32[1,128], index: 2, kind: input, shape index: {}]   ;;  %s844_s3 = inlined_call_operand.vmem [shape: f32[2048,128], index: 3, kind: output, shape index: {}]  }
   0x1 LB: > { %s552_s13 = sadd.s32 4294967295, %s665_s12   ;;  %p556_p0 = scmp.ge.s32.totalorder %s665_s12, 1  ;;  %s665_s12 = sphi %s687_s12, %s13_s12  }
   0x2   : > { %p138_p1 = scmp.lt.s32.totalorder %s665_s12, 9 }
   0x4   : > { %p139_p2 = pnand %p556_p0, %p138_p1 }
   0x5   : > { %v656_v0 = vld [vmem:[%s842_s1] sm:$0xff] (!%p139_p2)   ;;  %v657_v1 = vld [vmem:[%s842_s1 + $0x8] sm:$0xff] (!%p139_p2)   ;;  %s557_s18 = sshll.u32 (!%p139_p2), %s552_s13, 5  ;;  %v658_v2 = vld [vmem:[%s842_s1 + $0x10] ss:$0 sps:$4 sm:$0x33] (!%p139_p2)  }
   0x6   : > { %142 = sbr.rel (%p139_p2) target bundleno = 263 (0x107), region = 32  ;;  %602 = vmatprep.subr.bf16.mxu0 (!%p139_p2), %v656_v0  ;;  %640 = vmatprep.subr.bf16.mxu1 (!%p139_p2), %v656_v0  ;;  %p163_p3 = scmp.lt.s32.totalorder (!%p139_p2), %s557_s18, 255  ;;  %vm299_vm0 = vcmask (!%p139_p2), 1041408   ;;  %vm250_vm1 = vcmask (!%p139_p2), 293888   ;;  %v765_v52 = vld [vmem:[%s843_s2] ss:$0 sm:$0xff] (!%p139_p2) }
   0x7   : > { %603 = vmatpush3.bf16.msra.mxu0 (!%p139_p2), %v656_v0  ;;  %643 = vmatpush3.bf16.msra.mxu1 (!%p139_p2), %v656_v0  ;;  %v301_v3 = vsel (!%p139_p2), %vm299_vm0, %v658_v2, 0 }
   0x8   : > { %604 = vmatprep.subr.bf16.mxu0 (!%p139_p2), %v657_v1  ;;  %641 = vmatprep.subr.bf16.mxu1 (!%p139_p2), %v657_v1 }
   0xb   : > { %605 = vmatpush3.bf16.msra.mxu0 (!%p139_p2), %v657_v1  ;;  %644 = vmatpush3.bf16.msra.mxu1 (!%p139_p2), %v657_v1 }
   0xc   : > { %646 = vmatprep.subr.msk.bf16.mxu0 (!%p139_p2), %vm299_vm0, %v658_v2  ;;  %647 = vmatprep.subr.msk.bf16.mxu1 (!%p139_p2), %vm299_vm0, %v658_v2 }
   0xd   : > { %s846_s18 = smov (!%p163_p3, %s557_s18), 255 }
   0xe   : > { %s558_s21 = sshll.u32 %s846_s18, 3 }
   0xf   : > { %s712_s24 = scalar_lea.vmem %s841_s0, %s558_s21  ;;  %607 = vmatpush3.bf16.msra.mxu0 %v301_v3  ;;  %645 = vmatpush3.bf16.msra.mxu1 %v301_v3  ;;  %s772_s29 = scalar_lea.vmem %s844_s3, %s558_s21 }
  0x10   : > { %v175_v4 = vld [vmem:[%s712_s24] sm:$0xff]  ;;  %v176_v5 = vld [vmem:[%s712_s24 + $0x8] sm:$0xff]  ;;  %v177_v9 = vld [vmem:[%s712_s24 + $0x10] sm:$0xff] }
  0x11   : > { %v191_v6 = vld [vmem:[%s712_s24 + $0x80] sm:$0xff]  ;;  %v207_v7 = vpack.c.bf16 %v176_v5, %v175_v4  ;;  %v192_v8 = vld [vmem:[%s712_s24 + $0x88] sm:$0xff]  ;;  %v178_v10 = vld [vmem:[%s712_s24 + $0x18] sm:$0xff] }
  0x12   : > { %v215_v11 = vpack.c.bf16 %v192_v8, %v191_v6  ;;  %v208_v12 = vpack.c.bf16 %v178_v10, %v177_v9  ;;  %v193_v13 = vld [vmem:[%s712_s24 + $0x90] sm:$0xff]  ;;  %v194_v14 = vld [vmem:[%s712_s24 + $0x98] sm:$0xff]  ;;  %v179_v15 = vld [vmem:[%s712_s24 + $0x20] sm:$0xff] }
  0x13   : > { %v216_v16 = vpack.c.bf16 %v194_v14, %v193_v13  ;;  %v180_v17 = vld [vmem:[%s712_s24 + $0x28] sm:$0xff]  ;;  %v195_v18 = vld [vmem:[%s712_s24 + $0xa0] sm:$0xff]  ;;  %608 = vmatprep.mubr.msk.bf16.mxu0 %vm250_vm1, %v207_v7  ;;  %v181_v22 = vld [vmem:[%s712_s24 + $0x30] sm:$0xff] }
  0x14   : > { %v196_v19 = vld [vmem:[%s712_s24 + $0xa8] sm:$0xff]  ;;  %624 = vmatprep.mubr.msk.bf16.mxu1 %vm250_vm1, %v215_v11  ;;  %v209_v20 = vpack.c.bf16 %v180_v17, %v179_v15  ;;  %609 = vmatmul.mubr.msk.bf16.vlgmr.msra.gmra.mrb[0].mxu0 %vm250_vm1, %v208_v12  ;;  %v182_v23 = vld [vmem:[%s712_s24 + $0x38] sm:$0xff]  ;;  %v197_v24 = vld [vmem:[%s712_s24 + $0xb0] sm:$0xff] }
  0x15   : > { %v217_v21 = vpack.c.bf16 %v196_v19, %v195_v18  ;;  %625 = vmatmul.mubr.msk.bf16.vlgmr.msra.gmra.mrb[0].mxu1 %vm250_vm1, %v216_v16  ;;  %v198_v25 = vld [vmem:[%s712_s24 + $0xb8] sm:$0xff]  ;;  %v183_v26 = vld [vmem:[%s712_s24 + $0x40] sm:$0xff]  ;;  %v184_v27 = vld [vmem:[%s712_s24 + $0x48] sm:$0xff]  ;;  %v210_v30 = vpack.c.bf16 %v182_v23, %v181_v22 }
  0x16   : > { %612 = vmatprep.mubr.msk.bf16.mxu0 %vm250_vm1, %v209_v20  ;;  %v199_v28 = vld [vmem:[%s712_s24 + $0xc0] sm:$0xff]  ;;  %v200_v29 = vld [vmem:[%s712_s24 + $0xc8] sm:$0xff]  ;;  %v218_v31 = vpack.c.bf16 %v198_v25, %v197_v24  ;;  %v211_v32 = vpack.c.bf16 %v184_v27, %v183_v26  ;;  %v185_v34 = vld [vmem:[%s712_s24 + $0x50] sm:$0xff] }
  0x17   : > { %628 = vmatprep.mubr.msk.bf16.mxu1 %vm250_vm1, %v217_v21  ;;  %v219_v33 = vpack.c.bf16 %v200_v29, %v199_v28  ;;  %v186_v35 = vld [vmem:[%s712_s24 + $0x58] sm:$0xff]  ;;  %v201_v36 = vld [vmem:[%s712_s24 + $0xd0] sm:$0xff]  ;;  %v187_v38 = vld [vmem:[%s712_s24 + $0x60] sm:$0xff] }
  0x18   : > { %v202_v37 = vld [vmem:[%s712_s24 + $0xd8] sm:$0xff]  ;;  %v188_v39 = vld [vmem:[%s712_s24 + $0x68] sm:$0xff]  ;;  %v203_v40 = vld [vmem:[%s712_s24 + $0xe0] sm:$0xff]  ;;  %v212_v42 = vpack.c.bf16 %v186_v35, %v185_v34 }
  0x19   : > { %v204_v41 = vld [vmem:[%s712_s24 + $0xe8] sm:$0xff]  ;;  %v220_v43 = vpack.c.bf16 %v202_v37, %v201_v36  ;;  %v213_v44 = vpack.c.bf16 %v188_v39, %v187_v38  ;;  %v189_v46 = vld [vmem:[%s712_s24 + $0x70] sm:$0xff]  ;;  %v190_v47 = vld [vmem:[%s712_s24 + $0x78] sm:$0xff] }
  0x1a   : > { %v221_v45 = vpack.c.bf16 %v204_v41, %v203_v40  ;;  %v205_v48 = vld [vmem:[%s712_s24 + $0xf0] sm:$0xff]  ;;  %v206_v49 = vld [vmem:[%s712_s24 + $0xf8] sm:$0xff]  ;;  %v214_v50 = vpack.c.bf16 %v190_v47, %v189_v46 }
  0x1b   : > { %v222_v51 = vpack.c.bf16 %v206_v49, %v205_v48 }
  0x1c   : > { %613 = vmatmul.mubr.msk.bf16.gmra.mrb[4].mxu0 %vm250_vm1, %v210_v30 }
  0x1d   : > { %629 = vmatmul.mubr.msk.bf16.gmra.mrb[4].mxu1 %vm250_vm1, %v218_v31  ;;  %616 = vmatprep.mubr.msk.bf16.mxu0 %vm250_vm1, %v211_v32 }
  0x1e   : > { %632 = vmatprep.mubr.msk.bf16.mxu1 %vm250_vm1, %v219_v33 }
  0x24   : > { %617 = vmatmul.mubr.msk.bf16.gmra.mrb[8].mxu0 %vm250_vm1, %v212_v42 }
  0x25   : > { %633 = vmatmul.mubr.msk.bf16.gmra.mrb[8].mxu1 %vm250_vm1, %v220_v43  ;;  %620 = vmatprep.mubr.msk.bf16.mxu0 %vm250_vm1, %v213_v44 }
  0x26   : > { %636 = vmatprep.mubr.msk.bf16.mxu1 %vm250_vm1, %v221_v45 }
  0x2c   : > { %621 = vmatmul.mubr.msk.bf16.gmra.mrb[12].mxu0 %vm250_vm1, %v214_v50 }
  0x2d   : > { %637 = vmatmul.mubr.msk.bf16.gmra.mrb[12].mxu1 %vm250_vm1, %v222_v51 }
  0xe7   : > { %v610_v53 = vpop.f32.mrb[0].mxu0 }
  0xe8   : > { %v626_v54 = vpop.f32.mrb[0].mxu1  ;;  %v346_v55 = vadd.f32 %v610_v53, %v765_v52  ;;  %v337_v57 = vpop.f32.mrb[1].mxu0 }
  0xe9   : > { %v410_v56 = vadd.f32 %v626_v54, %v765_v52  ;;  %v401_v58 = vpop.f32.mrb[1].mxu1  ;;  %v338_v59 = vadd.f32 %v765_v52, %v337_v57  ;;  %v611_v61 = vpop.f32.mrb[2].mxu0 }
  0xea   : > { %v402_v60 = vadd.f32 %v765_v52, %v401_v58  ;;  %v627_v62 = vpop.f32.mrb[2].mxu1  ;;  %466 = vst [vmem:[%s772_s29 + $0x10] sm:$0xff] %v346_v55  ;;  %v349_v63 = vadd.f32 %v611_v61, %v765_v52  ;;  %v340_v1 = vpop.f32.mrb[3].mxu0 }
  0xeb   : > { %482 = vst [vmem:[%s772_s29 + $0x90] sm:$0xff] %v410_v56  ;;  %v413_v0 = vadd.f32 %v627_v62, %v765_v52  ;;  %v404_v2 = vpop.f32.mrb[3].mxu1  ;;  %464 = vst [vmem:[%s772_s29] sm:$0xff] %v338_v59  ;;  %v341_v3 = vadd.f32 %v765_v52, %v340_v1 }
  0xec   : > { %480 = vst [vmem:[%s772_s29 + $0x80] sm:$0xff] %v402_v60  ;;  %v405_v4 = vadd.f32 %v765_v52, %v404_v2  ;;  %467 = vst [vmem:[%s772_s29 + $0x18] sm:$0xff] %v349_v63 }
  0xed   : > { %483 = vst [vmem:[%s772_s29 + $0x98] sm:$0xff] %v413_v0  ;;  %465 = vst [vmem:[%s772_s29 + $0x8] sm:$0xff] %v341_v3 }
  0xee   : > { %481 = vst [vmem:[%s772_s29 + $0x88] sm:$0xff] %v405_v4 }
  0xef   : > { %v614_v5 = vpop.f32.mrb[4].mxu0 }
  0xf0   : > { %v630_v6 = vpop.f32.mrb[4].mxu1  ;;  %v362_v7 = vadd.f32 %v614_v5, %v765_v52  ;;  %v353_v9 = vpop.f32.mrb[5].mxu0 }
  0xf1   : > { %v426_v8 = vadd.f32 %v630_v6, %v765_v52  ;;  %v417_v10 = vpop.f32.mrb[5].mxu1  ;;  %v354_v11 = vadd.f32 %v765_v52, %v353_v9  ;;  %v615_v13 = vpop.f32.mrb[6].mxu0 }
  0xf2   : > { %v418_v12 = vadd.f32 %v765_v52, %v417_v10  ;;  %v631_v14 = vpop.f32.mrb[6].mxu1  ;;  %470 = vst [vmem:[%s772_s29 + $0x30] sm:$0xff] %v362_v7  ;;  %v365_v15 = vadd.f32 %v615_v13, %v765_v52  ;;  %v356_v17 = vpop.f32.mrb[7].mxu0 }
  0xf3   : > { %486 = vst [vmem:[%s772_s29 + $0xb0] sm:$0xff] %v426_v8  ;;  %v429_v16 = vadd.f32 %v631_v14, %v765_v52  ;;  %v420_v18 = vpop.f32.mrb[7].mxu1  ;;  %468 = vst [vmem:[%s772_s29 + $0x20] sm:$0xff] %v354_v11  ;;  %v357_v19 = vadd.f32 %v765_v52, %v356_v17 }
  0xf4   : > { %484 = vst [vmem:[%s772_s29 + $0xa0] sm:$0xff] %v418_v12  ;;  %v421_v20 = vadd.f32 %v765_v52, %v420_v18  ;;  %471 = vst [vmem:[%s772_s29 + $0x38] sm:$0xff] %v365_v15 }
  0xf5   : > { %487 = vst [vmem:[%s772_s29 + $0xb8] sm:$0xff] %v429_v16  ;;  %469 = vst [vmem:[%s772_s29 + $0x28] sm:$0xff] %v357_v19 }
  0xf6   : > { %485 = vst [vmem:[%s772_s29 + $0xa8] sm:$0xff] %v421_v20 }
  0xf7   : > { %v618_v21 = vpop.f32.mrb[8].mxu0 }
  0xf8   : > { %v634_v22 = vpop.f32.mrb[8].mxu1  ;;  %v378_v23 = vadd.f32 %v618_v21, %v765_v52  ;;  %v369_v25 = vpop.f32.mrb[9].mxu0 }
  0xf9   : > { %v442_v24 = vadd.f32 %v634_v22, %v765_v52  ;;  %v433_v26 = vpop.f32.mrb[9].mxu1  ;;  %v370_v27 = vadd.f32 %v765_v52, %v369_v25  ;;  %v619_v29 = vpop.f32.mrb[10].mxu0 }
  0xfa   : > { %v434_v28 = vadd.f32 %v765_v52, %v433_v26  ;;  %v635_v30 = vpop.f32.mrb[10].mxu1  ;;  %474 = vst [vmem:[%s772_s29 + $0x50] sm:$0xff] %v378_v23  ;;  %v381_v31 = vadd.f32 %v619_v29, %v765_v52  ;;  %v372_v33 = vpop.f32.mrb[11].mxu0 }
  0xfb   : > { %490 = vst [vmem:[%s772_s29 + $0xd0] sm:$0xff] %v442_v24  ;;  %v445_v32 = vadd.f32 %v635_v30, %v765_v52  ;;  %v436_v34 = vpop.f32.mrb[11].mxu1  ;;  %472 = vst [vmem:[%s772_s29 + $0x40] sm:$0xff] %v370_v27  ;;  %v373_v35 = vadd.f32 %v765_v52, %v372_v33 }
  0xfc   : > { %488 = vst [vmem:[%s772_s29 + $0xc0] sm:$0xff] %v434_v28  ;;  %v437_v36 = vadd.f32 %v765_v52, %v436_v34  ;;  %475 = vst [vmem:[%s772_s29 + $0x58] sm:$0xff] %v381_v31 }
  0xfd   : > { %491 = vst [vmem:[%s772_s29 + $0xd8] sm:$0xff] %v445_v32  ;;  %473 = vst [vmem:[%s772_s29 + $0x48] sm:$0xff] %v373_v35 }
  0xfe   : > { %489 = vst [vmem:[%s772_s29 + $0xc8] sm:$0xff] %v437_v36 }
  0xff   : > { %v622_v37 = vpop.f32.mrb[12].mxu0 }
 0x100   : > { %v638_v38 = vpop.f32.mrb[12].mxu1  ;;  %v394_v39 = vadd.f32 %v622_v37, %v765_v52  ;;  %v385_v41 = vpop.f32.mrb[13].mxu0 }
 0x101   : > { %v458_v40 = vadd.f32 %v638_v38, %v765_v52  ;;  %v449_v42 = vpop.f32.mrb[13].mxu1  ;;  %v386_v43 = vadd.f32 %v765_v52, %v385_v41  ;;  %v623_v45 = vpop.f32.mrb[14].mxu0 }
 0x102   : > { %v450_v44 = vadd.f32 %v765_v52, %v449_v42  ;;  %v639_v46 = vpop.f32.mrb[14].mxu1  ;;  %478 = vst [vmem:[%s772_s29 + $0x70] sm:$0xff] %v394_v39  ;;  %v397_v47 = vadd.f32 %v623_v45, %v765_v52  ;;  %v388_v49 = vpop.f32.mrb[15].mxu0 }
 0x103   : > { %494 = vst [vmem:[%s772_s29 + $0xf0] sm:$0xff] %v458_v40  ;;  %v461_v48 = vadd.f32 %v639_v46, %v765_v52  ;;  %v452_v50 = vpop.f32.mrb[15].mxu1  ;;  %476 = vst [vmem:[%s772_s29 + $0x60] sm:$0xff] %v386_v43  ;;  %v389_v51 = vadd.f32 %v765_v52, %v388_v49 }
 0x104   : > { %492 = vst [vmem:[%s772_s29 + $0xe0] sm:$0xff] %v450_v44  ;;  %v453_v53 = vadd.f32 %v765_v52, %v452_v50  ;;  %479 = vst [vmem:[%s772_s29 + $0x78] sm:$0xff] %v397_v47 }
 0x105   : > { %495 = vst [vmem:[%s772_s29 + $0xf8] sm:$0xff] %v461_v48  ;;  %477 = vst [vmem:[%s772_s29 + $0x68] sm:$0xff] %v389_v51 }
 0x106   : > { %493 = vst [vmem:[%s772_s29 + $0xe8] sm:$0xff] %v453_v53 }
 0x107 PF: > { %s13_s12 = sadd.s32 1, %s665_s12  }
 0x108   : > { %p10_p4 = scmp.ge.s32.totalorder %s13_s12, 10  }
 0x10a   :  { %12 = sbr.rel (!%p10_p4) target bundleno = 1 (0x1), region = 62 }

// kernel: _lambda_.8
= control target key start
LH: loop header
LB: loop body
LE: loop exit
PB: predicated region body
PF: predicated region fallthrough
CT: control target
= control target key end

     0   :  { %s7924_s18 = smov 0   ;;  %s7926_s19 = smov 0   ;;  %s10002_s0 = inlined_call_operand.vmem [shape: f32[2,4,256,128], index: 0, kind: input, shape index: {}]   ;;  %s10003_s1 = inlined_call_operand.vmem [shape: bf16[9,32,128], index: 1, kind: input, shape index: {}]   ;;  %s10004_s2 = inlined_call_operand.vmem [shape: f32[256,32], index: 2, kind: input, shape index: {}]   ;;  %s10005_s3 = inlined_call_operand.vmem [shape: f32[256,32], index: 3, kind: input, shape index: {}]   ;;  %s10006_s4 = inlined_call_operand.vmem [shape: f32[256,32], index: 4, kind: input, shape index: {}]   ;;  %s10007_s5 = inlined_call_operand.vmem [shape: f32[2,4,18,18,32], index: 5, kind: output, shape index: {}]  }
   0x1   :  { %s7928_s20 = smov 0   ;;  %s7930_s21 = smov 0  }
   0x2   :  { %s7932_s22 = smov 0  }
   0x3 LB: > { %s24_s23 = sadd.s32 1, %s7880_s20  ;;  %s27_s24 = sadd.s32 1, %s7884_s21  ;;  %s7888_s22 = sphi %s7932_s22, %s15_s22   ;;  %s7884_s21 = sphi %s7930_s21, %s10193_s21   ;;  %s7880_s20 = sphi %s7928_s20, %s10192_s20   ;;  %s7876_s19 = sphi %s7926_s19, %s10191_s19   ;;  %s7872_s18 = sphi %s7924_s18, %s10190_s18  }
   0x4   : > { %p25_p0 = scmp.ge.s32.totalorder %s24_s23, 4  ;;  %p6166_p1 = scmp.ge.s32.totalorder %s7888_s22, 1 }
   0x5   : > { %p207_p2 = scmp.lt.s32.totalorder %s7888_s22, 9 }
   0x6   : > { %s10195_s23 = smov (%p25_p0, %s24_s23), 0  ;;  %s10197_s24 = smov (!%p25_p0, %s27_s24), %s7884_s21 }
   0x7   : > { %p208_p3 = pnand %p6166_p1, %p207_p2  ;;  %p29_p4 = scmp.ge.s32.totalorder %s10197_s24, 2 }
   0x9   : > { %s10199_s24 = smov (%p29_p4, %s10197_s24), 0  ;;  %211 = sbr.rel (%p208_p3) target bundleno = 1250 (0x4e2), region = 40 }
  0x10   : > { %p243_p5 = scmp.lt.s32.totalorder %s7876_s19, 1  ;;  %p245_p6 = scmp.lt.s32.totalorder %s7872_s18, 3 }
  0x11   : > { %p6171_p7 = scmp.ne.s32.totalorder %s7872_s18, 0 }
  0x12   : > { %s10201_s19 = smov (!%p243_p5, %s7876_s19), 1  ;;  %vm266_vm0 = vcmask (!%p6171_p7), 261120   ;;  %vm269_vm1 = vcmask (!%p6171_p7), 254976   ;;  %v7890_v0 = vmov (!%p6171_p7), 0.0  }
  0x13   : > { %s246_s25 = scalar_select %p245_p6, %s7872_s18, 3 }
  0x14   : > { %s6168_s26 = sshll.u32 %s10201_s19, 7  ;;  %s7243_s27 = smul.u32 216, %s10201_s19  ;;  %267 = vst.msk [vmem:[#allocation2] sm:$0xff] (!%p6171_p7), %vm266_vm0, %v7890_v0  ;;  %268 = vst.msk [vmem:[#allocation2 + $0x8] sm:$0xff] (!%p6171_p7), %vm266_vm0, %v7890_v0 }
  0x15   : > { %s6167_s28 = sshll.u32 %s246_s25, 5  ;;  %s7242_s29 = smul.u32 54, %s246_s25  ;;  %271 = vst.msk [vmem:[#allocation2 + $0x18] sm:$0xff] (!%p6171_p7), %vm266_vm0, %v7890_v0  ;;  %272 = vst.msk [vmem:[#allocation2 + $0x20] sm:$0xff] (!%p6171_p7), %vm266_vm0, %v7890_v0 }
  0x16   : > { %s249_s30 = sadd.s32 %s6168_s26, %s6167_s28  ;;  %265 = sbr.rel (%p6171_p7) target bundleno = 63 (0x3f), region = 44  ;;  %274 = vst.msk [vmem:[#allocation2 + $0x30] sm:$0xff] (!%p6171_p7), %vm266_vm0, %v7890_v0  ;;  %275 = vst.msk [vmem:[#allocation2 + $0x38] sm:$0xff] (!%p6171_p7), %vm266_vm0, %v7890_v0 }
  0x17   : > { %s6169_s6 = sshll.u32 %s249_s30, 3  ;;  %s258_s7 = sadd.s32 %s7243_s27, %s7242_s29  ;;  %277 = vst.msk [vmem:[#allocation2 + $0x48] sm:$0xff] (!%p6171_p7), %vm266_vm0, %v7890_v0  ;;  %278 = vst.msk [vmem:[#allocation2 + $0x50] sm:$0xff] (!%p6171_p7), %vm266_vm0, %v7890_v0 }
  0x18   : > { %s7961_s10 = scalar_lea.vmem %s10002_s0, %s6169_s6  ;;  %s6170_s11 = sshll.u32 %s258_s7, 3  ;;  %280 = vst.msk [vmem:[#allocation2 + $0x60] sm:$0xff] (!%p6171_p7), %vm266_vm0, %v7890_v0  ;;  %281 = vst.msk [vmem:[#allocation2 + $0x68] sm:$0xff] (!%p6171_p7), %vm266_vm0, %v7890_v0 }
  0x19   : > { %s7966_s14 = scalar_lea.vmem %s10007_s5, %s6170_s11  ;;  %283 = vst.msk [vmem:[#allocation2 + $0x78] sm:$0xff] (!%p6171_p7), %vm266_vm0, %v7890_v0  ;;  %284 = vst.msk [vmem:[#allocation2 + $0x80] sm:$0xff] (!%p6171_p7), %vm266_vm0, %v7890_v0 }
  0x1a   : > { %286 = vst.msk [vmem:[#allocation2 + $0x90] sm:$0xff] (!%p6171_p7), %vm266_vm0, %v7890_v0  ;;  %287 = vst.msk [vmem:[#allocation2 + $0x98] sm:$0xff] (!%p6171_p7), %vm266_vm0, %v7890_v0 }
  0x1b   : > { %289 = vst.msk [vmem:[#allocation2 + $0xa8] sm:$0xff] (!%p6171_p7), %vm266_vm0, %v7890_v0  ;;  %290 = vst.msk [vmem:[#allocation2 + $0xb0] sm:$0xff] (!%p6171_p7), %vm266_vm0, %v7890_v0 }
  0x1c   : > { %292 = vst.msk [vmem:[#allocation2 + $0xc0] sm:$0xff] (!%p6171_p7), %vm266_vm0, %v7890_v0  ;;  %293 = vst.msk [vmem:[#allocation2 + $0xc8] sm:$0xff] (!%p6171_p7), %vm266_vm0, %v7890_v0 }
  0x1d   : > { %295 = vst.msk [vmem:[#allocation2 + $0xd8] sm:$0xff] %vm266_vm0, %v7890_v0  ;;  %296 = vst.msk [vmem:[#allocation2 + $0xe0] sm:$0xff] %vm266_vm0, %v7890_v0 }
  0x1e   : > { %298 = vst.msk [vmem:[#allocation2 + $0xf0] sm:$0xff] %vm266_vm0, %v7890_v0  ;;  %299 = vst.msk [vmem:[#allocation2 + $0xf8] sm:$0xff] %vm266_vm0, %v7890_v0 }
  0x1f   : > { %301 = vst.msk [vmem:[#allocation2 + $0x108] sm:$0xff] %vm266_vm0, %v7890_v0  ;;  %302 = vst.msk [vmem:[#allocation2 + $0x110] sm:$0xff] %vm266_vm0, %v7890_v0 }
  0x20   : > { %304 = vst.msk [vmem:[#allocation2 + $0x120] sm:$0xff] %vm266_vm0, %v7890_v0  ;;  %305 = vst.msk [vmem:[#allocation2 + $0x128] sm:$0xff] %vm266_vm0, %v7890_v0 }
  0x21   : > { %307 = vst.msk [vmem:[#allocation2 + $0x138] sm:$0xff] %vm266_vm0, %v7890_v0  ;;  %308 = vst.msk [vmem:[#allocation2 + $0x140] sm:$0xff] %vm266_vm0, %v7890_v0 }
  0x22   : > { %310 = vst.msk [vmem:[#allocation2 + $0x150] sm:$0xff] %vm266_vm0, %v7890_v0  ;;  %311 = vst.msk [vmem:[#allocation2 + $0x158] sm:$0xff] %vm266_vm0, %v7890_v0 }
  0x23   : > { %313 = vst.msk [vmem:[#allocation2 + $0x168] sm:$0xff] %vm266_vm0, %v7890_v0  ;;  %314 = vst.msk [vmem:[#allocation2 + $0x170] sm:$0xff] %vm266_vm0, %v7890_v0 }
  0x24   : > { %316 = vst.msk [vmem:[#allocation2 + $0x180] sm:$0xff] %vm266_vm0, %v7890_v0  ;;  %317 = vst.msk [vmem:[#allocation2 + $0x188] sm:$0xff] %vm266_vm0, %v7890_v0 }
  0x25   : > { %319 = vst.msk [vmem:[#allocation2 + $0x198] sm:$0xff] %vm266_vm0, %v7890_v0  ;;  %320 = vst.msk [vmem:[#allocation2 + $0x1a0] sm:$0xff] %vm266_vm0, %v7890_v0 }
  0x26   : > { %322 = vst.msk [vmem:[#allocation3] sm:$0xff] %vm266_vm0, %v7890_v0  ;;  %323 = vst.msk [vmem:[#allocation3 + $0x8] sm:$0xff] %vm266_vm0, %v7890_v0 }
  0x27   : > { %324 = vst.msk [vmem:[#allocation3 + $0x10] sm:$0xff] %vm266_vm0, %v7890_v0  ;;  %325 = vst.msk [vmem:[#allocation3 + $0x18] sm:$0xff] %vm266_vm0, %v7890_v0 }
  0x28   : > { %326 = vst.msk [vmem:[#allocation3 + $0x20] sm:$0xff] %vm266_vm0, %v7890_v0  ;;  %327 = vst.msk [vmem:[#allocation3 + $0x28] sm:$0xff] %vm266_vm0, %v7890_v0 }
  0x29   : > { %328 = vst.msk [vmem:[#allocation3 + $0x30] sm:$0xff] %vm266_vm0, %v7890_v0  ;;  %329 = vst.msk [vmem:[#allocation3 + $0x38] sm:$0xff] %vm266_vm0, %v7890_v0 }
  0x2a   : > { %330 = vst.msk [vmem:[#allocation3 + $0x40] sm:$0xff] %vm266_vm0, %v7890_v0  ;;  %331 = vst.msk [vmem:[#allocation3 + $0x48] sm:$0xff] %vm266_vm0, %v7890_v0 }
  0x2b   : > { %332 = vst.msk [vmem:[#allocation3 + $0x50] sm:$0xff] %vm266_vm0, %v7890_v0  ;;  %333 = vst.msk [vmem:[#allocation3 + $0x58] sm:$0xff] %vm266_vm0, %v7890_v0 }
  0x2c   : > { %334 = vst.msk [vmem:[#allocation3 + $0x60] sm:$0xff] %vm266_vm0, %v7890_v0  ;;  %335 = vst.msk [vmem:[#allocation3 + $0x68] sm:$0xff] %vm266_vm0, %v7890_v0 }
  0x2d   : > { %336 = vst.msk [vmem:[#allocation3 + $0x70] sm:$0xff] %vm266_vm0, %v7890_v0  ;;  %337 = vst.msk [vmem:[#allocation3 + $0x78] sm:$0xff] %vm266_vm0, %v7890_v0 }
  0x2e   : > { %338 = vst.msk [vmem:[#allocation3 + $0x80] sm:$0xff] %vm266_vm0, %v7890_v0  ;;  %339 = vst.msk [vmem:[#allocation3 + $0x88] sm:$0xff] %vm266_vm0, %v7890_v0 }
  0x2f   : > { %340 = vst.msk [vmem:[#allocation3 + $0x90] sm:$0xff] %vm266_vm0, %v7890_v0  ;;  %341 = vst.msk [vmem:[#allocation3 + $0x98] sm:$0xff] %vm266_vm0, %v7890_v0 }
  0x30   : > { %342 = vst.msk [vmem:[#allocation3 + $0xa0] sm:$0xff] %vm266_vm0, %v7890_v0  ;;  %343 = vst.msk [vmem:[#allocation3 + $0xa8] sm:$0xff] %vm266_vm0, %v7890_v0 }
  0x31   : > { %344 = vst.msk [vmem:[#allocation3 + $0xb0] sm:$0xff] %vm266_vm0, %v7890_v0  ;;  %345 = vst.msk [vmem:[#allocation3 + $0xb8] sm:$0xff] %vm266_vm0, %v7890_v0 }
  0x32   : > { %346 = vst.msk [vmem:[#allocation3 + $0xc0] sm:$0xff] %vm266_vm0, %v7890_v0  ;;  %347 = vst.msk [vmem:[#allocation3 + $0xc8] sm:$0xff] %vm266_vm0, %v7890_v0 }
  0x33   : > { %348 = vst.msk [vmem:[#allocation3 + $0xd0] sm:$0xff] %vm266_vm0, %v7890_v0  ;;  %349 = vst.msk [vmem:[#allocation3 + $0xd8] sm:$0xff] %vm266_vm0, %v7890_v0 }
  0x34   : > { %350 = vst.msk [vmem:[#allocation3 + $0xe0] sm:$0xff] %vm266_vm0, %v7890_v0  ;;  %351 = vst.msk [vmem:[#allocation3 + $0xe8] sm:$0xff] %vm266_vm0, %v7890_v0 }
  0x35   : > { %352 = vst.msk [vmem:[#allocation3 + $0xf0] sm:$0xff] %vm266_vm0, %v7890_v0  ;;  %353 = vst.msk [vmem:[#allocation3 + $0xf8] sm:$0xff] %vm266_vm0, %v7890_v0 }
  0x36   : > { %270 = vst.msk [vmem:[#allocation2 + $0x10] sm:$0x3] %vm269_vm1, %v7890_v0  ;;  %273 = vst.msk [vmem:[#allocation2 + $0x28] sm:$0x3] %vm269_vm1, %v7890_v0 }
  0x37   : > { %276 = vst.msk [vmem:[#allocation2 + $0x40] sm:$0x3] %vm269_vm1, %v7890_v0  ;;  %279 = vst.msk [vmem:[#allocation2 + $0x58] sm:$0x3] %vm269_vm1, %v7890_v0 }
  0x38   : > { %282 = vst.msk [vmem:[#allocation2 + $0x70] sm:$0x3] %vm269_vm1, %v7890_v0  ;;  %285 = vst.msk [vmem:[#allocation2 + $0x88] sm:$0x3] %vm269_vm1, %v7890_v0 }
  0x39   : > { %288 = vst.msk [vmem:[#allocation2 + $0xa0] sm:$0x3] %vm269_vm1, %v7890_v0  ;;  %291 = vst.msk [vmem:[#allocation2 + $0xb8] sm:$0x3] %vm269_vm1, %v7890_v0 }
  0x3a   : > { %294 = vst.msk [vmem:[#allocation2 + $0xd0] sm:$0x3] %vm269_vm1, %v7890_v0  ;;  %297 = vst.msk [vmem:[#allocation2 + $0xe8] sm:$0x3] %vm269_vm1, %v7890_v0 }
  0x3b   : > { %300 = vst.msk [vmem:[#allocation2 + $0x100] sm:$0x3] %vm269_vm1, %v7890_v0  ;;  %303 = vst.msk [vmem:[#allocation2 + $0x118] sm:$0x3] %vm269_vm1, %v7890_v0 }
  0x3c   : > { %306 = vst.msk [vmem:[#allocation2 + $0x130] sm:$0x3] %vm269_vm1, %v7890_v0  ;;  %309 = vst.msk [vmem:[#allocation2 + $0x148] sm:$0x3] %vm269_vm1, %v7890_v0 }
  0x3d   : > { %312 = vst.msk [vmem:[#allocation2 + $0x160] sm:$0x3] %vm269_vm1, %v7890_v0  ;;  %315 = vst.msk [vmem:[#allocation2 + $0x178] sm:$0x3] %vm269_vm1, %v7890_v0 }
  0x3e   : > { %318 = vst.msk [vmem:[#allocation2 + $0x190] sm:$0x3] %vm269_vm1, %v7890_v0  ;;  %321 = vst.msk [vmem:[#allocation2 + $0x1a8] sm:$0x3] %vm269_vm1, %v7890_v0 }
  0x3f PF: > { %v7288_v1 = vld [vmem:[%s10003_s1] sm:$0xff]   ;;  %v7290_v3 = vld [vmem:[%s10003_s1 + $0x8] sm:$0xff]   ;;  %vm514_vm2 = vcmask 261120   ;;  %v420_v10 = vld [vmem:[#allocation2 + $0x18] sm:$0xff]  ;;  %s7891_s19 = smov 32   ;;  %s7892_s9 = smov 64  }
  0x40   : > { %v8147_v2 = vld [vmem:[%s10003_s1 + $0x40] sm:$0xff]   ;;  %6626 = vmatprep.subr.bf16.mxu1 %v7288_v1  ;;  %v8156_v4 = vld [vmem:[%s10003_s1 + $0x48] sm:$0xff]   ;;  %v1901_v14 = vld [vmem:[#allocation2 + $0x31] sm:$0xff]  ;;  %s7893_s30 = smov 96   ;;  %vm6014_vm3 = vcmask 254976  }
  0x41   : > { %6770 = vmatprep.subr.bf16.mxu0 %v8147_v2  ;;  %6627 = vmatpush3.bf16.msra.mxu1 %v7288_v1  ;;  %v418_v5 = vld [vmem:[#allocation2] sm:$0xff]  ;;  %v419_v6 = vld [vmem:[#allocation2 + $0x8] sm:$0xff]  ;;  %v7292_v17 = vld [vmem:[%s10003_s1 + $0x50] sm:$0xff]  }
  0x42   : > { %6771 = vmatpush3.bf16.msra.mxu0 %v8147_v2  ;;  %6628 = vmatprep.subr.bf16.mxu1 %v7290_v3  ;;  %v1899_v7 = vld [vmem:[#allocation2 + $0x19] sm:$0xff]  ;;  %v450_v8 = vpack.c.bf16 %v419_v6, %v418_v5  ;;  %v1900_v9 = vld [vmem:[#allocation2 + $0x21] sm:$0xff]  ;;  %v422_v18 = vld [vmem:[#allocation2 + $0x30] sm:$0xff] }
  0x43   : > { %6772 = vmatprep.subr.bf16.mxu0 %v8156_v4  ;;  %v421_v11 = vld [vmem:[#allocation2 + $0x20] sm:$0xff]  ;;  %v8160_v12 = vpack.c.bf16 %v1900_v9, %v1899_v7  ;;  %v423_v19 = vld [vmem:[#allocation2 + $0x38] sm:$0xff]  ;;  %v1903_v20 = vld [vmem:[#allocation2 + $0x49] sm:$0xff] }
  0x44   : > { %v8162_v13 = vpack.c.bf16 %v421_v11, %v420_v10  ;;  %v1902_v15 = vld [vmem:[#allocation2 + $0x39] sm:$0xff]  ;;  %6630 = vmatprep.mubr.msk.bf16.mxu1 %vm514_vm2, %v450_v8  ;;  %v1904_v21 = vld [vmem:[#allocation2 + $0x51] sm:$0xff]  ;;  %v8173_v22 = vpack.c.bf16 %v423_v19, %v422_v18  ;;  %v424_v24 = vld [vmem:[#allocation2 + $0x48] sm:$0xff] }
  0x45   : > { %6629 = vmatpush3.bf16.msra.mxu1 %v7290_v3  ;;  %v8165_v16 = vpack.c.bf16 %v1902_v15, %v1901_v14  ;;  %6774 = vmatprep.mubr.msk.bf16.mxu0 %vm514_vm2, %v8160_v12  ;;  %v8175_v23 = vpack.c.bf16 %v1904_v21, %v1903_v20  ;;  %v425_v25 = vld [vmem:[#allocation2 + $0x50] sm:$0xff]  ;;  %v1905_v26 = vld [vmem:[#allocation2 + $0x61] sm:$0xff]  ;;  %v1907_v30 = vld [vmem:[#allocation2 + $0x79] sm:$0xff] }
  0x46   : > { %6773 = vmatpush3.bf16.msra.mxu0 %v8156_v4  ;;  %v1906_v27 = vld [vmem:[#allocation2 + $0x69] sm:$0xff]  ;;  %v426_v28 = vld [vmem:[#allocation2 + $0x60] sm:$0xff]  ;;  %v7293_v32 = vld [vmem:[%s10003_s1 + $0x58] sm:$0xff]   ;;  %v8188_v33 = vpack.c.bf16 %v425_v25, %v424_v24 }
  0x47   : > { %6806 = vmatprep.subr.bf16.mxu0 %v7292_v17  ;;  %v427_v29 = vld [vmem:[#allocation2 + $0x68] sm:$0xff]  ;;  %v7294_v34 = vld [vmem:[%s10003_s1 + $0x10] sm:$0xff]   ;;  %v8193_v35 = vpack.c.bf16 %v1906_v27, %v1905_v26  ;;  %v428_v38 = vld [vmem:[#allocation2 + $0x78] sm:$0xff] }
  0x48   : > { %6631 = vmatmul.mubr.msk.bf16.vlgmr.msra.gmra.mrb[0].mxu1 %vm514_vm2, %v8162_v13  ;;  %v1908_v31 = vld [vmem:[#allocation2 + $0x81] sm:$0xff]  ;;  %v8195_v36 = vpack.c.bf16 %v427_v29, %v426_v28  ;;  %6662 = vmatprep.subr.bf16.mxu1 %v7294_v34  ;;  %v1909_v40 = vld [vmem:[#allocation2 + $0x91] sm:$0xff]  ;;  %v1910_v41 = vld [vmem:[#allocation2 + $0x99] sm:$0xff] }
  0x49   : > { %6775 = vmatmul.mubr.msk.bf16.vlgmr.msra.gmra.mrb[0].mxu0 %vm514_vm2, %v8165_v16  ;;  %6634 = vmatprep.mubr.msk.bf16.mxu1 %vm514_vm2, %v8173_v22  ;;  %v8197_v37 = vpack.c.bf16 %v1908_v31, %v1907_v30  ;;  %v429_v39 = vld [vmem:[#allocation2 + $0x80] sm:$0xff]  ;;  %v430_v42 = vld [vmem:[#allocation2 + $0x90] sm:$0xff]  ;;  %v431_v43 = vld [vmem:[#allocation2 + $0x98] sm:$0xff]  ;;  %v8212_v48 = vpack.c.bf16 %v1910_v41, %v1909_v40 }
  0x4a   : > { %6807 = vmatpush3.bf16.msra.mxu0 %v7292_v17  ;;  %6778 = vmatprep.mubr.msk.bf16.mxu0 %vm514_vm2, %v8175_v23  ;;  %v1911_v44 = vld [vmem:[#allocation2 + $0xa9] sm:$0xff]  ;;  %v1912_v45 = vld [vmem:[#allocation2 + $0xb1] sm:$0xff]  ;;  %v7295_v46 = vld [vmem:[%s10003_s1 + $0x60] sm:$0xff]   ;;  %v8210_v47 = vpack.c.bf16 %v429_v39, %v428_v38  ;;  %v8214_v49 = vpack.c.bf16 %v431_v43, %v430_v42 }
  0x4b   : > { %6808 = vmatprep.subr.bf16.mxu0 %v7293_v32  ;;  %6663 = vmatpush3.bf16.msra.mxu1 %v7294_v34  ;;  %v8216_v50 = vpack.c.bf16 %v1912_v45, %v1911_v44  ;;  %v432_v51 = vld [vmem:[#allocation2 + $0xa8] sm:$0xff]  ;;  %v433_v52 = vld [vmem:[#allocation2 + $0xb0] sm:$0xff]  ;;  %v7296_v54 = vld [vmem:[%s10003_s1 + $0x18] sm:$0xff]  }
  0x4c   : > { %v1913_v53 = vld [vmem:[#allocation2 + $0xc1] sm:$0xff]  ;;  %v1914_v55 = vld [vmem:[#allocation2 + $0xc9] sm:$0xff]  ;;  %6664 = vmatprep.subr.bf16.mxu1 %v7296_v54  ;;  %v8229_v60 = vpack.c.bf16 %v433_v52, %v432_v51  ;;  %v436_v0 = vld [vmem:[#allocation2 + $0xd8] sm:$0xff] }
  0x4d   : > { %v434_v56 = vld [vmem:[#allocation2 + $0xc0] sm:$0xff]  ;;  %v435_v57 = vld [vmem:[#allocation2 + $0xc8] sm:$0xff]  ;;  %v8231_v61 = vpack.c.bf16 %v1914_v55, %v1913_v53  ;;  %v2271_v3 = vld [vmem:[#allocation2 + $0x32] sm:$0xff] }
  0x4e   : > { %6809 = vmatpush3.bf16.msra.mxu0 %v7293_v32  ;;  %v2269_v58 = vld [vmem:[#allocation2 + $0x1a] sm:$0xff]  ;;  %v2270_v59 = vld [vmem:[#allocation2 + $0x22] sm:$0xff]  ;;  %v8233_v62 = vpack.c.bf16 %v435_v57, %v434_v56  ;;  %v438_v6 = vld [vmem:[#allocation2 + $0xf0] sm:$0xff] }
  0x4f   : > { %6842 = vmatprep.subr.bf16.mxu0 %v7295_v46  ;;  %6665 = vmatpush3.bf16.msra.mxu1 %v7296_v54  ;;  %v8235_v63 = vpack.c.bf16 %v2270_v59, %v2269_v58  ;;  %v437_v1 = vld [vmem:[#allocation2 + $0xe0] sm:$0xff]  ;;  %v439_v7 = vld [vmem:[#allocation2 + $0xf8] sm:$0xff]  ;;  %v2273_v9 = vld [vmem:[#allocation2 + $0x4a] sm:$0xff] }
  0x50   : > { %6635 = vmatmul.mubr.msk.bf16.gmra.mrb[4].mxu1 %vm514_vm2, %v8188_v33  ;;  %v2272_v5 = vld [vmem:[#allocation2 + $0x3a] sm:$0xff]  ;;  %v2274_v10 = vld [vmem:[#allocation2 + $0x52] sm:$0xff]  ;;  %v8250_v11 = vpack.c.bf16 %v437_v1, %v436_v0  ;;  %v8255_v15 = vpack.c.bf16 %v439_v7, %v438_v6  ;;  %v7297_v18 = vld [vmem:[%s10003_s1 + $0x68] sm:$0xff]  }
  0x51   : > { %6779 = vmatmul.mubr.msk.bf16.gmra.mrb[4].mxu0 %vm514_vm2, %v8193_v35  ;;  %6638 = vmatprep.mubr.msk.bf16.mxu1 %vm514_vm2, %v8195_v36  ;;  %v8248_v8 = vld [vmem:[%s10003_s1 + $0x20] sm:$0xff]   ;;  %v8253_v14 = vpack.c.bf16 %v2272_v5, %v2271_v3  ;;  %v8257_v17 = vpack.c.bf16 %v2274_v10, %v2273_v9  ;;  %v440_v19 = vld [vmem:[#allocation2 + $0x108] sm:$0xff]  ;;  %v441_v20 = vld [vmem:[#allocation2 + $0x110] sm:$0xff] }
  0x52   : > { %6782 = vmatprep.mubr.msk.bf16.mxu0 %vm514_vm2, %v8197_v37  ;;  %6698 = vmatprep.subr.bf16.mxu1 %v8248_v8  ;;  %v2275_v21 = vld [vmem:[#allocation2 + $0x62] sm:$0xff]  ;;  %v2276_v24 = vld [vmem:[#allocation2 + $0x6a] sm:$0xff]  ;;  %v2277_v27 = vld [vmem:[#allocation2 + $0x7a] sm:$0xff]  ;;  %v8275_v30 = vpack.c.bf16 %v441_v20, %v440_v19 }
  0x53   : > { %v442_v25 = vld [vmem:[#allocation2 + $0x120] sm:$0xff]  ;;  %v443_v26 = vld [vmem:[#allocation2 + $0x128] sm:$0xff]  ;;  %v8273_v29 = vld [vmem:[%s10003_s1 + $0x70] sm:$0xff]   ;;  %v8277_v31 = vpack.c.bf16 %v2276_v24, %v2275_v21 }
  0x54   : > { %v2278_v28 = vld [vmem:[#allocation2 + $0x82] sm:$0xff]  ;;  %v8279_v32 = vpack.c.bf16 %v443_v26, %v442_v25  ;;  %v444_v38 = vld [vmem:[#allocation2 + $0x138] sm:$0xff]  ;;  %v446_v42 = vld [vmem:[#allocation2 + $0x150] sm:$0xff] }
  0x55   : > { %v8281_v34 = vpack.c.bf16 %v2278_v28, %v2277_v27  ;;  %v445_v39 = vld [vmem:[#allocation2 + $0x140] sm:$0xff]  ;;  %v2279_v40 = vld [vmem:[#allocation2 + $0x92] sm:$0xff]  ;;  %v2281_v44 = vld [vmem:[#allocation2 + $0xaa] sm:$0xff] }
  0x56   : > { %v2280_v41 = vld [vmem:[#allocation2 + $0x9a] sm:$0xff]  ;;  %v2282_v45 = vld [vmem:[#allocation2 + $0xb2] sm:$0xff]  ;;  %v448_v54 = vld [vmem:[#allocation2 + $0x168] sm:$0xff] }
  0x57   : > { %v447_v43 = vld [vmem:[#allocation2 + $0x158] sm:$0xff]  ;;  %v8294_v51 = vpack.c.bf16 %v2280_v41, %v2279_v40  ;;  %v8298_v53 = vpack.c.bf16 %v2282_v45, %v2281_v44  ;;  %v449_v55 = vld [vmem:[#allocation2 + $0x170] sm:$0xff]  ;;  %v2283_v56 = vld [vmem:[#allocation2 + $0xc2] sm:$0xff] }
  0x58   : > { %6639 = vmatmul.mubr.msk.bf16.gmra.mrb[8].mxu1 %vm514_vm2, %v8210_v47  ;;  %v8296_v52 = vpack.c.bf16 %v447_v43, %v446_v42  ;;  %v2284_v57 = vld [vmem:[#allocation2 + $0xca] sm:$0xff]  ;;  %v788_v58 = vld [vmem:[#allocation2 + $0x1] sm:$0xff]  ;;  %v8308_v3 = vpack.c.bf16 %v449_v55, %v448_v54  ;;  %v2287_v9 = vld [vmem:[#allocation2 + $0xf2] sm:$0xff] }
  0x59   : > { %6783 = vmatmul.mubr.msk.bf16.gmra.mrb[8].mxu0 %vm514_vm2, %v8212_v48  ;;  %6642 = vmatprep.mubr.msk.bf16.mxu1 %vm514_vm2, %v8214_v49  ;;  %v789_v59 = vld [vmem:[#allocation2 + $0x9] sm:$0xff]  ;;  %v2285_v0 = vld [vmem:[#allocation2 + $0xda] sm:$0xff]  ;;  %v8310_v5 = vpack.c.bf16 %v2284_v57, %v2283_v56  ;;  %v2290_v19 = vld [vmem:[#allocation2 + $0x112] sm:$0xff] }
  0x5a   : > { %6786 = vmatprep.mubr.msk.bf16.mxu0 %vm514_vm2, %v8216_v50  ;;  %v2286_v1 = vld [vmem:[#allocation2 + $0xe2] sm:$0xff]  ;;  %v820_v6 = vpack.c.bf16 %v789_v59, %v788_v58  ;;  %v2288_v10 = vld [vmem:[#allocation2 + $0xfa] sm:$0xff]  ;;  %v2292_v26 = vld [vmem:[#allocation2 + $0x12a] sm:$0xff] }
  0x5b   : > { %v8312_v7 = vpack.c.bf16 %v2286_v1, %v2285_v0  ;;  %v8321_v20 = vpack.c.bf16 %v2288_v10, %v2287_v9  ;;  %v7300_v24 = vld [vmem:[%s10003_s1 + $0x28] sm:$0xff]   ;;  %v2293_v27 = vld [vmem:[#allocation2 + $0x13a] sm:$0xff]  ;;  %v2298_v42 = vld [vmem:[#allocation2 + $0x172] sm:$0xff] }
  0x5c   : > { %v2291_v25 = vld [vmem:[#allocation2 + $0x122] sm:$0xff]  ;;  %v2296_v40 = vld [vmem:[#allocation2 + $0x15a] sm:$0xff]  ;;  %v2297_v41 = vld [vmem:[#allocation2 + $0x16a] sm:$0xff] }
  0x5d   : > { %v2294_v28 = vld [vmem:[#allocation2 + $0x142] sm:$0xff]  ;;  %v8357_v44 = vpack.c.bf16 %v2298_v42, %v2297_v41  ;;  %v2300_v54 = vld [vmem:[#allocation2 + $0x18a] sm:$0xff]  ;;  %v806_v56 = vld [vmem:[#allocation2 + $0xd9] sm:$0xff] }
  0x5e   : > { %v2299_v45 = vld [vmem:[#allocation2 + $0x182] sm:$0xff]  ;;  %v808_v58 = vld [vmem:[#allocation2 + $0xf1] sm:$0xff]  ;;  %v809_v59 = vld [vmem:[#allocation2 + $0xf9] sm:$0xff] }
  0x5f   : > { %10036 = vst [vmem:[#allocation7_spill] sm:$0xff] %v8357_v44  ;;  %v8367_v55 = vpack.c.bf16 %v2300_v54, %v2299_v45  ;;  %v807_v57 = vld [vmem:[#allocation2 + $0xe1] sm:$0xff]  ;;  %v8379_v1 = vpack.c.bf16 %v809_v59, %v808_v58  ;;  %v810_v9 = vld [vmem:[#allocation2 + $0x109] sm:$0xff]  ;;  %v811_v10 = vld [vmem:[#allocation2 + $0x111] sm:$0xff] }
  0x60   : > { %6643 = vmatmul.mubr.msk.bf16.gmra.mrb[12].mxu1 %vm514_vm2, %v8229_v60  ;;  %v8377_v0 = vpack.c.bf16 %v807_v57, %v806_v56  ;;  %v818_v42 = vld [vmem:[#allocation2 + $0x169] sm:$0xff]  ;;  %v819_v45 = vld [vmem:[#allocation2 + $0x171] sm:$0xff] }
  0x61   : > { %6787 = vmatmul.mubr.msk.bf16.gmra.mrb[12].mxu0 %vm514_vm2, %v8231_v61  ;;  %6646 = vmatprep.mubr.msk.bf16.mxu1 %vm514_vm2, %v8233_v62  ;;  %10037 = vst [vmem:[#allocation8_spill] sm:$0xff] %v8367_v55  ;;  %v1158_v54 = vld [vmem:[#allocation2 + $0x2] sm:$0xff]  ;;  %v1159_v56 = vld [vmem:[#allocation2 + $0xa] sm:$0xff]  ;;  %v8423_v57 = vpack.c.bf16 %v819_v45, %v818_v42  ;;  %v7304_v59 = vld [vmem:[%s10003_s1 + $0x38] sm:$0xff]  }
  0x62   : > { %6810 = vmatprep.mubr.msk.bf16.mxu0 %vm514_vm2, %v8235_v63  ;;  %v1190_v58 = vpack.c.bf16 %v1159_v56, %v1158_v54  ;;  %v8482_v45 = vld [vmem:[#allocation3 + $0x8] sm:$0xff]  ;;  %v4103_v54 = vld [vmem:[%s10005_s3 + $0x8] sm:$0xff] }
  0x63   : > { %v8489_v56 = vld [vmem:[#allocation3 + $0x18] sm:$0xff] }
  0x68   : > { %6647 = vmatmul.mubr.msk.bf16.gmra.mrb[16].mxu1 %vm514_vm2, %v8250_v11 }
  0x69   : > { %6811 = vmatmul.mubr.msk.bf16.vlgmr.msra.gmra.mrb[0].mxu0 %vm514_vm2, %v8253_v14  ;;  %6650 = vmatprep.mubr.msk.bf16.mxu1 %vm514_vm2, %v8255_v15 }
  0x6a   : > { %6843 = vmatpush3.bf16.msra.mxu0 %v7295_v46  ;;  %6814 = vmatprep.mubr.msk.bf16.mxu0 %vm514_vm2, %v8257_v17  ;;  %v8292_v46 = vpack.c.bf16 %v445_v39, %v444_v38  ;;  %v8342_v38 = vpack.c.bf16 %v2292_v26, %v2291_v25  ;;  %v8344_v39 = vpack.c.bf16 %v2294_v28, %v2293_v27  ;;  %v815_v27 = vld [vmem:[#allocation2 + $0x141] sm:$0xff]  ;;  %v816_v28 = vld [vmem:[#allocation2 + $0x151] sm:$0xff] }
  0x6b   : > { %6844 = vmatprep.subr.bf16.mxu0 %v7297_v18  ;;  %v8398_v25 = vpack.c.bf16 %v811_v10, %v810_v9  ;;  %v2671_v10 = vld [vmem:[#allocation2 + $0x1a0] sm:$0xff] }
  0x6c   : > { %10034 = vst [vmem:[#allocation5_spill] sm:$0xff] %v8344_v39 }
  0x6e   : > { %6845 = vmatpush3.bf16.msra.mxu0 %v7297_v18  ;;  %v2289_v18 = vld [vmem:[#allocation2 + $0x10a] sm:$0xff] }
  0x6f   : > { %6878 = vmatprep.subr.bf16.mxu0 %v8273_v29  ;;  %v8323_v21 = vpack.c.bf16 %v2290_v19, %v2289_v18  ;;  %v812_v18 = vld [vmem:[#allocation2 + $0x121] sm:$0xff]  ;;  %v813_v19 = vld [vmem:[#allocation2 + $0x129] sm:$0xff] }
  0x70   : > { %6651 = vmatmul.mubr.msk.bf16.gmra.mrb[20].mxu1 %vm514_vm2, %v8275_v30  ;;  %v8400_v26 = vpack.c.bf16 %v813_v19, %v812_v18  ;;  %v8468_v19 = vld [vmem:[#allocation3] sm:$0xff] }
  0x71   : > { %6815 = vmatmul.mubr.msk.bf16.gmra.mrb[4].mxu0 %vm514_vm2, %v8277_v31  ;;  %6654 = vmatprep.mubr.msk.bf16.mxu1 %vm514_vm2, %v8279_v32 }
  0x72   : > { %6818 = vmatprep.mubr.msk.bf16.mxu0 %vm514_vm2, %v8281_v34 }
  0x78   : > { %6655 = vmatmul.mubr.msk.bf16.gmra.mrb[24].mxu1 %vm514_vm2, %v8292_v46 }
  0x79   : > { %6819 = vmatmul.mubr.msk.bf16.gmra.mrb[8].mxu0 %vm514_vm2, %v8294_v51  ;;  %6658 = vmatprep.mubr.msk.bf16.mxu1 %vm514_vm2, %v8296_v52 }
  0x7a   : > { %6822 = vmatprep.mubr.msk.bf16.mxu0 %vm514_vm2, %v8298_v53 }
  0x80   : > { %6659 = vmatmul.mubr.msk.bf16.gmra.mrb[28].mxu1 %vm514_vm2, %v8308_v3 }
  0x81   : > { %6823 = vmatmul.mubr.msk.bf16.gmra.mrb[12].mxu0 %vm514_vm2, %v8310_v5  ;;  %6666 = vmatprep.mubr.msk.bf16.mxu1 %vm514_vm2, %v820_v6  ;;  %v7301_v6 = vld [vmem:[%s10003_s1 + $0x78] sm:$0xff]  }
  0x82   : > { %6826 = vmatprep.mubr.msk.bf16.mxu0 %vm514_vm2, %v8312_v7 }
  0x88   : > { %6667 = vmatmul.mubr.msk.bf16.vlgmr.msra.gmra.mrb[0].mxu1 %vm514_vm2, %v8160_v12  ;;  %v8340_v12 = vld [vmem:[%s10003_s1 + $0x30] sm:$0xff]  }
  0x89   : > { %6827 = vmatmul.mubr.msk.bf16.gmra.mrb[16].mxu0 %vm514_vm2, %v8321_v20  ;;  %6670 = vmatprep.mubr.msk.bf16.mxu1 %vm514_vm2, %v8165_v16 }
  0x8a   : > { %6830 = vmatprep.mubr.msk.bf16.mxu0 %vm514_vm2, %v8323_v21  ;;  %6699 = vmatpush3.bf16.msra.mxu1 %v8248_v8  ;;  %v2295_v8 = vld [vmem:[#allocation2 + $0x152] sm:$0xff] }
  0x8b   : > { %6700 = vmatprep.subr.bf16.mxu1 %v7300_v24  ;;  %v8355_v43 = vpack.c.bf16 %v2296_v40, %v2295_v8  ;;  %v817_v8 = vld [vmem:[#allocation2 + $0x159] sm:$0xff] }
  0x8c   : > { %v8413_v41 = vpack.c.bf16 %v817_v8, %v816_v28  ;;  %v8476_v28 = vld [vmem:[#allocation3 + $0x10] sm:$0xff]  ;;  %v4104_v8 = vld [vmem:[%s10005_s3 + $0x10] sm:$0xff] }
  0x8d   : > { %10035 = vst [vmem:[#allocation6_spill] sm:$0xff] %v8355_v43  ;;  %v4136_v42 = vmul.f32 %v4104_v8, %v8476_v28  ;;  %v4108_v8 = vld [vmem:[%s10005_s3 + $0x30] sm:$0xff] }
  0x8e   : > { %6701 = vmatpush3.bf16.msra.mxu1 %v7300_v24  ;;  %v8396_v24 = vld [vmem:[%s10003_s1 + $0x80] sm:$0xff]   ;;  %10039 = vst [vmem:[#allocation10_spill] sm:$0xff] %v8413_v41 }
  0x8f   : > { %6734 = vmatprep.subr.bf16.mxu1 %v8340_v12  ;;  %4202 = vrot.lane.b32.xlu1 %v4136_v42, %s7891_s19 }
  0x90   : > { %6671 = vmatmul.mubr.msk.bf16.gmra.mrb[4].mxu1 %vm514_vm2, %v8175_v23 }
  0x91   : > { %6831 = vmatmul.mubr.msk.bf16.gmra.mrb[20].mxu0 %vm514_vm2, %v8342_v38  ;;  %6674 = vmatprep.mubr.msk.bf16.mxu1 %vm514_vm2, %v8193_v35 }
  0x92   : > { %6834 = vmatprep.mubr.msk.bf16.mxu0 %vm514_vm2, %v8344_v39 }
  0x98   : > { %6675 = vmatmul.mubr.msk.bf16.gmra.mrb[8].mxu1 %vm514_vm2, %v8197_v37 }
  0x99   : > { %6835 = vmatmul.mubr.msk.bf16.gmra.mrb[24].mxu0 %vm514_vm2, %v8355_v43  ;;  %6678 = vmatprep.mubr.msk.bf16.mxu1 %vm514_vm2, %v8212_v48 }
  0x9a   : > { %6838 = vmatprep.mubr.msk.bf16.mxu0 %vm514_vm2, %v8357_v44 }
  0xa0   : > { %6679 = vmatmul.mubr.msk.bf16.gmra.mrb[12].mxu1 %vm514_vm2, %v8216_v50 }
  0xa1   : > { %6839 = vmatmul.mubr.msk.bf16.gmra.mrb[28].mxu0 %vm514_vm2, %v8367_v55  ;;  %6682 = vmatprep.mubr.msk.bf16.mxu1 %vm514_vm2, %v8231_v61  ;;  %v8606_v55 = vld [vmem:[#allocation3 + $0x80] sm:$0xff] }
  0xa2   : > { %6846 = vmatprep.mubr.msk.bf16.mxu0 %vm514_vm2, %v8173_v22 }
  0xa8   : > { %6683 = vmatmul.mubr.msk.bf16.gmra.mrb[16].mxu1 %vm514_vm2, %v8377_v0 }
  0xa9   : > { %6847 = vmatmul.mubr.msk.bf16.vlgmr.msra.gmra.mrb[0].mxu0 %vm514_vm2, %v8188_v33  ;;  %6686 = vmatprep.mubr.msk.bf16.mxu1 %vm514_vm2, %v8379_v1 }
  0xaa   : > { %6879 = vmatpush3.bf16.msra.mxu0 %v8273_v29  ;;  %6850 = vmatprep.mubr.msk.bf16.mxu0 %vm514_vm2, %v8195_v36  ;;  %v814_v29 = vld [vmem:[#allocation2 + $0x139] sm:$0xff] }
  0xab   : > { %6880 = vmatprep.subr.bf16.mxu0 %v7301_v6  ;;  %v8411_v40 = vpack.c.bf16 %v815_v27, %v814_v29  ;;  %v4102_v29 = vld [vmem:[%s10005_s3] sm:$0xff] }
  0xac   : > { %v4134_v27 = vmul.f32 %v4102_v29, %v8468_v19  ;;  %v4107_v29 = vld [vmem:[%s10005_s3 + $0x28] sm:$0xff] }
  0xad   : > { %10038 = vst [vmem:[#allocation9_spill] sm:$0xff] %v8411_v40 }
  0xae   : > { %6881 = vmatpush3.bf16.msra.mxu0 %v7301_v6  ;;  %v2669_v6 = vld [vmem:[#allocation2 + $0x188] sm:$0xff]  ;;  %4198 = vrot.lane.b32.xlu0 %v4134_v27, %s7891_s19  ;;  %v8517_v27 = vld [vmem:[#allocation3 + $0x30] sm:$0xff] }
  0xaf   : > { %6914 = vmatprep.subr.bf16.mxu0 %v8396_v24 }
  0xb0   : > { %6687 = vmatmul.mubr.msk.bf16.gmra.mrb[20].mxu1 %vm514_vm2, %v8398_v25 }
  0xb1   : > { %6851 = vmatmul.mubr.msk.bf16.gmra.mrb[4].mxu0 %vm514_vm2, %v8210_v47  ;;  %6690 = vmatprep.mubr.msk.bf16.mxu1 %vm514_vm2, %v8400_v26 }
  0xb2   : > { %6854 = vmatprep.mubr.msk.bf16.mxu0 %vm514_vm2, %v8214_v49 }
  0xb8   : > { %6691 = vmatmul.mubr.msk.bf16.gmra.mrb[24].mxu1 %vm514_vm2, %v8411_v40 }
  0xb9   : > { %6855 = vmatmul.mubr.msk.bf16.gmra.mrb[8].mxu0 %vm514_vm2, %v8229_v60  ;;  %6694 = vmatprep.mubr.msk.bf16.mxu1 %vm514_vm2, %v8413_v41 }
  0xba   : > { %6858 = vmatprep.mubr.msk.bf16.mxu0 %vm514_vm2, %v8233_v62 }
  0xc0   : > { %6695 = vmatmul.mubr.msk.bf16.gmra.mrb[28].mxu1 %vm514_vm2, %v8423_v57 }
  0xc1   : > { %6859 = vmatmul.mubr.msk.bf16.gmra.mrb[12].mxu0 %vm514_vm2, %v8250_v11  ;;  %6702 = vmatprep.mubr.msk.bf16.mxu1 %vm514_vm2, %v1190_v58  ;;  %v4105_v58 = vld [vmem:[%s10005_s3 + $0x18] sm:$0xff] }
  0xc2   : > { %6862 = vmatprep.mubr.msk.bf16.mxu0 %vm514_vm2, %v8255_v15 }
  0xc8   : > { %6703 = vmatmul.mubr.msk.bf16.vlgmr.msra.gmra.mrb[0].mxu1 %vm514_vm2, %v8235_v63  ;;  %v2668_v63 = vld [vmem:[#allocation2 + $0x180] sm:$0xff] }
  0xc9   : > { %6863 = vmatmul.mubr.msk.bf16.gmra.mrb[16].mxu0 %vm514_vm2, %v8275_v30  ;;  %6706 = vmatprep.mubr.msk.bf16.mxu1 %vm514_vm2, %v8253_v14  ;;  %v8453_v9 = vpack.c.bf16 %v2669_v6, %v2668_v63  ;;  %v4106_v63 = vld [vmem:[%s10005_s3 + $0x20] sm:$0xff]  ;;  %v7305_v6 = vld [vmem:[%s10003_s1 + $0x88] sm:$0xff]  }
  0xca   : > { %6866 = vmatprep.mubr.msk.bf16.mxu0 %vm514_vm2, %v8279_v32  ;;  %6735 = vmatpush3.bf16.msra.mxu1 %v8340_v12  ;;  %v2670_v12 = vld [vmem:[#allocation2 + $0x198] sm:$0xff] }
  0xcb   : > { %6736 = vmatprep.subr.bf16.mxu1 %v7304_v59  ;;  %v2687_v18 = vpack.c.bf16 %v2671_v10, %v2670_v12  ;;  %v4137_v12 = vmul.f32 %v4105_v58, %v8489_v56  ;;  %v8534_v58 = vld [vmem:[#allocation3 + $0x40] sm:$0xff] }
  0xcd   : > { %4204 = vrot.lane.b32.xlu1 %v4137_v12, %s7891_s19  ;;  %v8545_v12 = vld [vmem:[#allocation3 + $0x48] sm:$0xff] }
  0xce   : > { %6737 = vmatpush3.bf16.msra.mxu1 %v7304_v59  ;;  %v8495_v59 = vld [vmem:[#allocation3 + $0x20] sm:$0xff] }
  0xcf   : > { %6950 = vmatprep.subr.bf16.mxu1 %v8147_v2  ;;  %v4138_v10 = vmul.f32 %v4106_v63, %v8495_v59 }
  0xd0   : > { %6707 = vmatmul.mubr.msk.bf16.gmra.mrb[4].mxu1 %vm514_vm2, %v8257_v17 }
  0xd1   : > { %6867 = vmatmul.mubr.msk.bf16.gmra.mrb[20].mxu0 %vm514_vm2, %v8292_v46  ;;  %6710 = vmatprep.mubr.msk.bf16.mxu1 %vm514_vm2, %v8277_v31 }
  0xd2   : > { %6870 = vmatprep.mubr.msk.bf16.mxu0 %vm514_vm2, %v8296_v52 }
  0xd8   : > { %6711 = vmatmul.mubr.msk.bf16.gmra.mrb[8].mxu1 %vm514_vm2, %v8281_v34 }
  0xd9   : > { %6871 = vmatmul.mubr.msk.bf16.gmra.mrb[24].mxu0 %vm514_vm2, %v8308_v3  ;;  %6714 = vmatprep.mubr.msk.bf16.mxu1 %vm514_vm2, %v8294_v51 }
  0xda   : > { %6874 = vmatprep.mubr.msk.bf16.mxu0 %vm514_vm2, %v8453_v9 }
  0xe0   : > { %6715 = vmatmul.mubr.msk.bf16.gmra.mrb[12].mxu1 %vm514_vm2, %v8298_v53 }
  0xe1   : > { %6875 = vmatmul.mubr.msk.bf16.gmra.mrb[28].mxu0 %vm514_vm2, %v2687_v18  ;;  %6718 = vmatprep.mubr.msk.bf16.mxu1 %vm514_vm2, %v8310_v5  ;;  %v8508_v18 = vld [vmem:[#allocation3 + $0x28] sm:$0xff] }
  0xe2   : > { %6882 = vmatprep.mubr.msk.bf16.mxu0 %vm514_vm2, %v8165_v16  ;;  %v4135_v16 = vmul.f32 %v4103_v54, %v8482_v45  ;;  %v4139_v42 = vmul.f32 %v4107_v29, %v8508_v18  ;;  %v8529_v54 = vld [vmem:[#allocation3 + $0x38] sm:$0xff]  ;;  %v4112_v29 = vld [vmem:[%s10005_s3 + $0x50] sm:$0xff] }
  0xe4   : > { %4200 = vrot.lane.b32.xlu0 %v4135_v16, %s7891_s19  ;;  %v4109_v16 = vld [vmem:[%s10005_s3 + $0x38] sm:$0xff]  ;;  %4208 = vrot.lane.b32.xlu1 %v4139_v42, %s7891_s19  ;;  %v8565_v42 = vld [vmem:[#allocation3 + $0x58] sm:$0xff] }
  0xe8   : > { %6719 = vmatmul.mubr.msk.bf16.gmra.mrb[16].mxu1 %vm514_vm2, %v8312_v7  ;;  %4206 = vrot.lane.b32.xlu0 %v4138_v10, %s7891_s19  ;;  %v4111_v10 = vld [vmem:[%s10005_s3 + $0x48] sm:$0xff] }
  0xe9   : > { %6883 = vmatmul.mubr.msk.bf16.vlgmr.msra.gmra.mrb[0].mxu0 %vm514_vm2, %v8175_v23  ;;  %6722 = vmatprep.mubr.msk.bf16.mxu1 %vm514_vm2, %v8321_v20  ;;  %v4140_v23 = vmul.f32 %v4108_v8, %v8517_v27  ;;  %v4143_v8 = vmul.f32 %v4111_v10, %v8545_v12  ;;  %v4115_v10 = vld [vmem:[%s10005_s3 + $0x68] sm:$0xff] }
  0xea   : > { %6915 = vmatpush3.bf16.msra.mxu0 %v8396_v24  ;;  %6886 = vmatprep.mubr.msk.bf16.mxu0 %vm514_vm2, %v8193_v35  ;;  %v4110_v35 = vld [vmem:[%s10005_s3 + $0x40] sm:$0xff]  ;;  %v4141_v24 = vmul.f32 %v4109_v16, %v8529_v54  ;;  %v8570_v16 = vld [vmem:[#allocation3 + $0x60] sm:$0xff] }
  0xeb   : > { %6916 = vmatprep.subr.bf16.mxu0 %v7305_v6  ;;  %v4142_v63 = vmul.f32 %v4110_v35, %v8534_v58 }
  0xec   : > { %4210 = vrot.lane.b32.xlu0 %v4140_v23, %s7891_s19  ;;  %4212 = vrot.lane.b32.xlu1 %v4141_v24, %s7891_s19  ;;  %v4113_v23 = vld [vmem:[%s10005_s3 + $0x58] sm:$0xff] }
  0xed   : > { %v4145_v35 = vmul.f32 %v4113_v23, %v8565_v42  ;;  %v8601_v23 = vld [vmem:[#allocation3 + $0x78] sm:$0xff] }
  0xee   : > { %6917 = vmatpush3.bf16.msra.mxu0 %v7305_v6  ;;  %v8554_v6 = vld [vmem:[#allocation3 + $0x50] sm:$0xff] }
  0xf0   : > { %6723 = vmatmul.mubr.msk.bf16.gmra.mrb[20].mxu1 %vm514_vm2, %v8323_v21  ;;  %4214 = vrot.lane.b32.xlu0 %v4142_v63, %s7891_s19  ;;  %v8581_v63 = vld [vmem:[#allocation3 + $0x68] sm:$0xff] }
  0xf1   : > { %6887 = vmatmul.mubr.msk.bf16.gmra.mrb[4].mxu0 %vm514_vm2, %v8197_v37  ;;  %6726 = vmatprep.mubr.msk.bf16.mxu1 %vm514_vm2, %v8342_v38  ;;  %v4144_v37 = vmul.f32 %v4112_v29, %v8554_v6  ;;  %v8590_v29 = vld [vmem:[#allocation3 + $0x70] sm:$0xff] }
  0xf2   : > { %6890 = vmatprep.mubr.msk.bf16.mxu0 %vm514_vm2, %v8212_v48  ;;  %v4114_v48 = vld [vmem:[%s10005_s3 + $0x60] sm:$0xff]  ;;  %4216 = vrot.lane.b32.xlu1 %v4143_v8, %s7891_s19  ;;  %v4116_v8 = vld [vmem:[%s10005_s3 + $0x70] sm:$0xff] }
  0xf3   : > { %v4146_v24 = vmul.f32 %v4114_v48, %v8570_v16  ;;  %v4117_v48 = vld [vmem:[%s10005_s3 + $0x78] sm:$0xff] }
  0xf4   : > { %4218 = vrot.lane.b32.xlu0 %v4144_v37, %s7891_s19  ;;  %v4147_v37 = vmul.f32 %v4115_v10, %v8581_v63  ;;  %v8617_v10 = vld [vmem:[#allocation3 + $0x88] sm:$0xff] }
  0xf6   : > { %4220 = vrot.lane.b32.xlu1 %v4145_v35, %s7891_s19  ;;  %v4149_v35 = vmul.f32 %v4117_v48, %v8601_v23 }
  0xf8   : > { %6727 = vmatmul.mubr.msk.bf16.gmra.mrb[24].mxu1 %vm514_vm2, %v8344_v39  ;;  %4222 = vrot.lane.b32.xlu0 %v4146_v24, %s7891_s19  ;;  %v4122_v39 = vld [vmem:[%s10005_s3 + $0xa0] sm:$0xff] }
  0xf9   : > { %6891 = vmatmul.mubr.msk.bf16.gmra.mrb[8].mxu0 %vm514_vm2, %v8216_v50  ;;  %6730 = vmatprep.mubr.msk.bf16.mxu1 %vm514_vm2, %v8355_v43  ;;  %v4148_v50 = vmul.f32 %v4116_v8, %v8590_v29  ;;  %v4119_v8 = vld [vmem:[%s10005_s3 + $0x88] sm:$0xff]  ;;  %v8642_v43 = vld [vmem:[#allocation3 + $0xa0] sm:$0xff] }
  0xfa   : > { %6894 = vmatprep.mubr.msk.bf16.mxu0 %vm514_vm2, %v8231_v61  ;;  %v4118_v61 = vld [vmem:[%s10005_s3 + $0x80] sm:$0xff]  ;;  %4224 = vrot.lane.b32.xlu1 %v4147_v37, %s7891_s19  ;;  %v4151_v48 = vmul.f32 %v4119_v8, %v8617_v10  ;;  %10040 = vst [vmem:[#allocation11_spill] sm:$0xff] %v8642_v43  ;;  %v8653_v8 = vld [vmem:[#allocation3 + $0xa8] sm:$0xff] }
  0xfb   : > { %v4150_v24 = vmul.f32 %v4118_v61, %v8606_v55  ;;  %v8626_v37 = vld [vmem:[#allocation3 + $0x90] sm:$0xff] }
  0xfc   : > { %4226 = vrot.lane.b32.xlu0 %v4148_v50, %s7891_s19  ;;  %v4120_v50 = vld [vmem:[%s10005_s3 + $0x90] sm:$0xff] }
  0xfd   : > { %v4152_v61 = vmul.f32 %v4120_v50, %v8626_v37  ;;  %v4123_v50 = vld [vmem:[%s10005_s3 + $0xa8] sm:$0xff] }
  0xfe   : > { %4228 = vrot.lane.b32.xlu1 %v4149_v35, %s7891_s19 }
 0x100   : > { %6731 = vmatmul.mubr.msk.bf16.gmra.mrb[28].mxu1 %vm514_vm2, %v8357_v44  ;;  %4230 = vrot.lane.b32.xlu0 %v4150_v24, %s7891_s19  ;;  %v8637_v44 = vld [vmem:[#allocation3 + $0x98] sm:$0xff]  ;;  %v4154_v24 = vmul.f32 %v4122_v39, %v8642_v43  ;;  %v4155_v39 = vmul.f32 %v4123_v50, %v8653_v8  ;;  %v8680_v43 = vld [vmem:[#allocation3 + $0xc0] sm:$0xff]  ;;  %v8692_v50 = vld [vmem:[#allocation3 + $0xc8] sm:$0xff] }
 0x101   : > { %6895 = vmatmul.mubr.msk.bf16.gmra.mrb[12].mxu0 %vm514_vm2, %v8377_v0  ;;  %6738 = vmatprep.mubr.msk.bf16.mxu1 %vm514_vm2, %v8162_v13  ;;  %v4121_v13 = vld [vmem:[%s10005_s3 + $0x98] sm:$0xff]  ;;  %10042 = vst [vmem:[#allocation13_spill] sm:$0xff] %v8680_v43 }
 0x102   : > { %6898 = vmatprep.mubr.msk.bf16.mxu0 %vm514_vm2, %v8379_v1  ;;  %4232 = vrot.lane.b32.xlu1 %v4151_v48, %s7891_s19  ;;  %v4153_v35 = vmul.f32 %v4121_v13, %v8637_v44  ;;  %v8662_v48 = vld [vmem:[#allocation3 + $0xb0] sm:$0xff]  ;;  %v4125_v13 = vld [vmem:[%s10005_s3 + $0xb8] sm:$0xff] }
 0x104   : > { %4234 = vrot.lane.b32.xlu0 %v4152_v61, %s7891_s19  ;;  %v8675_v61 = vld [vmem:[#allocation3 + $0xb8] sm:$0xff] }
 0x105   : > { %10041 = vst [vmem:[#allocation12_spill] sm:$0xff] %v8675_v61 }
 0x106   : > { %4236 = vrot.lane.b32.xlu1 %v4153_v35, %s7891_s19  ;;  %v4157_v35 = vmul.f32 %v4125_v13, %v8675_v61  ;;  %v8717_v61 = vld [vmem:[#allocation3 + $0xe0] sm:$0xff] }
 0x107   : > { %10043 = vst [vmem:[#allocation14_spill] sm:$0xff] %v8717_v61 }
 0x108   : > { %6739 = vmatmul.mubr.msk.bf16.vlgmr.msra.gmra.mrb[0].mxu1 %vm514_vm2, %v8173_v22  ;;  %v4124_v22 = vld [vmem:[%s10005_s3 + $0xb0] sm:$0xff]  ;;  %4238 = vrot.lane.b32.xlu0 %v4154_v24, %s7891_s19 }
 0x109   : > { %6899 = vmatmul.mubr.msk.bf16.gmra.mrb[16].mxu0 %vm514_vm2, %v8398_v25  ;;  %6742 = vmatprep.mubr.msk.bf16.mxu1 %vm514_vm2, %v8188_v33  ;;  %v4156_v33 = vmul.f32 %v4124_v22, %v8662_v48  ;;  %v4127_v22 = vld [vmem:[%s10005_s3 + $0xc8] sm:$0xff] }
 0x10a   : > { %6902 = vmatprep.mubr.msk.bf16.mxu0 %vm514_vm2, %v8400_v26  ;;  %6952 = vmatpush3.bf16.msra.mxu1 %v8147_v2  ;;  %v4126_v2 = vld [vmem:[%s10005_s3 + $0xc0] sm:$0xff]  ;;  %v4159_v13 = vmul.f32 %v4127_v22, %v8692_v50  ;;  %v8730_v22 = vld [vmem:[#allocation3 + $0xe8] sm:$0xff] }
 0x10b   : > { %6951 = vmatprep.subr.bf16.mxu1 %v8156_v4  ;;  %4240 = vrot.lane.b32.xlu1 %v4155_v39, %s7891_s19  ;;  %v4158_v24 = vmul.f32 %v4126_v2, %v8680_v43  ;;  %v3038_v39 = vld [vmem:[#allocation2 + $0x181] sm:$0xff]  ;;  %v4129_v43 = vld [vmem:[%s10005_s3 + $0xd8] sm:$0xff] }
 0x10c   : > { %4242 = vrot.lane.b32.xlu0 %v4156_v33, %s7891_s19  ;;  %v3039_v33 = vld [vmem:[#allocation2 + $0x189] sm:$0xff] }
 0x10e   : > { %6953 = vmatpush3.bf16.msra.mxu1 %v8156_v4  ;;  %v8701_v4 = vld [vmem:[#allocation3 + $0xd0] sm:$0xff] }
 0x10f   : > { %4244 = vrot.lane.b32.xlu1 %v4157_v35, %s7891_s19 }
 0x110   : > { %6743 = vmatmul.mubr.msk.bf16.gmra.mrb[4].mxu1 %vm514_vm2, %v8195_v36  ;;  %v4128_v36 = vld [vmem:[%s10005_s3 + $0xd0] sm:$0xff]  ;;  %4246 = vrot.lane.b32.xlu0 %v4158_v24, %s7891_s19 }
 0x111   : > { %6903 = vmatmul.mubr.msk.bf16.gmra.mrb[20].mxu0 %vm514_vm2, %v8411_v40  ;;  %6746 = vmatprep.mubr.msk.bf16.mxu1 %vm514_vm2, %v8210_v47  ;;  %v4160_v2 = vmul.f32 %v4128_v36, %v8701_v4  ;;  %v8712_v47 = vld [vmem:[#allocation3 + $0xd8] sm:$0xff]  ;;  %v8722_v40 = vpack.c.bf16 %v3039_v33, %v3038_v39 }
 0x112   : > { %6906 = vmatprep.mubr.msk.bf16.mxu0 %vm514_vm2, %v8413_v41  ;;  %v4130_v41 = vld [vmem:[%s10005_s3 + $0xe0] sm:$0xff]  ;;  %v4161_v35 = vmul.f32 %v4129_v43, %v8712_v47  ;;  %v4131_v36 = vld [vmem:[%s10005_s3 + $0xe8] sm:$0xff] }
 0x113   : > { %10044 = vst [vmem:[#allocation15_spill] sm:$0xff] %v8722_v40  ;;  %4248 = vrot.lane.b32.xlu1 %v4159_v13, %s7891_s19  ;;  %v4162_v24 = vmul.f32 %v4130_v41, %v8717_v61  ;;  %v8739_v43 = vld [vmem:[#allocation3 + $0xf0] sm:$0xff]  ;;  %v4163_v33 = vmul.f32 %v4131_v36, %v8730_v22  ;;  %v355_v36 = vld [vmem:[%s7961_s10 + $0x8] sm:$0xff] }
 0x114   : > { %4250 = vrot.lane.b32.xlu0 %v4160_v2, %s7891_s19  ;;  %v3040_v41 = vld [vmem:[#allocation2 + $0x199] sm:$0xff]  ;;  %v3041_v39 = vld [vmem:[#allocation2 + $0x1a1] sm:$0xff] }
 0x115   : > { %v4133_v2 = vld [vmem:[%s10005_s3 + $0xf8] sm:$0xff]  ;;  %v3057_v61 = vpack.c.bf16 %v3041_v39, %v3040_v41 }
 0x117   : > { %4252 = vrot.lane.b32.xlu1 %v4161_v35, %s7891_s19  ;;  %v354_v35 = vld [vmem:[%s7961_s10] sm:$0xff] }
 0x118   : > { %6747 = vmatmul.mubr.msk.bf16.gmra.mrb[8].mxu1 %vm514_vm2, %v8214_v49  ;;  %v4132_v49 = vld [vmem:[%s10005_s3 + $0xf0] sm:$0xff]  ;;  %4254 = vrot.lane.b32.xlu0 %v4162_v24, %s7891_s19  ;;  %v357_v24 = vld [vmem:[%s7961_s10 + $0x18] sm:$0xff] }
 0x119   : > { %6907 = vmatmul.mubr.msk.bf16.gmra.mrb[24].mxu0 %vm514_vm2, %v8423_v57  ;;  %6750 = vmatprep.mubr.msk.bf16.mxu1 %vm514_vm2, %v8229_v60  ;;  %v4164_v13 = vmul.f32 %v4132_v49, %v8739_v43  ;;  %v8750_v60 = vld [vmem:[#allocation3 + $0xf8] sm:$0xff] }
 0x11a   : > { %6910 = vmatprep.mubr.msk.bf16.mxu0 %vm514_vm2, %v8722_v40  ;;  %v4165_v40 = vmul.f32 %v4133_v2, %v8750_v60 }
 0x11b   : > { %4256 = vrot.lane.b32.xlu1 %v4163_v33, %s7891_s19 }
 0x11c   : > { %4258 = vrot.lane.b32.xlu0 %v4164_v13, %s7891_s19 }
 0x11f   : > { %4260 = vrot.lane.b32.xlu1 %v4165_v40, %s7891_s19 }
 0x120   : > { %6751 = vmatmul.mubr.msk.bf16.gmra.mrb[12].mxu1 %vm514_vm2, %v8233_v62  ;;  %4550 = vrot.lane.b32.xlu0 %v8468_v19, %s7891_s19  ;;  %v10045_v62 = vld [vmem:[#allocation11_spill] sm:$0xff] }
 0x121   : > { %6911 = vmatmul.mubr.msk.bf16.gmra.mrb[28].mxu0 %vm514_vm2, %v3057_v61  ;;  %6754 = vmatprep.mubr.msk.bf16.mxu1 %vm514_vm2, %v8250_v11  ;;  %v10046_v11 = vld [vmem:[#allocation5_spill] sm:$0xff] }
 0x122   : > { %6918 = vmatprep.mubr.msk.bf16.mxu0 %vm514_vm2, %v8253_v14  ;;  %v10047_v14 = vld [vmem:[#allocation9_spill] sm:$0xff] }
 0x123   : > { %4552 = vrot.lane.b32.xlu1 %v8482_v45, %s7891_s19 }
 0x124   : > { %4554 = vrot.lane.b32.xlu0 %v8476_v28, %s7891_s19 }
 0x127   : > { %4556 = vrot.lane.b32.xlu1 %v8489_v56, %s7891_s19 }
 0x128   : > { %6755 = vmatmul.mubr.msk.bf16.gmra.mrb[16].mxu1 %vm514_vm2, %v8255_v15  ;;  %4558 = vrot.lane.b32.xlu0 %v8495_v59, %s7891_s19  ;;  %v10048_v15 = vld [vmem:[#allocation6_spill] sm:$0xff] }
 0x129   : > { %6919 = vmatmul.mubr.msk.bf16.vlgmr.msra.gmra.mrb[0].mxu0 %vm514_vm2, %v8257_v17  ;;  %6758 = vmatprep.mubr.msk.bf16.mxu1 %vm514_vm2, %v8275_v30  ;;  %v10049_v17 = vld [vmem:[#allocation12_spill] sm:$0xff]  ;;  %v10050_v30 = vld [vmem:[#allocation13_spill] sm:$0xff] }
 0x12a   : > { %6922 = vmatprep.mubr.msk.bf16.mxu0 %vm514_vm2, %v8277_v31  ;;  %v10051_v31 = vld [vmem:[#allocation10_spill] sm:$0xff] }
 0x12b   : > { %4560 = vrot.lane.b32.xlu1 %v8508_v18, %s7891_s19 }
 0x12c   : > { %4562 = vrot.lane.b32.xlu0 %v8517_v27, %s7891_s19 }
 0x12f   : > { %4564 = vrot.lane.b32.xlu1 %v8529_v54, %s7891_s19 }
 0x130   : > { %6759 = vmatmul.mubr.msk.bf16.gmra.mrb[20].mxu1 %vm514_vm2, %v8279_v32  ;;  %4566 = vrot.lane.b32.xlu0 %v8534_v58, %s7891_s19  ;;  %v10052_v32 = vld [vmem:[#allocation7_spill] sm:$0xff] }
 0x131   : > { %6923 = vmatmul.mubr.msk.bf16.gmra.mrb[4].mxu0 %vm514_vm2, %v8281_v34  ;;  %6762 = vmatprep.mubr.msk.bf16.mxu1 %vm514_vm2, %v8292_v46  ;;  %v10053_v34 = vld [vmem:[#allocation8_spill] sm:$0xff]  ;;  %v3410_v46 = vld [vmem:[#allocation2 + $0x19a] sm:$0xff] }
 0x132   : > { %6926 = vmatprep.mubr.msk.bf16.mxu0 %vm514_vm2, %v8294_v51  ;;  %v3411_v51 = vld [vmem:[#allocation2 + $0x1a2] sm:$0xff] }
 0x133   : > { %4568 = vrot.lane.b32.xlu1 %v8545_v12, %s7891_s19 }
 0x134   : > { %4570 = vrot.lane.b32.xlu0 %v8554_v6, %s7891_s19 }
 0x137   : > { %4572 = vrot.lane.b32.xlu1 %v8565_v42, %s7891_s19 }
 0x138   : > { %6763 = vmatmul.mubr.msk.bf16.gmra.mrb[24].mxu1 %vm514_vm2, %v8296_v52  ;;  %4574 = vrot.lane.b32.xlu0 %v8570_v16, %s7891_s19  ;;  %v10054_v52 = vld [vmem:[#allocation14_spill] sm:$0xff] }
 0x139   : > { %6927 = vmatmul.mubr.msk.bf16.gmra.mrb[8].mxu0 %vm514_vm2, %v8298_v53  ;;  %6766 = vmatprep.mubr.msk.bf16.mxu1 %vm514_vm2, %v8308_v3  ;;  %v3427_v53 = vpack.c.bf16 %v3411_v51, %v3410_v46  ;;  %v10055_v3 = vld [vmem:[#allocation15_spill] sm:$0xff]  ;;  %v359_v51 = vld [vmem:[%s7961_s10 + $0x28] sm:$0xff] }
 0x13a   : > { %6930 = vmatprep.mubr.msk.bf16.mxu0 %vm514_vm2, %v8310_v5  ;;  %v8889_v5 = vpop.permute.xlu0 %4198 }
 0x13b   : > { %4576 = vrot.lane.b32.xlu1 %v8581_v63, %s7891_s19 }
 0x13c   : > { %4578 = vrot.lane.b32.xlu0 %v8590_v29, %s7891_s19 }
 0x13f   : > { %4580 = vrot.lane.b32.xlu1 %v8601_v23, %s7891_s19 }
 0x140   : > { %6767 = vmatmul.mubr.msk.bf16.gmra.mrb[28].mxu1 %vm514_vm2, %v8453_v9  ;;  %4582 = vrot.lane.b32.xlu0 %v8606_v55, %s7891_s19 }
 0x141   : > { %6931 = vmatmul.mubr.msk.bf16.gmra.mrb[12].mxu0 %vm514_vm2, %v8312_v7  ;;  %6790 = vmatprep.mubr.msk.bf16.mxu1 %vm514_vm2, %v8377_v0  ;;  %v8891_v7 = vpop.permute.xlu1 %4202 }
 0x142   : > { %6934 = vmatprep.mubr.msk.bf16.mxu0 %vm514_vm2, %v8321_v20 }
 0x143   : > { %4584 = vrot.lane.b32.xlu1 %v8617_v10, %s7891_s19 }
 0x144   : > { %4586 = vrot.lane.b32.xlu0 %v8626_v37, %s7891_s19 }
 0x147   : > { %4588 = vrot.lane.b32.xlu1 %v8637_v44, %s7891_s19 }
 0x148   : > { %6791 = vmatmul.mubr.msk.bf16.vlgmr.msra.gmra.mrb[16].mxu1 %vm514_vm2, %v8379_v1  ;;  %4590 = vrot.lane.b32.xlu0 %v10045_v62, %s7891_s19 }
 0x149   : > { %6935 = vmatmul.mubr.msk.bf16.gmra.mrb[16].mxu0 %vm514_vm2, %v8323_v21  ;;  %6794 = vmatprep.mubr.msk.bf16.mxu1 %vm514_vm2, %v8398_v25  ;;  %v8895_v21 = vpop.permute.xlu1 %4204 }
 0x14a   : > { %6938 = vmatprep.mubr.msk.bf16.mxu0 %vm514_vm2, %v8342_v38 }
 0x14b   : > { %4592 = vrot.lane.b32.xlu1 %v8653_v8, %s7891_s19 }
 0x14c   : > { %4594 = vrot.lane.b32.xlu0 %v8662_v48, %s7891_s19 }
 0x14f   : > { %4596 = vrot.lane.b32.xlu1 %v10049_v17, %s7891_s19  ;;  %v360_v17 = vld [vmem:[%s7961_s10 + $0x30] sm:$0xff] }
 0x150   : > { %6795 = vmatmul.mubr.msk.bf16.gmra.mrb[20].mxu1 %vm514_vm2, %v8400_v26  ;;  %4598 = vrot.lane.b32.xlu0 %v10050_v30, %s7891_s19 }
 0x151   : > { %6939 = vmatmul.mubr.msk.bf16.gmra.mrb[20].mxu0 %vm514_vm2, %v10046_v11  ;;  %6798 = vmatprep.mubr.msk.bf16.mxu1 %vm514_vm2, %v10047_v14 }
 0x152   : > { %6942 = vmatprep.mubr.msk.bf16.mxu0 %vm514_vm2, %v10048_v15 }
 0x153   : > { %4600 = vrot.lane.b32.xlu1 %v8692_v50, %s7891_s19 }
 0x154   : > { %4602 = vrot.lane.b32.xlu0 %v8701_v4, %s7891_s19 }
 0x156   : > { %v8893_v20 = vpop.permute.xlu0 %4200  ;;  %v8899_v44 = vpop.permute.xlu1 %4208 }
 0x157   : > { %4604 = vrot.lane.b32.xlu1 %v8712_v47, %s7891_s19  ;;  %v356_v47 = vld [vmem:[%s7961_s10 + $0x10] sm:$0xff] }
 0x158   : > { %6799 = vmatmul.mubr.msk.bf16.gmra.mrb[24].mxu1 %vm514_vm2, %v10051_v31  ;;  %4606 = vrot.lane.b32.xlu0 %v10054_v52, %s7891_s19  ;;  %v358_v31 = vld [vmem:[%s7961_s10 + $0x20] sm:$0xff] }
 0x159   : > { %6943 = vmatmul.mubr.msk.bf16.gmra.mrb[24].mxu0 %vm514_vm2, %v10052_v32  ;;  %6802 = vmatprep.mubr.msk.bf16.mxu1 %vm514_vm2, %v8423_v57  ;;  %v361_v32 = vld [vmem:[%s7961_s10 + $0x38] sm:$0xff] }
 0x15a   : > { %6946 = vmatprep.mubr.msk.bf16.mxu0 %vm514_vm2, %v10053_v34  ;;  %v8897_v38 = vpop.permute.xlu0 %4206 }
 0x15b   : > { %4608 = vrot.lane.b32.xlu1 %v8730_v22, %s7891_s19 }
 0x15c   : > { %4610 = vrot.lane.b32.xlu0 %v8739_v43, %s7891_s19 }
 0x15e   : > { %v8901_v55 = vpop.permute.xlu0 %4210  ;;  %v8903_v0 = vpop.permute.xlu1 %4212 }
 0x15f   : > { %4612 = vrot.lane.b32.xlu1 %v8750_v60, %s7891_s19 }
 0x160   : > { %6803 = vmatmul.mubr.msk.bf16.gmra.mrb[28].mxu1 %vm514_vm2, %v10055_v3 }
 0x161   : > { %6947 = vmatmul.mubr.msk.bf16.gmra.mrb[28].mxu0 %vm514_vm2, %v3427_v53 }
 0x162   : > { %v8905_v1 = vpop.permute.xlu0 %4214 }
 0x163   : > { %10056 = vst [vmem:[#allocation11_spill] sm:$0xff] %v8905_v1 }
 0x164   : > { %v8907_v25 = vpop.permute.xlu1 %4216 }
 0x165   : > { %10057 = vst [vmem:[#allocation5_spill] sm:$0xff] %v8907_v25 }
 0x166   : > { %v8909_v26 = vpop.permute.xlu0 %4218 }
 0x168   : > { %v8911_v28 = vpop.permute.xlu1 %4220 }
 0x16a   : > { %v8913_v45 = vpop.permute.xlu0 %4222 }
 0x16b   : > { %10058 = vst [vmem:[#allocation9_spill] sm:$0xff] %v8913_v45 }
 0x16c   : > { %v8915_v18 = vpop.permute.xlu1 %4224 }
 0x16d   : > { %10059 = vst [vmem:[#allocation6_spill] sm:$0xff] %v8915_v18 }
 0x16e   : > { %v8917_v54 = vpop.permute.xlu0 %4226 }
 0x16f   : > { %10060 = vst [vmem:[#allocation12_spill] sm:$0xff] %v8917_v54 }
 0x170   : > { %v8919_v12 = vpop.permute.xlu1 %4228 }
 0x171   : > { %10061 = vst [vmem:[#allocation13_spill] sm:$0xff] %v8919_v12 }
 0x172   : > { %v8921_v42 = vpop.permute.xlu0 %4230 }
 0x173   : > { %10062 = vst [vmem:[#allocation10_spill] sm:$0xff] %v8921_v42 }
 0x174   : > { %v8927_v23 = vpop.permute.xlu1 %4232 }
 0x175   : > { %10063 = vst [vmem:[#allocation7_spill] sm:$0xff] %v8927_v23 }
 0x176   : > { %v8929_v10 = vpop.permute.xlu0 %4234 }
 0x177   : > { %10064 = vst [vmem:[#allocation8_spill] sm:$0xff] %v8929_v10 }
 0x178   : > { %v8939_v50 = vpop.permute.xlu1 %4236 }
 0x179   : > { %10065 = vst [vmem:[#allocation14_spill] sm:$0xff] %v8939_v50 }
 0x17a   : > { %v8941_v4 = vpop.permute.xlu0 %4238 }
 0x17b   : > { %10066 = vst [vmem:[#allocation15_spill] sm:$0xff] %v8941_v4 }
 0x17d   : > { %v8947_v41 = vpop.permute.xlu1 %4240 }
 0x17e   : > { %10067 = vst [vmem:[#allocation16_spill] sm:$0xff] %v8947_v41  ;;  %v8951_v60 = vpop.permute.xlu0 %4242 }
 0x17f   : > { %10068 = vst [vmem:[#allocation17_spill] sm:$0xff] %v8951_v60 }
 0x181   : > { %v8964_v34 = vpop.permute.xlu1 %4244 }
 0x182   : > { %10069 = vst [vmem:[#allocation18_spill] sm:$0xff] %v8964_v34  ;;  %v8968_v52 = vpop.permute.xlu0 %4246 }
 0x183   : > { %10070 = vst [vmem:[#allocation19_spill] sm:$0xff] %v8968_v52 }
 0x1db   : > { %v6740_v40 = vpop.f32.mrb[0].mxu1 }
 0x1dc   : > { %v1708_v57 = vpop.f32.mrb[1].mxu1  ;;  %v6954_v22 = vadd.f32 %v6740_v40, %v356_v47 }
 0x1dd   : > { %v6741_v9 = vpop.f32.mrb[2].mxu1  ;;  %v6956_v43 = vadd.f32 %v1708_v57, %v354_v35 }
 0x1de   : > { %v1711_v19 = vpop.f32.mrb[3].mxu1  ;;  %v6958_v39 = vadd.f32 %v6741_v9, %v357_v24 }
 0x1df   : > { %v6960_v2 = vadd.f32 %v1711_v19, %v355_v36 }
 0x1e3   : > { %v6744_v56 = vpop.f32.mrb[4].mxu1 }
 0x1e4   : > { %v1724_v59 = vpop.f32.mrb[5].mxu1  ;;  %v6962_v46 = vadd.f32 %v6744_v56, %v360_v17  ;;  %v364_v56 = vld [vmem:[%s7961_s10 + $0x50] sm:$0xff] }
 0x1e5   : > { %v6745_v27 = vpop.f32.mrb[6].mxu1  ;;  %v6964_v53 = vadd.f32 %v1724_v59, %v358_v31  ;;  %v365_v31 = vld [vmem:[%s7961_s10 + $0x58] sm:$0xff] }
 0x1e6   : > { %v1727_v58 = vpop.f32.mrb[7].mxu1  ;;  %v6966_v40 = vadd.f32 %v6745_v27, %v361_v32  ;;  %v8982_v27 = vpop.permute.xlu0 %4250  ;;  %v363_v32 = vld [vmem:[%s7961_s10 + $0x48] sm:$0xff] }
 0x1e7   : > { %v6968_v19 = vadd.f32 %v1727_v58, %v359_v51  ;;  %10072 = vst [vmem:[#allocation21_spill] sm:$0xff] %v8982_v27  ;;  %v377_v27 = vld [vmem:[%s7961_s10 + $0xb8] sm:$0xff] }
 0x1eb   : > { %v6748_v6 = vpop.f32.mrb[8].mxu1 }
 0x1ec   : > { %v1740_v16 = vpop.f32.mrb[9].mxu1  ;;  %v6970_v58 = vadd.f32 %v6748_v6, %v364_v56  ;;  %v366_v56 = vld [vmem:[%s7961_s10 + $0x60] sm:$0xff] }
 0x1ed   : > { %v8923_v63 = vpop.f32.mrb[10].mxu1 }
 0x1ee   : > { %v8925_v29 = vpop.f32.mrb[11].mxu1 }
 0x1f3   : > { %v8931_v37 = vpop.f32.mrb[12].mxu1 }
 0x1f4   : > { %v8933_v8 = vpop.f32.mrb[13].mxu1 }
 0x1f5   : > { %v8935_v48 = vpop.f32.mrb[14].mxu1 }
 0x1f6   : > { %v8937_v61 = vpop.f32.mrb[15].mxu1 }
 0x1fc   : > { %v6920_v49 = vpop.f32.mrb[0].mxu0 }
 0x1fd   : > { %v8949_v33 = vadd.f32 %v6954_v22, %v6920_v49  ;;  %v3559_v13 = vpop.f32.mrb[1].mxu0  ;;  %v362_v49 = vld [vmem:[%s7961_s10 + $0x40] sm:$0xff] }
 0x1fe   : > { %v8953_v62 = vadd.f32 %v6956_v43, %v3559_v13  ;;  %v6921_v11 = vpop.f32.mrb[2].mxu0  ;;  %v8979_v43 = vpop.permute.xlu1 %4248  ;;  %v6972_v13 = vadd.f32 %v1740_v16, %v362_v49 }
 0x1ff   : > { %7306 = vtanh.f32 %v8949_v33  ;;  %v8956_v14 = vadd.f32 %v6958_v39, %v6921_v11  ;;  %v3562_v15 = vpop.f32.mrb[3].mxu0  ;;  %10071 = vst [vmem:[#allocation20_spill] sm:$0xff] %v8979_v43  ;;  %v8997_v16 = vpop.permute.xlu0 %4254 }
 0x200   : > { %v8959_v30 = vadd.f32 %v6960_v2, %v3562_v15  ;;  %10074 = vst [vmem:[#allocation23_spill] sm:$0xff] %v8997_v16 }
 0x201   : > { %7308 = vtanh.f32 %v8956_v14 }
 0x202   : > { %7310 = vtanh.f32 %v8953_v62 }
 0x203   : > { %7312 = vtanh.f32 %v8959_v30 }
 0x204   : > { %v6924_v3 = vpop.f32.mrb[4].mxu0 }
 0x205   : > { %v8970_v57 = vadd.f32 %v6962_v46, %v6924_v3  ;;  %v3575_v9 = vpop.f32.mrb[5].mxu0  ;;  %v8992_v46 = vpop.permute.xlu1 %4252  ;;  %v6974_v3 = vadd.f32 %v8923_v63, %v365_v31  ;;  %v367_v63 = vld [vmem:[%s7961_s10 + $0x68] sm:$0xff] }
 0x206   : > { %v8972_v47 = vadd.f32 %v6964_v53, %v3575_v9  ;;  %v6925_v35 = vpop.f32.mrb[6].mxu0  ;;  %10073 = vst [vmem:[#allocation22_spill] sm:$0xff] %v8992_v46  ;;  %v368_v9 = vld [vmem:[%s7961_s10 + $0x70] sm:$0xff] }
 0x207   : > { %v8974_v24 = vadd.f32 %v6966_v40, %v6925_v35  ;;  %v3578_v22 = vpop.f32.mrb[7].mxu0  ;;  %7314 = vtanh.f32 %v8970_v57  ;;  %v6976_v40 = vadd.f32 %v8925_v29, %v363_v32 }
 0x208   : > { %v8977_v36 = vadd.f32 %v6968_v19, %v3578_v22  ;;  %7316 = vtanh.f32 %v8972_v47  ;;  %v6978_v22 = vadd.f32 %v8931_v37, %v368_v9 }
 0x209   : > { %v7307_v59 = vpop.eup %7306  ;;  %7318 = vtanh.f32 %v8974_v24 }
 0x20a   : > { %4746 = vrot.lane.b32.xlu0 %v7307_v59, %s7892_s9  ;;  %v9010_v59 = vpop.permute.xlu1 %4256  ;;  %7320 = vtanh.f32 %v8977_v36 }
 0x20b   : > { %v7309_v39 = vpop.eup %7308  ;;  %10076 = vst [vmem:[#allocation25_spill] sm:$0xff] %v9010_v59 }
 0x20c   : > { %v6928_v2 = vpop.f32.mrb[8].mxu0  ;;  %v7311_v11 = vpop.eup %7310  ;;  %4748 = vrot.lane.b32.xlu1 %v7309_v39, %s7892_s9  ;;  %v369_v39 = vld [vmem:[%s7961_s10 + $0x78] sm:$0xff] }
 0x20d   : > { %v8986_v15 = vadd.f32 %v6970_v58, %v6928_v2  ;;  %v3591_v17 = vpop.f32.mrb[9].mxu0  ;;  %v7313_v58 = vpop.eup %7312  ;;  %v6982_v32 = vadd.f32 %v8935_v48, %v369_v39 }
 0x20e   : > { %v8994_v6 = vadd.f32 %v6972_v13, %v3591_v17  ;;  %v6929_v51 = vpop.f32.mrb[10].mxu0  ;;  %4742 = vrot.lane.b32.xlu0 %v7311_v11, %s7892_s9  ;;  %v9014_v13 = vpop.permute.xlu0 %4258  ;;  %v6980_v17 = vadd.f32 %v8933_v8, %v366_v56 }
 0x20f   : > { %v3594_v53 = vpop.f32.mrb[11].mxu0  ;;  %v9003_v19 = vadd.f32 %v6974_v3, %v6929_v51  ;;  %10077 = vst [vmem:[#allocation26_spill] sm:$0xff] %v9014_v13  ;;  %v6984_v51 = vadd.f32 %v8937_v61, %v367_v63  ;;  %7322 = vtanh.f32 %v8986_v15  ;;  %v9027_v3 = vpop.permute.xlu1 %4260 }
 0x210   : > { %v9005_v35 = vadd.f32 %v6976_v40, %v3594_v53  ;;  %4744 = vrot.lane.b32.xlu1 %v7313_v58, %s7892_s9  ;;  %10079 = vst [vmem:[#allocation28_spill] sm:$0xff] %v9027_v3  ;;  %7324 = vtanh.f32 %v8994_v6 }
 0x211   : > { %v7315_v31 = vpop.eup %7314  ;;  %7326 = vtanh.f32 %v9003_v19 }
 0x212   : > { %10075 = vst [vmem:[#allocation24_spill] sm:$0xff] %v9005_v35  ;;  %4754 = vrot.lane.b32.xlu0 %v7315_v31, %s7892_s9  ;;  %v9033_v9 = vpop.permute.xlu0 %4550  ;;  %v7317_v61 = vpop.eup %7316  ;;  %7328 = vtanh.f32 %v9005_v35 }
 0x213   : > { %10082 = vst [vmem:[#allocation31_spill] sm:$0xff] %v9033_v9  ;;  %v7319_v63 = vpop.eup %7318  ;;  %v9043_v3 = vpop.permute.xlu1 %4552 }
 0x214   : > { %v6932_v49 = vpop.f32.mrb[12].mxu0  ;;  %4756 = vrot.lane.b32.xlu1 %v7319_v63, %s7892_s9  ;;  %v7321_v16 = vpop.eup %7320  ;;  %10083 = vst [vmem:[#allocation32_spill] sm:$0xff] %v9043_v3 }
 0x215   : > { %v3607_v29 = vpop.f32.mrb[13].mxu0  ;;  %v9017_v2 = vadd.f32 %v6978_v22, %v6932_v49  ;;  %v372_v49 = vld [vmem:[%s7961_s10 + $0x90] sm:$0xff] }
 0x216   : > { %v6933_v11 = vpop.f32.mrb[14].mxu0  ;;  %v9024_v53 = vadd.f32 %v6980_v17, %v3607_v29  ;;  %4750 = vrot.lane.b32.xlu0 %v7317_v61, %s7892_s9  ;;  %v370_v29 = vld [vmem:[%s7961_s10 + $0x80] sm:$0xff]  ;;  %v371_v61 = vld [vmem:[%s7961_s10 + $0x88] sm:$0xff]  ;;  %v9048_v43 = vpop.permute.xlu0 %4554 }
 0x217   : > { %10078 = vst [vmem:[#allocation27_spill] sm:$0xff] %v9017_v2  ;;  %v3610_v37 = vpop.f32.mrb[15].mxu0  ;;  %v9029_v8 = vadd.f32 %v6982_v32, %v6933_v11  ;;  %v373_v11 = vld [vmem:[%s7961_s10 + $0x98] sm:$0xff]  ;;  %10084 = vst [vmem:[#allocation33_spill] sm:$0xff] %v9048_v43  ;;  %7330 = vtanh.f32 %v9017_v2  ;;  %v379_v43 = vld [vmem:[%s7961_s10 + $0xc8] sm:$0xff] }
 0x218   : > { %v9031_v40 = vadd.f32 %v6984_v51, %v3610_v37  ;;  %4752 = vrot.lane.b32.xlu1 %v7321_v16, %s7892_s9  ;;  %v376_v16 = vld [vmem:[%s7961_s10 + $0xb0] sm:$0xff]  ;;  %7332 = vtanh.f32 %v9024_v53 }
 0x219   : > { %10080 = vst [vmem:[#allocation29_spill] sm:$0xff] %v9029_v8  ;;  %7334 = vtanh.f32 %v9029_v8 }
 0x21a   : > { %10081 = vst [vmem:[#allocation30_spill] sm:$0xff] %v9031_v40  ;;  %v9067_v34 = vpop.permute.xlu0 %4558  ;;  %7336 = vtanh.f32 %v9031_v40 }
 0x21b   : > { %v6792_v48 = vpop.f32.mrb[16].mxu1  ;;  %10086 = vst [vmem:[#allocation35_spill] sm:$0xff] %v9067_v34 }
 0x21c   : > { %v6936_v22 = vpop.f32.mrb[16].mxu0  ;;  %v2142_v56 = vpop.f32.mrb[17].mxu1  ;;  %v6986_v37 = vadd.f32 %v6792_v48, %v372_v49 }
 0x21d   : > { %v3623_v58 = vpop.f32.mrb[17].mxu0  ;;  %v6793_v39 = vpop.f32.mrb[18].mxu1  ;;  %v6988_v51 = vadd.f32 %v2142_v56, %v370_v29 }
 0x21e   : > { %v6937_v17 = vpop.f32.mrb[18].mxu0  ;;  %v2145_v31 = vpop.f32.mrb[19].mxu1  ;;  %v6990_v59 = vadd.f32 %v6793_v39, %v373_v11  ;;  %v9045_v13 = vadd.f32 %v6986_v37, %v6936_v22  ;;  %v374_v37 = vld [vmem:[%s7961_s10 + $0xa0] sm:$0xff] }
 0x21f   : > { %v3626_v32 = vpop.f32.mrb[19].mxu0  ;;  %v9050_v63 = vadd.f32 %v6988_v51, %v3623_v58  ;;  %v7323_v49 = vpop.eup %7322  ;;  %v6992_v56 = vadd.f32 %v2145_v31, %v371_v61 }
 0x220   : > { %v9052_v46 = vadd.f32 %v6990_v59, %v6937_v17  ;;  %4762 = vrot.lane.b32.xlu0 %v7323_v49, %s7892_s9  ;;  %v7325_v59 = vpop.eup %7324  ;;  %v9064_v49 = vpop.permute.xlu1 %4556  ;;  %7338 = vtanh.f32 %v9045_v13 }
 0x221   : > { %v9059_v17 = vadd.f32 %v6992_v56, %v3626_v32  ;;  %v7327_v41 = vpop.eup %7326  ;;  %10085 = vst [vmem:[#allocation34_spill] sm:$0xff] %v9064_v49  ;;  %v9084_v34 = vpop.permute.xlu0 %4562  ;;  %v381_v49 = vld [vmem:[%s7961_s10 + $0xd8] sm:$0xff]  ;;  %7340 = vtanh.f32 %v9050_v63 }
 0x222   : > { %4764 = vrot.lane.b32.xlu1 %v7327_v41, %s7892_s9  ;;  %v7329_v60 = vpop.eup %7328  ;;  %10088 = vst [vmem:[#allocation37_spill] sm:$0xff] %v9084_v34  ;;  %7342 = vtanh.f32 %v9052_v46 }
 0x223   : > { %v6796_v48 = vpop.f32.mrb[20].mxu1  ;;  %7344 = vtanh.f32 %v9059_v17 }
 0x224   : > { %v6940_v39 = vpop.f32.mrb[20].mxu0  ;;  %v2158_v29 = vpop.f32.mrb[21].mxu1  ;;  %4758 = vrot.lane.b32.xlu0 %v7325_v59, %s7892_s9  ;;  %v6994_v31 = vadd.f32 %v6796_v48, %v376_v16 }
 0x225   : > { %v3639_v22 = vpop.f32.mrb[21].mxu0  ;;  %v6797_v11 = vpop.f32.mrb[22].mxu1  ;;  %v6996_v61 = vadd.f32 %v2158_v29, %v374_v37 }
 0x226   : > { %v6941_v58 = vpop.f32.mrb[22].mxu0  ;;  %v2161_v51 = vpop.f32.mrb[23].mxu1  ;;  %v9069_v4 = vadd.f32 %v6994_v31, %v6940_v39  ;;  %v6998_v59 = vadd.f32 %v6797_v11, %v377_v27  ;;  %4760 = vrot.lane.b32.xlu1 %v7329_v60, %s7892_s9  ;;  %v375_v39 = vld [vmem:[%s7961_s10 + $0xa8] sm:$0xff]  ;;  %v378_v11 = vld [vmem:[%s7961_s10 + $0xc0] sm:$0xff] }
 0x227   : > { %v3642_v52 = vpop.f32.mrb[23].mxu0  ;;  %v9071_v32 = vadd.f32 %v6996_v61, %v3639_v22  ;;  %v380_v22 = vld [vmem:[%s7961_s10 + $0xd0] sm:$0xff]  ;;  %v7331_v27 = vpop.eup %7330  ;;  %v7000_v42 = vadd.f32 %v2161_v51, %v375_v39 }
 0x228   : > { %v9075_v50 = vadd.f32 %v6998_v59, %v6941_v58  ;;  %4770 = vrot.lane.b32.xlu0 %v7331_v27, %s7892_s9  ;;  %v9082_v61 = vpop.permute.xlu1 %4560  ;;  %v7333_v58 = vpop.eup %7332  ;;  %7346 = vtanh.f32 %v9069_v4 }
 0x229   : > { %10087 = vst [vmem:[#allocation36_spill] sm:$0xff] %v9082_v61  ;;  %v9086_v59 = vadd.f32 %v7000_v42, %v3642_v52  ;;  %v7335_v39 = vpop.eup %7334  ;;  %7348 = vtanh.f32 %v9071_v32 }
 0x22a   : > { %4772 = vrot.lane.b32.xlu1 %v7335_v39, %s7892_s9  ;;  %7350 = vtanh.f32 %v9075_v50 }
 0x22b   : > { %v6800_v56 = vpop.f32.mrb[24].mxu1  ;;  %7352 = vtanh.f32 %v9086_v59 }
 0x22c   : > { %v6944_v48 = vpop.f32.mrb[24].mxu0  ;;  %v2174_v29 = vpop.f32.mrb[25].mxu1  ;;  %v7002_v10 = vadd.f32 %v6800_v56, %v380_v22  ;;  %4766 = vrot.lane.b32.xlu0 %v7333_v58, %s7892_s9 }
 0x22d   : > { %v3655_v16 = vpop.f32.mrb[25].mxu0  ;;  %v6801_v37 = vpop.f32.mrb[26].mxu1  ;;  %v7004_v9 = vadd.f32 %v2174_v29, %v378_v11  ;;  %v384_v29 = vld [vmem:[%s7961_s10 + $0xf0] sm:$0xff] }
 0x22e   : > { %v6945_v23 = vpop.f32.mrb[26].mxu0  ;;  %v2177_v41 = vpop.f32.mrb[27].mxu1  ;;  %v9088_v3 = vadd.f32 %v7002_v10, %v6944_v48  ;;  %v7006_v42 = vadd.f32 %v6801_v37, %v381_v49  ;;  %v382_v49 = vld [vmem:[%s7961_s10 + $0xe0] sm:$0xff] }
 0x22f   : > { %v3658_v31 = vpop.f32.mrb[27].mxu0  ;;  %v7008_v10 = vadd.f32 %v2177_v41, %v379_v43  ;;  %v9095_v48 = vadd.f32 %v7004_v9, %v3655_v16  ;;  %v7337_v22 = vpop.eup %7336  ;;  %v385_v9 = vld [vmem:[%s7961_s10 + $0xf8] sm:$0xff]  ;;  %v383_v16 = vld [vmem:[%s7961_s10 + $0xe8] sm:$0xff] }
 0x230   : > { %v9099_v11 = vpop.permute.xlu1 %4564  ;;  %v9101_v58 = vpop.permute.xlu0 %4566  ;;  %v9103_v34 = vadd.f32 %v7006_v42, %v6945_v23  ;;  %4768 = vrot.lane.b32.xlu1 %v7337_v22, %s7892_s9  ;;  %7354 = vtanh.f32 %v9088_v3 }
 0x231   : > { %10089 = vst [vmem:[#allocation38_spill] sm:$0xff] %v9095_v48  ;;  %10090 = vst [vmem:[#allocation39_spill] sm:$0xff] %v9099_v11  ;;  %v9105_v45 = vadd.f32 %v7008_v10, %v3658_v31  ;;  %v7339_v37 = vpop.eup %7338  ;;  %7356 = vtanh.f32 %v9095_v48  ;;  %v7828_v11 = vld [vmem:[#allocation3 + $0x58] sm:$0xff] }
 0x232   : > { %10091 = vst [vmem:[#allocation40_spill] sm:$0xff] %v9101_v58  ;;  %10092 = vst [vmem:[#allocation41_spill] sm:$0xff] %v9103_v34  ;;  %4778 = vrot.lane.b32.xlu0 %v7339_v37, %s7892_s9  ;;  %v7341_v22 = vpop.eup %7340  ;;  %7358 = vtanh.f32 %v9103_v34 }
 0x233   : > { %v6804_v60 = vpop.f32.mrb[28].mxu1  ;;  %10093 = vst [vmem:[#allocation42_spill] sm:$0xff] %v9105_v45  ;;  %7360 = vtanh.f32 %v9105_v45 }
 0x234   : > { %v6948_v18 = vpop.f32.mrb[28].mxu0  ;;  %v2190_v12 = vpop.f32.mrb[29].mxu1  ;;  %v7010_v43 = vadd.f32 %v6804_v60, %v384_v29 }
 0x235   : > { %v3671_v27 = vpop.f32.mrb[29].mxu0  ;;  %v6805_v61 = vpop.f32.mrb[30].mxu1  ;;  %v7012_v31 = vadd.f32 %v2190_v12, %v382_v49 }
 0x236   : > { %v6949_v51 = vpop.f32.mrb[30].mxu0  ;;  %v2193_v56 = vpop.f32.mrb[31].mxu1  ;;  %v9118_v23 = vadd.f32 %v7010_v43, %v6948_v18  ;;  %v7014_v42 = vadd.f32 %v6805_v61, %v385_v9  ;;  %4774 = vrot.lane.b32.xlu0 %v7341_v22, %s7892_s9  ;;  %v3817_v22 = vld [vmem:[%s10004_s2 + $0x18] sm:$0xff] }
 0x237   : > { %v3674_v52 = vpop.f32.mrb[31].mxu0  ;;  %v9113_v41 = vpop.permute.xlu1 %4568  ;;  %v7016_v10 = vadd.f32 %v2193_v56, %v383_v16  ;;  %v9120_v58 = vadd.f32 %v7012_v31, %v3671_v27 }
 0x238   : > { %10094 = vst [vmem:[#allocation43_spill] sm:$0xff] %v9113_v41  ;;  %v9115_v39 = vpop.permute.xlu0 %4570  ;;  %10096 = vst [vmem:[#allocation45_spill] sm:$0xff] %v9118_v23  ;;  %v9122_v60 = vadd.f32 %v7014_v42, %v6949_v51  ;;  %v7343_v41 = vpop.eup %7342  ;;  %v3816_v42 = vld [vmem:[%s10004_s2 + $0x10] sm:$0xff]  ;;  %7362 = vtanh.f32 %v9118_v23 }
 0x239   : > { %10095 = vst [vmem:[#allocation44_spill] sm:$0xff] %v9115_v39  ;;  %10097 = vst [vmem:[#allocation46_spill] sm:$0xff] %v9120_v58  ;;  %v9124_v29 = vadd.f32 %v7016_v10, %v3674_v52  ;;  %4780 = vrot.lane.b32.xlu1 %v7343_v41, %s7892_s9  ;;  %v7345_v18 = vpop.eup %7344  ;;  %7364 = vtanh.f32 %v9120_v58 }
 0x23a   : > { %10098 = vst [vmem:[#allocation47_spill] sm:$0xff] %v9122_v60  ;;  %v7347_v27 = vpop.eup %7346  ;;  %7366 = vtanh.f32 %v9122_v60 }
 0x23b   : > { %10099 = vst [vmem:[#allocation48_spill] sm:$0xff] %v9124_v29  ;;  %v9128_v39 = vpop.permute.xlu1 %4572  ;;  %4786 = vrot.lane.b32.xlu0 %v7347_v27, %s7892_s9  ;;  %v7349_v52 = vpop.eup %7348  ;;  %v7818_v27 = vld [vmem:[#allocation3 + $0x10] sm:$0xff] }
 0x23c   : > { %10100 = vst [vmem:[#allocation49_spill] sm:$0xff] %v9128_v39  ;;  %v9130_v37 = vpop.permute.xlu0 %4574  ;;  %v7351_v43 = vpop.eup %7350 }
 0x23d   : > { %10101 = vst [vmem:[#allocation50_spill] sm:$0xff] %v9130_v37  ;;  %4776 = vrot.lane.b32.xlu1 %v7345_v18, %s7892_s9  ;;  %v7353_v16 = vpop.eup %7352  ;;  %v3814_v18 = vld [vmem:[%s10004_s2] sm:$0xff]  ;;  %v7821_v37 = vld [vmem:[#allocation3 + $0x8] sm:$0xff] }
 0x23e   : > { %v7355_v10 = vpop.eup %7354 }
 0x23f   : > { %v9136_v12 = vpop.permute.xlu1 %4576  ;;  %4782 = vrot.lane.b32.xlu0 %v7349_v52, %s7892_s9  ;;  %v3848_v52 = vmul.f32 %v7818_v27, %v3816_v42  ;;  %v3820_v42 = vld [vmem:[%s10004_s2 + $0x30] sm:$0xff] }
 0x240   : > { %10102 = vst [vmem:[#allocation51_spill] sm:$0xff] %v9136_v12  ;;  %v9138_v61 = vpop.permute.xlu0 %4578 }
 0x241   : > { %10103 = vst [vmem:[#allocation52_spill] sm:$0xff] %v9138_v61  ;;  %4788 = vrot.lane.b32.xlu1 %v7351_v43, %s7892_s9  ;;  %v7819_v43 = vld [vmem:[#allocation3 + $0x18] sm:$0xff] }
 0x243   : > { %v9144_v56 = vpop.permute.xlu1 %4580  ;;  %4794 = vrot.lane.b32.xlu0 %v7355_v10, %s7892_s9  ;;  %v3880_v10 = vadd.f32 %v8949_v33, %v3848_v52 }
 0x244   : > { %v9142_v51 = vpop.permute.xlu0 %4582  ;;  %10105 = vst [vmem:[#allocation54_spill] sm:$0xff] %v9144_v56 }
 0x245   : > { %10104 = vst [vmem:[#allocation53_spill] sm:$0xff] %v9142_v51  ;;  %4784 = vrot.lane.b32.xlu1 %v7353_v16, %s7892_s9  ;;  %v3849_v16 = vmul.f32 %v7819_v43, %v3817_v22  ;;  %v3821_v43 = vld [vmem:[%s10004_s2 + $0x38] sm:$0xff]  ;;  %v6368_v52 = vmul.f32 -1.442695, %v3880_v10 }
 0x247   : > { %v9148_v49 = vpop.permute.xlu1 %4584  ;;  %v3881_v27 = vadd.f32 %v8956_v14, %v3849_v16  ;;  %v3818_v16 = vld [vmem:[%s10004_s2 + $0x20] sm:$0xff]  ;;  %7368 = vpow2.f32 %v6368_v52 }
 0x248   : > { %10106 = vst [vmem:[#allocation55_spill] sm:$0xff] %v9148_v49  ;;  %v9150_v9 = vpop.permute.xlu0 %4586 }
 0x249   : > { %10107 = vst [vmem:[#allocation56_spill] sm:$0xff] %v9150_v9  ;;  %v7820_v9 = vld [vmem:[#allocation3] sm:$0xff]  ;;  %v6369_v39 = vmul.f32 -1.442695, %v3881_v27 }
 0x24a   : > { %v3846_v12 = vmul.f32 %v7820_v9, %v3814_v18  ;;  %v3824_v27 = vld [vmem:[%s10004_s2 + $0x50] sm:$0xff] }
 0x24b   : > { %v9156_v41 = vpop.permute.xlu1 %4588  ;;  %7370 = vpow2.f32 %v6369_v39  ;;  %v7826_v39 = vld [vmem:[#allocation3 + $0x50] sm:$0xff] }
 0x24c   : > { %10108 = vst [vmem:[#allocation57_spill] sm:$0xff] %v9156_v41  ;;  %v9158_v31 = vpop.permute.xlu0 %4590  ;;  %v7357_v41 = vpop.eup %7356  ;;  %v3878_v9 = vadd.f32 %v8953_v62, %v3846_v12  ;;  %v3819_v12 = vld [vmem:[%s10004_s2 + $0x28] sm:$0xff]  ;;  %7372 = vtanh.f32 %v9124_v29 }
 0x24d   : > { %10109 = vst [vmem:[#allocation58_spill] sm:$0xff] %v9158_v31  ;;  %v3815_v31 = vld [vmem:[%s10004_s2 + $0x8] sm:$0xff]  ;;  %4790 = vrot.lane.b32.xlu0 %v7357_v41, %s7892_s9  ;;  %v7359_v22 = vpop.eup %7358  ;;  %v7822_v41 = vld [vmem:[#allocation3 + $0x30] sm:$0xff] }
 0x24e   : > { %v3847_v56 = vmul.f32 %v7821_v37, %v3815_v31  ;;  %4796 = vrot.lane.b32.xlu1 %v7359_v22, %s7892_s9  ;;  %v3852_v18 = vmul.f32 %v7822_v41, %v3820_v42  ;;  %v7361_v22 = vpop.eup %7360  ;;  %v6366_v10 = vmul.f32 -1.442695, %v3878_v9  ;;  %v7824_v42 = vld [vmem:[#allocation3 + $0x20] sm:$0xff] }
 0x24f   : > { %v9174_v49 = vpop.permute.xlu1 %4592  ;;  %v3850_v41 = vmul.f32 %v7824_v42, %v3818_v16  ;;  %v7363_v16 = vpop.eup %7362 }
 0x250   : > { %10110 = vst [vmem:[#allocation59_spill] sm:$0xff] %v9174_v49  ;;  %v9176_v51 = vpop.permute.xlu0 %4594  ;;  %v3879_v49 = vadd.f32 %v8959_v30, %v3847_v56  ;;  %v3884_v56 = vadd.f32 %v8970_v57, %v3852_v18  ;;  %7374 = vpow2.f32 %v6366_v10  ;;  %v7365_v25 = vpop.eup %7364 }
 0x251   : > { %10111 = vst [vmem:[#allocation60_spill] sm:$0xff] %v9176_v51  ;;  %v7823_v51 = vld [vmem:[#allocation3 + $0x38] sm:$0xff]  ;;  %v3882_v52 = vadd.f32 %v8972_v47, %v3850_v41  ;;  %4802 = vrot.lane.b32.xlu0 %v7363_v16, %s7892_s9  ;;  %v7829_v16 = vld [vmem:[#allocation3 + $0x48] sm:$0xff] }
 0x252   : > { %v3853_v61 = vmul.f32 %v7823_v51, %v3821_v43  ;;  %4792 = vrot.lane.b32.xlu1 %v7361_v22, %s7892_s9  ;;  %v7825_v43 = vld [vmem:[#allocation3 + $0x28] sm:$0xff]  ;;  %v3822_v22 = vld [vmem:[%s10004_s2 + $0x40] sm:$0xff] }
 0x253   : > { %v9190_v37 = vpop.permute.xlu1 %4596  ;;  %v6370_v1 = vmul.f32 -1.442695, %v3882_v52 }
 0x254   : > { %10112 = vst [vmem:[#allocation61_spill] sm:$0xff] %v9190_v37  ;;  %v9192_v31 = vpop.permute.xlu0 %4598  ;;  %v3885_v51 = vadd.f32 %v8974_v24, %v3853_v61  ;;  %v3851_v37 = vmul.f32 %v7825_v43, %v3819_v12  ;;  %v3825_v61 = vld [vmem:[%s10004_s2 + $0x58] sm:$0xff]  ;;  %v3856_v12 = vmul.f32 %v7826_v39, %v3824_v27  ;;  %v7367_v27 = vpop.eup %7366 }
 0x255   : > { %10113 = vst [vmem:[#allocation62_spill] sm:$0xff] %v9192_v31  ;;  %v6367_v31 = vmul.f32 -1.442695, %v3879_v49  ;;  %v6372_v49 = vmul.f32 -1.442695, %v3884_v56  ;;  %v3857_v54 = vmul.f32 %v7828_v11, %v3825_v61  ;;  %4798 = vrot.lane.b32.xlu0 %v7365_v25, %s7892_s9  ;;  %v3823_v11 = vld [vmem:[%s10004_s2 + $0x48] sm:$0xff] }
 0x256   : > { %v6373_v42 = vmul.f32 -1.442695, %v3885_v51  ;;  %v3883_v43 = vadd.f32 %v8977_v36, %v3851_v37  ;;  %v3888_v10 = vadd.f32 %v8986_v15, %v3856_v12  ;;  %4804 = vrot.lane.b32.xlu1 %v7367_v27, %s7892_s9  ;;  %v3855_v61 = vmul.f32 %v7829_v16, %v3823_v11 }
 0x257   : > { %v9212_v9 = vpop.permute.xlu1 %4600  ;;  %7376 = vpow2.f32 %v6367_v31  ;;  %v3889_v51 = vadd.f32 %v9003_v19, %v3857_v54 }
 0x258   : > { %10114 = vst [vmem:[#allocation63_spill] sm:$0xff] %v9212_v9  ;;  %v9214_v18 = vpop.permute.xlu0 %4602  ;;  %v7827_v9 = vld [vmem:[#allocation3 + $0x40] sm:$0xff]  ;;  %7378 = vpow2.f32 %v6372_v49  ;;  %v6371_v31 = vmul.f32 -1.442695, %v3883_v43  ;;  %v6376_v25 = vmul.f32 -1.442695, %v3888_v10  ;;  %v3887_v16 = vadd.f32 %v9005_v35, %v3855_v61 }
 0x259   : > { %10115 = vst [vmem:[#allocation64_spill] sm:$0xff] %v9214_v18  ;;  %v3854_v18 = vmul.f32 %v7827_v9, %v3822_v22  ;;  %7380 = vpow2.f32 %v6373_v42  ;;  %v7369_v22 = vpop.eup %7368  ;;  %v3828_v49 = vld [vmem:[%s10004_s2 + $0x70] sm:$0xff]  ;;  %v6377_v12 = vmul.f32 -1.442695, %v3889_v51  ;;  %v7830_v10 = vld [vmem:[#allocation3 + $0x70] sm:$0xff] }
 0x25a   : > { %v7371_v9 = vpop.eup %7370  ;;  %7382 = vpow2.f32 %v6370_v1  ;;  %v4008_v1 = vadd.f32 1.0, %v7369_v22  ;;  %v3860_v27 = vmul.f32 %v7830_v10, %v3828_v49  ;;  %v7831_v22 = vld [vmem:[#allocation3 + $0x60] sm:$0xff] }
 0x25b   : > { %v9225_v56 = vpop.permute.xlu1 %4604  ;;  %v3886_v37 = vadd.f32 %v8994_v6, %v3854_v18  ;;  %v7373_v52 = vpop.eup %7372  ;;  %7384 = vpow2.f32 %v6371_v31  ;;  %v4009_v11 = vadd.f32 1.0, %v7371_v9  ;;  %v3826_v31 = vld [vmem:[%s10004_s2 + $0x60] sm:$0xff]  ;;  %v3829_v9 = vld [vmem:[%s10004_s2 + $0x78] sm:$0xff] }
 0x25c   : > { %10116 = vst [vmem:[#allocation65_spill] sm:$0xff] %v9225_v56  ;;  %v9227_v41 = vpop.permute.xlu0 %4606  ;;  %v7375_v39 = vpop.eup %7374  ;;  %4800 = vrot.lane.b32.xlu1 %v7373_v52, %s7892_s9  ;;  %7386 = vpow2.f32 %v6376_v25  ;;  %v3858_v56 = vmul.f32 %v7831_v22, %v3826_v31  ;;  %v6375_v25 = vmul.f32 -1.442695, %v3887_v16 }
 0x25d   : > { %10117 = vst [vmem:[#allocation66_spill] sm:$0xff] %v9227_v41  ;;  %v6374_v18 = vmul.f32 -1.442695, %v3886_v37  ;;  %v4006_v37 = vadd.f32 1.0, %v7375_v39 }
 0x25e   : > { %v3890_v22 = vadd.f32 %v9024_v53, %v3858_v56  ;;  %v3832_v56 = vld [vmem:[%s10004_s2 + $0x90] sm:$0xff] }
 0x25f   : > { %v9239_v54 = vpop.permute.xlu1 %4608  ;;  %7388 = vpow2.f32 %v6374_v18  ;;  %v3827_v18 = vld [vmem:[%s10004_s2 + $0x68] sm:$0xff] }
 0x260   : > { %10118 = vst [vmem:[#allocation67_spill] sm:$0xff] %v9239_v54  ;;  %v9241_v42 = vpop.permute.xlu0 %4610  ;;  %7390 = vpow2.f32 %v6377_v12 }
 0x261   : > { %10119 = vst [vmem:[#allocation68_spill] sm:$0xff] %v9241_v42  ;;  %v7377_v43 = vpop.eup %7376  ;;  %v3892_v42 = vadd.f32 %v9017_v2, %v3860_v27  ;;  %7392 = vrcp.f32 %v4008_v1  ;;  %v7833_v1 = vld [vmem:[#allocation3 + $0x68] sm:$0xff] }
 0x262   : > { %v7379_v51 = vpop.eup %7378  ;;  %v4007_v52 = vadd.f32 1.0, %v7377_v43  ;;  %7394 = vrcp.f32 %v4009_v11  ;;  %v7832_v43 = vld [vmem:[#allocation3 + $0x78] sm:$0xff]  ;;  %v3859_v16 = vmul.f32 %v7833_v1, %v3827_v18 }
 0x263   : > { %v7381_v41 = vpop.eup %7380  ;;  %v9251_v61 = vpop.permute.xlu1 %4612  ;;  %v4012_v49 = vadd.f32 1.0, %v7379_v51  ;;  %7396 = vrcp.f32 %v4006_v37  ;;  %v3861_v10 = vmul.f32 %v7832_v43, %v3829_v9  ;;  %v6380_v31 = vmul.f32 -1.442695, %v3892_v42 }
 0x264   : > { %10120 = vst [vmem:[#allocation69_spill] sm:$0xff] %v9251_v61  ;;  %v7383_v39 = vpop.eup %7382  ;;  %v4013_v12 = vadd.f32 1.0, %v7381_v41  ;;  %7398 = vrcp.f32 %v4007_v52  ;;  %v6378_v9 = vmul.f32 -1.442695, %v3890_v22  ;;  %v3891_v42 = vadd.f32 %v9031_v40, %v3859_v16  ;;  %v3830_v40 = vld [vmem:[%s10004_s2 + $0x80] sm:$0xff] }
 0x265   : > { %v7385_v27 = vpop.eup %7384  ;;  %7400 = vpow2.f32 %v6375_v25  ;;  %v4010_v51 = vadd.f32 1.0, %v7383_v39  ;;  %v3893_v37 = vadd.f32 %v9029_v8, %v3861_v10  ;;  %v7834_v10 = vld [vmem:[#allocation3 + $0x90] sm:$0xff] }
 0x266   : > { %7402 = vrcp.f32 %v4012_v49  ;;  %v7387_v2 = vpop.eup %7386  ;;  %v4011_v35 = vadd.f32 1.0, %v7385_v27  ;;  %v6379_v16 = vmul.f32 -1.442695, %v3891_v42 }
 0x267   : > { %7404 = vrcp.f32 %v4013_v12  ;;  %v4016_v18 = vadd.f32 1.0, %v7387_v2  ;;  %v6381_v49 = vmul.f32 -1.442695, %v3893_v37 }
 0x268   : > { %7406 = vpow2.f32 %v6380_v31  ;;  %v3864_v31 = vmul.f32 %v7834_v10, %v3832_v56  ;;  %v7835_v56 = vld [vmem:[#allocation3 + $0x80] sm:$0xff] }
 0x269   : > { %v7389_v41 = vpop.eup %7388  ;;  %7408 = vrcp.f32 %v4010_v51  ;;  %v3862_v42 = vmul.f32 %v7835_v56, %v3830_v40 }
 0x26a   : > { %v7391_v52 = vpop.eup %7390  ;;  %7410 = vrcp.f32 %v4011_v35  ;;  %v4014_v51 = vadd.f32 1.0, %v7389_v41 }
 0x26b   : > { %v7393_v25 = vpop.eup %7392  ;;  %7412 = vpow2.f32 %v6378_v9  ;;  %v4017_v37 = vadd.f32 1.0, %v7391_v52  ;;  %v3894_v10 = vadd.f32 %v9050_v63, %v3862_v42 }
 0x26c   : > { %v7395_v39 = vpop.eup %7394  ;;  %7414 = vrcp.f32 %v4016_v18 }
 0x26d   : > { %v7397_v12 = vpop.eup %7396  ;;  %7416 = vpow2.f32 %v6381_v49  ;;  %v6382_v42 = vmul.f32 -1.442695, %v3894_v10 }
 0x26e   : > { %v7399_v8 = vpop.eup %7398  ;;  %7418 = vpow2.f32 %v6379_v16 }
 0x26f   : > { %v7401_v35 = vpop.eup %7400  ;;  %7420 = vrcp.f32 %v4014_v51 }
 0x270   : > { %v7403_v9 = vpop.eup %7402  ;;  %v4015_v49 = vadd.f32 1.0, %v7401_v35  ;;  %7422 = vrcp.f32 %v4017_v37  ;;  %v7837_v37 = vld [vmem:[#allocation3 + $0x88] sm:$0xff] }
 0x272   : > { %7424 = vrcp.f32 %v4015_v49 }
 0x27c   : > { %v4747_v54 = vpop.permute.xlu0 %4746 }
 0x27d   : > { %v4840_v43 = vmul.f32 %v7393_v25, %v4747_v54  ;;  %v3833_v25 = vld [vmem:[%s10004_s2 + $0x98] sm:$0xff] }
 0x27e   : > { %v4749_v61 = vpop.permute.xlu1 %4748 }
 0x27f   : > { %v4841_v22 = vmul.f32 %v7395_v39, %v4749_v61  ;;  %4906 = vrot.lane.b32.xlu0 %v4840_v43, %s7891_s19  ;;  %v3896_v61 = vadd.f32 %v9045_v13, %v3864_v31  ;;  %v7405_v39 = vpop.eup %7404  ;;  %v7836_v43 = vld [vmem:[#allocation3 + $0x98] sm:$0xff] }
 0x280   : > { %v4743_v11 = vpop.permute.xlu0 %4742  ;;  %v7407_v18 = vpop.eup %7406  ;;  %v3831_v31 = vld [vmem:[%s10004_s2 + $0x88] sm:$0xff] }
 0x281   : > { %v4838_v2 = vmul.f32 %v7397_v12, %v4743_v11  ;;  %4908 = vrot.lane.b32.xlu1 %v4841_v22, %s7891_s19  ;;  %v7409_v40 = vpop.eup %7408  ;;  %v6384_v12 = vmul.f32 -1.442695, %v3896_v61  ;;  %v4020_v22 = vadd.f32 1.0, %v7407_v18 }
 0x282   : > { %v4745_v27 = vpop.permute.xlu1 %4744 }
 0x283   : > { %v4839_v54 = vmul.f32 %v7399_v8, %v4745_v27  ;;  %4902 = vrot.lane.b32.xlu0 %v4838_v2, %s7891_s19  ;;  %v3865_v27 = vmul.f32 %v7836_v43, %v3833_v25  ;;  %7426 = vpow2.f32 %v6384_v12 }
 0x284   : > { %v4755_v1 = vpop.permute.xlu0 %4754  ;;  %7428 = vrcp.f32 %v4020_v22 }
 0x285   : > { %v4844_v11 = vmul.f32 %v7403_v9, %v4755_v1  ;;  %4904 = vrot.lane.b32.xlu1 %v4839_v54, %s7891_s19  ;;  %v7411_v1 = vpop.eup %7410  ;;  %v3897_v35 = vadd.f32 %v9052_v46, %v3865_v27  ;;  %v3863_v9 = vmul.f32 %v7837_v37, %v3831_v31  ;;  %7430 = vpow2.f32 %v6382_v42  ;;  %v3834_v31 = vld [vmem:[%s10004_s2 + $0xa0] sm:$0xff] }
 0x286   : > { %v4757_v41 = vpop.permute.xlu1 %4756  ;;  %v7413_v54 = vpop.eup %7412 }
 0x287   : > { %v4845_v52 = vmul.f32 %v7405_v39, %v4757_v41  ;;  %4914 = vrot.lane.b32.xlu0 %v4844_v11, %s7891_s19  ;;  %v7415_v56 = vpop.eup %7414  ;;  %v4018_v39 = vadd.f32 1.0, %v7413_v54  ;;  %v3836_v11 = vld [vmem:[%s10004_s2 + $0xb0] sm:$0xff]  ;;  %v6385_v18 = vmul.f32 -1.442695, %v3897_v35 }
 0x288   : > { %v4751_v8 = vpop.permute.xlu0 %4750  ;;  %v7417_v25 = vpop.eup %7416  ;;  %v7839_v35 = vld [vmem:[#allocation3 + $0xa0] sm:$0xff] }
 0x289   : > { %v4842_v16 = vmul.f32 %v7409_v40, %v4751_v8  ;;  %4916 = vrot.lane.b32.xlu1 %v4845_v52, %s7891_s19  ;;  %v7419_v8 = vpop.eup %7418  ;;  %v3895_v52 = vadd.f32 %v9059_v17, %v3863_v9  ;;  %v4021_v27 = vadd.f32 1.0, %v7417_v25  ;;  %v7838_v40 = vld [vmem:[#allocation3 + $0xb0] sm:$0xff]  ;;  %7432 = vrcp.f32 %v4018_v39  ;;  %v3837_v9 = vld [vmem:[%s10004_s2 + $0xb8] sm:$0xff] }
 0x28a   : > { %v4753_v2 = vpop.permute.xlu1 %4752  ;;  %v7421_v43 = vpop.eup %7420  ;;  %v3868_v12 = vmul.f32 %v7838_v40, %v3836_v11  ;;  %7434 = vpow2.f32 %v6385_v18  ;;  %v4019_v54 = vadd.f32 1.0, %v7419_v8  ;;  %v3866_v37 = vmul.f32 %v7839_v35, %v3834_v31  ;;  %v7840_v11 = vld [vmem:[#allocation3 + $0xb8] sm:$0xff]  ;;  %v7841_v31 = vld [vmem:[#allocation3 + $0xa8] sm:$0xff] }
 0x28b   : > { %v4843_v51 = vmul.f32 %v7411_v1, %v4753_v2  ;;  %4910 = vrot.lane.b32.xlu0 %v4842_v16, %s7891_s19  ;;  %v7423_v10 = vpop.eup %7422  ;;  %v6383_v2 = vmul.f32 -1.442695, %v3895_v52  ;;  %7436 = vrcp.f32 %v4021_v27 }
 0x28c   : > { %v3898_v52 = vadd.f32 %v9071_v32, %v3866_v37  ;;  %v3840_v37 = vld [vmem:[%s10004_s2 + $0xd0] sm:$0xff] }
 0x28d   : > { %4912 = vrot.lane.b32.xlu1 %v4843_v51, %s7891_s19  ;;  %v3900_v51 = vadd.f32 %v9069_v4, %v3868_v12  ;;  %7438 = vpow2.f32 %v6383_v2 }
 0x28e   : > { %7440 = vrcp.f32 %v4019_v54 }
 0x28f   : > { %v6388_v18 = vmul.f32 -1.442695, %v3900_v51 }
 0x291   : > { %7442 = vpow2.f32 %v6388_v18 }
 0x292   : > { %v4763_v61 = vpop.permute.xlu0 %4762 }
 0x293   : > { %v4848_v41 = vmul.f32 %v7415_v56, %v4763_v61  ;;  %v7425_v61 = vpop.eup %7424 }
 0x294   : > { %v4765_v1 = vpop.permute.xlu1 %4764  ;;  %v7427_v42 = vpop.eup %7426 }
 0x295   : > { %4922 = vrot.lane.b32.xlu0 %v4848_v41, %s7891_s19  ;;  %v4849_v16 = vmul.f32 %v7423_v10, %v4765_v1  ;;  %v7429_v39 = vpop.eup %7428  ;;  %v3869_v41 = vmul.f32 %v7840_v11, %v3837_v9  ;;  %v4024_v27 = vadd.f32 1.0, %v7427_v42 }
 0x296   : > { %v4759_v49 = vpop.permute.xlu0 %4758  ;;  %v7431_v40 = vpop.eup %7430 }
 0x297   : > { %v4846_v22 = vmul.f32 %v7421_v43, %v4759_v49  ;;  %4924 = vrot.lane.b32.xlu1 %v4849_v16, %s7891_s19  ;;  %v3835_v49 = vld [vmem:[%s10004_s2 + $0xa8] sm:$0xff]  ;;  %v7433_v12 = vpop.eup %7432  ;;  %v3901_v10 = vadd.f32 %v9075_v50, %v3869_v41  ;;  %v6386_v16 = vmul.f32 -1.442695, %v3898_v52  ;;  %v4022_v35 = vadd.f32 1.0, %v7431_v40 }
 0x298   : > { %v4761_v56 = vpop.permute.xlu1 %4760  ;;  %v3867_v1 = vmul.f32 %v7841_v31, %v3835_v49  ;;  %v7435_v51 = vpop.eup %7434  ;;  %7444 = vrcp.f32 %v4024_v27  ;;  %v3841_v31 = vld [vmem:[%s10004_s2 + $0xd8] sm:$0xff] }
 0x299   : > { %4918 = vrot.lane.b32.xlu0 %v4846_v22, %s7891_s19  ;;  %v4847_v25 = vmul.f32 %v7425_v61, %v4761_v56  ;;  %v7437_v54 = vpop.eup %7436  ;;  %v6389_v61 = vmul.f32 -1.442695, %v3901_v10  ;;  %7446 = vpow2.f32 %v6386_v16  ;;  %v7844_v16 = vld [vmem:[#allocation3 + $0xd8] sm:$0xff] }
 0x29a   : > { %v4771_v8 = vpop.permute.xlu0 %4770  ;;  %v3899_v56 = vadd.f32 %v9086_v59, %v3867_v1  ;;  %v7439_v41 = vpop.eup %7438  ;;  %7448 = vrcp.f32 %v4022_v35 }
 0x29b   : > { %v4852_v43 = vmul.f32 %v7429_v39, %v4771_v8  ;;  %4920 = vrot.lane.b32.xlu1 %v4847_v25, %s7891_s19  ;;  %v4025_v25 = vadd.f32 1.0, %v7435_v51  ;;  %v7842_v39 = vld [vmem:[#allocation3 + $0xd0] sm:$0xff]  ;;  %v7441_v18 = vpop.eup %7440  ;;  %7450 = vpow2.f32 %v6389_v61  ;;  %v4023_v27 = vadd.f32 1.0, %v7439_v41 }
 0x29c   : > { %v4773_v9 = vpop.permute.xlu1 %4772  ;;  %v3872_v11 = vmul.f32 %v7842_v39, %v3840_v37  ;;  %v3838_v8 = vld [vmem:[%s10004_s2 + $0xc0] sm:$0xff]  ;;  %v6387_v49 = vmul.f32 -1.442695, %v3899_v56  ;;  %v7443_v1 = vpop.eup %7442  ;;  %v7845_v39 = vld [vmem:[#allocation3 + $0xc8] sm:$0xff] }
 0x29d   : > { %4930 = vrot.lane.b32.xlu0 %v4852_v43, %s7891_s19  ;;  %v4853_v42 = vmul.f32 %v7437_v54, %v4773_v9  ;;  %7452 = vrcp.f32 %v4025_v25  ;;  %v3839_v54 = vld [vmem:[%s10004_s2 + $0xc8] sm:$0xff]  ;;  %v4028_v61 = vadd.f32 1.0, %v7443_v1 }
 0x29e   : > { %v4767_v22 = vpop.permute.xlu0 %4766  ;;  %v3904_v40 = vadd.f32 %v9088_v3, %v3872_v11  ;;  %7454 = vpow2.f32 %v6387_v49  ;;  %v3871_v11 = vmul.f32 %v7845_v39, %v3839_v54 }
 0x29f   : > { %v4850_v2 = vmul.f32 %v7433_v12, %v4767_v22  ;;  %4932 = vrot.lane.b32.xlu1 %v4853_v42, %s7891_s19  ;;  %v7843_v12 = vld [vmem:[#allocation3 + $0xc0] sm:$0xff]  ;;  %7456 = vrcp.f32 %v4023_v27 }
 0x2a0   : > { %v3870_v10 = vmul.f32 %v7843_v12, %v3838_v8  ;;  %v6392_v35 = vmul.f32 -1.442695, %v3904_v40 }
 0x2a1   : > { %4926 = vrot.lane.b32.xlu0 %v4850_v2, %s7891_s19  ;;  %v3873_v2 = vmul.f32 %v7844_v16, %v3841_v31 }
 0x2a2   : > { %v4769_v52 = vpop.permute.xlu1 %4768  ;;  %v7445_v22 = vpop.eup %7444  ;;  %v3902_v37 = vadd.f32 %v9095_v48, %v3870_v10  ;;  %7458 = vpow2.f32 %v6392_v35  ;;  %v3903_v10 = vadd.f32 %v9105_v45, %v3871_v11 }
 0x2a3   : > { %v4851_v43 = vmul.f32 %v7441_v18, %v4769_v52  ;;  %v7447_v56 = vpop.eup %7446  ;;  %v3905_v25 = vadd.f32 %v9103_v34, %v3873_v2  ;;  %7460 = vrcp.f32 %v4028_v61 }
 0x2a4   : > { %v4779_v51 = vpop.permute.xlu0 %4778  ;;  %v7449_v42 = vpop.eup %7448  ;;  %v6390_v8 = vmul.f32 -1.442695, %v3902_v37  ;;  %v4026_v49 = vadd.f32 1.0, %v7447_v56  ;;  %v6391_v54 = vmul.f32 -1.442695, %v3903_v10 }
 0x2a5   : > { %4928 = vrot.lane.b32.xlu1 %v4851_v43, %s7891_s19  ;;  %v4856_v9 = vmul.f32 %v7445_v22, %v4779_v51  ;;  %v7451_v52 = vpop.eup %7450  ;;  %v3844_v43 = vld [vmem:[%s10004_s2 + $0xf0] sm:$0xff]  ;;  %v6393_v12 = vmul.f32 -1.442695, %v3905_v25  ;;  %v7846_v22 = vld [vmem:[#allocation3 + $0xf0] sm:$0xff] }
 0x2a6   : > { %v4029_v1 = vadd.f32 1.0, %v7451_v52  ;;  %7462 = vpow2.f32 %v6390_v8  ;;  %v3876_v16 = vmul.f32 %v7846_v22, %v3844_v43  ;;  %v3842_v51 = vld [vmem:[%s10004_s2 + $0xe0] sm:$0xff]  ;;  %v7847_v25 = vld [vmem:[#allocation3 + $0xe0] sm:$0xff]  ;;  %v3843_v52 = vld [vmem:[%s10004_s2 + $0xe8] sm:$0xff] }
 0x2a7   : > { %4938 = vrot.lane.b32.xlu0 %v4856_v9, %s7891_s19  ;;  %v7453_v27 = vpop.eup %7452  ;;  %7464 = vrcp.f32 %v4026_v49  ;;  %v3845_v9 = vld [vmem:[%s10004_s2 + $0xf8] sm:$0xff]  ;;  %v3874_v39 = vmul.f32 %v7847_v25, %v3842_v51 }
 0x2a8   : > { %v4775_v41 = vpop.permute.xlu0 %4774  ;;  %v7455_v2 = vpop.eup %7454  ;;  %7466 = vpow2.f32 %v6393_v12 }
 0x2a9   : > { %v4854_v18 = vmul.f32 %v7449_v42, %v4775_v41  ;;  %v7457_v35 = vpop.eup %7456  ;;  %v4027_v56 = vadd.f32 1.0, %v7455_v2  ;;  %v3908_v42 = vadd.f32 %v9118_v23, %v3876_v16  ;;  %7468 = vrcp.f32 %v4029_v1  ;;  %v7848_v41 = vld [vmem:[#allocation3 + $0xf8] sm:$0xff]  ;;  %v7849_v1 = vld [vmem:[#allocation3 + $0xe8] sm:$0xff] }
 0x2aa   : > { %v3877_v8 = vmul.f32 %v7848_v41, %v3845_v9  ;;  %7470 = vpow2.f32 %v6391_v54  ;;  %v3875_v22 = vmul.f32 %v7849_v1, %v3843_v52 }
 0x2ab   : > { %v4781_v40 = vpop.permute.xlu1 %4780  ;;  %4934 = vrot.lane.b32.xlu0 %v4854_v18, %s7891_s19  ;;  %v6396_v43 = vmul.f32 -1.442695, %v3908_v42  ;;  %7472 = vrcp.f32 %v4027_v56 }
 0x2ac   : > { %v4857_v31 = vmul.f32 %v7453_v27, %v4781_v40  ;;  %v7459_v11 = vpop.eup %7458  ;;  %v3906_v27 = vadd.f32 %v9120_v58, %v3874_v39  ;;  %v3907_v56 = vadd.f32 %v9124_v29, %v3875_v22 }
 0x2ad   : > { %v7461_v18 = vpop.eup %7460  ;;  %v4787_v49 = vpop.permute.xlu0 %4786  ;;  %v4032_v12 = vadd.f32 1.0, %v7459_v11  ;;  %7474 = vpow2.f32 %v6396_v43 }
 0x2ae   : > { %4940 = vrot.lane.b32.xlu1 %v4857_v31, %s7891_s19  ;;  %v4860_v40 = vmul.f32 %v7461_v18, %v4787_v49  ;;  %v3909_v31 = vadd.f32 %v9122_v60, %v3877_v8  ;;  %v6394_v51 = vmul.f32 -1.442695, %v3906_v27  ;;  %v6395_v8 = vmul.f32 -1.442695, %v3907_v56 }
 0x2af   : > { %v4777_v37 = vpop.permute.xlu1 %4776  ;;  %7476 = vrcp.f32 %v4032_v12 }
 0x2b0   : > { %v4855_v61 = vmul.f32 %v7457_v35, %v4777_v37  ;;  %v7463_v10 = vpop.eup %7462  ;;  %4946 = vrot.lane.b32.xlu0 %v4860_v40, %s7891_s19  ;;  %7478 = vpow2.f32 %v6394_v51 }
 0x2b1   : > { %v7465_v16 = vpop.eup %7464  ;;  %v4783_v2 = vpop.permute.xlu0 %4782  ;;  %v4030_v54 = vadd.f32 1.0, %v7463_v10 }
 0x2b2   : > { %4936 = vrot.lane.b32.xlu1 %v4855_v61, %s7891_s19  ;;  %v4858_v35 = vmul.f32 %v7465_v16, %v4783_v2  ;;  %v7467_v37 = vpop.eup %7466  ;;  %v6397_v61 = vmul.f32 -1.442695, %v3909_v31  ;;  %v4296_v2 = vadd.f32 %v8949_v33, %v8891_v7  ;;  %v4295_v7 = vadd.f32 %v8959_v30, %v8893_v20 }
 0x2b3   : > { %v7469_v9 = vpop.eup %7468  ;;  %v4789_v42 = vpop.permute.xlu1 %4788  ;;  %v4033_v39 = vadd.f32 1.0, %v7467_v37  ;;  %7480 = vrcp.f32 %v4030_v54 }
 0x2b4   : > { %4942 = vrot.lane.b32.xlu0 %v4858_v35, %s7891_s19  ;;  %v4861_v25 = vmul.f32 %v7469_v9, %v4789_v42  ;;  %v7471_v11 = vpop.eup %7470  ;;  %7482 = vpow2.f32 %v6397_v61  ;;  %v4297_v35 = vadd.f32 %v8956_v14, %v8895_v21 }
 0x2b5   : > { %v7473_v41 = vpop.eup %7472  ;;  %v4031_v49 = vadd.f32 1.0, %v7471_v11  ;;  %7484 = vrcp.f32 %v4033_v39  ;;  %v4795_v40 = vpop.permute.xlu0 %4794  ;;  %v4294_v39 = vadd.f32 %v8953_v62, %v8889_v5  ;;  %v4301_v5 = vadd.f32 %v8974_v24, %v8903_v0 }
 0x2b6   : > { %4948 = vrot.lane.b32.xlu1 %v4861_v25, %s7891_s19  ;;  %7486 = vpow2.f32 %v6395_v8  ;;  %v6400_v25 = vmul.f32 -1.442695, %v4296_v2  ;;  %v6401_v11 = vmul.f32 -1.442695, %v4297_v35 }
 0x2b7   : > { %v4785_v18 = vpop.permute.xlu1 %4784  ;;  %v7475_v43 = vpop.eup %7474  ;;  %7488 = vrcp.f32 %v4031_v49  ;;  %v4300_v49 = vadd.f32 %v8970_v57, %v8901_v55  ;;  %v4299_v55 = vadd.f32 %v8977_v36, %v8899_v44 }
 0x2b8   : > { %v4859_v52 = vmul.f32 %v7473_v41, %v4785_v18  ;;  %v4036_v10 = vadd.f32 1.0, %v7475_v43  ;;  %v6399_v43 = vmul.f32 -1.442695, %v4295_v7  ;;  %v4305_v7 = vadd.f32 %v9003_v19, %v8911_v28 }
 0x2b9   : > { %v7477_v27 = vpop.eup %7476 }
 0x2ba   : > { %4944 = vrot.lane.b32.xlu1 %v4859_v52, %s7891_s19  ;;  %v4864_v12 = vmul.f32 %v7477_v27, %v4795_v40  ;;  %v7479_v31 = vpop.eup %7478  ;;  %7490 = vrcp.f32 %v4036_v10  ;;  %v6398_v52 = vmul.f32 -1.442695, %v4294_v39  ;;  %v6404_v40 = vmul.f32 -1.442695, %v4300_v49  ;;  %v10121_v49 = vld [vmem:[#allocation11_spill] sm:$0xff] }
 0x2bb   : > { %v4034_v37 = vadd.f32 1.0, %v7479_v31  ;;  %v6405_v31 = vmul.f32 -1.442695, %v4301_v5  ;;  %v6409_v5 = vmul.f32 -1.442695, %v4305_v7 }
 0x2bc   : > { %4954 = vrot.lane.b32.xlu0 %v4864_v12, %s7891_s19  ;;  %v4298_v12 = vadd.f32 %v8972_v47, %v8897_v38 }
 0x2bd   : > { %v7481_v1 = vpop.eup %7480  ;;  %7492 = vrcp.f32 %v4034_v37 }
 0x2be   : > { %v7483_v16 = vpop.eup %7482 }
 0x2bf   : > { %v4791_v22 = vpop.permute.xlu0 %4790  ;;  %v7485_v54 = vpop.eup %7484  ;;  %v4037_v61 = vadd.f32 1.0, %v7483_v16 }
 0x2c0   : > { %v4862_v51 = vmul.f32 %v7481_v1, %v4791_v22  ;;  %v4797_v9 = vpop.permute.xlu1 %4796  ;;  %v7487_v42 = vpop.eup %7486  ;;  %v6402_v22 = vmul.f32 -1.442695, %v4298_v12 }
 0x2c1   : > { %v4865_v56 = vmul.f32 %v7485_v54, %v4797_v9  ;;  %v7489_v21 = vpop.eup %7488  ;;  %v4035_v8 = vadd.f32 1.0, %v7487_v42  ;;  %7494 = vrcp.f32 %v4037_v61 }
 0x2c2   : > { %4950 = vrot.lane.b32.xlu0 %v4862_v51, %s7891_s19  ;;  %7496 = vpow2.f32 %v6400_v25  ;;  %v6403_v51 = vmul.f32 -1.442695, %v4299_v55 }
 0x2c3   : > { %4956 = vrot.lane.b32.xlu1 %v4865_v56, %s7891_s19  ;;  %7498 = vpow2.f32 %v6401_v11  ;;  %v4803_v27 = vpop.permute.xlu0 %4802  ;;  %v4304_v11 = vadd.f32 %v8986_v15, %v8909_v26 }
 0x2c4   : > { %v4793_v41 = vpop.permute.xlu1 %4792  ;;  %v7491_v20 = vpop.eup %7490  ;;  %7500 = vrcp.f32 %v4035_v8 }
 0x2c5   : > { %v4863_v18 = vmul.f32 %v7489_v21, %v4793_v41  ;;  %7502 = vpow2.f32 %v6398_v52  ;;  %v4868_v10 = vmul.f32 %v7491_v20, %v4803_v27  ;;  %v6408_v52 = vmul.f32 -1.442695, %v4304_v11  ;;  %v10122_v20 = vld [vmem:[#allocation5_spill] sm:$0xff]  ;;  %v10123_v27 = vld [vmem:[#allocation24_spill] sm:$0xff] }
 0x2c6   : > { %7504 = vpow2.f32 %v6399_v43  ;;  %v4302_v43 = vadd.f32 %v8994_v6, %v10121_v49 }
 0x2c7   : > { %4952 = vrot.lane.b32.xlu1 %v4863_v18, %s7891_s19  ;;  %4962 = vrot.lane.b32.xlu0 %v4868_v10, %s7891_s19  ;;  %v7493_v1 = vpop.eup %7492  ;;  %v4799_v0 = vpop.permute.xlu0 %4798  ;;  %7506 = vpow2.f32 %v6404_v40  ;;  %v4303_v40 = vadd.f32 %v10123_v27, %v10122_v20 }
 0x2c8   : > { %v4866_v16 = vmul.f32 %v7493_v1, %v4799_v0  ;;  %7508 = vpow2.f32 %v6405_v31  ;;  %v4805_v35 = vpop.permute.xlu1 %4804  ;;  %v6406_v31 = vmul.f32 -1.442695, %v4302_v43 }
 0x2c9   : > { %7510 = vpow2.f32 %v6402_v22  ;;  %v6407_v55 = vmul.f32 -1.442695, %v4303_v40 }
 0x2ca   : > { %7512 = vpow2.f32 %v6403_v51 }
 0x2cb   : > { %v7495_v2 = vpop.eup %7494  ;;  %4958 = vrot.lane.b32.xlu0 %v4866_v16, %s7891_s19  ;;  %v10124_v16 = vld [vmem:[#allocation12_spill] sm:$0xff] }
 0x2cc   : > { %v7497_v37 = vpop.eup %7496  ;;  %v4869_v54 = vmul.f32 %v7495_v2, %v4805_v35  ;;  %v10125_v2 = vld [vmem:[#allocation27_spill] sm:$0xff] }
 0x2cd   : > { %v7499_v38 = vpop.eup %7498  ;;  %v4424_v9 = vadd.f32 1.0, %v7497_v37  ;;  %v4308_v51 = vadd.f32 %v10125_v2, %v10124_v16  ;;  %v10126_v37 = vld [vmem:[#allocation9_spill] sm:$0xff] }
 0x2ce   : > { %4964 = vrot.lane.b32.xlu1 %v4869_v54, %s7891_s19  ;;  %v7501_v44 = vpop.eup %7500  ;;  %v4801_v61 = vpop.permute.xlu1 %4800  ;;  %v4425_v42 = vadd.f32 1.0, %v7499_v38  ;;  %v4306_v54 = vadd.f32 %v9024_v53, %v10126_v37  ;;  %v10127_v38 = vld [vmem:[#allocation13_spill] sm:$0xff] }
 0x2cf   : > { %v7503_v56 = vpop.eup %7502  ;;  %v4867_v25 = vmul.f32 %v7501_v44, %v4801_v61  ;;  %7514 = vrcp.f32 %v4424_v9  ;;  %v10128_v44 = vld [vmem:[#allocation29_spill] sm:$0xff]  ;;  %v10129_v61 = vld [vmem:[#allocation6_spill] sm:$0xff]  ;;  %v6412_v7 = vmul.f32 -1.442695, %v4308_v51 }
 0x2d0   : > { %v7505_v39 = vpop.eup %7504  ;;  %v4422_v21 = vadd.f32 1.0, %v7503_v56  ;;  %7516 = vrcp.f32 %v4425_v42  ;;  %v4309_v9 = vadd.f32 %v10128_v44, %v10127_v38  ;;  %v10130_v56 = vld [vmem:[#allocation30_spill] sm:$0xff] }
 0x2d1   : > { %v7507_v41 = vpop.eup %7506  ;;  %v4423_v8 = vadd.f32 1.0, %v7505_v39  ;;  %v4307_v42 = vadd.f32 %v10130_v56, %v10129_v61  ;;  %v10135_v61 = vld [vmem:[#allocation37_spill] sm:$0xff] }
 0x2d2   : > { %4960 = vrot.lane.b32.xlu1 %v4867_v25, %s7891_s19  ;;  %v7509_v18 = vpop.eup %7508  ;;  %v4428_v26 = vadd.f32 1.0, %v7507_v41  ;;  %7518 = vrcp.f32 %v4422_v21  ;;  %v10131_v25 = vld [vmem:[#allocation33_spill] sm:$0xff]  ;;  %v10132_v21 = vld [vmem:[#allocation34_spill] sm:$0xff]  ;;  %v6413_v20 = vmul.f32 -1.442695, %v4309_v9 }
 0x2d3   : > { %v7511_v12 = vpop.eup %7510  ;;  %v4429_v28 = vadd.f32 1.0, %v7509_v18  ;;  %7520 = vrcp.f32 %v4423_v8 }
 0x2d4   : > { %v7513_v10 = vpop.eup %7512  ;;  %7522 = vpow2.f32 %v6408_v52  ;;  %v4426_v1 = vadd.f32 1.0, %v7511_v12  ;;  %v6410_v52 = vmul.f32 -1.442695, %v4306_v54  ;;  %v10133_v12 = vld [vmem:[#allocation31_spill] sm:$0xff] }
 0x2d5   : > { %7524 = vpow2.f32 %v6409_v5  ;;  %v4427_v0 = vadd.f32 1.0, %v7513_v10  ;;  %v6411_v10 = vmul.f32 -1.442695, %v4307_v42 }
 0x2d6   : > { %7526 = vrcp.f32 %v4428_v26 }
 0x2d7   : > { %7528 = vrcp.f32 %v4429_v28 }
 0x2d8   : > { %7530 = vpow2.f32 %v6406_v31 }
 0x2d9   : > { %v7515_v22 = vpop.eup %7514  ;;  %7532 = vpow2.f32 %v6407_v55  ;;  %v10134_v55 = vld [vmem:[#allocation32_spill] sm:$0xff] }
 0x2da   : > { %v7517_v35 = vpop.eup %7516  ;;  %7534 = vrcp.f32 %v4426_v1  ;;  %v4648_v39 = vmul.f32 %v7515_v22, %v10131_v25 }
 0x2db   : > { %7536 = vrcp.f32 %v4427_v0  ;;  %v4649_v41 = vmul.f32 %v7517_v35, %v10132_v21 }
 0x2dc   : > { %v7519_v11 = vpop.eup %7518  ;;  %7538 = vpow2.f32 %v6412_v7 }
 0x2dd   : > { %v7521_v18 = vpop.eup %7520  ;;  %v4646_v28 = vmul.f32 %v7519_v11, %v10133_v12  ;;  %7540 = vpow2.f32 %v6410_v52 }
 0x2de   : > { %v7523_v5 = vpop.eup %7522  ;;  %v4647_v1 = vmul.f32 %v7521_v18, %v10134_v55  ;;  %7542 = vpow2.f32 %v6413_v20 }
 0x2df   : > { %v7525_v26 = vpop.eup %7524  ;;  %v4432_v37 = vadd.f32 1.0, %v7523_v5  ;;  %7544 = vpow2.f32 %v6411_v10  ;;  %v10137_v5 = vld [vmem:[#allocation35_spill] sm:$0xff] }
 0x2e0   : > { %v7527_v31 = vpop.eup %7526  ;;  %v4433_v9 = vadd.f32 1.0, %v7525_v26  ;;  %v10138_v26 = vld [vmem:[#allocation8_spill] sm:$0xff] }
 0x2e1   : > { %v7529_v22 = vpop.eup %7528  ;;  %v4652_v42 = vmul.f32 %v7527_v31, %v10135_v61  ;;  %v4312_v12 = vadd.f32 %v9045_v13, %v10138_v26 }
 0x2e2   : > { %v7531_v35 = vpop.eup %7530 }
 0x2e3   : > { %v7533_v38 = vpop.eup %7532  ;;  %v4430_v18 = vadd.f32 1.0, %v7531_v35  ;;  %v6416_v61 = vmul.f32 -1.442695, %v4312_v12 }
 0x2e4   : > { %v7535_v25 = vpop.eup %7534 }
 0x2e5   : > { %v7537_v21 = vpop.eup %7536  ;;  %v4650_v20 = vmul.f32 %v7535_v25, %v10137_v5 }
 0x2f1   : > { %v4907_v8 = vpop.permute.xlu0 %4906 }
 0x2f2   : > { %v5000_v49 = vadd.f32 %v4907_v8, %v4648_v39  ;;  %v10136_v39 = vld [vmem:[#allocation39_spill] sm:$0xff] }
 0x2f3   : > { %v4909_v43 = vpop.permute.xlu1 %4908  ;;  %v4653_v11 = vmul.f32 %v7529_v22, %v10136_v39  ;;  %v10141_v22 = vld [vmem:[#allocation14_spill] sm:$0xff] }
 0x2f4   : > { %v5001_v40 = vadd.f32 %v4909_v43, %v4649_v41  ;;  %5098 = vrot.lane.b32.xlu0 %v5000_v49, %s7893_s30  ;;  %7546 = vtanh.f32 %v5000_v49  ;;  %v4431_v43 = vadd.f32 1.0, %v7533_v38  ;;  %v10139_v49 = vld [vmem:[#allocation36_spill] sm:$0xff]  ;;  %v10142_v38 = vld [vmem:[#allocation7_spill] sm:$0xff] }
 0x2f5   : > { %v4903_v0 = vpop.permute.xlu0 %4902 }
 0x2f6   : > { %5100 = vrot.lane.b32.xlu1 %v5001_v40, %s7893_s30  ;;  %v4998_v16 = vadd.f32 %v4903_v0, %v4646_v28  ;;  %7548 = vtanh.f32 %v5001_v40  ;;  %v4651_v28 = vmul.f32 %v7537_v21, %v10139_v49  ;;  %v10140_v40 = vld [vmem:[#allocation10_spill] sm:$0xff]  ;;  %v7539_v0 = vpop.eup %7538  ;;  %v10143_v49 = vld [vmem:[#allocation44_spill] sm:$0xff] }
 0x2f7   : > { %v4905_v51 = vpop.permute.xlu1 %4904  ;;  %7550 = vrcp.f32 %v4432_v37  ;;  %v4310_v31 = vadd.f32 %v9050_v63, %v10140_v40  ;;  %v7541_v37 = vpop.eup %7540  ;;  %v10144_v40 = vld [vmem:[#allocation49_spill] sm:$0xff] }
 0x2f8   : > { %v4999_v54 = vadd.f32 %v4905_v51, %v4647_v1  ;;  %5094 = vrot.lane.b32.xlu0 %v4998_v16, %s7893_s30  ;;  %7552 = vrcp.f32 %v4433_v9  ;;  %v4313_v51 = vadd.f32 %v9052_v46, %v10141_v22  ;;  %v4311_v9 = vadd.f32 %v9059_v17, %v10142_v38 }
 0x2f9   : > { %v4915_v7 = vpop.permute.xlu0 %4914  ;;  %7554 = vtanh.f32 %v4998_v16  ;;  %v7543_v16 = vpop.eup %7542 }
 0x2fa   : > { %5096 = vrot.lane.b32.xlu1 %v4999_v54, %s7893_s30  ;;  %v5004_v41 = vadd.f32 %v4915_v7, %v4652_v42  ;;  %7556 = vtanh.f32 %v4999_v54  ;;  %v7545_v54 = vpop.eup %7544  ;;  %v6414_v42 = vmul.f32 -1.442695, %v4310_v31  ;;  %v6417_v39 = vmul.f32 -1.442695, %v4313_v51 }
 0x2fb   : > { %v4917_v8 = vpop.permute.xlu1 %4916  ;;  %7558 = vrcp.f32 %v4430_v18  ;;  %v6415_v7 = vmul.f32 -1.442695, %v4311_v9  ;;  %v4437_v12 = vadd.f32 1.0, %v7543_v16  ;;  %v4434_v51 = vadd.f32 1.0, %v7541_v37  ;;  %v10145_v16 = vld [vmem:[#allocation40_spill] sm:$0xff] }
 0x2fc   : > { %v5005_v52 = vadd.f32 %v4917_v8, %v4653_v11  ;;  %5106 = vrot.lane.b32.xlu0 %v5004_v41, %s7893_s30  ;;  %7560 = vrcp.f32 %v4431_v43  ;;  %v4435_v9 = vadd.f32 1.0, %v7545_v54 }
 0x2fd   : > { %v4911_v10 = vpop.permute.xlu0 %4910  ;;  %7562 = vpow2.f32 %v6416_v61 }
 0x2fe   : > { %5108 = vrot.lane.b32.xlu1 %v5005_v52, %s7893_s30  ;;  %v5002_v55 = vadd.f32 %v4911_v10, %v4650_v20  ;;  %v7547_v25 = vpop.eup %7546  ;;  %7564 = vpow2.f32 %v6414_v42  ;;  %v4436_v20 = vadd.f32 1.0, %v7539_v0 }
 0x2ff   : > { %v4913_v1 = vpop.permute.xlu1 %4912  ;;  %7566 = vpow2.f32 %v6417_v39 }
 0x300   : > { %v5003_v35 = vadd.f32 %v4913_v1, %v4651_v28  ;;  %5102 = vrot.lane.b32.xlu0 %v5002_v55, %s7893_s30  ;;  %v7549_v11 = vpop.eup %7548  ;;  %7568 = vpow2.f32 %v6415_v7 }
 0x301   : > { %v7551_v21 = vpop.eup %7550  ;;  %7570 = vtanh.f32 %v5004_v41  ;;  %v10147_v41 = vld [vmem:[#allocation43_spill] sm:$0xff] }
 0x302   : > { %5104 = vrot.lane.b32.xlu1 %v5003_v35, %s7893_s30  ;;  %v7553_v18 = vpop.eup %7552  ;;  %v4656_v28 = vmul.f32 %v7551_v21, %v10143_v49  ;;  %7572 = vtanh.f32 %v5005_v52  ;;  %v10148_v52 = vld [vmem:[#allocation15_spill] sm:$0xff]  ;;  %v10149_v21 = vld [vmem:[#allocation18_spill] sm:$0xff] }
 0x303   : > { %v7555_v5 = vpop.eup %7554  ;;  %v4657_v31 = vmul.f32 %v7553_v18, %v10144_v40  ;;  %7574 = vrcp.f32 %v4436_v20  ;;  %v4314_v37 = vadd.f32 %v9071_v32, %v10148_v52 }
 0x304   : > { %5642 = vrot.lane.b32.xlu0 %v7547_v25, %s7892_s9  ;;  %v7557_v26 = vpop.eup %7556  ;;  %7576 = vrcp.f32 %v4437_v12  ;;  %v10146_v25 = vld [vmem:[#allocation17_spill] sm:$0xff] }
 0x305   : > { %v7559_v10 = vpop.eup %7558  ;;  %v4316_v39 = vadd.f32 %v9069_v4, %v10146_v25  ;;  %7578 = vtanh.f32 %v5002_v55  ;;  %v10151_v25 = vld [vmem:[#allocation52_spill] sm:$0xff] }
 0x306   : > { %5644 = vrot.lane.b32.xlu1 %v7549_v11, %s7892_s9  ;;  %v7561_v1 = vpop.eup %7560  ;;  %v4654_v61 = vmul.f32 %v7559_v10, %v10145_v16  ;;  %7580 = vtanh.f32 %v5003_v35  ;;  %v6418_v35 = vmul.f32 -1.442695, %v4314_v37 }
 0x307   : > { %v4923_v8 = vpop.permute.xlu0 %4922  ;;  %v4655_v11 = vmul.f32 %v7561_v1, %v10147_v41  ;;  %v7563_v54 = vpop.eup %7562  ;;  %7582 = vrcp.f32 %v4434_v51 }
 0x308   : > { %5638 = vrot.lane.b32.xlu0 %v7555_v5, %s7892_s9  ;;  %v5008_v22 = vadd.f32 %v4923_v8, %v4656_v28  ;;  %v4317_v8 = vadd.f32 %v9075_v50, %v10149_v21  ;;  %v10150_v5 = vld [vmem:[#allocation16_spill] sm:$0xff]  ;;  %7584 = vrcp.f32 %v4435_v9  ;;  %v4440_v16 = vadd.f32 1.0, %v7563_v54 }
 0x309   : > { %v4925_v43 = vpop.permute.xlu1 %4924  ;;  %v4315_v20 = vadd.f32 %v9086_v59, %v10150_v5 }
 0x30a   : > { %5640 = vrot.lane.b32.xlu1 %v7557_v26, %s7892_s9  ;;  %v5009_v0 = vadd.f32 %v4925_v43, %v4657_v31  ;;  %v7565_v43 = vpop.eup %7564  ;;  %v6420_v26 = vmul.f32 -1.442695, %v4316_v39  ;;  %v6421_v28 = vmul.f32 -1.442695, %v4317_v8 }
 0x30b   : > { %v4919_v38 = vpop.permute.xlu0 %4918  ;;  %v7567_v55 = vpop.eup %7566  ;;  %v6419_v40 = vmul.f32 -1.442695, %v4315_v20  ;;  %v4438_v8 = vadd.f32 1.0, %v7565_v43 }
 0x30c   : > { %5114 = vrot.lane.b32.xlu0 %v5008_v22, %s7893_s30  ;;  %v5006_v7 = vadd.f32 %v4919_v38, %v4654_v61  ;;  %v7569_v12 = vpop.eup %7568  ;;  %7586 = vpow2.f32 %v6420_v26 }
 0x30d   : > { %v4921_v42 = vpop.permute.xlu1 %4920  ;;  %v7571_v49 = vpop.eup %7570  ;;  %7588 = vpow2.f32 %v6418_v35  ;;  %v4439_v20 = vadd.f32 1.0, %v7569_v12 }
 0x30e   : > { %5116 = vrot.lane.b32.xlu1 %v5009_v0, %s7893_s30  ;;  %v5007_v18 = vadd.f32 %v4921_v42, %v4655_v11  ;;  %v7573_v10 = vpop.eup %7572  ;;  %7590 = vpow2.f32 %v6421_v28  ;;  %v4441_v42 = vadd.f32 1.0, %v7567_v55  ;;  %v10152_v11 = vld [vmem:[#allocation54_spill] sm:$0xff] }
 0x30f   : > { %v7575_v31 = vpop.eup %7574  ;;  %v4931_v1 = vpop.permute.xlu0 %4930  ;;  %7592 = vpow2.f32 %v6419_v40  ;;  %v10153_v55 = vld [vmem:[#allocation50_spill] sm:$0xff] }
 0x310   : > { %5110 = vrot.lane.b32.xlu0 %v5006_v7, %s7893_s30  ;;  %v7577_v51 = vpop.eup %7576  ;;  %v4660_v39 = vmul.f32 %v7575_v31, %v10151_v25  ;;  %7594 = vtanh.f32 %v5008_v22  ;;  %v10155_v22 = vld [vmem:[#allocation51_spill] sm:$0xff]  ;;  %v10157_v31 = vld [vmem:[#allocation22_spill] sm:$0xff] }
 0x311   : > { %v4933_v38 = vpop.permute.xlu1 %4932  ;;  %v7579_v9 = vpop.eup %7578  ;;  %v4661_v52 = vmul.f32 %v7577_v51, %v10152_v11  ;;  %7596 = vtanh.f32 %v5009_v0  ;;  %v10156_v0 = vld [vmem:[#allocation19_spill] sm:$0xff] }
 0x312   : > { %5112 = vrot.lane.b32.xlu1 %v5007_v18, %s7893_s30  ;;  %v7581_v61 = vpop.eup %7580  ;;  %v5012_v21 = vadd.f32 %v4931_v1, %v4660_v39  ;;  %7598 = vrcp.f32 %v4440_v16  ;;  %v4318_v43 = vadd.f32 %v9095_v48, %v10156_v0  ;;  %v4321_v1 = vadd.f32 %v9103_v34, %v10157_v31  ;;  %v10161_v31 = vld [vmem:[#allocation26_spill] sm:$0xff] }
 0x313   : > { %v7583_v41 = vpop.eup %7582  ;;  %v5013_v54 = vadd.f32 %v4933_v38, %v4661_v52  ;;  %v4927_v5 = vpop.permute.xlu0 %4926  ;;  %7600 = vrcp.f32 %v4441_v42 }
 0x314   : > { %5650 = vrot.lane.b32.xlu0 %v7571_v49, %s7892_s9  ;;  %v7585_v37 = vpop.eup %7584  ;;  %v4658_v26 = vmul.f32 %v7583_v41, %v10153_v55  ;;  %v10154_v49 = vld [vmem:[#allocation21_spill] sm:$0xff]  ;;  %7602 = vtanh.f32 %v5006_v7  ;;  %v6425_v39 = vmul.f32 -1.442695, %v4321_v1  ;;  %v4324_v1 = vadd.f32 %v9118_v23, %v10161_v31  ;;  %v5051_v23 = vld [vmem:[%s10006_s4 + $0xa8] sm:$0xff] }
 0x315   : > { %v4320_v28 = vadd.f32 %v9088_v3, %v10154_v49  ;;  %7604 = vtanh.f32 %v5007_v18  ;;  %v6422_v18 = vmul.f32 -1.442695, %v4318_v43  ;;  %v10159_v49 = vld [vmem:[#allocation56_spill] sm:$0xff] }
 0x316   : > { %5652 = vrot.lane.b32.xlu1 %v7573_v10, %s7892_s9  ;;  %v4659_v10 = vmul.f32 %v7585_v37, %v10155_v22  ;;  %v5010_v40 = vadd.f32 %v4927_v5, %v4658_v26  ;;  %v7587_v12 = vpop.eup %7586  ;;  %7606 = vrcp.f32 %v4438_v8 }
 0x317   : > { %v4929_v35 = vpop.permute.xlu1 %4928  ;;  %v7589_v38 = vpop.eup %7588  ;;  %7608 = vrcp.f32 %v4439_v20  ;;  %v4444_v55 = vadd.f32 1.0, %v7587_v12 }
 0x318   : > { %5646 = vrot.lane.b32.xlu0 %v7579_v9, %s7892_s9  ;;  %v5011_v51 = vadd.f32 %v4929_v35, %v4659_v10  ;;  %v10158_v9 = vld [vmem:[#allocation20_spill] sm:$0xff]  ;;  %v7591_v7 = vpop.eup %7590  ;;  %v10160_v10 = vld [vmem:[#allocation57_spill] sm:$0xff] }
 0x319   : > { %v4319_v16 = vadd.f32 %v9105_v45, %v10158_v9  ;;  %v7593_v42 = vpop.eup %7592  ;;  %v4939_v37 = vpop.permute.xlu0 %4938  ;;  %v4445_v35 = vadd.f32 1.0, %v7591_v7  ;;  %v4442_v9 = vadd.f32 1.0, %v7589_v38  ;;  %v10165_v38 = vld [vmem:[#allocation23_spill] sm:$0xff] }
 0x31a   : > { %5648 = vrot.lane.b32.xlu1 %v7581_v61, %s7892_s9  ;;  %v6424_v61 = vmul.f32 -1.442695, %v4320_v28  ;;  %v7595_v25 = vpop.eup %7594 }
 0x31b   : > { %v7597_v41 = vpop.eup %7596  ;;  %v6423_v11 = vmul.f32 -1.442695, %v4319_v16  ;;  %v10162_v16 = vld [vmem:[#allocation28_spill] sm:$0xff] }
 0x31c   : > { %5122 = vrot.lane.b32.xlu0 %v5012_v21, %s7893_s30  ;;  %v7599_v52 = vpop.eup %7598  ;;  %7610 = vpow2.f32 %v6424_v61  ;;  %v4325_v7 = vadd.f32 %v9122_v60, %v10162_v16 }
 0x31d   : > { %v7601_v8 = vpop.eup %7600  ;;  %7612 = vpow2.f32 %v6422_v18  ;;  %v4664_v28 = vmul.f32 %v7599_v52, %v10159_v49  ;;  %v4935_v18 = vpop.permute.xlu0 %4934 }
 0x31e   : > { %5124 = vrot.lane.b32.xlu1 %v5013_v54, %s7893_s30  ;;  %v7603_v20 = vpop.eup %7602  ;;  %7614 = vpow2.f32 %v6425_v39  ;;  %v4665_v0 = vmul.f32 %v7601_v8, %v10160_v10  ;;  %v10163_v39 = vld [vmem:[#allocation53_spill] sm:$0xff] }
 0x31f   : > { %v7605_v26 = vpop.eup %7604  ;;  %7616 = vpow2.f32 %v6423_v11  ;;  %v5016_v12 = vadd.f32 %v4939_v37, %v4664_v28  ;;  %v10164_v11 = vld [vmem:[#allocation55_spill] sm:$0xff]  ;;  %v4322_v37 = vadd.f32 %v9120_v58, %v10165_v38 }
 0x320   : > { %5118 = vrot.lane.b32.xlu0 %v5010_v40, %s7893_s30  ;;  %v4941_v5 = vpop.permute.xlu1 %4940  ;;  %v7607_v22 = vpop.eup %7606  ;;  %7618 = vtanh.f32 %v5012_v21 }
 0x321   : > { %v7609_v43 = vpop.eup %7608  ;;  %7620 = vtanh.f32 %v5013_v54  ;;  %v5017_v61 = vadd.f32 %v4941_v5, %v4665_v0  ;;  %v6428_v54 = vmul.f32 -1.442695, %v4324_v1  ;;  %v6426_v28 = vmul.f32 -1.442695, %v4322_v37 }
 0x322   : > { %5120 = vrot.lane.b32.xlu1 %v5011_v51, %s7893_s30  ;;  %7622 = vrcp.f32 %v4444_v55  ;;  %v4663_v52 = vmul.f32 %v7609_v43, %v10164_v11  ;;  %v4947_v43 = vpop.permute.xlu0 %4946 }
 0x323   : > { %7624 = vrcp.f32 %v4445_v35 }
 0x324   : > { %5658 = vrot.lane.b32.xlu0 %v7595_v25, %s7892_s9  ;;  %v4443_v25 = vadd.f32 1.0, %v7593_v42  ;;  %v4937_v21 = vpop.permute.xlu1 %4936  ;;  %7626 = vtanh.f32 %v5010_v40  ;;  %v10166_v42 = vld [vmem:[#allocation25_spill] sm:$0xff] }
 0x325   : > { %7628 = vtanh.f32 %v5011_v51  ;;  %v4323_v55 = vadd.f32 %v9124_v29, %v10166_v42 }
 0x326   : > { %5660 = vrot.lane.b32.xlu1 %v7597_v41, %s7892_s9  ;;  %v4662_v41 = vmul.f32 %v7607_v22, %v10163_v39  ;;  %v7611_v5 = vpop.eup %7610  ;;  %7630 = vrcp.f32 %v4442_v9 }
 0x327   : > { %v7613_v35 = vpop.eup %7612  ;;  %7632 = vrcp.f32 %v4443_v25  ;;  %v6427_v51 = vmul.f32 -1.442695, %v4323_v55  ;;  %v4448_v16 = vadd.f32 1.0, %v7611_v5  ;;  %v10167_v25 = vld [vmem:[#allocation60_spill] sm:$0xff]  ;;  %v4943_v5 = vpop.permute.xlu0 %4942  ;;  %v10169_v55 = vld [vmem:[#allocation58_spill] sm:$0xff] }
 0x328   : > { %5654 = vrot.lane.b32.xlu0 %v7603_v20, %s7892_s9  ;;  %v5014_v8 = vadd.f32 %v4935_v18, %v4662_v41  ;;  %v6429_v20 = vmul.f32 -1.442695, %v4325_v7  ;;  %v7615_v40 = vpop.eup %7614  ;;  %7634 = vpow2.f32 %v6428_v54  ;;  %v4949_v1 = vpop.permute.xlu1 %4948  ;;  %v4446_v38 = vadd.f32 1.0, %v7613_v35 }
 0x329   : > { %v7617_v49 = vpop.eup %7616  ;;  %v4449_v18 = vadd.f32 1.0, %v7615_v40 }
 0x32a   : > { %5656 = vrot.lane.b32.xlu1 %v7605_v26, %s7892_s9  ;;  %v5015_v26 = vadd.f32 %v4937_v21, %v4663_v52  ;;  %v7619_v22 = vpop.eup %7618  ;;  %7636 = vpow2.f32 %v6429_v20  ;;  %v10168_v21 = vld [vmem:[#allocation61_spill] sm:$0xff]  ;;  %v4447_v42 = vadd.f32 1.0, %v7617_v49 }
 0x32b   : > { %v7621_v10 = vpop.eup %7620  ;;  %7638 = vpow2.f32 %v6426_v28 }
 0x32c   : > { %5130 = vrot.lane.b32.xlu0 %v5016_v12, %s7893_s30  ;;  %v7623_v0 = vpop.eup %7622  ;;  %7640 = vpow2.f32 %v6427_v51  ;;  %v4945_v28 = vpop.permute.xlu1 %4944 }
 0x32d   : > { %v7625_v31 = vpop.eup %7624  ;;  %v4668_v39 = vmul.f32 %v7623_v0, %v10167_v25  ;;  %7642 = vtanh.f32 %v5016_v12 }
 0x32e   : > { %5132 = vrot.lane.b32.xlu1 %v5017_v61, %s7893_s30  ;;  %v7627_v9 = vpop.eup %7626  ;;  %v4669_v11 = vmul.f32 %v7625_v31, %v10168_v21  ;;  %7644 = vtanh.f32 %v5017_v61  ;;  %v4955_v31 = vpop.permute.xlu0 %4954  ;;  %v10171_v21 = vld [vmem:[#allocation64_spill] sm:$0xff] }
 0x32f   : > { %v7629_v7 = vpop.eup %7628  ;;  %v9477_v54 = vadd.f32 %v4947_v43, %v4668_v39  ;;  %7646 = vrcp.f32 %v4448_v16 }
 0x330   : > { %5126 = vrot.lane.b32.xlu0 %v5014_v8, %s7893_s30  ;;  %v7631_v41 = vpop.eup %7630  ;;  %v9479_v37 = vadd.f32 %v4949_v1, %v4669_v11  ;;  %7648 = vrcp.f32 %v4449_v18 }
 0x331   : > { %v7633_v52 = vpop.eup %7632  ;;  %v4666_v40 = vmul.f32 %v7631_v41, %v10169_v55  ;;  %7650 = vtanh.f32 %v5014_v8 }
 0x332   : > { %5128 = vrot.lane.b32.xlu1 %v5015_v26, %s7893_s30  ;;  %v7635_v20 = vpop.eup %7634  ;;  %7652 = vtanh.f32 %v5015_v26 }
 0x333   : > { %v9487_v61 = vadd.f32 %v4943_v5, %v4666_v40  ;;  %v4452_v35 = vadd.f32 1.0, %v7635_v20  ;;  %7654 = vrcp.f32 %v4446_v38  ;;  %v10172_v38 = vld [vmem:[#allocation65_spill] sm:$0xff] }
 0x334   : > { %5666 = vrot.lane.b32.xlu0 %v7619_v22, %s7892_s9  ;;  %v7637_v12 = vpop.eup %7636  ;;  %v10170_v22 = vld [vmem:[#allocation59_spill] sm:$0xff]  ;;  %7656 = vrcp.f32 %v4447_v42  ;;  %v4951_v39 = vpop.permute.xlu0 %4950 }
 0x335   : > { %v4667_v51 = vmul.f32 %v7633_v52, %v10170_v22  ;;  %v4453_v0 = vadd.f32 1.0, %v7637_v12  ;;  %7658 = vrcp.f32 %v4452_v35  ;;  %v4957_v16 = vpop.permute.xlu1 %4956 }
 0x336   : > { %5668 = vrot.lane.b32.xlu1 %v7621_v10, %s7892_s9  ;;  %v7639_v10 = vpop.eup %7638 }
 0x337   : > { %v9489_v49 = vadd.f32 %v4945_v28, %v4667_v51  ;;  %v7641_v43 = vpop.eup %7640  ;;  %v4450_v1 = vadd.f32 1.0, %v7639_v10  ;;  %7660 = vrcp.f32 %v4453_v0  ;;  %v10173_v28 = vld [vmem:[#allocation62_spill] sm:$0xff]  ;;  %v10174_v51 = vld [vmem:[#allocation63_spill] sm:$0xff] }
 0x338   : > { %5662 = vrot.lane.b32.xlu0 %v7627_v9, %s7892_s9  ;;  %v7643_v8 = vpop.eup %7642  ;;  %v4451_v9 = vadd.f32 1.0, %v7641_v43 }
 0x339   : > { %v7645_v26 = vpop.eup %7644  ;;  %7662 = vrcp.f32 %v4450_v1  ;;  %v4953_v55 = vpop.permute.xlu1 %4952 }
 0x33a   : > { %5664 = vrot.lane.b32.xlu1 %v7629_v7, %s7892_s9  ;;  %v7647_v7 = vpop.eup %7646  ;;  %7664 = vrcp.f32 %v4451_v9  ;;  %v4963_v10 = vpop.permute.xlu0 %4962 }
 0x33b   : > { %v7649_v18 = vpop.eup %7648  ;;  %v4672_v11 = vmul.f32 %v7647_v7, %v10171_v21  ;;  %v10177_v21 = vld [vmem:[#allocation66_spill] sm:$0xff]  ;;  %7666 = vtanh.f32 %v9487_v61 }
 0x33c   : > { %5138 = vrot.lane.b32.xlu0 %v9477_v54, %s7893_s30  ;;  %v7651_v25 = vpop.eup %7650  ;;  %v4673_v5 = vmul.f32 %v7649_v18, %v10172_v38  ;;  %v10178_v38 = vld [vmem:[#allocation67_spill] sm:$0xff]  ;;  %7668 = vtanh.f32 %v9489_v49 }
 0x33d   : > { %v7653_v41 = vpop.eup %7652  ;;  %v9501_v42 = vadd.f32 %v4955_v31, %v4672_v11  ;;  %7670 = vtanh.f32 %v9477_v54 }
 0x33e   : > { %5140 = vrot.lane.b32.xlu1 %v9479_v37, %s7893_s30  ;;  %v7655_v52 = vpop.eup %7654  ;;  %v9503_v40 = vadd.f32 %v4957_v16, %v4673_v5  ;;  %v10176_v16 = vld [vmem:[#allocation69_spill] sm:$0xff]  ;;  %7672 = vtanh.f32 %v9479_v37 }
 0x33f   : > { %v7657_v20 = vpop.eup %7656  ;;  %v4670_v12 = vmul.f32 %v7655_v52, %v10173_v28  ;;  %v5032_v28 = vld [vmem:[%s10006_s4 + $0x10] sm:$0xff] }
 0x340   : > { %5134 = vrot.lane.b32.xlu0 %v9487_v61, %s7893_s30  ;;  %v7659_v22 = vpop.eup %7658  ;;  %v4671_v35 = vmul.f32 %v7657_v20, %v10174_v51  ;;  %v5059_v61 = vld [vmem:[%s10006_s4 + $0xe8] sm:$0xff] }
 0x341   : > { %v7661_v0 = vpop.eup %7660  ;;  %v9511_v43 = vadd.f32 %v4951_v39, %v4670_v12  ;;  %v4959_v39 = vpop.permute.xlu0 %4958  ;;  %v5033_v12 = vld [vmem:[%s10006_s4 + $0x18] sm:$0xff] }
 0x342   : > { %5136 = vrot.lane.b32.xlu1 %v9489_v49, %s7893_s30  ;;  %v9513_v31 = vadd.f32 %v4953_v55, %v4671_v35  ;;  %v4677_v7 = vmul.f32 %v7661_v0, %v10176_v16  ;;  %v5030_v0 = vld [vmem:[%s10006_s4] sm:$0xff] }
 0x343   : > { %v7663_v9 = vpop.eup %7662  ;;  %7674 = vtanh.f32 %v9511_v43 }
 0x344   : > { %5674 = vrot.lane.b32.xlu0 %v7643_v8, %s7892_s9  ;;  %v10175_v8 = vld [vmem:[#allocation68_spill] sm:$0xff]  ;;  %v7665_v18 = vpop.eup %7664  ;;  %v4674_v11 = vmul.f32 %v7663_v9, %v10177_v21  ;;  %7676 = vtanh.f32 %v9513_v31 }
 0x345   : > { %v4676_v1 = vmul.f32 %v7659_v22, %v10175_v8  ;;  %v4675_v5 = vmul.f32 %v7665_v18, %v10178_v38  ;;  %v5031_v8 = vld [vmem:[%s10006_s4 + $0x8] sm:$0xff]  ;;  %v5037_v18 = vld [vmem:[%s10006_s4 + $0x38] sm:$0xff]  ;;  %v5034_v38 = vld [vmem:[%s10006_s4 + $0x20] sm:$0xff]  ;;  %v7667_v54 = vpop.eup %7666  ;;  %7678 = vtanh.f32 %v9501_v42 }
 0x346   : > { %5676 = vrot.lane.b32.xlu1 %v7645_v26, %s7892_s9  ;;  %v4965_v26 = vpop.permute.xlu1 %4964  ;;  %v9531_v20 = vadd.f32 %v4959_v39, %v4674_v11  ;;  %7680 = vtanh.f32 %v9503_v40 }
 0x348   : > { %5670 = vrot.lane.b32.xlu0 %v7651_v25, %s7892_s9  ;;  %v9521_v25 = vadd.f32 %v4963_v10, %v4676_v1  ;;  %7682 = vtanh.f32 %v9531_v20 }
 0x34a   : > { %5672 = vrot.lane.b32.xlu1 %v7653_v41, %s7892_s9  ;;  %v9523_v41 = vadd.f32 %v4965_v26, %v4677_v7  ;;  %v4961_v52 = vpop.permute.xlu1 %4960  ;;  %v5036_v7 = vld [vmem:[%s10006_s4 + $0x30] sm:$0xff] }
 0x34b   : > { %v9533_v55 = vadd.f32 %v4961_v52, %v4675_v5  ;;  %v5035_v5 = vld [vmem:[%s10006_s4 + $0x28] sm:$0xff] }
 0x34c   : > { %5146 = vrot.lane.b32.xlu0 %v9501_v42, %s7893_s30 }
 0x34d   : > { %7684 = vtanh.f32 %v9533_v55 }
 0x34e   : > { %5148 = vrot.lane.b32.xlu1 %v9503_v40, %s7893_s30  ;;  %7686 = vtanh.f32 %v9521_v25 }
 0x34f   : > { %7688 = vtanh.f32 %v9523_v41 }
 0x350   : > { %5142 = vrot.lane.b32.xlu0 %v9511_v43, %s7893_s30 }
 0x352   : > { %5144 = vrot.lane.b32.xlu1 %v9513_v31, %s7893_s30 }
 0x354   : > { %5154 = vrot.lane.b32.xlu0 %v9521_v25, %s7893_s30 }
 0x356   : > { %5156 = vrot.lane.b32.xlu1 %v9523_v41, %s7893_s30 }
 0x358   : > { %5150 = vrot.lane.b32.xlu0 %v9531_v20, %s7893_s30 }
 0x35a   : > { %5152 = vrot.lane.b32.xlu1 %v9533_v55, %s7893_s30 }
 0x366   : > { %v5099_v22 = vpop.permute.xlu0 %5098 }
 0x367   : > { %v5192_v51 = vmul.f32 %v5099_v22, %v5032_v28  ;;  %5768 = vst.msk [vmem:[#allocation3 + $0x10] sm:$0xff] %vm514_vm2, %v5099_v22 }
 0x368   : > { %v5101_v35 = vpop.permute.xlu1 %5100 }
 0x369   : > { %v5193_v10 = vmul.f32 %v5101_v35, %v5033_v12  ;;  %5769 = vst.msk [vmem:[#allocation3 + $0x18] sm:$0xff] %vm514_vm2, %v5101_v35  ;;  %5258 = vrot.lane.b32.xlu0 %v5192_v51, %s7893_s30 }
 0x36a   : > { %v5095_v1 = vpop.permute.xlu0 %5094 }
 0x36b   : > { %5260 = vrot.lane.b32.xlu1 %v5193_v10, %s7893_s30  ;;  %v5190_v26 = vmul.f32 %v5095_v1, %v5030_v0  ;;  %5766 = vst.msk [vmem:[#allocation3] sm:$0xff] %vm514_vm2, %v5095_v1  ;;  %v5040_v1 = vld [vmem:[%s10006_s4 + $0x50] sm:$0xff] }
 0x36c   : > { %v5097_v9 = vpop.permute.xlu1 %5096 }
 0x36d   : > { %v5191_v16 = vmul.f32 %v5097_v9, %v5031_v8  ;;  %5767 = vst.msk [vmem:[#allocation3 + $0x8] sm:$0xff] %vm514_vm2, %v5097_v9  ;;  %5254 = vrot.lane.b32.xlu0 %v5190_v26, %s7893_s30  ;;  %v5041_v26 = vld [vmem:[%s10006_s4 + $0x58] sm:$0xff] }
 0x36e   : > { %v5107_v39 = vpop.permute.xlu0 %5106 }
 0x36f   : > { %5256 = vrot.lane.b32.xlu1 %v5191_v16, %s7893_s30  ;;  %v5196_v21 = vmul.f32 %v5107_v39, %v5036_v7  ;;  %5772 = vst.msk [vmem:[#allocation3 + $0x30] sm:$0xff] %vm514_vm2, %v5107_v39  ;;  %v5038_v39 = vld [vmem:[%s10006_s4 + $0x40] sm:$0xff] }
 0x370   : > { %v5109_v11 = vpop.permute.xlu1 %5108 }
 0x371   : > { %v5197_v52 = vmul.f32 %v5109_v11, %v5037_v18  ;;  %5773 = vst.msk [vmem:[#allocation3 + $0x38] sm:$0xff] %vm514_vm2, %v5109_v11  ;;  %5266 = vrot.lane.b32.xlu0 %v5196_v21, %s7893_s30  ;;  %v5039_v21 = vld [vmem:[%s10006_s4 + $0x48] sm:$0xff] }
 0x372   : > { %v5103_v28 = vpop.permute.xlu0 %5102 }
 0x373   : > { %5268 = vrot.lane.b32.xlu1 %v5197_v52, %s7893_s30  ;;  %v5194_v12 = vmul.f32 %v5103_v28, %v5034_v38  ;;  %5770 = vst.msk [vmem:[#allocation3 + $0x20] sm:$0xff] %vm514_vm2, %v5103_v28 }
 0x374   : > { %v5105_v22 = vpop.permute.xlu1 %5104 }
 0x375   : > { %v5195_v51 = vmul.f32 %v5105_v22, %v5035_v5  ;;  %5771 = vst.msk [vmem:[#allocation3 + $0x28] sm:$0xff] %vm514_vm2, %v5105_v22  ;;  %5262 = vrot.lane.b32.xlu0 %v5194_v12, %s7893_s30 }
 0x376   : > { %v9578_v35 = vpop.permute.xlu0 %5642 }
 0x377   : > { %5264 = vrot.lane.b32.xlu1 %v5195_v51, %s7893_s30 }
 0x378   : > { %v9581_v10 = vpop.permute.xlu1 %5644 }
 0x37a   : > { %v9583_v0 = vpop.permute.xlu0 %5638 }
 0x37c   : > { %v9585_v8 = vpop.permute.xlu1 %5640 }
 0x37e   : > { %v5115_v9 = vpop.permute.xlu0 %5114 }
 0x37f   : > { %v5200_v16 = vmul.f32 %v5115_v9, %v5040_v1  ;;  %5776 = vst.msk [vmem:[#allocation3 + $0x50] sm:$0xff] %vm514_vm2, %v5115_v9  ;;  %v5044_v1 = vld [vmem:[%s10006_s4 + $0x70] sm:$0xff] }
 0x380   : > { %v5117_v7 = vpop.permute.xlu1 %5116 }
 0x381   : > { %v5201_v18 = vmul.f32 %v5117_v7, %v5041_v26  ;;  %5777 = vst.msk [vmem:[#allocation3 + $0x58] sm:$0xff] %vm514_vm2, %v5117_v7  ;;  %5274 = vrot.lane.b32.xlu0 %v5200_v16, %s7893_s30  ;;  %v5045_v26 = vld [vmem:[%s10006_s4 + $0x78] sm:$0xff] }
 0x382   : > { %v5111_v11 = vpop.permute.xlu0 %5110 }
 0x383   : > { %5276 = vrot.lane.b32.xlu1 %v5201_v18, %s7893_s30  ;;  %v5198_v52 = vmul.f32 %v5111_v11, %v5038_v39  ;;  %5774 = vst.msk [vmem:[#allocation3 + $0x40] sm:$0xff] %vm514_vm2, %v5111_v11  ;;  %v5042_v39 = vld [vmem:[%s10006_s4 + $0x60] sm:$0xff] }
 0x384   : > { %v5113_v38 = vpop.permute.xlu1 %5112 }
 0x385   : > { %v5199_v5 = vmul.f32 %v5113_v38, %v5039_v21  ;;  %5775 = vst.msk [vmem:[#allocation3 + $0x48] sm:$0xff] %vm514_vm2, %v5113_v38  ;;  %5270 = vrot.lane.b32.xlu0 %v5198_v52, %s7893_s30  ;;  %v5043_v21 = vld [vmem:[%s10006_s4 + $0x68] sm:$0xff] }
 0x386   : > { %v9606_v28 = vpop.permute.xlu0 %5650 }
 0x387   : > { %5272 = vrot.lane.b32.xlu1 %v5199_v5, %s7893_s30 }
 0x388   : > { %v9609_v12 = vpop.permute.xlu1 %5652 }
 0x38a   : > { %v9611_v22 = vpop.permute.xlu0 %5646 }
 0x38c   : > { %v9613_v51 = vpop.permute.xlu1 %5648 }
 0x38e   : > { %v5123_v9 = vpop.permute.xlu0 %5122 }
 0x38f   : > { %v5204_v16 = vmul.f32 %v5123_v9, %v5044_v1  ;;  %5780 = vst.msk [vmem:[#allocation3 + $0x70] sm:$0xff] %vm514_vm2, %v5123_v9 }
 0x390   : > { %v5125_v7 = vpop.permute.xlu1 %5124 }
 0x391   : > { %v5205_v18 = vmul.f32 %v5125_v7, %v5045_v26  ;;  %5781 = vst.msk [vmem:[#allocation3 + $0x78] sm:$0xff] %vm514_vm2, %v5125_v7  ;;  %5282 = vrot.lane.b32.xlu0 %v5204_v16, %s7893_s30  ;;  %v5048_v7 = vld [vmem:[%s10006_s4 + $0x90] sm:$0xff] }
 0x392   : > { %v5119_v11 = vpop.permute.xlu0 %5118 }
 0x393   : > { %5284 = vrot.lane.b32.xlu1 %v5205_v18, %s7893_s30  ;;  %v5202_v52 = vmul.f32 %v5119_v11, %v5042_v39  ;;  %5778 = vst.msk [vmem:[#allocation3 + $0x60] sm:$0xff] %vm514_vm2, %v5119_v11  ;;  %v5049_v18 = vld [vmem:[%s10006_s4 + $0x98] sm:$0xff] }
 0x394   : > { %v5121_v38 = vpop.permute.xlu1 %5120 }
 0x395   : > { %v5203_v5 = vmul.f32 %v5121_v38, %v5043_v21  ;;  %5779 = vst.msk [vmem:[#allocation3 + $0x68] sm:$0xff] %vm514_vm2, %v5121_v38  ;;  %5278 = vrot.lane.b32.xlu0 %v5202_v52, %s7893_s30  ;;  %v5046_v38 = vld [vmem:[%s10006_s4 + $0x80] sm:$0xff] }
 0x396   : > { %v9634_v1 = vpop.permute.xlu0 %5658 }
 0x397   : > { %5280 = vrot.lane.b32.xlu1 %v5203_v5, %s7893_s30  ;;  %v5047_v5 = vld [vmem:[%s10006_s4 + $0x88] sm:$0xff] }
 0x398   : > { %v9637_v26 = vpop.permute.xlu1 %5660 }
 0x39a   : > { %v9639_v9 = vpop.permute.xlu0 %5654 }
 0x39c   : > { %v9641_v16 = vpop.permute.xlu1 %5656 }
 0x39e   : > { %v5131_v39 = vpop.permute.xlu0 %5130 }
 0x39f   : > { %v5208_v21 = vmul.f32 %v5131_v39, %v5048_v7  ;;  %5784 = vst.msk [vmem:[#allocation3 + $0x90] sm:$0xff] %vm514_vm2, %v5131_v39 }
 0x3a0   : > { %v5133_v11 = vpop.permute.xlu1 %5132 }
 0x3a1   : > { %v5209_v52 = vmul.f32 %v5133_v11, %v5049_v18  ;;  %5785 = vst.msk [vmem:[#allocation3 + $0x98] sm:$0xff] %vm514_vm2, %v5133_v11  ;;  %5290 = vrot.lane.b32.xlu0 %v5208_v21, %s7893_s30 }
 0x3a2   : > { %v5127_v29 = vpop.permute.xlu0 %5126 }
 0x3a3   : > { %5292 = vrot.lane.b32.xlu1 %v5209_v52, %s7893_s30  ;;  %v5206_v7 = vmul.f32 %v5127_v29, %v5046_v38  ;;  %5782 = vst.msk [vmem:[#allocation3 + $0x80] sm:$0xff] %vm514_vm2, %v5127_v29  ;;  %v5052_v29 = vld [vmem:[%s10006_s4 + $0xb0] sm:$0xff]  ;;  %v5053_v52 = vld [vmem:[%s10006_s4 + $0xb8] sm:$0xff] }
 0x3a4   : > { %v5129_v39 = vpop.permute.xlu1 %5128 }
 0x3a5   : > { %v5207_v18 = vmul.f32 %v5129_v39, %v5047_v5  ;;  %5783 = vst.msk [vmem:[#allocation3 + $0x88] sm:$0xff] %vm514_vm2, %v5129_v39  ;;  %5286 = vrot.lane.b32.xlu0 %v5206_v7, %s7893_s30 }
 0x3a6   : > { %v9662_v11 = vpop.permute.xlu0 %5666 }
 0x3a7   : > { %5288 = vrot.lane.b32.xlu1 %v5207_v18, %s7893_s30  ;;  %v5050_v18 = vld [vmem:[%s10006_s4 + $0xa0] sm:$0xff] }
 0x3a8   : > { %v9665_v21 = vpop.permute.xlu1 %5668 }
 0x3aa   : > { %v9667_v58 = vpop.permute.xlu0 %5662 }
 0x3ac   : > { %v9669_v60 = vpop.permute.xlu1 %5664 }
 0x3ae   : > { %v5139_v38 = vpop.permute.xlu0 %5138 }
 0x3af   : > { %v5212_v5 = vmul.f32 %v5139_v38, %v5052_v29  ;;  %5788 = vst.msk [vmem:[#allocation3 + $0xb0] sm:$0xff] %vm514_vm2, %v5139_v38 }
 0x3b0   : > { %v5141_v7 = vpop.permute.xlu1 %5140 }
 0x3b1   : > { %v5213_v39 = vmul.f32 %v5141_v7, %v5053_v52  ;;  %5789 = vst.msk [vmem:[#allocation3 + $0xb8] sm:$0xff] %vm514_vm2, %v5141_v7  ;;  %5298 = vrot.lane.b32.xlu0 %v5212_v5, %s7893_s30 }
 0x3b2   : > { %v5135_v45 = vpop.permute.xlu0 %5134 }
 0x3b3   : > { %5300 = vrot.lane.b32.xlu1 %v5213_v39, %s7893_s30  ;;  %v5210_v29 = vmul.f32 %v5135_v45, %v5050_v18  ;;  %5786 = vst.msk [vmem:[#allocation3 + $0xa0] sm:$0xff] %vm514_vm2, %v5135_v45  ;;  %v5056_v45 = vld [vmem:[%s10006_s4 + $0xd0] sm:$0xff] }
 0x3b4   : > { %v5137_v38 = vpop.permute.xlu1 %5136 }
 0x3b5   : > { %v5211_v52 = vmul.f32 %v5137_v38, %v5051_v23  ;;  %5787 = vst.msk [vmem:[#allocation3 + $0xa8] sm:$0xff] %vm514_vm2, %v5137_v38  ;;  %5294 = vrot.lane.b32.xlu0 %v5210_v29, %s7893_s30  ;;  %v5057_v23 = vld [vmem:[%s10006_s4 + $0xd8] sm:$0xff] }
 0x3b6   : > { %v9690_v7 = vpop.permute.xlu0 %5674 }
 0x3b7   : > { %5296 = vrot.lane.b32.xlu1 %v5211_v52, %s7893_s30  ;;  %v5054_v52 = vld [vmem:[%s10006_s4 + $0xc0] sm:$0xff] }
 0x3b8   : > { %v9693_v5 = vpop.permute.xlu1 %5676 }
 0x3ba   : > { %v9695_v48 = vpop.permute.xlu0 %5670 }
 0x3bb   : > { %10179 = vst [vmem:[#allocation11_spill] sm:$0xff] %v9695_v48 }
 0x3bc   : > { %v9697_v34 = vpop.permute.xlu1 %5672 }
 0x3bd   : > { %10180 = vst [vmem:[#allocation5_spill] sm:$0xff] %v9697_v34  ;;  %v5055_v34 = vld [vmem:[%s10006_s4 + $0xc8] sm:$0xff] }
 0x3be   : > { %v5147_v39 = vpop.permute.xlu0 %5146 }
 0x3bf   : > { %v5216_v18 = vmul.f32 %v5147_v39, %v5056_v45  ;;  %5792 = vst.msk [vmem:[#allocation3 + $0xd0] sm:$0xff] %vm514_vm2, %v5147_v39 }
 0x3c0   : > { %v5149_v29 = vpop.permute.xlu1 %5148 }
 0x3c1   : > { %v5217_v38 = vmul.f32 %v5149_v29, %v5057_v23  ;;  %5793 = vst.msk [vmem:[#allocation3 + $0xd8] sm:$0xff] %vm514_vm2, %v5149_v29  ;;  %5306 = vrot.lane.b32.xlu0 %v5216_v18, %s7893_s30  ;;  %v5060_v29 = vld [vmem:[%s10006_s4 + $0xf0] sm:$0xff]  ;;  %v5061_v18 = vld [vmem:[%s10006_s4 + $0xf8] sm:$0xff] }
 0x3c2   : > { %v5143_v48 = vpop.permute.xlu0 %5142 }
 0x3c3   : > { %5308 = vrot.lane.b32.xlu1 %v5217_v38, %s7893_s30  ;;  %v5214_v45 = vmul.f32 %v5143_v48, %v5054_v52  ;;  %5790 = vst.msk [vmem:[#allocation3 + $0xc0] sm:$0xff] %vm514_vm2, %v5143_v48 }
 0x3c4   : > { %v5145_v39 = vpop.permute.xlu1 %5144 }
 0x3c5   : > { %v5215_v23 = vmul.f32 %v5145_v39, %v5055_v34  ;;  %5791 = vst.msk [vmem:[#allocation3 + $0xc8] sm:$0xff] %vm514_vm2, %v5145_v39  ;;  %5302 = vrot.lane.b32.xlu0 %v5214_v45, %s7893_s30  ;;  %v5058_v45 = vld [vmem:[%s10006_s4 + $0xe0] sm:$0xff] }
 0x3c6   : > { %v5155_v38 = vpop.permute.xlu0 %5154 }
 0x3c7   : > { %5304 = vrot.lane.b32.xlu1 %v5215_v23, %s7893_s30  ;;  %v5220_v34 = vmul.f32 %v5155_v38, %v5060_v29  ;;  %5796 = vst.msk [vmem:[#allocation3 + $0xf0] sm:$0xff] %vm514_vm2, %v5155_v38 }
 0x3c8   : > { %v5157_v48 = vpop.permute.xlu1 %5156 }
 0x3c9   : > { %v5221_v52 = vmul.f32 %v5157_v48, %v5061_v18  ;;  %5797 = vst.msk [vmem:[#allocation3 + $0xf8] sm:$0xff] %vm514_vm2, %v5157_v48  ;;  %5314 = vrot.lane.b32.xlu0 %v5220_v34, %s7893_s30  ;;  %v7669_v18 = vpop.eup %7668 }
 0x3ca   : > { %v5151_v49 = vpop.permute.xlu0 %5150  ;;  %v7671_v37 = vpop.eup %7670 }
 0x3cb   : > { %5316 = vrot.lane.b32.xlu1 %v5221_v52, %s7893_s30  ;;  %v5218_v39 = vmul.f32 %v5151_v49, %v5058_v45  ;;  %5794 = vst.msk [vmem:[#allocation3 + $0xe0] sm:$0xff] %vm514_vm2, %v5151_v49  ;;  %v7673_v38 = vpop.eup %7672 }
 0x3cc   : > { %v5153_v23 = vpop.permute.xlu1 %5152  ;;  %v7675_v43 = vpop.eup %7674 }
 0x3cd   : > { %v5219_v29 = vmul.f32 %v5153_v23, %v5059_v61  ;;  %5795 = vst.msk [vmem:[#allocation3 + $0xe8] sm:$0xff] %vm514_vm2, %v5153_v23  ;;  %5310 = vrot.lane.b32.xlu0 %v5218_v39, %s7893_s30  ;;  %v7677_v31 = vpop.eup %7676 }
 0x3ce   : > { %v7679_v40 = vpop.eup %7678 }
 0x3cf   : > { %5312 = vrot.lane.b32.xlu1 %v5219_v29, %s7893_s30  ;;  %v7681_v20 = vpop.eup %7680 }
 0x3d0   : > { %v7683_v25 = vpop.eup %7682 }
 0x3d1   : > { %5678 = vrot.lane.b32.xlu0 %v7667_v54, %s7892_s9  ;;  %v7685_v39 = vpop.eup %7684 }
 0x3d2   : > { %v7687_v54 = vpop.eup %7686 }
 0x3d3   : > { %5680 = vrot.lane.b32.xlu1 %v7669_v18, %s7892_s9 }
 0x3d5   : > { %5682 = vrot.lane.b32.xlu0 %v7671_v37, %s7892_s9 }
 0x3d7   : > { %5684 = vrot.lane.b32.xlu1 %v7673_v38, %s7892_s9  ;;  %v7689_v38 = vpop.eup %7688 }
 0x3d9   : > { %5686 = vrot.lane.b32.xlu0 %v7675_v43, %s7892_s9 }
 0x3db   : > { %5688 = vrot.lane.b32.xlu1 %v7677_v31, %s7892_s9  ;;  %v5259_v42 = vpop.permute.xlu0 %5258 }
 0x3dc   : > { %v5352_v34 = vadd.f32 %v8949_v33, %v5259_v42 }
 0x3dd   : > { %v5261_v48 = vpop.permute.xlu1 %5260  ;;  %5690 = vrot.lane.b32.xlu0 %v7679_v40, %s7892_s9 }
 0x3de   : > { %v5353_v52 = vadd.f32 %v8956_v14, %v5261_v48  ;;  %v6432_v55 = vmul.f32 -1.442695, %v5352_v34 }
 0x3df   : > { %5692 = vrot.lane.b32.xlu1 %v7681_v20, %s7892_s9  ;;  %v5255_v61 = vpop.permute.xlu0 %5254 }
 0x3e0   : > { %v6433_v45 = vmul.f32 -1.442695, %v5353_v52  ;;  %7690 = vpow2.f32 %v6432_v55  ;;  %v5350_v49 = vadd.f32 %v8953_v62, %v5255_v61 }
 0x3e1   : > { %v5257_v41 = vpop.permute.xlu1 %5256  ;;  %5694 = vrot.lane.b32.xlu0 %v7683_v25, %s7892_s9 }
 0x3e2   : > { %7692 = vpow2.f32 %v6433_v45  ;;  %v5351_v33 = vadd.f32 %v8959_v30, %v5257_v41  ;;  %v6430_v23 = vmul.f32 -1.442695, %v5350_v49 }
 0x3e3   : > { %5696 = vrot.lane.b32.xlu1 %v7685_v39, %s7892_s9  ;;  %v5267_v29 = vpop.permute.xlu0 %5266 }
 0x3e4   : > { %v6431_v14 = vmul.f32 -1.442695, %v5351_v33  ;;  %7694 = vpow2.f32 %v6430_v23  ;;  %v5356_v18 = vadd.f32 %v8970_v57, %v5267_v29 }
 0x3e5   : > { %v5269_v37 = vpop.permute.xlu1 %5268  ;;  %5698 = vrot.lane.b32.xlu0 %v7687_v54, %s7892_s9  ;;  %v5960_v54 = vld [vmem:[#allocation2 + $0x10] sm:$0x3] }
 0x3e6   : > { %7696 = vpow2.f32 %v6431_v14  ;;  %v5357_v62 = vadd.f32 %v8974_v24, %v5269_v37  ;;  %v6436_v43 = vmul.f32 -1.442695, %v5356_v18  ;;  %v6011_v18 = vld [vmem:[#allocation2 + $0x1a8] sm:$0x3]  ;;  %6015 = vst.msk [vmem:[%s7966_s14 + $0x10] sm:$0x3] %vm6014_vm3, %v5960_v54 }
 0x3e7   : > { %5700 = vrot.lane.b32.xlu1 %v7689_v38, %s7892_s9  ;;  %v5263_v31 = vpop.permute.xlu0 %5262  ;;  %6066 = vst.msk [vmem:[%s7966_s14 + $0x1a8] sm:$0x3] %vm6014_vm3, %v6011_v18 }
 0x3e8   : > { %v6437_v30 = vmul.f32 -1.442695, %v5357_v62  ;;  %7698 = vpow2.f32 %v6436_v43  ;;  %v5354_v42 = vadd.f32 %v8972_v47, %v5263_v31 }
 0x3e9   : > { %v5265_v40 = vpop.permute.xlu1 %5264 }
 0x3ea   : > { %7700 = vpow2.f32 %v6437_v30  ;;  %v5355_v34 = vadd.f32 %v8977_v36, %v5265_v40  ;;  %v7691_v57 = vpop.eup %7690  ;;  %v6434_v48 = vmul.f32 -1.442695, %v5354_v42 }
 0x3eb   : > { %v5480_v52 = vadd.f32 1.0, %v7691_v57 }
 0x3ec   : > { %v7693_v20 = vpop.eup %7692  ;;  %v6435_v55 = vmul.f32 -1.442695, %v5355_v34  ;;  %7702 = vpow2.f32 %v6434_v48 }
 0x3ed   : > { %v5481_v24 = vadd.f32 1.0, %v7693_v20  ;;  %7704 = vrcp.f32 %v5480_v52 }
 0x3ee   : > { %v7695_v45 = vpop.eup %7694 }
 0x3ef   : > { %7706 = vrcp.f32 %v5481_v24  ;;  %v5478_v25 = vadd.f32 1.0, %v7695_v45 }
 0x3f0   : > { %v7697_v61 = vpop.eup %7696  ;;  %7708 = vpow2.f32 %v6435_v55 }
 0x3f1   : > { %v5479_v49 = vadd.f32 1.0, %v7697_v61  ;;  %7710 = vrcp.f32 %v5478_v25 }
 0x3f2   : > { %v7699_v47 = vpop.eup %7698 }
 0x3f3   : > { %7712 = vrcp.f32 %v5479_v49  ;;  %v5484_v41 = vadd.f32 1.0, %v7699_v47  ;;  %v5275_v39 = vpop.permute.xlu0 %5274 }
 0x3f4   : > { %v7701_v36 = vpop.eup %7700  ;;  %v5360_v23 = vadd.f32 %v8986_v15, %v5275_v39 }
 0x3f5   : > { %v5485_v33 = vadd.f32 1.0, %v7701_v36  ;;  %v5277_v14 = vpop.permute.xlu1 %5276  ;;  %7714 = vrcp.f32 %v5484_v41 }
 0x3f6   : > { %v5361_v29 = vadd.f32 %v9003_v19, %v5277_v14  ;;  %v7703_v37 = vpop.eup %7702  ;;  %v6440_v38 = vmul.f32 -1.442695, %v5360_v23 }
 0x3f7   : > { %7716 = vrcp.f32 %v5485_v33  ;;  %v7705_v62 = vpop.eup %7704  ;;  %v5482_v43 = vadd.f32 1.0, %v7703_v37  ;;  %v5271_v31 = vpop.permute.xlu0 %5270 }
 0x3f8   : > { %v6441_v30 = vmul.f32 -1.442695, %v5361_v29  ;;  %7718 = vpow2.f32 %v6440_v38  ;;  %v5358_v15 = vadd.f32 %v8994_v6, %v5271_v31  ;;  %v5736_v19 = vmul.f32 %v7705_v62, %v9578_v35 }
 0x3f9   : > { %v7707_v42 = vpop.eup %7706  ;;  %v5273_v40 = vpop.permute.xlu1 %5272  ;;  %7720 = vrcp.f32 %v5482_v43 }
 0x3fa   : > { %v7709_v34 = vpop.eup %7708  ;;  %v5359_v57 = vadd.f32 %v10123_v27, %v5273_v40  ;;  %v5737_v48 = vmul.f32 %v7707_v42, %v9581_v10  ;;  %7722 = vpow2.f32 %v6441_v30  ;;  %v6438_v52 = vmul.f32 -1.442695, %v5358_v15  ;;  %5834 = vrot.lane.b32.xlu0 %v5736_v19, %s7891_s19 }
 0x3fb   : > { %v5483_v20 = vadd.f32 1.0, %v7709_v34  ;;  %v7711_v55 = vpop.eup %7710 }
 0x3fc   : > { %v6439_v24 = vmul.f32 -1.442695, %v5359_v57  ;;  %5836 = vrot.lane.b32.xlu1 %v5737_v48, %s7891_s19  ;;  %v5734_v6 = vmul.f32 %v7711_v55, %v9583_v0 }
 0x3fd   : > { %v7713_v45 = vpop.eup %7712  ;;  %7724 = vrcp.f32 %v5483_v20 }
 0x3fe   : > { %7726 = vpow2.f32 %v6438_v52  ;;  %v5735_v35 = vmul.f32 %v7713_v45, %v9585_v8  ;;  %5830 = vrot.lane.b32.xlu0 %v5734_v6, %s7891_s19 }
 0x3ff   : > { %7728 = vpow2.f32 %v6439_v24  ;;  %v7715_v27 = vpop.eup %7714 }
 0x400   : > { %5832 = vrot.lane.b32.xlu1 %v5735_v35, %s7891_s19  ;;  %v5740_v61 = vmul.f32 %v7715_v27, %v9606_v28 }
 0x401   : > { %v7717_v10 = vpop.eup %7716 }
 0x402   : > { %v5741_v25 = vmul.f32 %v7717_v10, %v9609_v12  ;;  %v7719_v49 = vpop.eup %7718  ;;  %5842 = vrot.lane.b32.xlu0 %v5740_v61, %s7891_s19 }
 0x403   : > { %v7721_v47 = vpop.eup %7720  ;;  %v5488_v36 = vadd.f32 1.0, %v7719_v49  ;;  %v5283_v0 = vpop.permute.xlu0 %5282 }
 0x404   : > { %5844 = vrot.lane.b32.xlu1 %v5741_v25, %s7891_s19  ;;  %v7723_v8 = vpop.eup %7722  ;;  %v5364_v41 = vadd.f32 %v10125_v2, %v5283_v0  ;;  %v5738_v33 = vmul.f32 %v7721_v47, %v9611_v22 }
 0x405   : > { %v5285_v39 = vpop.permute.xlu1 %5284  ;;  %7730 = vrcp.f32 %v5488_v36  ;;  %v5489_v23 = vadd.f32 1.0, %v7723_v8 }
 0x406   : > { %v5365_v28 = vadd.f32 %v10128_v44, %v5285_v39  ;;  %v6444_v12 = vmul.f32 -1.442695, %v5364_v41  ;;  %5838 = vrot.lane.b32.xlu0 %v5738_v33, %s7891_s19 }
 0x407   : > { %v7725_v14 = vpop.eup %7724  ;;  %7732 = vrcp.f32 %v5489_v23  ;;  %v5279_v18 = vpop.permute.xlu0 %5278 }
 0x408   : > { %v7727_v29 = vpop.eup %7726  ;;  %v6445_v54 = vmul.f32 -1.442695, %v5365_v28  ;;  %v5739_v37 = vmul.f32 %v7725_v14, %v9613_v51  ;;  %7734 = vpow2.f32 %v6444_v12  ;;  %v5362_v2 = vadd.f32 %v9024_v53, %v5279_v18 }
 0x409   : > { %v7729_v38 = vpop.eup %7728  ;;  %v5486_v62 = vadd.f32 1.0, %v7727_v29  ;;  %v5281_v22 = vpop.permute.xlu1 %5280 }
 0x40a   : > { %v5487_v43 = vadd.f32 1.0, %v7729_v38  ;;  %7736 = vpow2.f32 %v6445_v54  ;;  %5840 = vrot.lane.b32.xlu1 %v5739_v37, %s7891_s19  ;;  %v5363_v44 = vadd.f32 %v10130_v56, %v5281_v22  ;;  %v6442_v30 = vmul.f32 -1.442695, %v5362_v2 }
 0x40b   : > { %7738 = vrcp.f32 %v5486_v62 }
 0x40c   : > { %7740 = vrcp.f32 %v5487_v43  ;;  %v6443_v31 = vmul.f32 -1.442695, %v5363_v44 }
 0x40d   : > { %7742 = vpow2.f32 %v6442_v30 }
 0x40e   : > { %7744 = vpow2.f32 %v6443_v31 }
 0x40f   : > { %v7731_v42 = vpop.eup %7730 }
 0x410   : > { %v5744_v51 = vmul.f32 %v7731_v42, %v9634_v1 }
 0x411   : > { %v7733_v15 = vpop.eup %7732 }
 0x412   : > { %v7735_v40 = vpop.eup %7734  ;;  %5850 = vrot.lane.b32.xlu0 %v5744_v51, %s7891_s19  ;;  %v5745_v53 = vmul.f32 %v7733_v15, %v9637_v26 }
 0x413   : > { %v5492_v34 = vadd.f32 1.0, %v7735_v40  ;;  %v5291_v57 = vpop.permute.xlu0 %5290 }
 0x414   : > { %v7737_v19 = vpop.eup %7736  ;;  %v5368_v20 = vadd.f32 %v9045_v13, %v5291_v57  ;;  %5852 = vrot.lane.b32.xlu1 %v5745_v53, %s7891_s19  ;;  %v10181_v53 = vld [vmem:[#allocation11_spill] sm:$0xff]  ;;  %v10182_v57 = vld [vmem:[#allocation41_spill] sm:$0xff] }
 0x415   : > { %v7739_v48 = vpop.eup %7738  ;;  %v5493_v56 = vadd.f32 1.0, %v7737_v19  ;;  %v5293_v52 = vpop.permute.xlu1 %5292  ;;  %7746 = vrcp.f32 %v5492_v34 }
 0x416   : > { %v7741_v55 = vpop.eup %7740  ;;  %v5369_v1 = vadd.f32 %v9052_v46, %v5293_v52  ;;  %v5742_v24 = vmul.f32 %v7739_v48, %v9639_v9  ;;  %v6448_v6 = vmul.f32 -1.442695, %v5368_v20 }
 0x417   : > { %v7743_v45 = vpop.eup %7742  ;;  %7748 = vrcp.f32 %v5493_v56  ;;  %v5743_v26 = vmul.f32 %v7741_v55, %v9641_v16  ;;  %v5287_v13 = vpop.permute.xlu0 %5286  ;;  %v10183_v56 = vld [vmem:[#allocation5_spill] sm:$0xff] }
 0x418   : > { %v7745_v35 = vpop.eup %7744  ;;  %v5490_v27 = vadd.f32 1.0, %v7743_v45  ;;  %v6449_v10 = vmul.f32 -1.442695, %v5369_v1  ;;  %5846 = vrot.lane.b32.xlu0 %v5742_v24, %s7891_s19  ;;  %7750 = vpow2.f32 %v6448_v6  ;;  %v5366_v25 = vadd.f32 %v9050_v63, %v5287_v13 }
 0x419   : > { %v5491_v61 = vadd.f32 1.0, %v7745_v35  ;;  %5848 = vrot.lane.b32.xlu1 %v5743_v26, %s7891_s19  ;;  %v5289_v46 = vpop.permute.xlu1 %5288 }
 0x41a   : > { %7752 = vrcp.f32 %v5490_v27  ;;  %v5367_v9 = vadd.f32 %v9059_v17, %v5289_v46  ;;  %v6446_v49 = vmul.f32 -1.442695, %v5366_v25 }
 0x41b   : > { %7754 = vrcp.f32 %v5491_v61 }
 0x41c   : > { %7756 = vpow2.f32 %v6449_v10  ;;  %v6447_v16 = vmul.f32 -1.442695, %v5367_v9  ;;  %v10185_v10 = vld [vmem:[#allocation42_spill] sm:$0xff] }
 0x41d   : > { %7758 = vpow2.f32 %v6446_v49  ;;  %v10186_v49 = vld [vmem:[#allocation45_spill] sm:$0xff] }
 0x41e   : > { %7760 = vpow2.f32 %v6447_v16 }
 0x41f   : > { %v7747_v47 = vpop.eup %7746 }
 0x420   : > { %v5748_v0 = vmul.f32 %v7747_v47, %v9662_v11 }
 0x421   : > { %v7749_v36 = vpop.eup %7748 }
 0x422   : > { %v5749_v8 = vmul.f32 %v7749_v36, %v9665_v21  ;;  %v7751_v41 = vpop.eup %7750  ;;  %5858 = vrot.lane.b32.xlu0 %v5748_v0, %s7891_s19  ;;  %v10187_v36 = vld [vmem:[#allocation47_spill] sm:$0xff] }
 0x423   : > { %v5496_v39 = vadd.f32 1.0, %v7751_v41  ;;  %v5299_v33 = vpop.permute.xlu0 %5298 }
 0x424   : > { %v7753_v63 = vpop.eup %7752  ;;  %5860 = vrot.lane.b32.xlu1 %v5749_v8, %s7891_s19  ;;  %v5372_v23 = vadd.f32 %v9069_v4, %v5299_v33 }
 0x425   : > { %v7755_v17 = vpop.eup %7754  ;;  %v5301_v28 = vpop.permute.xlu1 %5300  ;;  %v5746_v14 = vmul.f32 %v7753_v63, %v9667_v58  ;;  %7762 = vrcp.f32 %v5496_v39  ;;  %v10188_v39 = vld [vmem:[#allocation46_spill] sm:$0xff] }
 0x426   : > { %v7757_v12 = vpop.eup %7756  ;;  %v5373_v11 = vadd.f32 %v9075_v50, %v5301_v28  ;;  %v5747_v21 = vmul.f32 %v7755_v17, %v9669_v60  ;;  %v6452_v38 = vmul.f32 -1.442695, %v5372_v23  ;;  %v10189_v23 = vld [vmem:[#allocation48_spill] sm:$0xff] }
 0x427   : > { %v7759_v29 = vpop.eup %7758  ;;  %v5497_v54 = vadd.f32 1.0, %v7757_v12  ;;  %5854 = vrot.lane.b32.xlu0 %v5746_v14, %s7891_s19  ;;  %v5295_v62 = vpop.permute.xlu0 %5294 }
 0x428   : > { %v7761_v18 = vpop.eup %7760  ;;  %v5494_v37 = vadd.f32 1.0, %v7759_v29  ;;  %5856 = vrot.lane.b32.xlu1 %v5747_v21, %s7891_s19  ;;  %v6453_v2 = vmul.f32 -1.442695, %v5373_v11  ;;  %v5370_v58 = vadd.f32 %v9071_v32, %v5295_v62 }
 0x429   : > { %7764 = vrcp.f32 %v5497_v54  ;;  %v5495_v4 = vadd.f32 1.0, %v7761_v18  ;;  %v5297_v22 = vpop.permute.xlu1 %5296 }
 0x42a   : > { %7766 = vrcp.f32 %v5494_v37  ;;  %v5371_v50 = vadd.f32 %v9086_v59, %v5297_v22  ;;  %v6450_v60 = vmul.f32 -1.442695, %v5370_v58 }
 0x42b   : > { %7768 = vrcp.f32 %v5495_v4 }
 0x42c   : > { %7770 = vpow2.f32 %v6452_v38  ;;  %v6451_v43 = vmul.f32 -1.442695, %v5371_v50 }
 0x42d   : > { %7772 = vpow2.f32 %v6453_v2 }
 0x42e   : > { %7774 = vpow2.f32 %v6450_v60 }
 0x42f   : > { %v7763_v44 = vpop.eup %7762  ;;  %7776 = vpow2.f32 %v6451_v43 }
 0x430   : > { %v5752_v30 = vmul.f32 %v7763_v44, %v9690_v7 }
 0x432   : > { %5866 = vrot.lane.b32.xlu0 %v5752_v30, %s7891_s19 }
 0x433   : > { %v7765_v31 = vpop.eup %7764  ;;  %v5307_v51 = vpop.permute.xlu0 %5306 }
 0x434   : > { %v7767_v42 = vpop.eup %7766  ;;  %v5753_v32 = vmul.f32 %v7765_v31, %v9693_v5  ;;  %v5376_v59 = vadd.f32 %v9088_v3, %v5307_v51  ;;  %v10184_v3 = vld [vmem:[#allocation38_spill] sm:$0xff] }
 0x435   : > { %v7769_v15 = vpop.eup %7768  ;;  %v5309_v40 = vpop.permute.xlu1 %5308  ;;  %v5750_v19 = vmul.f32 %v7767_v42, %v10181_v53 }
 0x436   : > { %v7771_v34 = vpop.eup %7770  ;;  %5868 = vrot.lane.b32.xlu1 %v5753_v32, %s7891_s19  ;;  %v5377_v48 = vadd.f32 %v10182_v57, %v5309_v40  ;;  %v5751_v7 = vmul.f32 %v7769_v15, %v10183_v56  ;;  %v6456_v45 = vmul.f32 -1.442695, %v5376_v59 }
 0x437   : > { %v7773_v20 = vpop.eup %7772  ;;  %v5500_v52 = vadd.f32 1.0, %v7771_v34  ;;  %5862 = vrot.lane.b32.xlu0 %v5750_v19, %s7891_s19  ;;  %v5303_v5 = vpop.permute.xlu0 %5302 }
 0x438   : > { %v7775_v55 = vpop.eup %7774  ;;  %v5501_v1 = vadd.f32 1.0, %v7773_v20  ;;  %v5374_v6 = vadd.f32 %v10184_v3, %v5303_v5  ;;  %v6457_v27 = vmul.f32 -1.442695, %v5377_v48 }
 0x439   : > { %v5498_v24 = vadd.f32 1.0, %v7775_v55  ;;  %v5305_v26 = vpop.permute.xlu1 %5304  ;;  %v7777_v35 = vpop.eup %7776  ;;  %7778 = vrcp.f32 %v5500_v52 }
 0x43a   : > { %5864 = vrot.lane.b32.xlu1 %v5751_v7, %s7891_s19  ;;  %v5375_v13 = vadd.f32 %v10185_v10, %v5305_v26  ;;  %7780 = vrcp.f32 %v5501_v1  ;;  %v6454_v61 = vmul.f32 -1.442695, %v5374_v6  ;;  %v5499_v9 = vadd.f32 1.0, %v7777_v35 }
 0x43b   : > { %7782 = vrcp.f32 %v5498_v24  ;;  %v5315_v46 = vpop.permute.xlu0 %5314 }
 0x43c   : > { %v6455_v25 = vmul.f32 -1.442695, %v5375_v13  ;;  %7784 = vpow2.f32 %v6456_v45  ;;  %v5380_v16 = vadd.f32 %v10186_v49, %v5315_v46 }
 0x43d   : > { %v5317_v47 = vpop.permute.xlu1 %5316  ;;  %7786 = vpow2.f32 %v6457_v27 }
 0x43e   : > { %v5381_v0 = vadd.f32 %v10187_v36, %v5317_v47  ;;  %7788 = vpow2.f32 %v6454_v61  ;;  %v6460_v8 = vmul.f32 -1.442695, %v5380_v16  ;;  %v5958_v16 = vld [vmem:[#allocation2] sm:$0xff]  ;;  %v5959_v47 = vld [vmem:[#allocation2 + $0x8] sm:$0xff]  ;;  %v6009_v36 = vld [vmem:[#allocation2 + $0x198] sm:$0xff] }
 0x43f   : > { %7790 = vpow2.f32 %v6455_v25  ;;  %v5311_v63 = vpop.permute.xlu0 %5310  ;;  %6012 = vst.msk [vmem:[%s7966_s14] sm:$0xff] %vm514_vm2, %v5958_v16  ;;  %6013 = vst.msk [vmem:[%s7966_s14 + $0x8] sm:$0xff] %vm514_vm2, %v5959_v47 }
 0x440   : > { %v6461_v41 = vmul.f32 -1.442695, %v5381_v0  ;;  %7792 = vrcp.f32 %v5499_v9  ;;  %v5378_v33 = vadd.f32 %v10188_v39, %v5311_v63  ;;  %v6010_v0 = vld [vmem:[#allocation2 + $0x1a0] sm:$0xff]  ;;  %6064 = vst.msk [vmem:[%s7966_s14 + $0x198] sm:$0xff] %vm514_vm2, %v6009_v36 }
 0x441   : > { %v5313_v17 = vpop.permute.xlu1 %5312  ;;  %7794 = vpow2.f32 %v6460_v8  ;;  %6065 = vst.msk [vmem:[%s7966_s14 + $0x1a0] sm:$0xff] %vm514_vm2, %v6010_v0 }
 0x442   : > { %v5379_v28 = vadd.f32 %v10189_v23, %v5313_v17  ;;  %v6458_v14 = vmul.f32 -1.442695, %v5378_v33  ;;  %7796 = vpow2.f32 %v6461_v41 }
 0x443   : > { %v7779_v12 = vpop.eup %7778  ;;  %v5679_v21 = vpop.permute.xlu0 %5678 }
 0x444   : > { %v6459_v11 = vmul.f32 -1.442695, %v5379_v28  ;;  %v7781_v29 = vpop.eup %7780  ;;  %7798 = vpow2.f32 %v6458_v14 }
 0x445   : > { %v5681_v54 = vpop.permute.xlu1 %5680  ;;  %v7783_v18 = vpop.eup %7782 }
 0x446   : > { %7800 = vpow2.f32 %v6459_v11  ;;  %v7785_v37 = vpop.eup %7784  ;;  %v5754_v32 = vmul.f32 %v7783_v18, %v5679_v21 }
 0x447   : > { %v7787_v38 = vpop.eup %7786  ;;  %v5504_v62 = vadd.f32 1.0, %v7785_v37  ;;  %v5683_v4 = vpop.permute.xlu0 %5682 }
 0x448   : > { %v7789_v2 = vpop.eup %7788  ;;  %v5505_v58 = vadd.f32 1.0, %v7787_v38  ;;  %v5756_v22 = vmul.f32 %v7779_v12, %v5683_v4 }
 0x449   : > { %v5685_v50 = vpop.permute.xlu1 %5684  ;;  %v7791_v60 = vpop.eup %7790  ;;  %7802 = vrcp.f32 %v5504_v62  ;;  %v5502_v43 = vadd.f32 1.0, %v7789_v2 }
 0x44a   : > { %v5757_v44 = vmul.f32 %v7781_v29, %v5685_v50  ;;  %v7793_v30 = vpop.eup %7792  ;;  %7804 = vrcp.f32 %v5505_v58  ;;  %v5503_v31 = vadd.f32 1.0, %v7791_v60  ;;  %5874 = vrot.lane.b32.xlu0 %v5756_v22, %s7891_s19 }
 0x44b   : > { %7806 = vrcp.f32 %v5502_v43  ;;  %v5687_v42 = vpop.permute.xlu0 %5686  ;;  %v7795_v51 = vpop.eup %7794  ;;  %v5755_v40 = vmul.f32 %v7793_v30, %v5681_v54 }
 0x44c   : > { %5876 = vrot.lane.b32.xlu1 %v5757_v44, %s7891_s19  ;;  %7808 = vrcp.f32 %v5503_v31  ;;  %v7797_v59 = vpop.eup %7796  ;;  %v5508_v34 = vadd.f32 1.0, %v7795_v51 }
 0x44d   : > { %v5689_v15 = vpop.permute.xlu1 %5688  ;;  %v5509_v48 = vadd.f32 1.0, %v7797_v59 }
 0x44e   : > { %v7799_v53 = vpop.eup %7798  ;;  %5870 = vrot.lane.b32.xlu0 %v5754_v32, %s7891_s19 }
 0x44f   : > { %v5506_v57 = vadd.f32 1.0, %v7799_v53  ;;  %v5691_v7 = vpop.permute.xlu0 %5690 }
 0x450   : > { %v7801_v19 = vpop.eup %7800  ;;  %5872 = vrot.lane.b32.xlu1 %v5755_v40, %s7891_s19 }
 0x451   : > { %v5507_v56 = vadd.f32 1.0, %v7801_v19  ;;  %7810 = vrcp.f32 %v5506_v57  ;;  %v5693_v20 = vpop.permute.xlu1 %5692 }
 0x453   : > { %7812 = vrcp.f32 %v5507_v56  ;;  %v7803_v52 = vpop.eup %7802  ;;  %v5695_v26 = vpop.permute.xlu0 %5694 }
 0x454   : > { %7814 = vrcp.f32 %v5508_v34  ;;  %v7805_v55 = vpop.eup %7804  ;;  %v5760_v1 = vmul.f32 %v7803_v52, %v5691_v7 }
 0x455   : > { %7816 = vrcp.f32 %v5509_v48  ;;  %v7807_v5 = vpop.eup %7806  ;;  %v5761_v24 = vmul.f32 %v7805_v55, %v5693_v20  ;;  %v5697_v35 = vpop.permute.xlu1 %5696 }
 0x456   : > { %v7809_v45 = vpop.eup %7808  ;;  %v5758_v3 = vmul.f32 %v7807_v5, %v5687_v42  ;;  %5882 = vrot.lane.b32.xlu0 %v5760_v1, %s7891_s19 }
 0x457   : > { %v5759_v6 = vmul.f32 %v7809_v45, %v5689_v15  ;;  %5884 = vrot.lane.b32.xlu1 %v5761_v24, %s7891_s19  ;;  %v5699_v46 = vpop.permute.xlu0 %5698 }
 0x459   : > { %v5701_v49 = vpop.permute.xlu1 %5700 }
 0x45a   : > { %5878 = vrot.lane.b32.xlu0 %v5758_v3, %s7891_s19 }
 0x45b   : > { %v7811_v27 = vpop.eup %7810  ;;  %5880 = vrot.lane.b32.xlu1 %v5759_v6, %s7891_s19 }
 0x45c   : > { %v5762_v13 = vmul.f32 %v7811_v27, %v5695_v26 }
 0x45d   : > { %v7813_v10 = vpop.eup %7812 }
 0x45e   : > { %v7815_v61 = vpop.eup %7814  ;;  %v5763_v25 = vmul.f32 %v7813_v10, %v5697_v35  ;;  %5886 = vrot.lane.b32.xlu0 %v5762_v13, %s7891_s19 }
 0x45f   : > { %v7817_v9 = vpop.eup %7816  ;;  %v5764_v8 = vmul.f32 %v7815_v61, %v5699_v46 }
 0x460   : > { %5888 = vrot.lane.b32.xlu1 %v5763_v25, %s7891_s19  ;;  %v5765_v41 = vmul.f32 %v7817_v9, %v5701_v49 }
 0x462   : > { %5890 = vrot.lane.b32.xlu0 %v5764_v8, %s7891_s19 }
 0x464   : > { %5892 = vrot.lane.b32.xlu1 %v5765_v41, %s7891_s19 }
 0x46c   : > { %v5835_v63 = vpop.permute.xlu0 %5834 }
 0x46d   : > { %5928 = vst.msk [vmem:[#allocation2 + $0x31] sm:$0xff] %vm514_vm2, %v5835_v63 }
 0x46e   : > { %v5837_v39 = vpop.permute.xlu1 %5836 }
 0x46f   : > { %5929 = vst.msk [vmem:[#allocation2 + $0x39] sm:$0xff] %vm514_vm2, %v5837_v39 }
 0x470   : > { %v5831_v33 = vpop.permute.xlu0 %5830 }
 0x471   : > { %5926 = vst.msk [vmem:[#allocation2 + $0x19] sm:$0xff] %vm514_vm2, %v5831_v33 }
 0x472   : > { %v5833_v17 = vpop.permute.xlu1 %5832 }
 0x473   : > { %5927 = vst.msk [vmem:[#allocation2 + $0x21] sm:$0xff] %vm514_vm2, %v5833_v17 }
 0x474   : > { %v5964_v23 = vld [vmem:[#allocation2 + $0x30] sm:$0xff]  ;;  %v5843_v28 = vpop.permute.xlu0 %5842 }
 0x475   : > { %6019 = vst.msk [vmem:[%s7966_s14 + $0x30] sm:$0xff] %vm514_vm2, %v5964_v23  ;;  %5932 = vst.msk [vmem:[#allocation2 + $0x61] sm:$0xff] %vm514_vm2, %v5843_v28 }
 0x476   : > { %v5965_v14 = vld [vmem:[#allocation2 + $0x38] sm:$0xff]  ;;  %v5966_v12 = vld [vmem:[#allocation2 + $0x40] sm:$0x3]  ;;  %v5845_v11 = vpop.permute.xlu1 %5844 }
 0x477   : > { %6020 = vst.msk [vmem:[%s7966_s14 + $0x38] sm:$0xff] %vm514_vm2, %v5965_v14  ;;  %5933 = vst.msk [vmem:[#allocation2 + $0x69] sm:$0xff] %vm514_vm2, %v5845_v11 }
 0x478   : > { %6021 = vst.msk [vmem:[%s7966_s14 + $0x40] sm:$0x3] %vm6014_vm3, %v5966_v12  ;;  %v5961_v21 = vld [vmem:[#allocation2 + $0x18] sm:$0xff]  ;;  %v5839_v29 = vpop.permute.xlu0 %5838 }
 0x479   : > { %6016 = vst.msk [vmem:[%s7966_s14 + $0x18] sm:$0xff] %vm514_vm2, %v5961_v21  ;;  %5930 = vst.msk [vmem:[#allocation2 + $0x49] sm:$0xff] %vm514_vm2, %v5839_v29 }
 0x47a   : > { %v5962_v54 = vld [vmem:[#allocation2 + $0x20] sm:$0xff]  ;;  %v5963_v18 = vld [vmem:[#allocation2 + $0x28] sm:$0x3] }
 0x47b   : > { %6017 = vst.msk [vmem:[%s7966_s14 + $0x20] sm:$0xff] %vm514_vm2, %v5962_v54 }
 0x47c   : > { %6018 = vst.msk [vmem:[%s7966_s14 + $0x28] sm:$0x3] %vm6014_vm3, %v5963_v18  ;;  %v5841_v37 = vpop.permute.xlu1 %5840  ;;  %v5970_v38 = vld [vmem:[#allocation2 + $0x60] sm:$0xff] }
 0x47d   : > { %5931 = vst.msk [vmem:[#allocation2 + $0x51] sm:$0xff] %vm514_vm2, %v5841_v37  ;;  %6025 = vst.msk [vmem:[%s7966_s14 + $0x60] sm:$0xff] %vm514_vm2, %v5970_v38 }
 0x47e   : > { %v5971_v62 = vld [vmem:[#allocation2 + $0x68] sm:$0xff]  ;;  %v5972_v4 = vld [vmem:[#allocation2 + $0x70] sm:$0x3] }
 0x47f   : > { %6026 = vst.msk [vmem:[%s7966_s14 + $0x68] sm:$0xff] %vm514_vm2, %v5971_v62 }
 0x480   : > { %6027 = vst.msk [vmem:[%s7966_s14 + $0x70] sm:$0x3] %vm6014_vm3, %v5972_v4  ;;  %v5967_v2 = vld [vmem:[#allocation2 + $0x48] sm:$0xff] }
 0x481   : > { %6022 = vst.msk [vmem:[%s7966_s14 + $0x48] sm:$0xff] %vm514_vm2, %v5967_v2 }
 0x484   : > { %v5968_v58 = vld [vmem:[#allocation2 + $0x50] sm:$0xff]  ;;  %v5969_v22 = vld [vmem:[#allocation2 + $0x58] sm:$0x3]  ;;  %v5851_v50 = vpop.permute.xlu0 %5850 }
 0x485   : > { %6023 = vst.msk [vmem:[%s7966_s14 + $0x50] sm:$0xff] %vm514_vm2, %v5968_v58  ;;  %5936 = vst.msk [vmem:[#allocation2 + $0x91] sm:$0xff] %vm514_vm2, %v5851_v50 }
 0x486   : > { %6024 = vst.msk [vmem:[%s7966_s14 + $0x58] sm:$0x3] %vm6014_vm3, %v5969_v22  ;;  %v5853_v60 = vpop.permute.xlu1 %5852 }
 0x487   : > { %5937 = vst.msk [vmem:[#allocation2 + $0x99] sm:$0xff] %vm514_vm2, %v5853_v60 }
 0x48a   : > { %v5847_v43 = vpop.permute.xlu0 %5846 }
 0x48b   : > { %5934 = vst.msk [vmem:[#allocation2 + $0x79] sm:$0xff] %vm514_vm2, %v5847_v43  ;;  %v5849_v44 = vpop.permute.xlu1 %5848 }
 0x48c   : > { %5935 = vst.msk [vmem:[#allocation2 + $0x81] sm:$0xff] %vm514_vm2, %v5849_v44  ;;  %v5976_v30 = vld [vmem:[#allocation2 + $0x90] sm:$0xff] }
 0x48d   : > { %6031 = vst.msk [vmem:[%s7966_s14 + $0x90] sm:$0xff] %vm514_vm2, %v5976_v30 }
 0x48e   : > { %v5977_v31 = vld [vmem:[#allocation2 + $0x98] sm:$0xff]  ;;  %v5978_v42 = vld [vmem:[#allocation2 + $0xa0] sm:$0x3] }
 0x48f   : > { %6032 = vst.msk [vmem:[%s7966_s14 + $0x98] sm:$0xff] %vm514_vm2, %v5977_v31 }
 0x490   : > { %6033 = vst.msk [vmem:[%s7966_s14 + $0xa0] sm:$0x3] %vm6014_vm3, %v5978_v42 }
 0x492   : > { %v5973_v51 = vld [vmem:[#allocation2 + $0x78] sm:$0xff] }
 0x493   : > { %6028 = vst.msk [vmem:[%s7966_s14 + $0x78] sm:$0xff] %vm514_vm2, %v5973_v51  ;;  %v5974_v32 = vld [vmem:[#allocation2 + $0x80] sm:$0xff]  ;;  %v5975_v15 = vld [vmem:[#allocation2 + $0x88] sm:$0x3] }
 0x494   : > { %6029 = vst.msk [vmem:[%s7966_s14 + $0x80] sm:$0xff] %vm514_vm2, %v5974_v32  ;;  %v5859_v59 = vpop.permute.xlu0 %5858 }
 0x495   : > { %6030 = vst.msk [vmem:[%s7966_s14 + $0x88] sm:$0x3] %vm6014_vm3, %v5975_v15 }
 0x496   : > { %5940 = vst.msk [vmem:[#allocation2 + $0xc1] sm:$0xff] %vm514_vm2, %v5859_v59  ;;  %v5861_v40 = vpop.permute.xlu1 %5860 }
 0x497   : > { %5941 = vst.msk [vmem:[#allocation2 + $0xc9] sm:$0xff] %vm514_vm2, %v5861_v40 }
 0x499   : > { %v5855_v53 = vpop.permute.xlu0 %5854 }
 0x49a   : > { %5938 = vst.msk [vmem:[#allocation2 + $0xa9] sm:$0xff] %vm514_vm2, %v5855_v53  ;;  %v5857_v19 = vpop.permute.xlu1 %5856 }
 0x49b   : > { %5939 = vst.msk [vmem:[#allocation2 + $0xb1] sm:$0xff] %vm514_vm2, %v5857_v19 }
 0x49d   : > { %v5982_v34 = vld [vmem:[#allocation2 + $0xc0] sm:$0xff] }
 0x49e   : > { %6037 = vst.msk [vmem:[%s7966_s14 + $0xc0] sm:$0xff] %vm514_vm2, %v5982_v34  ;;  %v5983_v57 = vld [vmem:[#allocation2 + $0xc8] sm:$0xff]  ;;  %v5984_v48 = vld [vmem:[#allocation2 + $0xd0] sm:$0x3] }
 0x49f   : > { %6038 = vst.msk [vmem:[%s7966_s14 + $0xc8] sm:$0xff] %vm514_vm2, %v5983_v57 }
 0x4a0   : > { %6039 = vst.msk [vmem:[%s7966_s14 + $0xd0] sm:$0x3] %vm6014_vm3, %v5984_v48 }
 0x4a1   : > { %v5979_v56 = vld [vmem:[#allocation2 + $0xa8] sm:$0xff] }
 0x4a2   : > { %6034 = vst.msk [vmem:[%s7966_s14 + $0xa8] sm:$0xff] %vm514_vm2, %v5979_v56  ;;  %v5980_v7 = vld [vmem:[#allocation2 + $0xb0] sm:$0xff]  ;;  %v5981_v20 = vld [vmem:[#allocation2 + $0xb8] sm:$0x3] }
 0x4a3   : > { %6035 = vst.msk [vmem:[%s7966_s14 + $0xb0] sm:$0xff] %vm514_vm2, %v5980_v7 }
 0x4a4   : > { %6036 = vst.msk [vmem:[%s7966_s14 + $0xb8] sm:$0x3] %vm6014_vm3, %v5981_v20  ;;  %v5867_v52 = vpop.permute.xlu0 %5866 }
 0x4a5   : > { %5944 = vst.msk [vmem:[#allocation2 + $0xf1] sm:$0xff] %vm514_vm2, %v5867_v52 }
 0x4a8   : > { %v5869_v55 = vpop.permute.xlu1 %5868 }
 0x4a9   : > { %5945 = vst.msk [vmem:[#allocation2 + $0xf9] sm:$0xff] %vm514_vm2, %v5869_v55  ;;  %v5863_v1 = vpop.permute.xlu0 %5862 }
 0x4aa   : > { %5942 = vst.msk [vmem:[#allocation2 + $0xd9] sm:$0xff] %vm514_vm2, %v5863_v1 }
 0x4ac   : > { %v5865_v5 = vpop.permute.xlu1 %5864  ;;  %v5988_v24 = vld [vmem:[#allocation2 + $0xf0] sm:$0xff] }
 0x4ad   : > { %5943 = vst.msk [vmem:[#allocation2 + $0xe1] sm:$0xff] %vm514_vm2, %v5865_v5  ;;  %6043 = vst.msk [vmem:[%s7966_s14 + $0xf0] sm:$0xff] %vm514_vm2, %v5988_v24 }
 0x4b0   : > { %v5989_v45 = vld [vmem:[#allocation2 + $0xf8] sm:$0xff]  ;;  %v5990_v3 = vld [vmem:[#allocation2 + $0x100] sm:$0x3] }
 0x4b1   : > { %6044 = vst.msk [vmem:[%s7966_s14 + $0xf8] sm:$0xff] %vm514_vm2, %v5989_v45  ;;  %v5985_v6 = vld [vmem:[#allocation2 + $0xd8] sm:$0xff] }
 0x4b2   : > { %6045 = vst.msk [vmem:[%s7966_s14 + $0x100] sm:$0x3] %vm6014_vm3, %v5990_v3 }
 0x4b3   : > { %6040 = vst.msk [vmem:[%s7966_s14 + $0xd8] sm:$0xff] %vm514_vm2, %v5985_v6 }
 0x4b4   : > { %v5986_v26 = vld [vmem:[#allocation2 + $0xe0] sm:$0xff]  ;;  %v5987_v35 = vld [vmem:[#allocation2 + $0xe8] sm:$0x3] }
 0x4b5   : > { %6041 = vst.msk [vmem:[%s7966_s14 + $0xe0] sm:$0xff] %vm514_vm2, %v5986_v26 }
 0x4b6   : > { %6042 = vst.msk [vmem:[%s7966_s14 + $0xe8] sm:$0x3] %vm6014_vm3, %v5987_v35 }
 0x4bc   : > { %v5875_v27 = vpop.permute.xlu0 %5874 }
 0x4bd   : > { %5948 = vst.msk [vmem:[#allocation2 + $0x121] sm:$0xff] %vm514_vm2, %v5875_v27 }
 0x4be   : > { %v5877_v10 = vpop.permute.xlu1 %5876 }
 0x4bf   : > { %5949 = vst.msk [vmem:[#allocation2 + $0x129] sm:$0xff] %vm514_vm2, %v5877_v10 }
 0x4c0   : > { %v5871_v13 = vpop.permute.xlu0 %5870 }
 0x4c1   : > { %5946 = vst.msk [vmem:[#allocation2 + $0x109] sm:$0xff] %vm514_vm2, %v5871_v13 }
 0x4c2   : > { %v5873_v61 = vpop.permute.xlu1 %5872 }
 0x4c3   : > { %5947 = vst.msk [vmem:[#allocation2 + $0x111] sm:$0xff] %vm514_vm2, %v5873_v61 }
 0x4c4   : > { %v5994_v25 = vld [vmem:[#allocation2 + $0x120] sm:$0xff] }
 0x4c5   : > { %6049 = vst.msk [vmem:[%s7966_s14 + $0x120] sm:$0xff] %vm514_vm2, %v5994_v25 }
 0x4c6   : > { %v5995_v46 = vld [vmem:[#allocation2 + $0x128] sm:$0xff]  ;;  %v5996_v9 = vld [vmem:[#allocation2 + $0x130] sm:$0x3] }
 0x4c7   : > { %6050 = vst.msk [vmem:[%s7966_s14 + $0x128] sm:$0xff] %vm514_vm2, %v5995_v46 }
 0x4c8   : > { %6051 = vst.msk [vmem:[%s7966_s14 + $0x130] sm:$0x3] %vm6014_vm3, %v5996_v9  ;;  %v5991_v49 = vld [vmem:[#allocation2 + $0x108] sm:$0xff]  ;;  %v5883_v16 = vpop.permute.xlu0 %5882 }
 0x4c9   : > { %6046 = vst.msk [vmem:[%s7966_s14 + $0x108] sm:$0xff] %vm514_vm2, %v5991_v49  ;;  %5952 = vst.msk [vmem:[#allocation2 + $0x151] sm:$0xff] %vm514_vm2, %v5883_v16  ;;  %v5885_v0 = vpop.permute.xlu1 %5884 }
 0x4ca   : > { %v5992_v47 = vld [vmem:[#allocation2 + $0x110] sm:$0xff]  ;;  %v5993_v36 = vld [vmem:[#allocation2 + $0x118] sm:$0x3]  ;;  %5953 = vst.msk [vmem:[#allocation2 + $0x159] sm:$0xff] %vm514_vm2, %v5885_v0 }
 0x4cb   : > { %6047 = vst.msk [vmem:[%s7966_s14 + $0x110] sm:$0xff] %vm514_vm2, %v5992_v47 }
 0x4cc   : > { %6048 = vst.msk [vmem:[%s7966_s14 + $0x118] sm:$0x3] %vm6014_vm3, %v5993_v36  ;;  %v5879_v8 = vpop.permute.xlu0 %5878 }
 0x4cd   : > { %5950 = vst.msk [vmem:[#allocation2 + $0x139] sm:$0xff] %vm514_vm2, %v5879_v8  ;;  %v5881_v41 = vpop.permute.xlu1 %5880 }
 0x4ce   : > { %5951 = vst.msk [vmem:[#allocation2 + $0x141] sm:$0xff] %vm514_vm2, %v5881_v41 }
 0x4d0   : > { %v6000_v63 = vld [vmem:[#allocation2 + $0x150] sm:$0xff]  ;;  %v5887_v39 = vpop.permute.xlu0 %5886 }
 0x4d1   : > { %6055 = vst.msk [vmem:[%s7966_s14 + $0x150] sm:$0xff] %vm514_vm2, %v6000_v63  ;;  %v6001_v33 = vld [vmem:[#allocation2 + $0x158] sm:$0xff]  ;;  %v6002_v17 = vld [vmem:[#allocation2 + $0x160] sm:$0x3]  ;;  %5954 = vst.msk [vmem:[#allocation2 + $0x169] sm:$0xff] %vm514_vm2, %v5887_v39 }
 0x4d2   : > { %v5889_v23 = vpop.permute.xlu1 %5888  ;;  %6056 = vst.msk [vmem:[%s7966_s14 + $0x158] sm:$0xff] %vm514_vm2, %v6001_v33 }
 0x4d3   : > { %6057 = vst.msk [vmem:[%s7966_s14 + $0x160] sm:$0x3] %vm6014_vm3, %v6002_v17 }
 0x4d4   : > { %5955 = vst.msk [vmem:[#allocation2 + $0x171] sm:$0xff] %vm514_vm2, %v5889_v23  ;;  %v5997_v28 = vld [vmem:[#allocation2 + $0x138] sm:$0xff]  ;;  %v5891_v14 = vpop.permute.xlu0 %5890 }
 0x4d5   : > { %6052 = vst.msk [vmem:[%s7966_s14 + $0x138] sm:$0xff] %vm514_vm2, %v5997_v28  ;;  %v5998_v12 = vld [vmem:[#allocation2 + $0x140] sm:$0xff]  ;;  %v5999_v11 = vld [vmem:[#allocation2 + $0x148] sm:$0x3]  ;;  %5956 = vst.msk [vmem:[#allocation2 + $0x181] sm:$0xff] %vm514_vm2, %v5891_v14 }
 0x4d6   : > { %v5893_v21 = vpop.permute.xlu1 %5892  ;;  %6053 = vst.msk [vmem:[%s7966_s14 + $0x140] sm:$0xff] %vm514_vm2, %v5998_v12 }
 0x4d7   : > { %6054 = vst.msk [vmem:[%s7966_s14 + $0x148] sm:$0x3] %vm6014_vm3, %v5999_v11 }
 0x4d8   : > { %5957 = vst.msk [vmem:[#allocation2 + $0x189] sm:$0xff] %vm514_vm2, %v5893_v21  ;;  %v6003_v29 = vld [vmem:[#allocation2 + $0x168] sm:$0xff] }
 0x4d9   : > { %6058 = vst.msk [vmem:[%s7966_s14 + $0x168] sm:$0xff] %vm514_vm2, %v6003_v29 }
 0x4db   : > { %v6004_v54 = vld [vmem:[#allocation2 + $0x170] sm:$0xff]  ;;  %v6005_v18 = vld [vmem:[#allocation2 + $0x178] sm:$0x3] }
 0x4dc   : > { %6059 = vst.msk [vmem:[%s7966_s14 + $0x170] sm:$0xff] %vm514_vm2, %v6004_v54  ;;  %v6006_v37 = vld [vmem:[#allocation2 + $0x180] sm:$0xff] }
 0x4dd   : > { %6060 = vst.msk [vmem:[%s7966_s14 + $0x178] sm:$0x3] %vm6014_vm3, %v6005_v18 }
 0x4de   : > { %6061 = vst.msk [vmem:[%s7966_s14 + $0x180] sm:$0xff] %vm514_vm2, %v6006_v37 }
 0x4df   : > { %v6007_v38 = vld [vmem:[#allocation2 + $0x188] sm:$0xff]  ;;  %v6008_v62 = vld [vmem:[#allocation2 + $0x190] sm:$0x3] }
 0x4e0   : > { %6062 = vst.msk [vmem:[%s7966_s14 + $0x188] sm:$0xff] %vm514_vm2, %v6007_v38 }
 0x4e1   : > { %6063 = vst.msk [vmem:[%s7966_s14 + $0x190] sm:$0x3] %vm6014_vm3, %v6008_v62 }
 0x4e2 PF: > { %s15_s22 = sadd.s32 1, %s7888_s22   ;;  %s10190_s18 = smov %s7880_s20 }
 0x4e3   : > { %p12_p8 = scmp.ge.s32.totalorder %s15_s22, 10   ;;  %s10191_s19 = smov %s7884_s21 }
 0x4e4   : > { %s10192_s20 = smov %s10195_s23  ;;  %s10193_s21 = smov %s10199_s24 }
 0x4e5   :  { %14 = sbr.rel (!%p12_p8) target bundleno = 3 (0x3), region = 84 }

// kernel: _lambda_.9
= control target key start
LH: loop header
LB: loop body
LE: loop exit
PB: predicated region body
PF: predicated region fallthrough
CT: control target
= control target key end

     0   :  { %s1180_s12 = smov 0   ;;  %s1390_s0 = inlined_call_operand.vmem [shape: f32[8,9,9,128], index: 0, kind: input, shape index: {}]   ;;  %s1391_s1 = inlined_call_operand.vmem [shape: bf16[4,128,32], index: 1, kind: input, shape index: {}]   ;;  %s1392_s2 = inlined_call_operand.vmem [shape: f32[1,32], index: 2, kind: input, shape index: {}]   ;;  %s1393_s3 = inlined_call_operand.vmem [shape: f32[8,8,8,32], index: 3, kind: output, shape index: {}]  }
   0x1 LB: > { %s835_s13 = sadd.s32 4294967295, %s1158_s12   ;;  %p839_p0 = scmp.ge.s32.totalorder %s1158_s12, 1  ;;  %s1158_s12 = sphi %s1180_s12, %s13_s12  }
   0x2   : > { %p137_p1 = scmp.lt.s32.totalorder %s1158_s12, 9 }
   0x4   : > { %p138_p2 = pnand %p839_p0, %p137_p1 }
   0x5   : > { %v1120_v0 = vld [vmem:[%s1391_s1 + $0x40] sm:$0xff] (!%p138_p2)   ;;  %p161_p3 = scmp.lt.s32.totalorder (!%p138_p2), %s835_s13, 7  ;;  %v1122_v2 = vld [vmem:[%s1391_s1 + $0x48] sm:$0xff] (!%p138_p2)   ;;  %v1124_v4 = vld [vmem:[%s1391_s1 + $0x50] sm:$0xff] (!%p138_p2)   ;;  %vm771_vm0 = vcmask (!%p138_p2), 261120  }
   0x6   : > { %141 = sbr.rel (%p138_p2) target bundleno = 299 (0x12b), region = 32  ;;  %v1121_v1 = vld [vmem:[%s1391_s1 + $0x80] sm:$0xff] (!%p138_p2)   ;;  %991 = vmatprep.subr.bf16.mxu1 (!%p138_p2), %v1120_v0  ;;  %v1123_v3 = vld [vmem:[%s1391_s1 + $0x88] sm:$0xff] (!%p138_p2)   ;;  %v1125_v5 = vld [vmem:[%s1391_s1 + $0x90] sm:$0xff] (!%p138_p2)  }
   0x7   : > { %1039 = vmatprep.subr.bf16.mxu0 (!%p138_p2), %v1121_v1  ;;  %992 = vmatpush3.bf16.msra.mxu1 (!%p138_p2), %v1120_v0  ;;  %v1126_v6 = vld [vmem:[%s1391_s1 + $0x58] sm:$0xff] (!%p138_p2)   ;;  %v1128_v8 = vld [vmem:[%s1391_s1 + $0x60] sm:$0xff] (!%p138_p2)   ;;  %v1130_v10 = vld [vmem:[%s1391_s1 + $0x68] sm:$0xff] (!%p138_p2)  }
   0x8   : > { %1040 = vmatpush3.bf16.msra.mxu0 (!%p138_p2), %v1121_v1  ;;  %993 = vmatprep.subr.bf16.mxu1 (!%p138_p2), %v1122_v2  ;;  %v1127_v7 = vld [vmem:[%s1391_s1 + $0x98] sm:$0xff] (!%p138_p2)   ;;  %v1129_v9 = vld [vmem:[%s1391_s1 + $0xa0] sm:$0xff] (!%p138_p2)   ;;  %v1131_v13 = vld [vmem:[%s1391_s1 + $0xa8] sm:$0xff] (!%p138_p2)  }
   0x9   : > { %1041 = vmatprep.subr.bf16.mxu0 (!%p138_p2), %v1123_v3  ;;  %v1132_v18 = vld [vmem:[%s1391_s1 + $0x70] sm:$0xff] (!%p138_p2)   ;;  %v1134_v20 = vld [vmem:[%s1391_s1 + $0x78] sm:$0xff] (!%p138_p2)   ;;  %v1136_v23 = vld [vmem:[%s1391_s1] sm:$0xff] (!%p138_p2)  }
   0xa   : > { %v1133_v19 = vld [vmem:[%s1391_s1 + $0xb0] sm:$0xff] (!%p138_p2)   ;;  %v1135_v21 = vld [vmem:[%s1391_s1 + $0xb8] sm:$0xff] (!%p138_p2)   ;;  %v1137_v27 = vld [vmem:[%s1391_s1 + $0xc0] sm:$0xff] (!%p138_p2)  }
   0xb   : > { %994 = vmatpush3.bf16.msra.mxu1 (!%p138_p2), %v1122_v2  ;;  %v1138_v34 = vld [vmem:[%s1391_s1 + $0x8] sm:$0xff] (!%p138_p2)   ;;  %v1140_v38 = vld [vmem:[%s1391_s1 + $0x10] sm:$0xff] (!%p138_p2)   ;;  %v1142_v47 = vld [vmem:[%s1391_s1 + $0x18] sm:$0xff] (!%p138_p2)  }
   0xc   : > { %1042 = vmatpush3.bf16.msra.mxu0 (!%p138_p2), %v1123_v3  ;;  %995 = vmatprep.subr.bf16.mxu1 (!%p138_p2), %v1124_v4  ;;  %v1139_v35 = vld [vmem:[%s1391_s1 + $0xc8] sm:$0xff] (!%p138_p2)   ;;  %v1141_v43 = vld [vmem:[%s1391_s1 + $0xd0] sm:$0xff] (!%p138_p2)   ;;  %v1143_v48 = vld [vmem:[%s1391_s1 + $0xd8] sm:$0xff] (!%p138_p2)  }
   0xd   : > { %s1395_s13 = smov (!%p161_p3, %s835_s13), 7  ;;  %1043 = vmatprep.subr.bf16.mxu0 %v1125_v5  ;;  %v1144_v51 = vld [vmem:[%s1391_s1 + $0x20] sm:$0xff]   ;;  %v1146_v53 = vld [vmem:[%s1391_s1 + $0x28] sm:$0xff]   ;;  %v1148_v55 = vld [vmem:[%s1391_s1 + $0x30] sm:$0xff]  }
   0xe   : > { %s1111_s30 = smul.u32 144, %s1395_s13  ;;  %v1145_v52 = vld [vmem:[%s1391_s1 + $0xe0] sm:$0xff]   ;;  %v1147_v54 = vld [vmem:[%s1391_s1 + $0xe8] sm:$0xff]   ;;  %v1149_v56 = vld [vmem:[%s1391_s1 + $0xf0] sm:$0xff]   ;;  %s942_s6 = sshll.u32 %s1395_s13, 6 }
   0xf   : > { %996 = vmatpush3.bf16.msra.mxu1 %v1124_v4  ;;  %v1150_v57 = vld [vmem:[%s1391_s1 + $0x38] sm:$0xff]   ;;  %v939_v4 = vld [vmem:[%s1392_s2] ss:$0 sm:$0xff]  ;;  %s1369_s11 = scalar_lea.vmem %s1393_s3, %s942_s6 }
  0x10   : > { %1044 = vmatpush3.bf16.msra.mxu0 %v1125_v5  ;;  %997 = vmatprep.subr.bf16.mxu1 %v1126_v6  ;;  %s1224_s10 = scalar_lea.vmem %s1390_s0, %s1111_s30  ;;  %v1151_v58 = vld [vmem:[%s1391_s1 + $0xf8] sm:$0xff]  }
  0x11   : > { %1045 = vmatprep.subr.bf16.mxu0 %v1127_v7  ;;  %v200_v11 = vld [vmem:[%s1224_s10 + $0x1] sm:$0xff]  ;;  %v1231_v12 = vld [vmem:[%s1224_s10 + $0x11] sm:$0xff] }
  0x12   : > { %v208_v14 = vpack.c.bf16 %v1231_v12, %v200_v11  ;;  %v1238_v15 = vld [vmem:[%s1224_s10 + $0x10] sm:$0xff]  ;;  %v1241_v16 = vld [vmem:[%s1224_s10 + $0x20] sm:$0xff] }
  0x13   : > { %998 = vmatpush3.bf16.msra.mxu1 %v1126_v6  ;;  %v464_v17 = vpack.c.bf16 %v1241_v16, %v1238_v15  ;;  %v202_v22 = vld [vmem:[%s1224_s10 + $0x21] sm:$0xff]  ;;  %v1262_v24 = vld [vmem:[%s1224_s10 + $0x31] sm:$0xff] }
  0x14   : > { %1046 = vmatpush3.bf16.msra.mxu0 %v1127_v7  ;;  %999 = vmatprep.subr.bf16.mxu1 %v1128_v8  ;;  %v1265_v25 = vld [vmem:[%s1224_s10 + $0x30] sm:$0xff]  ;;  %v1268_v26 = vld [vmem:[%s1224_s10 + $0x40] sm:$0xff]  ;;  %v209_v28 = vpack.c.bf16 %v1262_v24, %v202_v22  ;;  %v614_v50 = vpack.c.bf16 %v202_v22, %v1231_v12 }
  0x15   : > { %1047 = vmatprep.subr.bf16.mxu0 %v1129_v9  ;;  %1007 = vmatprep.mubr.bf16.mxu1 %v208_v14  ;;  %v1275_v29 = vld [vmem:[%s1224_s10 + $0x41] sm:$0xff]  ;;  %v465_v30 = vpack.c.bf16 %v1268_v26, %v1265_v25  ;;  %v1280_v31 = vld [vmem:[%s1224_s10 + $0x51] sm:$0xff]  ;;  %v181_v59 = vpack.c.bf16 %v1265_v25, %v1241_v16 }
  0x16   : > { %1055 = vmatprep.mubr.bf16.mxu0 %v464_v17  ;;  %v1283_v32 = vld [vmem:[%s1224_s10 + $0x50] sm:$0xff]  ;;  %v1286_v33 = vld [vmem:[%s1224_s10 + $0x60] sm:$0xff]  ;;  %v210_v36 = vpack.c.bf16 %v1280_v31, %v1275_v29  ;;  %v615_v60 = vpack.c.bf16 %v1275_v29, %v1262_v24 }
  0x17   : > { %1000 = vmatpush3.bf16.msra.mxu1 %v1128_v8  ;;  %v1297_v37 = vld [vmem:[%s1224_s10 + $0x61] sm:$0xff]  ;;  %v466_v39 = vpack.c.bf16 %v1286_v33, %v1283_v32  ;;  %v1305_v40 = vld [vmem:[%s1224_s10 + $0x71] sm:$0xff]  ;;  %v182_v61 = vpack.c.bf16 %v1283_v32, %v1268_v26 }
  0x18   : > { %1048 = vmatpush3.bf16.msra.mxu0 %v1129_v9  ;;  %1001 = vmatprep.subr.bf16.mxu1 %v1130_v10  ;;  %v1308_v41 = vld [vmem:[%s1224_s10 + $0x70] sm:$0xff]  ;;  %v882_v42 = vld [vmem:[%s1224_s10 + $0x80] sm:$0xff]  ;;  %v211_v44 = vpack.c.bf16 %v1305_v40, %v1297_v37  ;;  %v616_v62 = vpack.c.bf16 %v1297_v37, %v1280_v31 }
  0x19   : > { %1049 = vmatprep.subr.bf16.mxu0 %v1131_v13  ;;  %v172_v45 = vld [vmem:[%s1224_s10] sm:$0xff]  ;;  %v467_v46 = vpack.c.bf16 %v882_v42, %v1308_v41  ;;  %v183_v0 = vpack.c.bf16 %v1308_v41, %v1286_v33 }
  0x1a   : > { %v180_v49 = vpack.c.bf16 %v1238_v15, %v172_v45  ;;  %v914_v63 = vld [vmem:[%s1224_s10 + $0x81] sm:$0xff] }
  0x1b   : > { %1002 = vmatpush3.bf16.msra.mxu1 %v1130_v10  ;;  %v617_v1 = vpack.c.bf16 %v914_v63, %v1305_v40 }
  0x1c   : > { %1050 = vmatpush3.bf16.msra.mxu0 %v1131_v13  ;;  %1003 = vmatprep.subr.bf16.mxu1 %v1132_v18 }
  0x1d   : > { %1051 = vmatprep.subr.bf16.mxu0 %v1133_v19 }
  0x1f   : > { %1004 = vmatpush3.bf16.msra.mxu1 %v1132_v18 }
  0x20   : > { %1052 = vmatpush3.bf16.msra.mxu0 %v1133_v19  ;;  %1005 = vmatprep.subr.bf16.mxu1 %v1134_v20 }
  0x21   : > { %1053 = vmatprep.subr.bf16.mxu0 %v1135_v21 }
  0x23   : > { %1006 = vmatpush3.bf16.msra.mxu1 %v1134_v20 }
  0x24   : > { %1054 = vmatpush3.bf16.msra.mxu0 %v1135_v21  ;;  %1015 = vmatprep.subr.bf16.mxu1 %v1136_v23 }
  0x25   : > { %1063 = vmatprep.subr.bf16.mxu0 %v1137_v27 }
  0x26   : > { %1008 = vmatmul.mubr.bf16.vlgmr.msra.gmra.mrb[0].mxu1 %v209_v28 }
  0x27   : > { %1016 = vmatpush3.bf16.msra.mxu1 %v1136_v23  ;;  %1056 = vmatmul.mubr.bf16.vlgmr.msra.gmra.mrb[0].mxu0 %v465_v30 }
  0x28   : > { %1064 = vmatpush3.bf16.msra.mxu0 %v1137_v27  ;;  %1017 = vmatprep.subr.bf16.mxu1 %v1138_v34 }
  0x29   : > { %1065 = vmatprep.subr.bf16.mxu0 %v1139_v35  ;;  %1011 = vmatprep.mubr.bf16.mxu1 %v210_v36 }
  0x2a   : > { %1059 = vmatprep.mubr.bf16.mxu0 %v466_v39 }
  0x2b   : > { %1018 = vmatpush3.bf16.msra.mxu1 %v1138_v34 }
  0x2c   : > { %1066 = vmatpush3.bf16.msra.mxu0 %v1139_v35  ;;  %1019 = vmatprep.subr.bf16.mxu1 %v1140_v38 }
  0x2d   : > { %1067 = vmatprep.subr.bf16.mxu0 %v1141_v43 }
  0x2e   : > { %1012 = vmatmul.mubr.bf16.gmra.mrb[4].mxu1 %v211_v44 }
  0x2f   : > { %1020 = vmatpush3.bf16.msra.mxu1 %v1140_v38  ;;  %1060 = vmatmul.mubr.bf16.gmra.mrb[4].mxu0 %v467_v46 }
  0x30   : > { %1068 = vmatpush3.bf16.msra.mxu0 %v1141_v43  ;;  %1021 = vmatprep.subr.bf16.mxu1 %v1142_v47 }
  0x31   : > { %1069 = vmatprep.subr.bf16.mxu0 %v1143_v48  ;;  %1031 = vmatprep.mubr.bf16.mxu1 %v180_v49 }
  0x32   : > { %1079 = vmatprep.mubr.bf16.mxu0 %v614_v50 }
  0x33   : > { %1022 = vmatpush3.bf16.msra.mxu1 %v1142_v47 }
  0x34   : > { %1070 = vmatpush3.bf16.msra.mxu0 %v1143_v48  ;;  %1023 = vmatprep.subr.bf16.mxu1 %v1144_v51 }
  0x35   : > { %1071 = vmatprep.subr.bf16.mxu0 %v1145_v52 }
  0x37   : > { %1024 = vmatpush3.bf16.msra.mxu1 %v1144_v51 }
  0x38   : > { %1072 = vmatpush3.bf16.msra.mxu0 %v1145_v52  ;;  %1025 = vmatprep.subr.bf16.mxu1 %v1146_v53 }
  0x39   : > { %1073 = vmatprep.subr.bf16.mxu0 %v1147_v54 }
  0x3b   : > { %1026 = vmatpush3.bf16.msra.mxu1 %v1146_v53 }
  0x3c   : > { %1074 = vmatpush3.bf16.msra.mxu0 %v1147_v54  ;;  %1027 = vmatprep.subr.bf16.mxu1 %v1148_v55 }
  0x3d   : > { %1075 = vmatprep.subr.bf16.mxu0 %v1149_v56 }
  0x3f   : > { %1028 = vmatpush3.bf16.msra.mxu1 %v1148_v55 }
  0x40   : > { %1076 = vmatpush3.bf16.msra.mxu0 %v1149_v56  ;;  %1029 = vmatprep.subr.bf16.mxu1 %v1150_v57 }
  0x41   : > { %1077 = vmatprep.subr.bf16.mxu0 %v1151_v58 }
  0x43   : > { %1030 = vmatpush3.bf16.msra.mxu1 %v1150_v57 }
  0x44   : > { %1078 = vmatpush3.bf16.msra.mxu0 %v1151_v58 }
  0x46   : > { %1032 = vmatmul.mubr.bf16.vlgmr.msra.gmra.mrb[0].mxu1 %v181_v59 }
  0x47   : > { %1080 = vmatmul.mubr.bf16.vlgmr.msra.gmra.mrb[0].mxu0 %v615_v60  ;;  %1035 = vmatprep.mubr.bf16.mxu1 %v182_v61 }
  0x48   : > { %1083 = vmatprep.mubr.bf16.mxu0 %v616_v62 }
  0x4e   : > { %1036 = vmatmul.mubr.bf16.gmra.mrb[4].mxu1 %v183_v0 }
  0x4f   : > { %1084 = vmatmul.mubr.bf16.gmra.mrb[4].mxu0 %v617_v1 }
 0x119   : > { %v1033_v2 = vpop.f32.mrb[0].mxu1 }
 0x11a   : > { %v1081_v3 = vpop.f32.mrb[0].mxu0  ;;  %v424_v5 = vpop.f32.mrb[1].mxu1 }
 0x11b   : > { %v1087_v6 = vadd.f32 %v1081_v3, %v1033_v2  ;;  %v717_v7 = vpop.f32.mrb[1].mxu0  ;;  %v1034_v8 = vpop.f32.mrb[2].mxu1 }
 0x11c   : > { %v1088_v9 = vadd.f32 %v717_v7, %v424_v5  ;;  %v1082_v10 = vpop.f32.mrb[2].mxu0  ;;  %v427_v11 = vpop.f32.mrb[3].mxu1 }
 0x11d   : > { %v765_v12 = vadd.f32 %v1087_v6, %v939_v4  ;;  %v1089_v13 = vadd.f32 %v1082_v10, %v1034_v8  ;;  %v720_v14 = vpop.f32.mrb[3].mxu0 }
 0x11e   : > { %v763_v15 = vadd.f32 %v1088_v9, %v939_v4  ;;  %v1090_v16 = vadd.f32 %v720_v14, %v427_v11 }
 0x11f   : > { %774 = vst.msk [vmem:[%s1369_s11 + $0x10] sm:$0xff] %vm771_vm0, %v765_v12  ;;  %v766_v17 = vadd.f32 %v1089_v13, %v939_v4 }
 0x120   : > { %772 = vst.msk [vmem:[%s1369_s11] sm:$0xff] %vm771_vm0, %v763_v15  ;;  %v764_v18 = vadd.f32 %v1090_v16, %v939_v4 }
 0x121   : > { %775 = vst.msk [vmem:[%s1369_s11 + $0x18] sm:$0xff] %vm771_vm0, %v766_v17  ;;  %v1037_v19 = vpop.f32.mrb[4].mxu1 }
 0x122   : > { %773 = vst.msk [vmem:[%s1369_s11 + $0x8] sm:$0xff] %vm771_vm0, %v764_v18  ;;  %v1085_v20 = vpop.f32.mrb[4].mxu0  ;;  %v440_v21 = vpop.f32.mrb[5].mxu1 }
 0x123   : > { %v1091_v22 = vadd.f32 %v1085_v20, %v1037_v19  ;;  %v733_v23 = vpop.f32.mrb[5].mxu0  ;;  %v1038_v24 = vpop.f32.mrb[6].mxu1 }
 0x124   : > { %v1092_v25 = vadd.f32 %v733_v23, %v440_v21  ;;  %v1086_v26 = vpop.f32.mrb[6].mxu0  ;;  %v443_v27 = vpop.f32.mrb[7].mxu1 }
 0x125   : > { %v769_v28 = vadd.f32 %v1091_v22, %v939_v4  ;;  %v1093_v29 = vadd.f32 %v1086_v26, %v1038_v24  ;;  %v736_v30 = vpop.f32.mrb[7].mxu0 }
 0x126   : > { %v767_v31 = vadd.f32 %v1092_v25, %v939_v4  ;;  %v1094_v32 = vadd.f32 %v736_v30, %v443_v27 }
 0x127   : > { %778 = vst.msk [vmem:[%s1369_s11 + $0x30] sm:$0xff] %vm771_vm0, %v769_v28  ;;  %v770_v33 = vadd.f32 %v1093_v29, %v939_v4 }
 0x128   : > { %776 = vst.msk [vmem:[%s1369_s11 + $0x20] sm:$0xff] %vm771_vm0, %v767_v31  ;;  %v768_v34 = vadd.f32 %v1094_v32, %v939_v4 }
 0x129   : > { %779 = vst.msk [vmem:[%s1369_s11 + $0x38] sm:$0xff] %vm771_vm0, %v770_v33 }
 0x12a   : > { %777 = vst.msk [vmem:[%s1369_s11 + $0x28] sm:$0xff] %vm771_vm0, %v768_v34 }
 0x12b PF: > { %s13_s12 = sadd.s32 1, %s1158_s12  }
 0x12c   : > { %p10_p4 = scmp.ge.s32.totalorder %s13_s12, 10  }
 0x12e   :  { %12 = sbr.rel (!%p10_p4) target bundleno = 1 (0x1), region = 66 }

// kernel: _lambda_.10
= control target key start
LH: loop header
LB: loop body
LE: loop exit
PB: predicated region body
PF: predicated region fallthrough
CT: control target
= control target key end

     0   :  { %s1215_s12 = smov 0   ;;  %s1505_s0 = inlined_call_operand.vmem [shape: f32[512,288], index: 0, kind: input, shape index: {}]   ;;  %s1506_s1 = inlined_call_operand.vmem [shape: bf16[288,128], index: 1, kind: input, shape index: {}]   ;;  %s1507_s2 = inlined_call_operand.vmem [shape: f32[1,128], index: 2, kind: input, shape index: {}]   ;;  %s1508_s3 = inlined_call_operand.vmem [shape: f32[512,128], index: 3, kind: output, shape index: {}]  }
   0x1 LB: > { %s932_s13 = sadd.s32 4294967295, %s1193_s12   ;;  %p936_p0 = scmp.ge.s32.totalorder %s1193_s12, 1  ;;  %s1193_s12 = sphi %s1215_s12, %s13_s12  }
   0x2   : > { %p139_p1 = scmp.lt.s32.totalorder %s1193_s12, 3 }
   0x4   : > { %p140_p2 = pnand %p936_p0, %p139_p1 }
   0x5   : > { %v1169_v0 = vld [vmem:[%s1506_s1 + $0x40] sm:$0xff] (!%p140_p2)   ;;  %s937_s16 = sshll.u32 (!%p140_p2), %s932_s13, 5  ;;  %v1171_v2 = vld [vmem:[%s1506_s1 + $0x48] sm:$0xff] (!%p140_p2)   ;;  %v1173_v4 = vld [vmem:[%s1506_s1 + $0x50] sm:$0xff] (!%p140_p2)   ;;  %vm473_vm0 = vcmask (!%p140_p2), 261120  }
   0x6   : > { %143 = sbr.rel (%p140_p2) target bundleno = 348 (0x15c), region = 32  ;;  %v1170_v1 = vld [vmem:[%s1506_s1] sm:$0xff] (!%p140_p2)   ;;  %p165_p3 = scmp.lt.s32.totalorder (!%p140_p2), %s937_s16, 63  ;;  %978 = vmatprep.subr.bf16.mxu0 (!%p140_p2), %v1169_v0  ;;  %1144 = vmatprep.subr.bf16.mxu1 (!%p140_p2), %v1169_v0  ;;  %v1172_v3 = vld [vmem:[%s1506_s1 + $0x8] sm:$0xff] (!%p140_p2)   ;;  %v1174_v5 = vld [vmem:[%s1506_s1 + $0x10] sm:$0xff] (!%p140_p2)  }
   0x7   : > { %979 = vmatpush3.bf16.msra.mxu0 (!%p140_p2), %v1170_v1  ;;  %1152 = vmatpush3.bf16.msra.mxu1 (!%p140_p2), %v1170_v1  ;;  %v1175_v6 = vld [vmem:[%s1506_s1 + $0x58] sm:$0xff] (!%p140_p2)   ;;  %v1177_v8 = vld [vmem:[%s1506_s1 + $0x60] sm:$0xff] (!%p140_p2)   ;;  %v1179_v10 = vld [vmem:[%s1506_s1 + $0x68] sm:$0xff] (!%p140_p2)  }
   0x8   : > { %980 = vmatprep.subr.bf16.mxu0 (!%p140_p2), %v1171_v2  ;;  %1145 = vmatprep.subr.bf16.mxu1 (!%p140_p2), %v1171_v2  ;;  %v1176_v7 = vld [vmem:[%s1506_s1 + $0x18] sm:$0xff] (!%p140_p2)   ;;  %v1178_v9 = vld [vmem:[%s1506_s1 + $0x20] sm:$0xff] (!%p140_p2)   ;;  %v1180_v17 = vld [vmem:[%s1506_s1 + $0x28] sm:$0xff] (!%p140_p2)  }
   0x9   : > { %v1181_v18 = vld [vmem:[%s1506_s1 + $0x70] sm:$0xff] (!%p140_p2)   ;;  %v1183_v20 = vld [vmem:[%s1506_s1 + $0x78] sm:$0xff] (!%p140_p2)   ;;  %v1185_v26 = vld [vmem:[%s1506_s1 + $0x80] sm:$0xff] (!%p140_p2)  }
   0xa   : > { %v1182_v19 = vld [vmem:[%s1506_s1 + $0x30] sm:$0xff] (!%p140_p2)   ;;  %v1184_v21 = vld [vmem:[%s1506_s1 + $0x38] sm:$0xff] (!%p140_p2)   ;;  %v1186_v35 = vld [vmem:[%s1506_s1 + $0x88] sm:$0xff] (!%p140_p2)  }
   0xb   : > { %981 = vmatpush3.bf16.msra.mxu0 (!%p140_p2), %v1172_v3  ;;  %1153 = vmatpush3.bf16.msra.mxu1 (!%p140_p2), %v1172_v3 }
   0xc   : > { %982 = vmatprep.subr.bf16.mxu0 (!%p140_p2), %v1173_v4  ;;  %1146 = vmatprep.subr.bf16.mxu1 (!%p140_p2), %v1173_v4 }
   0xd   : > { %s1510_s16 = smov (!%p165_p3, %s937_s16), 63 }
   0xe   : > { %s1160_s29 = smul.u32 24, %s1510_s16  ;;  %s940_s30 = sshll.u32 %s1510_s16, 3 }
   0xf   : > { %983 = vmatpush3.bf16.msra.mxu0 %v1174_v5  ;;  %1154 = vmatpush3.bf16.msra.mxu1 %v1174_v5  ;;  %s1423_s8 = scalar_lea.vmem %s1508_s3, %s940_s30 }
  0x10   : > { %984 = vmatprep.subr.bf16.mxu0 %v1175_v6  ;;  %1147 = vmatprep.subr.bf16.mxu1 %v1175_v6  ;;  %s1256_s9 = scalar_lea.vmem %s1505_s0, %s1160_s29 }
  0x11   : > { %v179_v11 = vld [vmem:[%s1256_s9 + $0x8] sm:$0xff]  ;;  %v182_v12 = vld [vmem:[%s1256_s9 + $0x20] sm:$0xff]  ;;  %v181_v23 = vld [vmem:[%s1256_s9 + $0x18] sm:$0xff] }
  0x12   : > { %v251_v13 = vld [vmem:[%s1256_s9 + $0x248] sm:$0xff]  ;;  %v275_v14 = vpack.c.bf16 %v182_v12, %v179_v11  ;;  %v254_v15 = vld [vmem:[%s1256_s9 + $0x260] sm:$0xff]  ;;  %v253_v25 = vld [vmem:[%s1256_s9 + $0x258] sm:$0xff] }
  0x13   : > { %985 = vmatpush3.bf16.msra.mxu0 %v1176_v7  ;;  %1155 = vmatpush3.bf16.msra.mxu1 %v1176_v7  ;;  %v311_v16 = vpack.c.bf16 %v254_v15, %v251_v13  ;;  %v178_v22 = vld [vmem:[%s1256_s9] sm:$0xff]  ;;  %v185_v27 = vld [vmem:[%s1256_s9 + $0x38] sm:$0xff]  ;;  %v188_v28 = vld [vmem:[%s1256_s9 + $0x50] sm:$0xff] }
  0x14   : > { %986 = vmatprep.subr.bf16.mxu0 %v1177_v8  ;;  %1148 = vmatprep.subr.bf16.mxu1 %v1177_v8  ;;  %v250_v24 = vld [vmem:[%s1256_s9 + $0x240] sm:$0xff]  ;;  %v257_v29 = vld [vmem:[%s1256_s9 + $0x278] sm:$0xff]  ;;  %v260_v30 = vld [vmem:[%s1256_s9 + $0x290] sm:$0xff]  ;;  %v274_v31 = vpack.c.bf16 %v181_v23, %v178_v22  ;;  %v278_v33 = vpack.c.bf16 %v188_v28, %v185_v27 }
  0x15   : > { %554 = vmatprep.mubr.bf16.mxu0 %v275_v14  ;;  %650 = vmatprep.mubr.bf16.mxu1 %v311_v16  ;;  %v310_v32 = vpack.c.bf16 %v253_v25, %v250_v24  ;;  %v314_v34 = vpack.c.bf16 %v260_v30, %v257_v29  ;;  %v184_v36 = vld [vmem:[%s1256_s9 + $0x30] sm:$0xff]  ;;  %v187_v37 = vld [vmem:[%s1256_s9 + $0x48] sm:$0xff]  ;;  %v194_v41 = vld [vmem:[%s1256_s9 + $0x80] sm:$0xff] }
  0x16   : > { %v256_v38 = vld [vmem:[%s1256_s9 + $0x270] sm:$0xff]  ;;  %v259_v39 = vld [vmem:[%s1256_s9 + $0x288] sm:$0xff]  ;;  %v266_v43 = vld [vmem:[%s1256_s9 + $0x2c0] sm:$0xff]  ;;  %v277_v44 = vpack.c.bf16 %v187_v37, %v184_v36 }
  0x17   : > { %987 = vmatpush3.bf16.msra.mxu0 %v1178_v9  ;;  %1156 = vmatpush3.bf16.msra.mxu1 %v1178_v9  ;;  %v191_v40 = vld [vmem:[%s1256_s9 + $0x68] sm:$0xff]  ;;  %v313_v45 = vpack.c.bf16 %v259_v39, %v256_v38  ;;  %v190_v48 = vld [vmem:[%s1256_s9 + $0x60] sm:$0xff]  ;;  %v193_v49 = vld [vmem:[%s1256_s9 + $0x78] sm:$0xff] }
  0x18   : > { %988 = vmatprep.subr.bf16.mxu0 %v1179_v10  ;;  %1149 = vmatprep.subr.bf16.mxu1 %v1179_v10  ;;  %v263_v42 = vld [vmem:[%s1256_s9 + $0x2a8] sm:$0xff]  ;;  %v281_v46 = vpack.c.bf16 %v194_v41, %v191_v40  ;;  %v262_v50 = vld [vmem:[%s1256_s9 + $0x2a0] sm:$0xff]  ;;  %v265_v51 = vld [vmem:[%s1256_s9 + $0x2b8] sm:$0xff]  ;;  %v280_v56 = vpack.c.bf16 %v193_v49, %v190_v48 }
  0x19   : > { %v317_v47 = vpack.c.bf16 %v266_v43, %v263_v42  ;;  %v197_v52 = vld [vmem:[%s1256_s9 + $0x98] sm:$0xff]  ;;  %v200_v53 = vld [vmem:[%s1256_s9 + $0xb0] sm:$0xff]  ;;  %v316_v57 = vpack.c.bf16 %v265_v51, %v262_v50  ;;  %v199_v61 = vld [vmem:[%s1256_s9 + $0xa8] sm:$0xff] }
  0x1a   : > { %v269_v54 = vld [vmem:[%s1256_s9 + $0x2d8] sm:$0xff]  ;;  %v272_v55 = vld [vmem:[%s1256_s9 + $0x2f0] sm:$0xff]  ;;  %v284_v58 = vpack.c.bf16 %v200_v53, %v197_v52  ;;  %v271_v63 = vld [vmem:[%s1256_s9 + $0x2e8] sm:$0xff] }
  0x1b   : > { %989 = vmatpush3.bf16.msra.mxu0 %v1180_v17  ;;  %1157 = vmatpush3.bf16.msra.mxu1 %v1180_v17  ;;  %v320_v59 = vpack.c.bf16 %v272_v55, %v269_v54  ;;  %v196_v60 = vld [vmem:[%s1256_s9 + $0x90] sm:$0xff]  ;;  %v203_v0 = vld [vmem:[%s1256_s9 + $0xc8] sm:$0xff]  ;;  %v206_v1 = vld [vmem:[%s1256_s9 + $0xe0] sm:$0xff] }
  0x1c   : > { %990 = vmatprep.subr.bf16.mxu0 %v1181_v18  ;;  %1150 = vmatprep.subr.bf16.mxu1 %v1181_v18  ;;  %v268_v62 = vld [vmem:[%s1256_s9 + $0x2d0] sm:$0xff]  ;;  %v183_v3 = vld [vmem:[%s1256_s9 + $0x28] sm:$0xff]  ;;  %v283_v4 = vpack.c.bf16 %v199_v61, %v196_v60  ;;  %v287_v6 = vpack.c.bf16 %v206_v1, %v203_v0  ;;  %v202_v8 = vld [vmem:[%s1256_s9 + $0xc0] sm:$0xff] }
  0x1d   : > { %v180_v2 = vld [vmem:[%s1256_s9 + $0x10] sm:$0xff]  ;;  %v319_v5 = vpack.c.bf16 %v271_v63, %v268_v62  ;;  %v205_v9 = vld [vmem:[%s1256_s9 + $0xd8] sm:$0xff]  ;;  %v186_v10 = vld [vmem:[%s1256_s9 + $0x40] sm:$0xff] }
  0x1e   : > { %v276_v7 = vpack.c.bf16 %v183_v3, %v180_v2  ;;  %v189_v11 = vld [vmem:[%s1256_s9 + $0x58] sm:$0xff]  ;;  %v212_v13 = vld [vmem:[%s1256_s9 + $0x110] sm:$0xff]  ;;  %v195_v15 = vld [vmem:[%s1256_s9 + $0x88] sm:$0xff]  ;;  %v286_v16 = vpack.c.bf16 %v205_v9, %v202_v8 }
  0x1f   : > { %991 = vmatpush3.bf16.msra.mxu0 %v1182_v19  ;;  %1158 = vmatpush3.bf16.msra.mxu1 %v1182_v19  ;;  %v209_v12 = vld [vmem:[%s1256_s9 + $0xf8] sm:$0xff]  ;;  %v192_v14 = vld [vmem:[%s1256_s9 + $0x70] sm:$0xff]  ;;  %v279_v17 = vpack.c.bf16 %v189_v11, %v186_v10  ;;  %v198_v22 = vld [vmem:[%s1256_s9 + $0xa0] sm:$0xff] }
  0x20   : > { %992 = vmatprep.subr.bf16.mxu0 %v1183_v20  ;;  %1151 = vmatprep.subr.bf16.mxu1 %v1183_v20  ;;  %v290_v18 = vpack.c.bf16 %v212_v13, %v209_v12  ;;  %v282_v19 = vpack.c.bf16 %v195_v15, %v192_v14  ;;  %v208_v20 = vld [vmem:[%s1256_s9 + $0xf0] sm:$0xff]  ;;  %v201_v23 = vld [vmem:[%s1256_s9 + $0xb8] sm:$0xff]  ;;  %v215_v24 = vld [vmem:[%s1256_s9 + $0x128] sm:$0xff] }
  0x21   : > { %v218_v25 = vld [vmem:[%s1256_s9 + $0x140] sm:$0xff]  ;;  %v207_v27 = vld [vmem:[%s1256_s9 + $0xe8] sm:$0xff]  ;;  %v285_v29 = vpack.c.bf16 %v201_v23, %v198_v22  ;;  %v221_v36 = vld [vmem:[%s1256_s9 + $0x158] sm:$0xff] }
  0x22   : > { %v293_v30 = vpack.c.bf16 %v218_v25, %v215_v24  ;;  %v224_v37 = vld [vmem:[%s1256_s9 + $0x170] sm:$0xff]  ;;  %v219_v39 = vld [vmem:[%s1256_s9 + $0x148] sm:$0xff]  ;;  %v230_v49 = vld [vmem:[%s1256_s9 + $0x1a0] sm:$0xff] }
  0x23   : > { %993 = vmatpush3.bf16.msra.mxu0 %v1184_v21  ;;  %1159 = vmatpush3.bf16.msra.mxu1 %v1184_v21  ;;  %v211_v21 = vld [vmem:[%s1256_s9 + $0x108] sm:$0xff]  ;;  %v216_v38 = vld [vmem:[%s1256_s9 + $0x130] sm:$0xff]  ;;  %v296_v42 = vpack.c.bf16 %v224_v37, %v221_v36  ;;  %v233_v60 = vld [vmem:[%s1256_s9 + $0x1b8] sm:$0xff] }
  0x24   : > { %1108 = vmatprep.subr.bf16.mxu1 %v1185_v26  ;;  %v289_v28 = vpack.c.bf16 %v211_v21, %v208_v20  ;;  %v294_v43 = vpack.c.bf16 %v219_v39, %v216_v38  ;;  %v227_v48 = vld [vmem:[%s1256_s9 + $0x188] sm:$0xff]  ;;  %v228_v50 = vld [vmem:[%s1256_s9 + $0x190] sm:$0xff]  ;;  %v242_v9 = vld [vmem:[%s1256_s9 + $0x200] sm:$0xff] }
  0x25   : > { %v231_v51 = vld [vmem:[%s1256_s9 + $0x1a8] sm:$0xff]  ;;  %v299_v54 = vpack.c.bf16 %v230_v49, %v227_v48  ;;  %v236_v61 = vld [vmem:[%s1256_s9 + $0x1d0] sm:$0xff]  ;;  %v245_v20 = vld [vmem:[%s1256_s9 + $0x218] sm:$0xff] }
  0x26   : > { %555 = vmatmul.mubr.bf16.vlgmr.msra.gmra.mrb[0].mxu0 %v274_v31  ;;  %651 = vmatmul.mubr.bf16.vlgmr.msra.gmra.mrb[0].mxu1 %v310_v32  ;;  %v214_v32 = vld [vmem:[%s1256_s9 + $0x120] sm:$0xff]  ;;  %v300_v55 = vpack.c.bf16 %v231_v51, %v228_v50  ;;  %v240_v62 = vld [vmem:[%s1256_s9 + $0x1f0] sm:$0xff]  ;;  %v243_v63 = vld [vmem:[%s1256_s9 + $0x208] sm:$0xff]  ;;  %v302_v2 = vpack.c.bf16 %v236_v61, %v233_v60 }
  0x27   : > { %1109 = vmatpush3.bf16.msra.mxu1 %v1185_v26  ;;  %562 = vmatprep.mubr.bf16.mxu0 %v278_v33  ;;  %v204_v26 = vld [vmem:[%s1256_s9 + $0xd0] sm:$0xff]  ;;  %v217_v33 = vld [vmem:[%s1256_s9 + $0x138] sm:$0xff]  ;;  %v306_v3 = vpack.c.bf16 %v243_v63, %v240_v62  ;;  %v239_v8 = vld [vmem:[%s1256_s9 + $0x1e8] sm:$0xff] }
  0x28   : > { %658 = vmatprep.mubr.bf16.mxu1 %v314_v34  ;;  %1110 = vmatprep.subr.bf16.mxu1 %v1186_v35  ;;  %v288_v31 = vpack.c.bf16 %v207_v27, %v204_v26  ;;  %v210_v34 = vld [vmem:[%s1256_s9 + $0x100] sm:$0xff]  ;;  %v292_v40 = vpack.c.bf16 %v217_v33, %v214_v32  ;;  %v252_v10 = vld [vmem:[%s1256_s9 + $0x250] sm:$0xff]  ;;  %v255_v11 = vld [vmem:[%s1256_s9 + $0x268] sm:$0xff]  ;;  %v305_v14 = vpack.c.bf16 %v242_v9, %v239_v8 }
  0x29   : > { %v312_v15 = vpack.c.bf16 %v255_v11, %v252_v10  ;;  %v248_v21 = vld [vmem:[%s1256_s9 + $0x230] sm:$0xff]  ;;  %v267_v23 = vld [vmem:[%s1256_s9 + $0x2c8] sm:$0xff] }
  0x2a   : > { %v264_v22 = vld [vmem:[%s1256_s9 + $0x2b0] sm:$0xff]  ;;  %v308_v26 = vpack.c.bf16 %v248_v21, %v245_v20 }
  0x2b   : > { %1111 = vmatpush3.bf16.msra.mxu1 %v1186_v35  ;;  %v213_v35 = vld [vmem:[%s1256_s9 + $0x118] sm:$0xff]  ;;  %v318_v27 = vpack.c.bf16 %v267_v23, %v264_v22 }
  0x2c   : > { %v291_v41 = vpack.c.bf16 %v213_v35, %v210_v34 }
  0x2e   : > { %563 = vmatmul.mubr.bf16.gmra.mrb[4].mxu0 %v277_v44  ;;  %659 = vmatmul.mubr.bf16.gmra.mrb[4].mxu1 %v313_v45  ;;  %v220_v44 = vld [vmem:[%s1256_s9 + $0x150] sm:$0xff]  ;;  %v223_v45 = vld [vmem:[%s1256_s9 + $0x168] sm:$0xff] }
  0x2f   : > { %570 = vmatprep.mubr.bf16.mxu0 %v281_v46  ;;  %666 = vmatprep.mubr.bf16.mxu1 %v317_v47  ;;  %v222_v46 = vld [vmem:[%s1256_s9 + $0x160] sm:$0xff]  ;;  %v225_v47 = vld [vmem:[%s1256_s9 + $0x178] sm:$0xff]  ;;  %v295_v52 = vpack.c.bf16 %v223_v45, %v220_v44 }
  0x30   : > { %v297_v53 = vpack.c.bf16 %v225_v47, %v222_v46 }
  0x36   : > { %571 = vmatmul.mubr.bf16.gmra.mrb[8].mxu0 %v280_v56  ;;  %667 = vmatmul.mubr.bf16.gmra.mrb[8].mxu1 %v316_v57  ;;  %v226_v56 = vld [vmem:[%s1256_s9 + $0x180] sm:$0xff]  ;;  %v229_v57 = vld [vmem:[%s1256_s9 + $0x198] sm:$0xff] }
  0x37   : > { %578 = vmatprep.mubr.bf16.mxu0 %v284_v58  ;;  %674 = vmatprep.mubr.bf16.mxu1 %v320_v59  ;;  %v234_v58 = vld [vmem:[%s1256_s9 + $0x1c0] sm:$0xff]  ;;  %v237_v59 = vld [vmem:[%s1256_s9 + $0x1d8] sm:$0xff]  ;;  %v298_v0 = vpack.c.bf16 %v229_v57, %v226_v56 }
  0x38   : > { %v303_v1 = vpack.c.bf16 %v237_v59, %v234_v58 }
  0x3e   : > { %579 = vmatmul.mubr.bf16.gmra.mrb[12].mxu0 %v283_v4  ;;  %675 = vmatmul.mubr.bf16.gmra.mrb[12].mxu1 %v319_v5  ;;  %v232_v4 = vld [vmem:[%s1256_s9 + $0x1b0] sm:$0xff]  ;;  %v235_v5 = vld [vmem:[%s1256_s9 + $0x1c8] sm:$0xff] }
  0x3f   : > { %586 = vmatprep.mubr.bf16.mxu0 %v287_v6  ;;  %1112 = vmatprep.mubr.msk.bf16.mxu1 %vm473_vm0, %v276_v7  ;;  %v246_v6 = vld [vmem:[%s1256_s9 + $0x220] sm:$0xff]  ;;  %v249_v7 = vld [vmem:[%s1256_s9 + $0x238] sm:$0xff]  ;;  %v301_v12 = vpack.c.bf16 %v235_v5, %v232_v4 }
  0x40   : > { %v309_v13 = vpack.c.bf16 %v249_v7, %v246_v6 }
  0x46   : > { %587 = vmatmul.mubr.bf16.gmra.mrb[16].mxu0 %v286_v16  ;;  %1113 = vmatmul.mubr.msk.bf16.vlgmr.msra.gmra.mrb[16].mxu1 %vm473_vm0, %v279_v17  ;;  %v238_v16 = vld [vmem:[%s1256_s9 + $0x1e0] sm:$0xff]  ;;  %v241_v17 = vld [vmem:[%s1256_s9 + $0x1f8] sm:$0xff] }
  0x47   : > { %594 = vmatprep.mubr.bf16.mxu0 %v290_v18  ;;  %1116 = vmatprep.mubr.msk.bf16.mxu1 %vm473_vm0, %v282_v19  ;;  %v258_v18 = vld [vmem:[%s1256_s9 + $0x280] sm:$0xff]  ;;  %v261_v19 = vld [vmem:[%s1256_s9 + $0x298] sm:$0xff]  ;;  %v304_v24 = vpack.c.bf16 %v241_v17, %v238_v16 }
  0x48   : > { %v315_v25 = vpack.c.bf16 %v261_v19, %v258_v18  ;;  %v1417_v18 = vld [vmem:[%s1507_s2] ss:$0 sm:$0xff] }
  0x4e   : > { %595 = vmatmul.mubr.bf16.gmra.mrb[20].mxu0 %v289_v28  ;;  %1117 = vmatmul.mubr.msk.bf16.gmra.mrb[20].mxu1 %vm473_vm0, %v285_v29  ;;  %v244_v28 = vld [vmem:[%s1256_s9 + $0x210] sm:$0xff]  ;;  %v247_v29 = vld [vmem:[%s1256_s9 + $0x228] sm:$0xff] }
  0x4f   : > { %602 = vmatprep.mubr.bf16.mxu0 %v293_v30  ;;  %1120 = vmatprep.mubr.msk.bf16.mxu1 %vm473_vm0, %v288_v31  ;;  %v270_v30 = vld [vmem:[%s1256_s9 + $0x2e0] sm:$0xff]  ;;  %v273_v31 = vld [vmem:[%s1256_s9 + $0x2f8] sm:$0xff]  ;;  %v307_v32 = vpack.c.bf16 %v247_v29, %v244_v28 }
  0x50   : > { %v321_v33 = vpack.c.bf16 %v273_v31, %v270_v30 }
  0x56   : > { %603 = vmatmul.mubr.bf16.gmra.mrb[24].mxu0 %v292_v40  ;;  %1121 = vmatmul.mubr.msk.bf16.gmra.mrb[24].mxu1 %vm473_vm0, %v291_v41 }
  0x57   : > { %610 = vmatprep.mubr.bf16.mxu0 %v296_v42  ;;  %1124 = vmatprep.mubr.msk.bf16.mxu1 %vm473_vm0, %v294_v43 }
  0x5e   : > { %611 = vmatmul.mubr.bf16.gmra.mrb[28].mxu0 %v295_v52  ;;  %1125 = vmatmul.mubr.msk.bf16.gmra.mrb[28].mxu1 %vm473_vm0, %v297_v53 }
  0x5f   : > { %618 = vmatprep.mubr.bf16.mxu0 %v299_v54  ;;  %1128 = vmatprep.mubr.msk.bf16.mxu1 %vm473_vm0, %v300_v55 }
  0x66   : > { %619 = vmatmul.mubr.bf16.gmra.mrb[32].mxu0 %v298_v0  ;;  %1129 = vmatmul.mubr.msk.bf16.gmra.mrb[32].mxu1 %vm473_vm0, %v303_v1 }
  0x67   : > { %626 = vmatprep.mubr.bf16.mxu0 %v302_v2  ;;  %1132 = vmatprep.mubr.msk.bf16.mxu1 %vm473_vm0, %v306_v3 }
  0x6e   : > { %627 = vmatmul.mubr.bf16.gmra.mrb[36].mxu0 %v301_v12  ;;  %1133 = vmatmul.mubr.msk.bf16.gmra.mrb[36].mxu1 %vm473_vm0, %v309_v13 }
  0x6f   : > { %634 = vmatprep.mubr.bf16.mxu0 %v305_v14  ;;  %1136 = vmatprep.mubr.msk.bf16.mxu1 %vm473_vm0, %v312_v15 }
  0x76   : > { %635 = vmatmul.mubr.bf16.gmra.mrb[40].mxu0 %v304_v24  ;;  %1137 = vmatmul.mubr.msk.bf16.gmra.mrb[40].mxu1 %vm473_vm0, %v315_v25 }
  0x77   : > { %642 = vmatprep.mubr.bf16.mxu0 %v308_v26  ;;  %1140 = vmatprep.mubr.msk.bf16.mxu1 %vm473_vm0, %v318_v27 }
  0x7e   : > { %643 = vmatmul.mubr.bf16.gmra.mrb[44].mxu0 %v307_v32  ;;  %1141 = vmatmul.mubr.msk.bf16.gmra.mrb[44].mxu1 %vm473_vm0, %v321_v33 }
  0xf9   : > { %v994_v34 = vpop.f32.mrb[0].mxu0  ;;  %v1066_v35 = vpop.f32.mrb[0].mxu1 }
  0xfa   : > { %v995_v36 = vpop.f32.mrb[1].mxu0  ;;  %v1067_v37 = vpop.f32.mrb[1].mxu1 }
  0xfb   : > { %v996_v38 = vadd.f32 %v995_v36, %v994_v34  ;;  %v997_v39 = vpop.f32.mrb[2].mxu0  ;;  %v1397_v40 = vadd.f32 %v1067_v37, %v1066_v35  ;;  %v1069_v41 = vpop.f32.mrb[2].mxu1 }
  0xfc   : > { %v998_v42 = vpop.f32.mrb[3].mxu0  ;;  %v1070_v43 = vpop.f32.mrb[3].mxu1 }
  0xfd   : > { %v999_v44 = vadd.f32 %v998_v42, %v997_v39  ;;  %v1399_v45 = vadd.f32 %v1070_v43, %v1069_v41  ;;  %v557_v22 = vadd.f32 %v996_v38, %v1417_v18 }
  0xff   : > { %v560_v31 = vadd.f32 %v999_v44, %v1417_v18 }
 0x101   : > { %v1000_v46 = vpop.f32.mrb[4].mxu0  ;;  %v1072_v47 = vpop.f32.mrb[4].mxu1 }
 0x102   : > { %v1001_v48 = vpop.f32.mrb[5].mxu0  ;;  %v1073_v49 = vpop.f32.mrb[5].mxu1 }
 0x103   : > { %v1002_v50 = vadd.f32 %v1001_v48, %v1000_v46  ;;  %v1003_v51 = vpop.f32.mrb[6].mxu0  ;;  %v1401_v52 = vadd.f32 %v1073_v49, %v1072_v47  ;;  %v1075_v53 = vpop.f32.mrb[6].mxu1 }
 0x104   : > { %v1004_v54 = vpop.f32.mrb[7].mxu0  ;;  %v1076_v55 = vpop.f32.mrb[7].mxu1 }
 0x105   : > { %v1005_v56 = vadd.f32 %v1004_v54, %v1003_v51  ;;  %v1403_v57 = vadd.f32 %v1076_v55, %v1075_v53  ;;  %v565_v19 = vadd.f32 %v1002_v50, %v1417_v18 }
 0x107   : > { %v568_v26 = vadd.f32 %v1005_v56, %v1417_v18 }
 0x109   : > { %v1006_v58 = vpop.f32.mrb[8].mxu0  ;;  %v1078_v59 = vpop.f32.mrb[8].mxu1 }
 0x10a   : > { %v1007_v60 = vpop.f32.mrb[9].mxu0  ;;  %v1079_v61 = vpop.f32.mrb[9].mxu1 }
 0x10b   : > { %v1008_v62 = vadd.f32 %v1007_v60, %v1006_v58  ;;  %v1009_v63 = vpop.f32.mrb[10].mxu0  ;;  %v1405_v0 = vadd.f32 %v1079_v61, %v1078_v59  ;;  %v1081_v1 = vpop.f32.mrb[10].mxu1 }
 0x10c   : > { %v1010_v2 = vpop.f32.mrb[11].mxu0  ;;  %v1082_v3 = vpop.f32.mrb[11].mxu1 }
 0x10d   : > { %v1011_v4 = vadd.f32 %v1010_v2, %v1009_v63  ;;  %v1407_v5 = vadd.f32 %v1082_v3, %v1081_v1  ;;  %v573_v41 = vadd.f32 %v1008_v62, %v1417_v18 }
 0x10f   : > { %v576_v51 = vadd.f32 %v1011_v4, %v1417_v18 }
 0x111   : > { %v1012_v6 = vpop.f32.mrb[12].mxu0  ;;  %v1084_v7 = vpop.f32.mrb[12].mxu1 }
 0x112   : > { %v1013_v8 = vpop.f32.mrb[13].mxu0  ;;  %v1085_v9 = vpop.f32.mrb[13].mxu1 }
 0x113   : > { %v1014_v10 = vadd.f32 %v1013_v8, %v1012_v6  ;;  %v1015_v11 = vpop.f32.mrb[14].mxu0  ;;  %v1409_v12 = vadd.f32 %v1085_v9, %v1084_v7  ;;  %v1087_v13 = vpop.f32.mrb[14].mxu1 }
 0x114   : > { %v1016_v14 = vpop.f32.mrb[15].mxu0  ;;  %v1088_v15 = vpop.f32.mrb[15].mxu1 }
 0x115   : > { %v1017_v16 = vadd.f32 %v1016_v14, %v1015_v11  ;;  %v1411_v17 = vadd.f32 %v1088_v15, %v1087_v13  ;;  %v581_v37 = vadd.f32 %v1014_v10, %v1417_v18 }
 0x117   : > { %v584_v46 = vadd.f32 %v1017_v16, %v1417_v18 }
 0x119   : > { %v1018_v20 = vpop.f32.mrb[16].mxu0  ;;  %v1114_v21 = vpop.f32.mrb[16].mxu1 }
 0x11a   : > { %v726_v23 = vadd.f32 %v1114_v21, %v565_v19  ;;  %v1019_v24 = vpop.f32.mrb[17].mxu0  ;;  %v717_v25 = vpop.f32.mrb[17].mxu1 }
 0x11b   : > { %v1020_v27 = vadd.f32 %v1019_v24, %v1018_v20  ;;  %v718_v28 = vadd.f32 %v717_v25, %v557_v22  ;;  %v1021_v29 = vpop.f32.mrb[18].mxu0  ;;  %v1115_v30 = vpop.f32.mrb[18].mxu1 }
 0x11c   : > { %846 = vst [vmem:[%s1423_s8 + $0x10] sm:$0xff] %v726_v23  ;;  %v729_v32 = vadd.f32 %v1115_v30, %v568_v26  ;;  %v1022_v33 = vpop.f32.mrb[19].mxu0  ;;  %v720_v34 = vpop.f32.mrb[19].mxu1 }
 0x11d   : > { %844 = vst [vmem:[%s1423_s8] sm:$0xff] %v718_v28  ;;  %v1023_v35 = vadd.f32 %v1022_v33, %v1021_v29  ;;  %v721_v36 = vadd.f32 %v720_v34, %v560_v31  ;;  %v589_v62 = vadd.f32 %v1020_v27, %v1417_v18 }
 0x11e   : > { %847 = vst [vmem:[%s1423_s8 + $0x18] sm:$0xff] %v729_v32 }
 0x11f   : > { %845 = vst [vmem:[%s1423_s8 + $0x8] sm:$0xff] %v721_v36  ;;  %v592_v9 = vadd.f32 %v1023_v35, %v1417_v18 }
 0x121   : > { %v1024_v38 = vpop.f32.mrb[20].mxu0  ;;  %v1118_v39 = vpop.f32.mrb[20].mxu1 }
 0x122   : > { %v742_v42 = vadd.f32 %v1118_v39, %v581_v37  ;;  %v1025_v43 = vpop.f32.mrb[21].mxu0  ;;  %v733_v44 = vpop.f32.mrb[21].mxu1 }
 0x123   : > { %v1026_v47 = vadd.f32 %v1025_v43, %v1024_v38  ;;  %v734_v48 = vadd.f32 %v733_v44, %v573_v41  ;;  %v1027_v49 = vpop.f32.mrb[22].mxu0  ;;  %v1119_v50 = vpop.f32.mrb[22].mxu1 }
 0x124   : > { %850 = vst [vmem:[%s1423_s8 + $0x30] sm:$0xff] %v742_v42  ;;  %v745_v53 = vadd.f32 %v1119_v50, %v584_v46  ;;  %v1028_v54 = vpop.f32.mrb[23].mxu0  ;;  %v736_v55 = vpop.f32.mrb[23].mxu1 }
 0x125   : > { %848 = vst [vmem:[%s1423_s8 + $0x20] sm:$0xff] %v734_v48  ;;  %v1029_v56 = vadd.f32 %v1028_v54, %v1027_v49  ;;  %v737_v58 = vadd.f32 %v736_v55, %v576_v51  ;;  %v597_v59 = vadd.f32 %v1026_v47, %v1417_v18 }
 0x126   : > { %851 = vst [vmem:[%s1423_s8 + $0x38] sm:$0xff] %v745_v53 }
 0x127   : > { %849 = vst [vmem:[%s1423_s8 + $0x28] sm:$0xff] %v737_v58  ;;  %v600_v3 = vadd.f32 %v1029_v56, %v1417_v18 }
 0x129   : > { %v1030_v60 = vpop.f32.mrb[24].mxu0  ;;  %v1122_v61 = vpop.f32.mrb[24].mxu1 }
 0x12a   : > { %v758_v63 = vadd.f32 %v1122_v61, %v597_v59  ;;  %v1031_v1 = vpop.f32.mrb[25].mxu0  ;;  %v749_v2 = vpop.f32.mrb[25].mxu1 }
 0x12b   : > { %v1032_v4 = vadd.f32 %v1031_v1, %v1030_v60  ;;  %v750_v6 = vadd.f32 %v749_v2, %v589_v62  ;;  %v1033_v7 = vpop.f32.mrb[26].mxu0  ;;  %v1123_v8 = vpop.f32.mrb[26].mxu1 }
 0x12c   : > { %854 = vst [vmem:[%s1423_s8 + $0x50] sm:$0xff] %v758_v63  ;;  %v761_v10 = vadd.f32 %v1123_v8, %v600_v3  ;;  %v1034_v11 = vpop.f32.mrb[27].mxu0  ;;  %v752_v13 = vpop.f32.mrb[27].mxu1 }
 0x12d   : > { %852 = vst [vmem:[%s1423_s8 + $0x40] sm:$0xff] %v750_v6  ;;  %v1035_v14 = vadd.f32 %v1034_v11, %v1033_v7  ;;  %v753_v15 = vadd.f32 %v752_v13, %v592_v9  ;;  %v605_v20 = vadd.f32 %v1032_v4, %v1417_v18  ;;  %v661_v4 = vadd.f32 %v1401_v52, %v1417_v18 }
 0x12e   : > { %855 = vst [vmem:[%s1423_s8 + $0x58] sm:$0xff] %v761_v10  ;;  %v653_v9 = vadd.f32 %v1397_v40, %v1417_v18 }
 0x12f   : > { %853 = vst [vmem:[%s1423_s8 + $0x48] sm:$0xff] %v753_v15  ;;  %v608_v27 = vadd.f32 %v1035_v14, %v1417_v18  ;;  %v664_v14 = vadd.f32 %v1403_v57, %v1417_v18 }
 0x131   : > { %v1036_v16 = vpop.f32.mrb[28].mxu0  ;;  %v1126_v19 = vpop.f32.mrb[28].mxu1 }
 0x132   : > { %v1037_v21 = vpop.f32.mrb[29].mxu0  ;;  %v765_v22 = vpop.f32.mrb[29].mxu1 }
 0x133   : > { %v1038_v23 = vadd.f32 %v1037_v21, %v1036_v16  ;;  %v766_v24 = vadd.f32 %v765_v22, %v605_v20  ;;  %v1039_v25 = vpop.f32.mrb[30].mxu0  ;;  %v1127_v26 = vpop.f32.mrb[30].mxu1  ;;  %v656_v20 = vadd.f32 %v1399_v45, %v1417_v18 }
 0x134   : > { %v1040_v28 = vpop.f32.mrb[31].mxu0  ;;  %v768_v29 = vpop.f32.mrb[31].mxu1 }
 0x135   : > { %v613_v30 = vadd.f32 %v1038_v23, %v1417_v18  ;;  %856 = vst [vmem:[%s1423_s8 + $0x60] sm:$0xff] %v766_v24  ;;  %v1041_v31 = vadd.f32 %v1040_v28, %v1039_v25  ;;  %v769_v32 = vadd.f32 %v768_v29, %v608_v27  ;;  %v677_v27 = vadd.f32 %v1409_v12, %v1417_v18 }
 0x137   : > { %v774_v33 = vadd.f32 %v1126_v19, %v613_v30  ;;  %v616_v34 = vadd.f32 %v1041_v31, %v1417_v18  ;;  %857 = vst [vmem:[%s1423_s8 + $0x68] sm:$0xff] %v769_v32  ;;  %v669_v30 = vadd.f32 %v1405_v0, %v1417_v18 }
 0x139   : > { %858 = vst [vmem:[%s1423_s8 + $0x70] sm:$0xff] %v774_v33  ;;  %v777_v35 = vadd.f32 %v1127_v26, %v616_v34  ;;  %v1042_v36 = vpop.f32.mrb[32].mxu0  ;;  %v1130_v37 = vpop.f32.mrb[32].mxu1  ;;  %v680_v34 = vadd.f32 %v1411_v17, %v1417_v18 }
 0x13a   : > { %v1043_v38 = vpop.f32.mrb[33].mxu0  ;;  %v781_v39 = vpop.f32.mrb[33].mxu1 }
 0x13b   : > { %859 = vst [vmem:[%s1423_s8 + $0x78] sm:$0xff] %v777_v35  ;;  %v1044_v41 = vadd.f32 %v1043_v38, %v1042_v36  ;;  %v1045_v42 = vpop.f32.mrb[34].mxu0  ;;  %v1131_v43 = vpop.f32.mrb[34].mxu1  ;;  %v672_v38 = vadd.f32 %v1407_v5, %v1417_v18 }
 0x13c   : > { %v1046_v44 = vpop.f32.mrb[35].mxu0  ;;  %v784_v46 = vpop.f32.mrb[35].mxu1 }
 0x13d   : > { %v621_v47 = vadd.f32 %v1044_v41, %v1417_v18  ;;  %v1047_v48 = vadd.f32 %v1046_v44, %v1045_v42 }
 0x13f   : > { %v782_v49 = vadd.f32 %v781_v39, %v621_v47  ;;  %v624_v50 = vadd.f32 %v1047_v48, %v1417_v18 }
 0x141   : > { %860 = vst [vmem:[%s1423_s8 + $0x80] sm:$0xff] %v782_v49  ;;  %v785_v51 = vadd.f32 %v784_v46, %v624_v50  ;;  %v1048_v53 = vpop.f32.mrb[36].mxu0  ;;  %v1459_v54 = vpop.f32.mrb[36].mxu1 }
 0x142   : > { %v1049_v55 = vpop.f32.mrb[37].mxu0  ;;  %v797_v56 = vpop.f32.mrb[37].mxu1 }
 0x143   : > { %861 = vst [vmem:[%s1423_s8 + $0x88] sm:$0xff] %v785_v51  ;;  %v1050_v58 = vadd.f32 %v1049_v55, %v1048_v53  ;;  %v1051_v59 = vpop.f32.mrb[38].mxu0  ;;  %v1462_v60 = vpop.f32.mrb[38].mxu1 }
 0x144   : > { %v1052_v61 = vpop.f32.mrb[39].mxu0  ;;  %v800_v62 = vpop.f32.mrb[39].mxu1 }
 0x145   : > { %v629_v63 = vadd.f32 %v1050_v58, %v1417_v18  ;;  %v1053_v1 = vadd.f32 %v1052_v61, %v1051_v59 }
 0x147   : > { %v790_v2 = vadd.f32 %v1130_v37, %v629_v63  ;;  %v632_v3 = vadd.f32 %v1053_v1, %v1417_v18 }
 0x149   : > { %862 = vst [vmem:[%s1423_s8 + $0x90] sm:$0xff] %v790_v2  ;;  %v793_v6 = vadd.f32 %v1131_v43, %v632_v3  ;;  %v1054_v7 = vpop.f32.mrb[40].mxu0  ;;  %v1138_v8 = vpop.f32.mrb[40].mxu1 }
 0x14a   : > { %v822_v10 = vadd.f32 %v1138_v8, %v661_v4  ;;  %v1055_v11 = vpop.f32.mrb[41].mxu0  ;;  %v813_v13 = vpop.f32.mrb[41].mxu1 }
 0x14b   : > { %863 = vst [vmem:[%s1423_s8 + $0x98] sm:$0xff] %v793_v6  ;;  %v1056_v15 = vadd.f32 %v1055_v11, %v1054_v7  ;;  %v814_v52 = vadd.f32 %v813_v13, %v653_v9  ;;  %v1057_v16 = vpop.f32.mrb[42].mxu0  ;;  %v1139_v19 = vpop.f32.mrb[42].mxu1 }
 0x14c   : > { %870 = vst [vmem:[%s1423_s8 + $0xd0] sm:$0xff] %v822_v10  ;;  %v825_v40 = vadd.f32 %v1139_v19, %v664_v14  ;;  %v1058_v21 = vpop.f32.mrb[43].mxu0  ;;  %v816_v22 = vpop.f32.mrb[43].mxu1 }
 0x14d   : > { %v637_v23 = vadd.f32 %v1056_v15, %v1417_v18  ;;  %868 = vst [vmem:[%s1423_s8 + $0xc0] sm:$0xff] %v814_v52  ;;  %v1059_v24 = vadd.f32 %v1058_v21, %v1057_v16  ;;  %v817_v57 = vadd.f32 %v816_v22, %v656_v20 }
 0x14e   : > { %871 = vst [vmem:[%s1423_s8 + $0xd8] sm:$0xff] %v825_v40 }
 0x14f   : > { %v798_v25 = vadd.f32 %v797_v56, %v637_v23  ;;  %v640_v26 = vadd.f32 %v1059_v24, %v1417_v18  ;;  %869 = vst [vmem:[%s1423_s8 + $0xc8] sm:$0xff] %v817_v57 }
 0x151   : > { %864 = vst [vmem:[%s1423_s8 + $0xa0] sm:$0xff] %v798_v25  ;;  %v801_v45 = vadd.f32 %v800_v62, %v640_v26  ;;  %v1060_v28 = vpop.f32.mrb[44].mxu0  ;;  %v1142_v29 = vpop.f32.mrb[44].mxu1 }
 0x152   : > { %v838_v31 = vadd.f32 %v1142_v29, %v677_v27  ;;  %v1061_v32 = vpop.f32.mrb[45].mxu0  ;;  %v829_v33 = vpop.f32.mrb[45].mxu1 }
 0x153   : > { %865 = vst [vmem:[%s1423_s8 + $0xa8] sm:$0xff] %v801_v45  ;;  %v1062_v35 = vadd.f32 %v1061_v32, %v1060_v28  ;;  %v830_v12 = vadd.f32 %v829_v33, %v669_v30  ;;  %v1063_v36 = vpop.f32.mrb[46].mxu0  ;;  %v1143_v37 = vpop.f32.mrb[46].mxu1 }
 0x154   : > { %874 = vst [vmem:[%s1423_s8 + $0xf0] sm:$0xff] %v838_v31  ;;  %v841_v0 = vadd.f32 %v1143_v37, %v680_v34  ;;  %v1064_v39 = vpop.f32.mrb[47].mxu0  ;;  %v832_v41 = vpop.f32.mrb[47].mxu1 }
 0x155   : > { %v645_v42 = vadd.f32 %v1062_v35, %v1417_v18  ;;  %872 = vst [vmem:[%s1423_s8 + $0xe0] sm:$0xff] %v830_v12  ;;  %v1065_v43 = vadd.f32 %v1064_v39, %v1063_v36  ;;  %v833_v17 = vadd.f32 %v832_v41, %v672_v38 }
 0x156   : > { %875 = vst [vmem:[%s1423_s8 + $0xf8] sm:$0xff] %v841_v0 }
 0x157   : > { %v806_v44 = vadd.f32 %v1459_v54, %v645_v42  ;;  %v648_v46 = vadd.f32 %v1065_v43, %v1417_v18  ;;  %873 = vst [vmem:[%s1423_s8 + $0xe8] sm:$0xff] %v833_v17 }
 0x159   : > { %866 = vst [vmem:[%s1423_s8 + $0xb0] sm:$0xff] %v806_v44  ;;  %v809_v47 = vadd.f32 %v1462_v60, %v648_v46 }
 0x15b   : > { %867 = vst [vmem:[%s1423_s8 + $0xb8] sm:$0xff] %v809_v47 }
 0x15c PF: > { %s13_s12 = sadd.s32 1, %s1193_s12  }
 0x15d   : > { %p10_p4 = scmp.ge.s32.totalorder %s13_s12, 4  }
 0x15f   :  { %12 = sbr.rel (!%p10_p4) target bundleno = 1 (0x1), region = 62 }

// kernel: _lambda_.11
= control target key start
LH: loop header
LB: loop body
LE: loop exit
PB: predicated region body
PF: predicated region fallthrough
CT: control target
= control target key end

     0   :  { %s2798_s18 = smov 0   ;;  %s2800_s19 = smov 0   ;;  %s3296_s0 = inlined_call_operand.vmem [shape: f32[2,4,64,128], index: 0, kind: input, shape index: {}]   ;;  %s3297_s1 = inlined_call_operand.vmem [shape: bf16[9,32,128], index: 1, kind: input, shape index: {}]   ;;  %s3298_s2 = inlined_call_operand.vmem [shape: f32[64,32], index: 2, kind: input, shape index: {}]   ;;  %s3299_s3 = inlined_call_operand.vmem [shape: f32[64,32], index: 3, kind: input, shape index: {}]   ;;  %s3300_s4 = inlined_call_operand.vmem [shape: f32[64,32], index: 4, kind: input, shape index: {}]   ;;  %s3301_s5 = inlined_call_operand.vmem [shape: f32[2,4,10,10,32], index: 5, kind: output, shape index: {}]  }
   0x1   :  { %s2802_s20 = smov 0   ;;  %s2804_s21 = smov 0  }
   0x2   :  { %s2806_s22 = smov 0  }
   0x3 LB: > { %s24_s23 = sadd.s32 1, %s2754_s20  ;;  %s27_s24 = sadd.s32 1, %s2758_s21  ;;  %s2762_s22 = sphi %s2806_s22, %s15_s22   ;;  %s2758_s21 = sphi %s2804_s21, %s3305_s21   ;;  %s2754_s20 = sphi %s2802_s20, %s3304_s20   ;;  %s2750_s19 = sphi %s2800_s19, %s3303_s19   ;;  %s2746_s18 = sphi %s2798_s18, %s3302_s18  }
   0x4   : > { %p25_p0 = scmp.ge.s32.totalorder %s24_s23, 4  ;;  %p2176_p1 = scmp.ge.s32.totalorder %s2762_s22, 1 }
   0x5   : > { %p207_p2 = scmp.lt.s32.totalorder %s2762_s22, 9 }
   0x6   : > { %s3307_s23 = smov (%p25_p0, %s24_s23), 0  ;;  %s3309_s24 = smov (!%p25_p0, %s27_s24), %s2758_s21 }
   0x7   : > { %p208_p3 = pnand %p2176_p1, %p207_p2  ;;  %p29_p4 = scmp.ge.s32.totalorder %s3309_s24, 2 }
   0x8   : > { %p243_p5 = scmp.lt.s32.totalorder (!%p208_p3), %s2750_s19, 1  ;;  %p245_p6 = scmp.lt.s32.totalorder (!%p208_p3), %s2746_s18, 3 }
   0x9   : > { %s3311_s24 = smov (%p29_p4, %s3309_s24), 0  ;;  %211 = sbr.rel (%p208_p3) target bundleno = 965 (0x3c5), region = 40 }
   0xa   : > { %p2181_p7 = scmp.ne.s32.totalorder (!%p208_p3), %s2746_s18, 0 }
  0x10   : > { %s3313_s19 = smov (!%p243_p5, %s2750_s19), 1  ;;  %vm266_vm0 = vcmask (!%p2181_p7), 261120   ;;  %vm268_vm1 = vcmask (!%p2181_p7), 254976   ;;  %v2764_v0 = vmov (!%p2181_p7), 0.0  }
  0x11   : > { %s246_s25 = scalar_select %p245_p6, %s2746_s18, 3 }
  0x12   : > { %s2178_s26 = sshll.u32 %s3313_s19, 5  ;;  %s2533_s27 = smul.u32 80, %s3313_s19  ;;  %267 = vst.msk [vmem:[#allocation2] sm:$0xff] (!%p2181_p7), %vm266_vm0, %v2764_v0  ;;  %270 = vst.msk [vmem:[#allocation2 + $0x10] sm:$0xff] (!%p2181_p7), %vm266_vm0, %v2764_v0 }
  0x13   : > { %s2177_s28 = sshll.u32 %s246_s25, 3  ;;  %s2532_s29 = smul.u32 20, %s246_s25  ;;  %272 = vst.msk [vmem:[#allocation2 + $0x20] sm:$0xff] (!%p2181_p7), %vm266_vm0, %v2764_v0  ;;  %274 = vst.msk [vmem:[#allocation2 + $0x30] sm:$0xff] (!%p2181_p7), %vm266_vm0, %v2764_v0 }
  0x14   : > { %s249_s30 = sadd.s32 %s2178_s26, %s2177_s28  ;;  %265 = sbr.rel (%p2181_p7) target bundleno = 32 (0x20), region = 44  ;;  %276 = vst.msk [vmem:[#allocation2 + $0x40] sm:$0xff] (!%p2181_p7), %vm266_vm0, %v2764_v0  ;;  %278 = vst.msk [vmem:[#allocation2 + $0x50] sm:$0xff] (!%p2181_p7), %vm266_vm0, %v2764_v0 }
  0x15   : > { %s2179_s6 = sshll.u32 %s249_s30, 3  ;;  %s258_s7 = sadd.s32 %s2533_s27, %s2532_s29  ;;  %280 = vst.msk [vmem:[#allocation2 + $0x60] sm:$0xff] (!%p2181_p7), %vm266_vm0, %v2764_v0  ;;  %282 = vst.msk [vmem:[#allocation2 + $0x70] sm:$0xff] (!%p2181_p7), %vm266_vm0, %v2764_v0 }
  0x16   : > { %s2835_s10 = scalar_lea.vmem %s3296_s0, %s2179_s6  ;;  %s2180_s11 = sshll.u32 %s258_s7, 3  ;;  %284 = vst.msk [vmem:[#allocation2 + $0x80] sm:$0xff] (!%p2181_p7), %vm266_vm0, %v2764_v0  ;;  %286 = vst.msk [vmem:[#allocation2 + $0x90] sm:$0xff] (!%p2181_p7), %vm266_vm0, %v2764_v0 }
  0x17   : > { %s2840_s14 = scalar_lea.vmem %s3301_s5, %s2180_s11  ;;  %288 = vst.msk [vmem:[#allocation3] sm:$0xff] (!%p2181_p7), %vm266_vm0, %v2764_v0  ;;  %289 = vst.msk [vmem:[#allocation3 + $0x8] sm:$0xff] (!%p2181_p7), %vm266_vm0, %v2764_v0 }
  0x18   : > { %290 = vst.msk [vmem:[#allocation3 + $0x10] sm:$0xff] (!%p2181_p7), %vm266_vm0, %v2764_v0  ;;  %291 = vst.msk [vmem:[#allocation3 + $0x18] sm:$0xff] (!%p2181_p7), %vm266_vm0, %v2764_v0 }
  0x19   : > { %292 = vst.msk [vmem:[#allocation3 + $0x20] sm:$0xff] (!%p2181_p7), %vm266_vm0, %v2764_v0  ;;  %293 = vst.msk [vmem:[#allocation3 + $0x28] sm:$0xff] (!%p2181_p7), %vm266_vm0, %v2764_v0 }
  0x1a   : > { %294 = vst.msk [vmem:[#allocation3 + $0x30] sm:$0xff] (!%p2181_p7), %vm266_vm0, %v2764_v0  ;;  %295 = vst.msk [vmem:[#allocation3 + $0x38] sm:$0xff] (!%p2181_p7), %vm266_vm0, %v2764_v0 }
  0x1b   : > { %269 = vst.msk [vmem:[#allocation2 + $0x8] sm:$0x3] %vm268_vm1, %v2764_v0  ;;  %271 = vst.msk [vmem:[#allocation2 + $0x18] sm:$0x3] %vm268_vm1, %v2764_v0 }
  0x1c   : > { %273 = vst.msk [vmem:[#allocation2 + $0x28] sm:$0x3] %vm268_vm1, %v2764_v0  ;;  %275 = vst.msk [vmem:[#allocation2 + $0x38] sm:$0x3] %vm268_vm1, %v2764_v0 }
  0x1d   : > { %277 = vst.msk [vmem:[#allocation2 + $0x48] sm:$0x3] %vm268_vm1, %v2764_v0  ;;  %279 = vst.msk [vmem:[#allocation2 + $0x58] sm:$0x3] %vm268_vm1, %v2764_v0 }
  0x1e   : > { %281 = vst.msk [vmem:[#allocation2 + $0x68] sm:$0x3] %vm268_vm1, %v2764_v0  ;;  %283 = vst.msk [vmem:[#allocation2 + $0x78] sm:$0x3] %vm268_vm1, %v2764_v0 }
  0x1f   : > { %285 = vst.msk [vmem:[#allocation2 + $0x88] sm:$0x3] %vm268_vm1, %v2764_v0  ;;  %287 = vst.msk [vmem:[#allocation2 + $0x98] sm:$0x3] %vm268_vm1, %v2764_v0 }
  0x20 PF: > { %v2578_v1 = vld [vmem:[%s3297_s1] sm:$0xff]   ;;  %v2580_v3 = vld [vmem:[%s3297_s1 + $0x8] sm:$0xff]   ;;  %v2889_v6 = vld [vmem:[#allocation2 + $0x10] sm:$0xff]  ;;  %vm348_vm2 = vcmask 261120   ;;  %s2766_s28 = smov 32   ;;  %s2767_s12 = smov 96  }
  0x21   : > { %v2877_v2 = vld [vmem:[%s3297_s1 + $0x40] sm:$0xff]   ;;  %2348 = vmatprep.subr.bf16.mxu1 %v2578_v1  ;;  %v2886_v4 = vld [vmem:[%s3297_s1 + $0x48] sm:$0xff]   ;;  %v2895_v11 = vld [vmem:[#allocation2 + $0x30] sm:$0xff]  ;;  %vm2057_vm3 = vcmask 254976  }
  0x22   : > { %2396 = vmatprep.subr.bf16.mxu0 %v2877_v2  ;;  %2349 = vmatpush3.bf16.msra.mxu1 %v2578_v1  ;;  %v312_v5 = vld [vmem:[#allocation2] sm:$0xff]  ;;  %v2582_v14 = vld [vmem:[%s3297_s1 + $0x10] sm:$0xff]   ;;  %v2584_v22 = vld [vmem:[%s3297_s1 + $0x58] sm:$0xff]  }
  0x23   : > { %2397 = vmatpush3.bf16.msra.mxu0 %v2877_v2  ;;  %2350 = vmatprep.subr.bf16.mxu1 %v2580_v3  ;;  %v320_v8 = vpack.c.bf16 %v2889_v6, %v312_v5  ;;  %v834_v9 = vld [vmem:[#allocation2 + $0x21] sm:$0xff]  ;;  %v835_v15 = vld [vmem:[#allocation2 + $0x31] sm:$0xff] }
  0x24   : > { %2398 = vmatprep.subr.bf16.mxu0 %v2886_v4  ;;  %v2893_v10 = vld [vmem:[#allocation2 + $0x20] sm:$0xff]  ;;  %v2583_v18 = vld [vmem:[%s3297_s1 + $0x50] sm:$0xff]   ;;  %v2585_v25 = vld [vmem:[%s3297_s1 + $0x18] sm:$0xff]   ;;  %v451_v42 = vpack.c.bf16 %v835_v15, %v834_v9 }
  0x25   : > { %v2899_v13 = vpack.c.bf16 %v2895_v11, %v2893_v10  ;;  %2352 = vmatprep.mubr.msk.bf16.mxu1 %vm348_vm2, %v320_v8  ;;  %v836_v16 = vld [vmem:[#allocation2 + $0x41] sm:$0xff]  ;;  %v2912_v20 = vld [vmem:[#allocation2 + $0x50] sm:$0xff]  ;;  %v2592_v55 = vld [vmem:[%s3297_s1 + $0x78] sm:$0xff]   ;;  %v711_v0 = vpack.c.bf16 %v2893_v10, %v2889_v6 }
  0x26   : > { %2351 = vmatpush3.bf16.msra.mxu1 %v2580_v3  ;;  %v842_v17 = vpack.c.bf16 %v836_v16, %v835_v15  ;;  %v2910_v19 = vld [vmem:[#allocation2 + $0x40] sm:$0xff]  ;;  %v2925_v24 = vld [vmem:[#allocation2 + $0x70] sm:$0xff]  ;;  %v2588_v41 = vld [vmem:[%s3297_s1 + $0x68] sm:$0xff]  }
  0x27   : > { %v833_v7 = vld [vmem:[#allocation2 + $0x11] sm:$0xff]  ;;  %2399 = vmatpush3.bf16.msra.mxu0 %v2886_v4  ;;  %2360 = vmatprep.subr.bf16.mxu1 %v2582_v14  ;;  %v2918_v21 = vpack.c.bf16 %v2912_v20, %v2910_v19  ;;  %v2923_v23 = vld [vmem:[#allocation2 + $0x60] sm:$0xff]  ;;  %v2589_v46 = vld [vmem:[%s3297_s1 + $0x28] sm:$0xff]   ;;  %v712_v3 = vpack.c.bf16 %v2910_v19, %v2895_v11 }
  0x28   : > { %v841_v12 = vpack.c.bf16 %v834_v9, %v833_v7  ;;  %2408 = vmatprep.subr.bf16.mxu0 %v2583_v18  ;;  %v963_v26 = vld [vmem:[#allocation2 + $0x12] sm:$0xff]  ;;  %v964_v27 = vld [vmem:[#allocation2 + $0x22] sm:$0xff]  ;;  %v323_v29 = vpack.c.bf16 %v2925_v24, %v2923_v23  ;;  %v713_v5 = vpack.c.bf16 %v2923_v23, %v2912_v20 }
  0x29   : > { %2353 = vmatmul.mubr.msk.bf16.vlgmr.msra.gmra.mrb[0].mxu1 %vm348_vm2, %v2899_v13  ;;  %v971_v28 = vpack.c.bf16 %v964_v27, %v963_v26  ;;  %v2586_v30 = vld [vmem:[%s3297_s1 + $0x60] sm:$0xff]   ;;  %v965_v34 = vld [vmem:[#allocation2 + $0x32] sm:$0xff]  ;;  %v2595_v1 = vld [vmem:[%s3297_s1 + $0x88] sm:$0xff]  }
  0x2a   : > { %2400 = vmatprep.mubr.msk.bf16.mxu0 %vm348_vm2, %v841_v12  ;;  %2361 = vmatpush3.bf16.msra.mxu1 %v2582_v14  ;;  %v442_v31 = vld [vmem:[#allocation2 + $0x1] sm:$0xff]  ;;  %v967_v36 = vld [vmem:[#allocation2 + $0x52] sm:$0xff]  ;;  %v581_v56 = vpack.c.bf16 %v965_v34, %v964_v27 }
  0x2b   : > { %2401 = vmatmul.mubr.msk.bf16.vlgmr.msra.gmra.mrb[0].mxu0 %vm348_vm2, %v842_v17  ;;  %2356 = vmatprep.mubr.msk.bf16.mxu1 %vm348_vm2, %v2918_v21  ;;  %v450_v32 = vpack.c.bf16 %v833_v7, %v442_v31  ;;  %v2587_v33 = vld [vmem:[%s3297_s1 + $0x20] sm:$0xff]   ;;  %v2944_v40 = vld [vmem:[#allocation2 + $0x51] sm:$0xff]  ;;  %v297_v20 = vld [vmem:[%s2835_s10 + $0x8] sm:$0xff] }
  0x2c   : > { %2409 = vmatpush3.bf16.msra.mxu0 %v2583_v18  ;;  %2362 = vmatprep.subr.bf16.mxu1 %v2585_v25  ;;  %v966_v35 = vld [vmem:[#allocation2 + $0x42] sm:$0xff]  ;;  %v969_v43 = vld [vmem:[#allocation2 + $0x72] sm:$0xff]  ;;  %v452_v45 = vpack.c.bf16 %v2944_v40, %v836_v16 }
  0x2d   : > { %2410 = vmatprep.subr.bf16.mxu0 %v2584_v22  ;;  %2412 = vmatprep.mubr.msk.bf16.mxu0 %vm348_vm2, %v971_v28  ;;  %v968_v37 = vld [vmem:[#allocation2 + $0x62] sm:$0xff]  ;;  %v972_v38 = vpack.c.bf16 %v966_v35, %v965_v34  ;;  %v2590_v47 = vld [vmem:[%s3297_s1 + $0x70] sm:$0xff]   ;;  %v582_v57 = vpack.c.bf16 %v967_v36, %v966_v35  ;;  %v2593_v60 = vld [vmem:[%s3297_s1 + $0x38] sm:$0xff]  }
  0x2e   : > { %2363 = vmatpush3.bf16.msra.mxu1 %v2585_v25  ;;  %v973_v39 = vpack.c.bf16 %v968_v37, %v967_v36  ;;  %v2950_v44 = vld [vmem:[#allocation2 + $0x82] sm:$0xff]  ;;  %v2965_v50 = vld [vmem:[#allocation2 + $0x71] sm:$0xff]  ;;  %v583_v63 = vpack.c.bf16 %v969_v43, %v968_v37 }
  0x2f   : > { %2372 = vmatprep.subr.bf16.mxu1 %v2587_v33  ;;  %v974_v48 = vpack.c.bf16 %v2950_v44, %v969_v43  ;;  %v2963_v49 = vld [vmem:[#allocation2 + $0x61] sm:$0xff]  ;;  %v2591_v52 = vld [vmem:[%s3297_s1 + $0x30] sm:$0xff]   ;;  %v299_v18 = vld [vmem:[%s2835_s10 + $0x18] sm:$0xff] }
  0x30   : > { %2411 = vmatpush3.bf16.msra.mxu0 %v2584_v22  ;;  %v572_v51 = vld [vmem:[#allocation2 + $0x2] sm:$0xff]  ;;  %v453_v53 = vpack.c.bf16 %v2965_v50, %v2963_v49  ;;  %v1101_v59 = vld [vmem:[#allocation2 + $0x90] sm:$0xff]  ;;  %v843_v10 = vpack.c.bf16 %v2963_v49, %v2944_v40  ;;  %v303_v35 = vld [vmem:[%s2835_s10 + $0x38] sm:$0xff] }
  0x31   : > { %2420 = vmatprep.subr.bf16.mxu0 %v2586_v30  ;;  %2357 = vmatmul.mubr.msk.bf16.gmra.mrb[4].mxu1 %vm348_vm2, %v323_v29  ;;  %v580_v54 = vpack.c.bf16 %v963_v26, %v572_v51  ;;  %v1100_v58 = vld [vmem:[#allocation2 + $0x80] sm:$0xff]  ;;  %v1231_v7 = vld [vmem:[#allocation2 + $0x91] sm:$0xff] }
  0x32   : > { %2364 = vmatprep.mubr.msk.bf16.mxu1 %vm348_vm2, %v450_v32  ;;  %v2594_v61 = vld [vmem:[%s3297_s1 + $0x80] sm:$0xff]   ;;  %v1105_v62 = vpack.c.bf16 %v1101_v59, %v1100_v58  ;;  %v714_v9 = vpack.c.bf16 %v1100_v58, %v2925_v24  ;;  %v298_v16 = vld [vmem:[%s2835_s10 + $0x10] sm:$0xff] }
  0x33   : > { %v1230_v6 = vld [vmem:[#allocation2 + $0x81] sm:$0xff]  ;;  %v302_v32 = vld [vmem:[%s2835_s10 + $0x30] sm:$0xff] }
  0x34   : > { %v1235_v8 = vpack.c.bf16 %v1231_v7, %v1230_v6  ;;  %v296_v17 = vld [vmem:[%s2835_s10] sm:$0xff] }
  0x35   : > { %v1572_v58 = vld [vmem:[%s3299_s3] sm:$0xff] }
  0x37   : > { %2413 = vmatmul.mubr.msk.bf16.vlgmr.msra.gmra.mrb[0].mxu0 %vm348_vm2, %v972_v38 }
  0x38   : > { %2421 = vmatpush3.bf16.msra.mxu0 %v2586_v30  ;;  %2416 = vmatprep.mubr.msk.bf16.mxu0 %vm348_vm2, %v973_v39  ;;  %v301_v39 = vld [vmem:[%s2835_s10 + $0x28] sm:$0xff] }
  0x39   : > { %2422 = vmatprep.subr.bf16.mxu0 %v2588_v41  ;;  %2365 = vmatmul.mubr.msk.bf16.vlgmr.msra.gmra.mrb[0].mxu1 %vm348_vm2, %v451_v42 }
  0x3a   : > { %2373 = vmatpush3.bf16.msra.mxu1 %v2587_v33  ;;  %2368 = vmatprep.mubr.msk.bf16.mxu1 %vm348_vm2, %v452_v45  ;;  %v300_v33 = vld [vmem:[%s2835_s10 + $0x20] sm:$0xff]  ;;  %s2765_s10 = smov 64  }
  0x3b   : > { %2374 = vmatprep.subr.bf16.mxu1 %v2589_v46 }
  0x3c   : > { %2423 = vmatpush3.bf16.msra.mxu0 %v2588_v41 }
  0x3d   : > { %2432 = vmatprep.subr.bf16.mxu0 %v2590_v47 }
  0x3e   : > { %2375 = vmatpush3.bf16.msra.mxu1 %v2589_v46 }
  0x3f   : > { %2417 = vmatmul.mubr.msk.bf16.gmra.mrb[4].mxu0 %vm348_vm2, %v974_v48  ;;  %2384 = vmatprep.subr.bf16.mxu1 %v2591_v52 }
  0x40   : > { %2424 = vmatprep.mubr.msk.bf16.mxu0 %vm348_vm2, %v2899_v13 }
  0x41   : > { %2369 = vmatmul.mubr.msk.bf16.gmra.mrb[4].mxu1 %vm348_vm2, %v453_v53 }
  0x42   : > { %2376 = vmatprep.mubr.msk.bf16.mxu1 %vm348_vm2, %v580_v54 }
  0x47   : > { %2425 = vmatmul.mubr.msk.bf16.vlgmr.msra.gmra.mrb[0].mxu0 %vm348_vm2, %v2918_v21 }
  0x48   : > { %2433 = vmatpush3.bf16.msra.mxu0 %v2590_v47  ;;  %2428 = vmatprep.mubr.msk.bf16.mxu0 %vm348_vm2, %v323_v29 }
  0x49   : > { %2434 = vmatprep.subr.bf16.mxu0 %v2592_v55  ;;  %2377 = vmatmul.mubr.msk.bf16.vlgmr.msra.gmra.mrb[0].mxu1 %vm348_vm2, %v581_v56 }
  0x4a   : > { %2385 = vmatpush3.bf16.msra.mxu1 %v2591_v52  ;;  %2380 = vmatprep.mubr.msk.bf16.mxu1 %vm348_vm2, %v582_v57 }
  0x4b   : > { %2386 = vmatprep.subr.bf16.mxu1 %v2593_v60 }
  0x4c   : > { %2435 = vmatpush3.bf16.msra.mxu0 %v2592_v55 }
  0x4d   : > { %2444 = vmatprep.subr.bf16.mxu0 %v2594_v61 }
  0x4e   : > { %2387 = vmatpush3.bf16.msra.mxu1 %v2593_v60  ;;  %v1492_v60 = vld [vmem:[#allocation3] sm:$0xff] }
  0x4f   : > { %2429 = vmatmul.mubr.msk.bf16.gmra.mrb[4].mxu0 %vm348_vm2, %v1105_v62  ;;  %2456 = vmatprep.subr.bf16.mxu1 %v2877_v2  ;;  %v1580_v62 = vmul.f32 %v1572_v58, %v1492_v60 }
  0x50   : > { %2436 = vmatprep.mubr.msk.bf16.mxu0 %vm348_vm2, %v451_v42 }
  0x51   : > { %2381 = vmatmul.mubr.msk.bf16.gmra.mrb[4].mxu1 %vm348_vm2, %v583_v63 }
  0x52   : > { %2388 = vmatprep.mubr.msk.bf16.mxu1 %vm348_vm2, %v711_v0  ;;  %v1493_v0 = vld [vmem:[#allocation3 + $0x8] sm:$0xff] }
  0x57   : > { %2437 = vmatmul.mubr.msk.bf16.vlgmr.msra.gmra.mrb[0].mxu0 %vm348_vm2, %v452_v45 }
  0x58   : > { %2445 = vmatpush3.bf16.msra.mxu0 %v2594_v61  ;;  %2440 = vmatprep.mubr.msk.bf16.mxu0 %vm348_vm2, %v453_v53  ;;  %v1573_v61 = vld [vmem:[%s3299_s3 + $0x8] sm:$0xff] }
  0x59   : > { %2446 = vmatprep.subr.bf16.mxu0 %v2595_v1  ;;  %2389 = vmatmul.mubr.msk.bf16.vlgmr.msra.gmra.mrb[0].mxu1 %vm348_vm2, %v712_v3  ;;  %v1581_v3 = vmul.f32 %v1573_v61, %v1493_v0 }
  0x5a   : > { %2458 = vmatpush3.bf16.msra.mxu1 %v2877_v2  ;;  %2392 = vmatprep.mubr.msk.bf16.mxu1 %vm348_vm2, %v713_v5  ;;  %v1361_v2 = vld [vmem:[#allocation2 + $0x92] sm:$0xff] }
  0x5b   : > { %2457 = vmatprep.subr.bf16.mxu1 %v2886_v4  ;;  %v1365_v11 = vpack.c.bf16 %v1361_v2, %v2950_v44  ;;  %v1494_v5 = vld [vmem:[#allocation3 + $0x10] sm:$0xff]  ;;  %v1496_v2 = vld [vmem:[#allocation3 + $0x20] sm:$0xff] }
  0x5c   : > { %2447 = vmatpush3.bf16.msra.mxu0 %v2595_v1  ;;  %v1574_v1 = vld [vmem:[%s3299_s3 + $0x10] sm:$0xff] }
  0x5d   : > { %v1582_v7 = vmul.f32 %v1574_v1, %v1494_v5 }
  0x5e   : > { %2459 = vmatpush3.bf16.msra.mxu1 %v2886_v4  ;;  %v844_v4 = vpack.c.bf16 %v1230_v6, %v2965_v50  ;;  %v1575_v6 = vld [vmem:[%s3299_s3 + $0x18] sm:$0xff] }
  0x5f   : > { %2441 = vmatmul.mubr.msk.bf16.gmra.mrb[4].mxu0 %vm348_vm2, %v1235_v8  ;;  %v1495_v8 = vld [vmem:[#allocation3 + $0x18] sm:$0xff] }
  0x60   : > { %2448 = vmatprep.mubr.msk.bf16.mxu0 %vm348_vm2, %v581_v56 }
  0x61   : > { %2393 = vmatmul.mubr.msk.bf16.gmra.mrb[4].mxu1 %vm348_vm2, %v714_v9  ;;  %v1576_v9 = vld [vmem:[%s3299_s3 + $0x20] sm:$0xff] }
  0x62   : > { %2404 = vmatprep.mubr.msk.bf16.mxu1 %vm348_vm2, %v843_v10  ;;  %v1583_v10 = vmul.f32 %v1575_v6, %v1495_v8 }
  0x67   : > { %2449 = vmatmul.mubr.msk.bf16.vlgmr.msra.gmra.mrb[0].mxu0 %vm348_vm2, %v582_v57 }
  0x68   : > { %2452 = vmatprep.mubr.msk.bf16.mxu0 %vm348_vm2, %v583_v63 }
  0x6d   : > { %2405 = vmatmul.mubr.msk.bf16.vlgmr.msra.gmra.mrb[4].mxu1 %vm348_vm2, %v844_v4  ;;  %v1577_v4 = vld [vmem:[%s3299_s3 + $0x28] sm:$0xff] }
  0x6f   : > { %2453 = vmatmul.mubr.msk.bf16.gmra.mrb[4].mxu0 %vm348_vm2, %v1365_v11  ;;  %v1584_v11 = vmul.f32 %v1576_v9, %v1496_v2 }
 0x12c   : > { %v2390_v12 = vpop.f32.mrb[0].mxu1 }
 0x12d   : > { %v786_v13 = vpop.f32.mrb[1].mxu1  ;;  %v2460_v19 = vadd.f32 %v2390_v12, %v298_v16  ;;  %v1497_v12 = vld [vmem:[#allocation3 + $0x28] sm:$0xff]  ;;  %v1579_v16 = vld [vmem:[%s3299_s3 + $0x38] sm:$0xff] }
 0x12e   : > { %v2391_v14 = vpop.f32.mrb[2].mxu1  ;;  %v2462_v21 = vadd.f32 %v786_v13, %v296_v17  ;;  %v1578_v13 = vld [vmem:[%s3299_s3 + $0x30] sm:$0xff] }
 0x12f   : > { %v789_v15 = vpop.f32.mrb[3].mxu1  ;;  %v2464_v23 = vadd.f32 %v2391_v14, %v299_v18  ;;  %v1585_v14 = vmul.f32 %v1577_v4, %v1497_v12  ;;  %v1499_v18 = vld [vmem:[#allocation3 + $0x38] sm:$0xff] }
 0x130   : > { %v2466_v26 = vadd.f32 %v789_v15, %v297_v20  ;;  %v1498_v15 = vld [vmem:[#allocation3 + $0x30] sm:$0xff] }
 0x131   : > { %v1586_v17 = vmul.f32 %v1578_v13, %v1498_v15  ;;  %v1502_v20 = vld [vmem:[%s3298_s2 + $0x10] sm:$0xff] }
 0x13a   : > { %v2450_v22 = vpop.f32.mrb[0].mxu0 }
 0x13b   : > { %v3029_v24 = vadd.f32 %v2460_v19, %v2450_v22  ;;  %v1437_v25 = vpop.f32.mrb[1].mxu0  ;;  %v1587_v19 = vmul.f32 %v1579_v16, %v1499_v18  ;;  %v1510_v22 = vmul.f32 %v1502_v20, %v1494_v5 }
 0x13c   : > { %v3031_v27 = vadd.f32 %v2462_v21, %v1437_v25  ;;  %v2451_v28 = vpop.f32.mrb[2].mxu0  ;;  %v1500_v21 = vld [vmem:[%s3298_s2] sm:$0xff] }
 0x13d   : > { %2596 = vtanh.f32 %v3029_v24  ;;  %v3034_v29 = vadd.f32 %v2464_v23, %v2451_v28  ;;  %v1440_v30 = vpop.f32.mrb[3].mxu0  ;;  %v1503_v23 = vld [vmem:[%s3298_s2 + $0x18] sm:$0xff]  ;;  %v1508_v25 = vmul.f32 %v1500_v21, %v1492_v60 }
 0x13e   : > { %2598 = vtanh.f32 %v3031_v27  ;;  %v3037_v31 = vadd.f32 %v2466_v26, %v1440_v30  ;;  %v1518_v26 = vadd.f32 %v3029_v24, %v1510_v22  ;;  %v1511_v28 = vmul.f32 %v1503_v23, %v1495_v8  ;;  %v1501_v30 = vld [vmem:[%s3298_s2 + $0x8] sm:$0xff] }
 0x13f   : > { %2600 = vtanh.f32 %v3034_v29 }
 0x140   : > { %v2406_v34 = vpop.f32.mrb[4].mxu1  ;;  %2602 = vtanh.f32 %v3037_v31 }
 0x141   : > { %v2468_v36 = vadd.f32 %v2406_v34, %v302_v32  ;;  %v932_v38 = vpop.f32.mrb[5].mxu1  ;;  %v1516_v32 = vadd.f32 %v3031_v27, %v1508_v25  ;;  %v1509_v34 = vmul.f32 %v1501_v30, %v1493_v0 }
 0x142   : > { %v2454_v37 = vpop.f32.mrb[4].mxu0  ;;  %v2470_v40 = vadd.f32 %v932_v38, %v300_v33  ;;  %v2407_v42 = vpop.f32.mrb[6].mxu1  ;;  %v1504_v33 = vld [vmem:[%s3298_s2 + $0x20] sm:$0xff] }
 0x143   : > { %v1453_v41 = vpop.f32.mrb[5].mxu0  ;;  %v3045_v43 = vadd.f32 %v2468_v36, %v2454_v37  ;;  %v2472_v44 = vadd.f32 %v2407_v42, %v303_v35  ;;  %v935_v46 = vpop.f32.mrb[7].mxu1  ;;  %v2270_v35 = vmul.f32 -1.442695, %v1518_v26  ;;  %v1519_v36 = vadd.f32 %v3034_v29, %v1511_v28  ;;  %v1505_v37 = vld [vmem:[%s3298_s2 + $0x28] sm:$0xff] }
 0x144   : > { %v2455_v45 = vpop.f32.mrb[6].mxu0  ;;  %v3047_v47 = vadd.f32 %v2470_v40, %v1453_v41  ;;  %v2474_v48 = vadd.f32 %v935_v46, %v301_v39  ;;  %v1512_v38 = vmul.f32 %v1504_v33, %v1496_v2  ;;  %v2268_v39 = vmul.f32 -1.442695, %v1516_v32  ;;  %v1506_v40 = vld [vmem:[%s3298_s2 + $0x30] sm:$0xff] }
 0x145   : > { %v1456_v49 = vpop.f32.mrb[7].mxu0  ;;  %v3049_v50 = vadd.f32 %v2472_v44, %v2455_v45  ;;  %v1517_v41 = vadd.f32 %v3037_v31, %v1509_v34  ;;  %v2271_v42 = vmul.f32 -1.442695, %v1519_v36  ;;  %v1513_v44 = vmul.f32 %v1505_v37, %v1497_v12  ;;  %v1507_v45 = vld [vmem:[%s3298_s2 + $0x38] sm:$0xff] }
 0x146   : > { %2604 = vtanh.f32 %v3047_v47  ;;  %v3052_v52 = vadd.f32 %v2474_v48, %v1456_v49  ;;  %v1520_v46 = vadd.f32 %v3047_v47, %v1512_v38  ;;  %v1514_v48 = vmul.f32 %v1506_v40, %v1498_v15 }
 0x147   : > { %v2597_v51 = vpop.eup %2596  ;;  %v2269_v49 = vmul.f32 -1.442695, %v1517_v41 }
 0x148   : > { %v2599_v53 = vpop.eup %2598  ;;  %1736 = vrot.lane.b32.xlu1 %v2597_v51, %s2765_s10  ;;  %2606 = vtanh.f32 %v3052_v52  ;;  %v1521_v51 = vadd.f32 %v3052_v52, %v1513_v44 }
 0x149   : > { %1732 = vrot.lane.b32.xlu0 %v2599_v53, %s2765_s10  ;;  %v2601_v54 = vpop.eup %2600  ;;  %2608 = vtanh.f32 %v3045_v43  ;;  %v1515_v53 = vmul.f32 %v1507_v45, %v1499_v18 }
 0x14a   : > { %v2603_v55 = vpop.eup %2602  ;;  %2610 = vtanh.f32 %v3049_v50 }
 0x14b   : > { %2612 = vpow2.f32 %v2270_v35 }
 0x14c   : > { %1738 = vrot.lane.b32.xlu1 %v2601_v54, %s2765_s10  ;;  %2614 = vpow2.f32 %v2268_v39  ;;  %v2272_v54 = vmul.f32 -1.442695, %v1520_v46 }
 0x14d   : > { %1734 = vrot.lane.b32.xlu0 %v2603_v55, %s2765_s10  ;;  %2616 = vpow2.f32 %v2271_v42  ;;  %v1522_v55 = vadd.f32 %v3045_v43, %v1514_v48 }
 0x14e   : > { %2618 = vpow2.f32 %v2269_v49 }
 0x14f   : > { %2620 = vpow2.f32 %v2272_v54 }
 0x150   : > { %v2605_v56 = vpop.eup %2604 }
 0x151   : > { %1740 = vrot.lane.b32.xlu0 %v2605_v56, %s2765_s10  ;;  %v2273_v56 = vmul.f32 -1.442695, %v1521_v51 }
 0x152   : > { %v2607_v57 = vpop.eup %2606 }
 0x153   : > { %1742 = vrot.lane.b32.xlu1 %v2607_v57, %s2765_s10  ;;  %v2609_v59 = vpop.eup %2608  ;;  %v1523_v57 = vadd.f32 %v3049_v50, %v1515_v53  ;;  %2622 = vpow2.f32 %v2273_v56 }
 0x154   : > { %v2611_v63 = vpop.eup %2610 }
 0x155   : > { %1744 = vrot.lane.b32.xlu0 %v2609_v59, %s2765_s10  ;;  %v2613_v58 = vpop.eup %2612  ;;  %v2274_v59 = vmul.f32 -1.442695, %v1522_v55 }
 0x156   : > { %v2615_v61 = vpop.eup %2614 }
 0x157   : > { %1746 = vrot.lane.b32.xlu1 %v2611_v63, %s2765_s10  ;;  %v2617_v63 = vpop.eup %2616  ;;  %2624 = vpow2.f32 %v2274_v59 }
 0x158   : > { %v1551_v1 = vadd.f32 1.0, %v2617_v63 }
 0x159   : > { %1596 = vrot.lane.b32.xlu0 %v1580_v62, %s2766_s28  ;;  %v1550_v62 = vadd.f32 1.0, %v2613_v58 }
 0x15b   : > { %1598 = vrot.lane.b32.xlu1 %v1581_v3, %s2766_s28  ;;  %v2619_v3 = vpop.eup %2618 }
 0x15c   : > { %v1549_v6 = vadd.f32 1.0, %v2619_v3 }
 0x15d   : > { %1600 = vrot.lane.b32.xlu0 %v1582_v7, %s2766_s28 }
 0x15f   : > { %1602 = vrot.lane.b32.xlu1 %v1583_v10, %s2766_s28 }
 0x161   : > { %1604 = vrot.lane.b32.xlu0 %v1584_v11, %s2766_s28 }
 0x163   : > { %1606 = vrot.lane.b32.xlu1 %v1585_v14, %s2766_s28 }
 0x165   : > { %1608 = vrot.lane.b32.xlu0 %v1586_v17, %s2766_s28 }
 0x167   : > { %1610 = vrot.lane.b32.xlu1 %v1587_v19, %s2766_s28 }
 0x169   : > { %1684 = vrot.lane.b32.xlu0 %v1492_v60, %s2766_s28  ;;  %v2275_v60 = vmul.f32 -1.442695, %v1523_v57 }
 0x16b   : > { %1686 = vrot.lane.b32.xlu1 %v1493_v0, %s2766_s28  ;;  %v1548_v0 = vadd.f32 1.0, %v2615_v61  ;;  %2626 = vpow2.f32 %v2275_v60 }
 0x16c   : > { %2628 = vrcp.f32 %v1550_v62 }
 0x16d   : > { %1688 = vrot.lane.b32.xlu0 %v1494_v5, %s2766_s28  ;;  %v2621_v5 = vpop.eup %2620  ;;  %2630 = vrcp.f32 %v1548_v0 }
 0x16e   : > { %2632 = vrcp.f32 %v1551_v1  ;;  %v2623_v7 = vpop.eup %2622 }
 0x16f   : > { %1690 = vrot.lane.b32.xlu1 %v1495_v8, %s2766_s28  ;;  %v1552_v8 = vadd.f32 1.0, %v2621_v5  ;;  %v2625_v9 = vpop.eup %2624  ;;  %2634 = vrcp.f32 %v1549_v6  ;;  %v1553_v10 = vadd.f32 1.0, %v2623_v7 }
 0x171   : > { %1692 = vrot.lane.b32.xlu0 %v1496_v2, %s2766_s28  ;;  %2636 = vrcp.f32 %v1552_v8 }
 0x172   : > { %2638 = vrcp.f32 %v1553_v10 }
 0x173   : > { %1694 = vrot.lane.b32.xlu1 %v1497_v12, %s2766_s28  ;;  %v1554_v12 = vadd.f32 1.0, %v2625_v9 }
 0x175   : > { %1696 = vrot.lane.b32.xlu0 %v1498_v15, %s2766_s28  ;;  %v2627_v2 = vpop.eup %2626  ;;  %2640 = vrcp.f32 %v1554_v12 }
 0x176   : > { %v2629_v4 = vpop.eup %2628  ;;  %v1555_v15 = vadd.f32 1.0, %v2627_v2 }
 0x177   : > { %1698 = vrot.lane.b32.xlu1 %v1499_v18, %s2766_s28  ;;  %v2631_v16 = vpop.eup %2630 }
 0x178   : > { %v2633_v17 = vpop.eup %2632  ;;  %2642 = vrcp.f32 %v1555_v15 }
 0x179   : > { %v2635_v22 = vpop.eup %2634 }
 0x17b   : > { %v2637_v25 = vpop.eup %2636 }
 0x17c   : > { %v2639_v30 = vpop.eup %2638 }
 0x17f   : > { %v2641_v34 = vpop.eup %2640 }
 0x182   : > { %v2643_v37 = vpop.eup %2642 }
 0x1ba   : > { %v1737_v11 = vpop.permute.xlu1 %1736 }
 0x1bb   : > { %v1758_v13 = vmul.f32 %v2629_v4, %v1737_v11  ;;  %v1733_v14 = vpop.permute.xlu0 %1732 }
 0x1bc   : > { %v1756_v19 = vmul.f32 %v2631_v16, %v1733_v14 }
 0x1bd   : > { %1776 = vrot.lane.b32.xlu0 %v1758_v13, %s2766_s28 }
 0x1be   : > { %v1739_v18 = vpop.permute.xlu1 %1738 }
 0x1bf   : > { %v1759_v20 = vmul.f32 %v2633_v17, %v1739_v18  ;;  %v1735_v21 = vpop.permute.xlu0 %1734 }
 0x1c0   : > { %v1757_v23 = vmul.f32 %v2635_v22, %v1735_v21 }
 0x1c1   : > { %1778 = vrot.lane.b32.xlu1 %v1759_v20, %s2766_s28  ;;  %1772 = vrot.lane.b32.xlu0 %v1756_v19, %s2766_s28 }
 0x1c3   : > { %v1741_v26 = vpop.permute.xlu0 %1740 }
 0x1c4   : > { %v1760_v28 = vmul.f32 %v2637_v25, %v1741_v26 }
 0x1c5   : > { %1774 = vrot.lane.b32.xlu1 %v1757_v23, %s2766_s28  ;;  %v1743_v32 = vpop.permute.xlu1 %1742 }
 0x1c6   : > { %v1761_v33 = vmul.f32 %v2639_v30, %v1743_v32  ;;  %1780 = vrot.lane.b32.xlu0 %v1760_v28, %s2766_s28 }
 0x1c7   : > { %v1745_v35 = vpop.permute.xlu0 %1744 }
 0x1c8   : > { %v1762_v36 = vmul.f32 %v2641_v34, %v1745_v35 }
 0x1c9   : > { %1782 = vrot.lane.b32.xlu1 %v1761_v33, %s2766_s28  ;;  %v1747_v38 = vpop.permute.xlu1 %1746 }
 0x1ca   : > { %v1763_v39 = vmul.f32 %v2643_v37, %v1747_v38  ;;  %1784 = vrot.lane.b32.xlu0 %v1762_v36, %s2766_s28 }
 0x1cb   : > { %v1597_v40 = vpop.permute.xlu0 %1596 }
 0x1cc   : > { %v1620_v46 = vadd.f32 %v3031_v27, %v1597_v40 }
 0x1cd   : > { %1786 = vrot.lane.b32.xlu1 %v1763_v39, %s2766_s28  ;;  %v1599_v41 = vpop.permute.xlu1 %1598 }
 0x1ce   : > { %v2276_v53 = vmul.f32 -1.442695, %v1620_v46  ;;  %v1621_v55 = vadd.f32 %v3037_v31, %v1599_v41 }
 0x1cf   : > { %v1601_v42 = vpop.permute.xlu0 %1600 }
 0x1d0   : > { %v1622_v44 = vadd.f32 %v3029_v24, %v1601_v42  ;;  %v2277_v59 = vmul.f32 -1.442695, %v1621_v55 }
 0x1d1   : > { %v1603_v45 = vpop.permute.xlu1 %1602 }
 0x1d2   : > { %v2278_v48 = vmul.f32 -1.442695, %v1622_v44  ;;  %v1623_v49 = vadd.f32 %v3034_v29, %v1603_v45 }
 0x1d3   : > { %v1605_v51 = vpop.permute.xlu0 %1604 }
 0x1d4   : > { %2644 = vpow2.f32 %v2278_v48  ;;  %v2279_v56 = vmul.f32 -1.442695, %v1623_v49  ;;  %v1624_v57 = vadd.f32 %v3047_v47, %v1605_v51 }
 0x1d5   : > { %v1607_v54 = vpop.permute.xlu1 %1606  ;;  %2646 = vpow2.f32 %v2276_v53 }
 0x1d6   : > { %2648 = vpow2.f32 %v2279_v56  ;;  %v1625_v60 = vadd.f32 %v3052_v52, %v1607_v54  ;;  %v2280_v62 = vmul.f32 -1.442695, %v1624_v57 }
 0x1d7   : > { %v1609_v58 = vpop.permute.xlu0 %1608  ;;  %2650 = vpow2.f32 %v2277_v59 }
 0x1d8   : > { %v1626_v63 = vadd.f32 %v3045_v43, %v1609_v58  ;;  %v2281_v0 = vmul.f32 -1.442695, %v1625_v60  ;;  %2652 = vpow2.f32 %v2280_v62 }
 0x1d9   : > { %v1611_v61 = vpop.permute.xlu1 %1610 }
 0x1da   : > { %v1627_v1 = vadd.f32 %v3049_v50, %v1611_v61  ;;  %v2282_v6 = vmul.f32 -1.442695, %v1626_v63  ;;  %2654 = vpow2.f32 %v2281_v0 }
 0x1db   : > { %v1685_v3 = vpop.permute.xlu0 %1684 }
 0x1dc   : > { %v2283_v7 = vmul.f32 -1.442695, %v1627_v1  ;;  %2656 = vpow2.f32 %v2282_v6  ;;  %v1806_v6 = vld [vmem:[%s3300_s4 + $0x10] sm:$0xff] }
 0x1dd   : > { %v1687_v10 = vpop.permute.xlu1 %1686 }
 0x1de   : > { %v2645_v5 = vpop.eup %2644  ;;  %2658 = vpow2.f32 %v2283_v7 }
 0x1df   : > { %v2647_v8 = vpop.eup %2646  ;;  %v1654_v9 = vadd.f32 1.0, %v2645_v5  ;;  %v1689_v4 = vpop.permute.xlu0 %1688 }
 0x1e0   : > { %v2649_v2 = vpop.eup %2648  ;;  %v1652_v11 = vadd.f32 1.0, %v2647_v8 }
 0x1e1   : > { %2660 = vrcp.f32 %v1654_v9  ;;  %v1655_v12 = vadd.f32 1.0, %v2649_v2  ;;  %v2651_v13 = vpop.eup %2650  ;;  %v1691_v14 = vpop.permute.xlu1 %1690  ;;  %v1807_v9 = vld [vmem:[%s3300_s4 + $0x18] sm:$0xff] }
 0x1e2   : > { %v2653_v15 = vpop.eup %2652  ;;  %2662 = vrcp.f32 %v1652_v11  ;;  %v1653_v16 = vadd.f32 1.0, %v2651_v13  ;;  %v1805_v13 = vld [vmem:[%s3300_s4 + $0x8] sm:$0xff] }
 0x1e3   : > { %2664 = vrcp.f32 %v1655_v12  ;;  %v1693_v17 = vpop.permute.xlu0 %1692  ;;  %v1656_v19 = vadd.f32 1.0, %v2653_v15  ;;  %v1808_v15 = vld [vmem:[%s3300_s4 + $0x20] sm:$0xff] }
 0x1e4   : > { %v2655_v18 = vpop.eup %2654  ;;  %2666 = vrcp.f32 %v1653_v16 }
 0x1e5   : > { %v1657_v21 = vadd.f32 1.0, %v2655_v18  ;;  %v1695_v22 = vpop.permute.xlu1 %1694  ;;  %2668 = vrcp.f32 %v1656_v19  ;;  %v1809_v18 = vld [vmem:[%s3300_s4 + $0x28] sm:$0xff] }
 0x1e6   : > { %v2657_v20 = vpop.eup %2656 }
 0x1e7   : > { %v1658_v26 = vadd.f32 1.0, %v2657_v20  ;;  %v1697_v28 = vpop.permute.xlu0 %1696  ;;  %2670 = vrcp.f32 %v1657_v21  ;;  %v1810_v21 = vld [vmem:[%s3300_s4 + $0x30] sm:$0xff] }
 0x1e8   : > { %v2659_v23 = vpop.eup %2658 }
 0x1e9   : > { %v1659_v30 = vadd.f32 1.0, %v2659_v23  ;;  %2672 = vrcp.f32 %v1658_v26  ;;  %v1699_v35 = vpop.permute.xlu1 %1698 }
 0x1eb   : > { %v2661_v25 = vpop.eup %2660  ;;  %2674 = vrcp.f32 %v1659_v30 }
 0x1ec   : > { %v2663_v32 = vpop.eup %2662  ;;  %v1710_v33 = vmul.f32 %v2661_v25, %v1689_v4  ;;  %v1811_v25 = vld [vmem:[%s3300_s4 + $0x38] sm:$0xff] }
 0x1ed   : > { %v2665_v34 = vpop.eup %2664  ;;  %v1708_v38 = vmul.f32 %v2663_v32, %v1685_v3 }
 0x1ee   : > { %v1711_v39 = vmul.f32 %v2665_v34, %v1691_v14  ;;  %v2667_v40 = vpop.eup %2666 }
 0x1ef   : > { %v2669_v46 = vpop.eup %2668  ;;  %v1709_v48 = vmul.f32 %v2667_v40, %v1687_v10  ;;  %v1804_v10 = vld [vmem:[%s3300_s4] sm:$0xff]  ;;  %v2037_v40 = vld [vmem:[#allocation2 + $0x8] sm:$0x3] }
 0x1f0   : > { %v1712_v53 = vmul.f32 %v2669_v46, %v1693_v17  ;;  %2058 = vst.msk [vmem:[%s2840_s14 + $0x8] sm:$0x3] %vm2057_vm3, %v2037_v40 }
 0x1f1   : > { %v2671_v49 = vpop.eup %2670 }
 0x1f2   : > { %v1713_v57 = vmul.f32 %v2671_v49, %v1695_v22 }
 0x1f3   : > { %v2673_v55 = vpop.eup %2672 }
 0x1f4   : > { %v1714_v61 = vmul.f32 %v2673_v55, %v1697_v28 }
 0x1f5   : > { %v2675_v59 = vpop.eup %2674 }
 0x1f6   : > { %v1715_v0 = vmul.f32 %v2675_v59, %v1699_v35 }
 0x22f   : > { %v1777_v36 = vpop.permute.xlu0 %1776 }
 0x230   : > { %v3153_v37 = vadd.f32 %v1777_v36, %v1710_v33 }
 0x232   : > { %1824 = vrot.lane.b32.xlu0 %v3153_v37, %s2767_s12 }
 0x233   : > { %v1779_v41 = vpop.permute.xlu1 %1778  ;;  %v1773_v42 = vpop.permute.xlu0 %1772 }
 0x234   : > { %v3157_v44 = vadd.f32 %v1779_v41, %v1711_v39  ;;  %v1796_v45 = vadd.f32 %v1773_v42, %v1708_v38  ;;  %v2055_v41 = vld [vmem:[#allocation2 + $0x98] sm:$0x3] }
 0x235   : > { %2076 = vst.msk [vmem:[%s2840_s14 + $0x98] sm:$0x3] %vm2057_vm3, %v2055_v41 }
 0x236   : > { %1826 = vrot.lane.b32.xlu1 %v3157_v44, %s2767_s12  ;;  %1820 = vrot.lane.b32.xlu0 %v1796_v45, %s2767_s12  ;;  %2676 = vtanh.f32 %v1796_v45 }
 0x237   : > { %v1775_v51 = vpop.permute.xlu1 %1774 }
 0x238   : > { %v1797_v54 = vadd.f32 %v1775_v51, %v1709_v48  ;;  %v1781_v56 = vpop.permute.xlu0 %1780 }
 0x239   : > { %v1800_v58 = vadd.f32 %v1781_v56, %v1712_v53 }
 0x23a   : > { %1822 = vrot.lane.b32.xlu1 %v1797_v54, %s2767_s12  ;;  %2678 = vtanh.f32 %v1797_v54 }
 0x23b   : > { %v1783_v60 = vpop.permute.xlu1 %1782  ;;  %1828 = vrot.lane.b32.xlu0 %v1800_v58, %s2767_s12  ;;  %2680 = vtanh.f32 %v3153_v37 }
 0x23c   : > { %v1801_v62 = vadd.f32 %v1783_v60, %v1713_v57  ;;  %v1785_v63 = vpop.permute.xlu0 %1784  ;;  %2682 = vtanh.f32 %v3157_v44 }
 0x23d   : > { %v1802_v1 = vadd.f32 %v1785_v63, %v1714_v61  ;;  %2684 = vtanh.f32 %v1800_v58 }
 0x23e   : > { %1830 = vrot.lane.b32.xlu1 %v1801_v62, %s2767_s12  ;;  %2686 = vtanh.f32 %v1801_v62 }
 0x23f   : > { %v1787_v3 = vpop.permute.xlu1 %1786  ;;  %1832 = vrot.lane.b32.xlu0 %v1802_v1, %s2767_s12  ;;  %2688 = vtanh.f32 %v1802_v1 }
 0x240   : > { %v1803_v5 = vadd.f32 %v1787_v3, %v1715_v0  ;;  %v2677_v32 = vpop.eup %2676 }
 0x242   : > { %1834 = vrot.lane.b32.xlu1 %v1803_v5, %s2767_s12  ;;  %2690 = vtanh.f32 %v1803_v5 }
 0x244   : > { %v2679_v33 = vpop.eup %2678 }
 0x245   : > { %v2681_v34 = vpop.eup %2680 }
 0x246   : > { %v2683_v35 = vpop.eup %2682 }
 0x247   : > { %v2685_v36 = vpop.eup %2684 }
 0x248   : > { %v2687_v37 = vpop.eup %2686 }
 0x249   : > { %v2689_v38 = vpop.eup %2688 }
 0x24c   : > { %v2691_v39 = vpop.eup %2690 }
 0x2a4   : > { %v1825_v7 = vpop.permute.xlu0 %1824 }
 0x2a5   : > { %v1846_v8 = vmul.f32 %v1825_v7, %v1806_v6  ;;  %1990 = vst.msk [vmem:[#allocation3 + $0x10] sm:$0xff] %vm348_vm2, %v1825_v7 }
 0x2a7   : > { %1864 = vrot.lane.b32.xlu0 %v1846_v8, %s2767_s12 }
 0x2a8   : > { %v1827_v2 = vpop.permute.xlu1 %1826  ;;  %v1821_v4 = vpop.permute.xlu0 %1820 }
 0x2a9   : > { %v1847_v11 = vmul.f32 %v1827_v2, %v1807_v9  ;;  %1991 = vst.msk [vmem:[#allocation3 + $0x18] sm:$0xff] %vm348_vm2, %v1827_v2  ;;  %v1844_v12 = vmul.f32 %v1821_v4, %v1804_v10  ;;  %1988 = vst.msk [vmem:[#allocation3] sm:$0xff] %vm348_vm2, %v1821_v4 }
 0x2ab   : > { %1866 = vrot.lane.b32.xlu1 %v1847_v11, %s2767_s12  ;;  %1860 = vrot.lane.b32.xlu0 %v1844_v12, %s2767_s12 }
 0x2ac   : > { %v1823_v14 = vpop.permute.xlu1 %1822 }
 0x2ad   : > { %v1845_v16 = vmul.f32 %v1823_v14, %v1805_v13  ;;  %1989 = vst.msk [vmem:[#allocation3 + $0x8] sm:$0xff] %vm348_vm2, %v1823_v14  ;;  %v1829_v17 = vpop.permute.xlu0 %1828 }
 0x2ae   : > { %v1848_v19 = vmul.f32 %v1829_v17, %v1808_v15  ;;  %1992 = vst.msk [vmem:[#allocation3 + $0x20] sm:$0xff] %vm348_vm2, %v1829_v17 }
 0x2af   : > { %1862 = vrot.lane.b32.xlu1 %v1845_v16, %s2767_s12 }
 0x2b0   : > { %v1831_v20 = vpop.permute.xlu1 %1830  ;;  %1868 = vrot.lane.b32.xlu0 %v1848_v19, %s2767_s12 }
 0x2b1   : > { %v1849_v22 = vmul.f32 %v1831_v20, %v1809_v18  ;;  %1993 = vst.msk [vmem:[#allocation3 + $0x28] sm:$0xff] %vm348_vm2, %v1831_v20  ;;  %v1833_v23 = vpop.permute.xlu0 %1832 }
 0x2b2   : > { %v1850_v26 = vmul.f32 %v1833_v23, %v1810_v21  ;;  %1994 = vst.msk [vmem:[#allocation3 + $0x30] sm:$0xff] %vm348_vm2, %v1833_v23 }
 0x2b3   : > { %1870 = vrot.lane.b32.xlu1 %v1849_v22, %s2767_s12 }
 0x2b4   : > { %v1835_v28 = vpop.permute.xlu1 %1834  ;;  %1872 = vrot.lane.b32.xlu0 %v1850_v26, %s2767_s12 }
 0x2b5   : > { %v1851_v30 = vmul.f32 %v1835_v28, %v1811_v25  ;;  %1995 = vst.msk [vmem:[#allocation3 + $0x38] sm:$0xff] %vm348_vm2, %v1835_v28 }
 0x2b7   : > { %1874 = vrot.lane.b32.xlu1 %v1851_v30, %s2767_s12 }
 0x2b8   : > { %1956 = vrot.lane.b32.xlu0 %v2677_v32, %s2765_s10 }
 0x2bb   : > { %1958 = vrot.lane.b32.xlu1 %v2679_v33, %s2765_s10 }
 0x2bc   : > { %1960 = vrot.lane.b32.xlu0 %v2681_v34, %s2765_s10 }
 0x2bf   : > { %1962 = vrot.lane.b32.xlu1 %v2683_v35, %s2765_s10 }
 0x2c0   : > { %1964 = vrot.lane.b32.xlu0 %v2685_v36, %s2765_s10 }
 0x2c3   : > { %1966 = vrot.lane.b32.xlu1 %v2687_v37, %s2765_s10 }
 0x2c4   : > { %1968 = vrot.lane.b32.xlu0 %v2689_v38, %s2765_s10  ;;  %v2036_v38 = vld [vmem:[#allocation2] sm:$0xff] }
 0x2c5   : > { %2056 = vst.msk [vmem:[%s2840_s14] sm:$0xff] %vm348_vm2, %v2036_v38 }
 0x2c7   : > { %1970 = vrot.lane.b32.xlu1 %v2691_v39, %s2765_s10  ;;  %v2054_v39 = vld [vmem:[#allocation2 + $0x90] sm:$0xff] }
 0x2c8   : > { %2075 = vst.msk [vmem:[%s2840_s14 + $0x90] sm:$0xff] %vm348_vm2, %v2054_v39 }
 0x319   : > { %v1865_v42 = vpop.permute.xlu0 %1864 }
 0x31a   : > { %v1886_v44 = vadd.f32 %v3029_v24, %v1865_v42 }
 0x31c   : > { %v2286_v45 = vmul.f32 -1.442695, %v1886_v44 }
 0x31d   : > { %v1867_v46 = vpop.permute.xlu1 %1866  ;;  %v1861_v48 = vpop.permute.xlu0 %1860 }
 0x31e   : > { %2692 = vpow2.f32 %v2286_v45  ;;  %v1887_v49 = vadd.f32 %v3034_v29, %v1867_v46  ;;  %v1884_v51 = vadd.f32 %v3031_v27, %v1861_v48 }
 0x320   : > { %v2287_v53 = vmul.f32 -1.442695, %v1887_v49  ;;  %v2284_v54 = vmul.f32 -1.442695, %v1884_v51 }
 0x321   : > { %v1863_v55 = vpop.permute.xlu1 %1862 }
 0x322   : > { %2694 = vpow2.f32 %v2287_v53  ;;  %v1885_v56 = vadd.f32 %v3037_v31, %v1863_v55  ;;  %v1869_v57 = vpop.permute.xlu0 %1868 }
 0x323   : > { %2696 = vpow2.f32 %v2284_v54  ;;  %v1888_v59 = vadd.f32 %v3047_v47, %v1869_v57 }
 0x324   : > { %v2285_v58 = vmul.f32 -1.442695, %v1885_v56 }
 0x325   : > { %v1871_v24 = vpop.permute.xlu1 %1870  ;;  %v2288_v60 = vmul.f32 -1.442695, %v1888_v59 }
 0x326   : > { %2698 = vpow2.f32 %v2285_v58  ;;  %v1889_v61 = vadd.f32 %v3052_v52, %v1871_v24  ;;  %v1873_v62 = vpop.permute.xlu0 %1872 }
 0x327   : > { %2700 = vpow2.f32 %v2288_v60  ;;  %v1890_v63 = vadd.f32 %v3045_v43, %v1873_v62 }
 0x328   : > { %v2693_v29 = vpop.eup %2692  ;;  %v2289_v27 = vmul.f32 -1.442695, %v1889_v61 }
 0x329   : > { %v1918_v0 = vadd.f32 1.0, %v2693_v29  ;;  %v1875_v1 = vpop.permute.xlu1 %1874  ;;  %v2290_v31 = vmul.f32 -1.442695, %v1890_v63 }
 0x32a   : > { %2702 = vpow2.f32 %v2289_v27  ;;  %v1891_v3 = vadd.f32 %v3049_v50, %v1875_v1  ;;  %v1957_v52 = vpop.permute.xlu0 %1956 }
 0x32b   : > { %2704 = vrcp.f32 %v1918_v0 }
 0x32c   : > { %v2695_v5 = vpop.eup %2694  ;;  %2706 = vpow2.f32 %v2290_v31  ;;  %v2291_v47 = vmul.f32 -1.442695, %v1891_v3 }
 0x32d   : > { %v2697_v6 = vpop.eup %2696  ;;  %v1919_v7 = vadd.f32 1.0, %v2695_v5  ;;  %v1959_v4 = vpop.permute.xlu1 %1958 }
 0x32e   : > { %v1916_v8 = vadd.f32 1.0, %v2697_v6  ;;  %2708 = vpow2.f32 %v2291_v47  ;;  %v1961_v13 = vpop.permute.xlu0 %1960 }
 0x32f   : > { %2710 = vrcp.f32 %v1919_v7 }
 0x330   : > { %v2699_v9 = vpop.eup %2698  ;;  %2712 = vrcp.f32 %v1916_v8 }
 0x331   : > { %v1917_v10 = vadd.f32 1.0, %v2699_v9  ;;  %v2701_v43 = vpop.eup %2700  ;;  %v1963_v20 = vpop.permute.xlu1 %1962 }
 0x332   : > { %v1920_v2 = vadd.f32 1.0, %v2701_v43  ;;  %v1965_v26 = vpop.permute.xlu0 %1964 }
 0x333   : > { %2714 = vrcp.f32 %v1917_v10 }
 0x334   : > { %v2703_v11 = vpop.eup %2702  ;;  %2716 = vrcp.f32 %v1920_v2 }
 0x335   : > { %v2705_v12 = vpop.eup %2704  ;;  %v1921_v50 = vadd.f32 1.0, %v2703_v11  ;;  %v1967_v32 = vpop.permute.xlu1 %1966 }
 0x336   : > { %v2707_v14 = vpop.eup %2706  ;;  %v1982_v15 = vmul.f32 %v2705_v12, %v1961_v13  ;;  %v1969_v37 = vpop.permute.xlu0 %1968 }
 0x337   : > { %2718 = vrcp.f32 %v1921_v50  ;;  %v1922_v16 = vadd.f32 1.0, %v2707_v14 }
 0x338   : > { %v2709_v17 = vpop.eup %2708  ;;  %2008 = vrot.lane.b32.xlu0 %v1982_v15, %s2766_s28 }
 0x339   : > { %v2711_v18 = vpop.eup %2710  ;;  %2720 = vrcp.f32 %v1922_v16  ;;  %v1923_v19 = vadd.f32 1.0, %v2709_v17  ;;  %v1971_v42 = vpop.permute.xlu1 %1970 }
 0x33a   : > { %v2713_v21 = vpop.eup %2712  ;;  %v1983_v22 = vmul.f32 %v2711_v18, %v1963_v20 }
 0x33b   : > { %2722 = vrcp.f32 %v1923_v19  ;;  %v1980_v23 = vmul.f32 %v2713_v21, %v1957_v52 }
 0x33c   : > { %2010 = vrot.lane.b32.xlu1 %v1983_v22, %s2766_s28 }
 0x33d   : > { %v2715_v25 = vpop.eup %2714  ;;  %2004 = vrot.lane.b32.xlu0 %v1980_v23, %s2766_s28 }
 0x33e   : > { %v1981_v28 = vmul.f32 %v2715_v25, %v1959_v4  ;;  %v2717_v30 = vpop.eup %2716 }
 0x33f   : > { %v1984_v33 = vmul.f32 %v2717_v30, %v1965_v26 }
 0x340   : > { %2006 = vrot.lane.b32.xlu1 %v1981_v28, %s2766_s28 }
 0x341   : > { %v2719_v34 = vpop.eup %2718  ;;  %2012 = vrot.lane.b32.xlu0 %v1984_v33, %s2766_s28 }
 0x342   : > { %v1985_v35 = vmul.f32 %v2719_v34, %v1967_v32 }
 0x343   : > { %v2721_v36 = vpop.eup %2720 }
 0x344   : > { %v1986_v40 = vmul.f32 %v2721_v36, %v1969_v37  ;;  %2014 = vrot.lane.b32.xlu1 %v1985_v35, %s2766_s28 }
 0x345   : > { %v2723_v41 = vpop.eup %2722 }
 0x346   : > { %v1987_v44 = vmul.f32 %v2723_v41, %v1971_v42  ;;  %2016 = vrot.lane.b32.xlu0 %v1986_v40, %s2766_s28 }
 0x348   : > { %2018 = vrot.lane.b32.xlu1 %v1987_v44, %s2766_s28 }
 0x3aa   : > { %v2009_v45 = vpop.permute.xlu0 %2008 }
 0x3ab   : > { %2030 = vst.msk [vmem:[#allocation2 + $0x31] sm:$0xff] %vm348_vm2, %v2009_v45 }
 0x3ae   : > { %v2011_v46 = vpop.permute.xlu1 %2010 }
 0x3af   : > { %2031 = vst.msk [vmem:[#allocation2 + $0x41] sm:$0xff] %vm348_vm2, %v2011_v46  ;;  %v2005_v48 = vpop.permute.xlu0 %2004 }
 0x3b0   : > { %2028 = vst.msk [vmem:[#allocation2 + $0x11] sm:$0xff] %vm348_vm2, %v2005_v48 }
 0x3b2   : > { %v2042_v49 = vld [vmem:[#allocation2 + $0x30] sm:$0xff]  ;;  %v2043_v51 = vld [vmem:[#allocation2 + $0x38] sm:$0x3]  ;;  %v2007_v53 = vpop.permute.xlu1 %2006 }
 0x3b3   : > { %2063 = vst.msk [vmem:[%s2840_s14 + $0x30] sm:$0xff] %vm348_vm2, %v2042_v49  ;;  %2029 = vst.msk [vmem:[#allocation2 + $0x21] sm:$0xff] %vm348_vm2, %v2007_v53  ;;  %v2013_v54 = vpop.permute.xlu0 %2012 }
 0x3b4   : > { %2064 = vst.msk [vmem:[%s2840_s14 + $0x38] sm:$0x3] %vm2057_vm3, %v2043_v51 }
 0x3b5   : > { %2032 = vst.msk [vmem:[#allocation2 + $0x51] sm:$0xff] %vm348_vm2, %v2013_v54 }
 0x3b6   : > { %v2044_v55 = vld [vmem:[#allocation2 + $0x40] sm:$0xff]  ;;  %v2045_v56 = vld [vmem:[#allocation2 + $0x48] sm:$0x3]  ;;  %v2015_v57 = vpop.permute.xlu1 %2014 }
 0x3b7   : > { %2065 = vst.msk [vmem:[%s2840_s14 + $0x40] sm:$0xff] %vm348_vm2, %v2044_v55  ;;  %v2038_v58 = vld [vmem:[#allocation2 + $0x10] sm:$0xff]  ;;  %v2039_v59 = vld [vmem:[#allocation2 + $0x18] sm:$0x3]  ;;  %2033 = vst.msk [vmem:[#allocation2 + $0x61] sm:$0xff] %vm348_vm2, %v2015_v57 }
 0x3b8   : > { %2066 = vst.msk [vmem:[%s2840_s14 + $0x48] sm:$0x3] %vm2057_vm3, %v2045_v56  ;;  %2060 = vst.msk [vmem:[%s2840_s14 + $0x18] sm:$0x3] %vm2057_vm3, %v2039_v59  ;;  %v2017_v24 = vpop.permute.xlu0 %2016 }
 0x3b9   : > { %2059 = vst.msk [vmem:[%s2840_s14 + $0x10] sm:$0xff] %vm348_vm2, %v2038_v58  ;;  %2034 = vst.msk [vmem:[#allocation2 + $0x71] sm:$0xff] %vm348_vm2, %v2017_v24 }
 0x3ba   : > { %v2040_v60 = vld [vmem:[#allocation2 + $0x20] sm:$0xff]  ;;  %v2041_v61 = vld [vmem:[#allocation2 + $0x28] sm:$0x3]  ;;  %v2019_v62 = vpop.permute.xlu1 %2018 }
 0x3bb   : > { %2061 = vst.msk [vmem:[%s2840_s14 + $0x20] sm:$0xff] %vm348_vm2, %v2040_v60  ;;  %2035 = vst.msk [vmem:[#allocation2 + $0x81] sm:$0xff] %vm348_vm2, %v2019_v62 }
 0x3bc   : > { %2062 = vst.msk [vmem:[%s2840_s14 + $0x28] sm:$0x3] %vm2057_vm3, %v2041_v61  ;;  %v2046_v29 = vld [vmem:[#allocation2 + $0x50] sm:$0xff]  ;;  %v2047_v27 = vld [vmem:[#allocation2 + $0x58] sm:$0x3] }
 0x3bd   : > { %2067 = vst.msk [vmem:[%s2840_s14 + $0x50] sm:$0xff] %vm348_vm2, %v2046_v29 }
 0x3be   : > { %2068 = vst.msk [vmem:[%s2840_s14 + $0x58] sm:$0x3] %vm2057_vm3, %v2047_v27  ;;  %v2048_v63 = vld [vmem:[#allocation2 + $0x60] sm:$0xff]  ;;  %v2049_v0 = vld [vmem:[#allocation2 + $0x68] sm:$0x3] }
 0x3bf   : > { %2069 = vst.msk [vmem:[%s2840_s14 + $0x60] sm:$0xff] %vm348_vm2, %v2048_v63 }
 0x3c0   : > { %2070 = vst.msk [vmem:[%s2840_s14 + $0x68] sm:$0x3] %vm2057_vm3, %v2049_v0  ;;  %v2050_v1 = vld [vmem:[#allocation2 + $0x70] sm:$0xff]  ;;  %v2051_v31 = vld [vmem:[#allocation2 + $0x78] sm:$0x3] }
 0x3c1   : > { %2071 = vst.msk [vmem:[%s2840_s14 + $0x70] sm:$0xff] %vm348_vm2, %v2050_v1 }
 0x3c2   : > { %2072 = vst.msk [vmem:[%s2840_s14 + $0x78] sm:$0x3] %vm2057_vm3, %v2051_v31  ;;  %v2052_v3 = vld [vmem:[#allocation2 + $0x80] sm:$0xff]  ;;  %v2053_v5 = vld [vmem:[#allocation2 + $0x88] sm:$0x3] }
 0x3c3   : > { %2073 = vst.msk [vmem:[%s2840_s14 + $0x80] sm:$0xff] %vm348_vm2, %v2052_v3 }
 0x3c4   : > { %2074 = vst.msk [vmem:[%s2840_s14 + $0x88] sm:$0x3] %vm2057_vm3, %v2053_v5 }
 0x3c5 PF: > { %s15_s22 = sadd.s32 1, %s2762_s22   ;;  %s3302_s18 = smov %s2754_s20 }
 0x3c6   : > { %p12_p8 = scmp.ge.s32.totalorder %s15_s22, 10   ;;  %s3303_s19 = smov %s2758_s21 }
 0x3c7   : > { %s3304_s20 = smov %s3307_s23  ;;  %s3305_s21 = smov %s3311_s24 }
 0x3c8   :  { %14 = sbr.rel (!%p12_p8) target bundleno = 3 (0x3), region = 84 }

// kernel: _lambda_.12
= control target key start
LH: loop header
LB: loop body
LE: loop exit
PB: predicated region body
PF: predicated region fallthrough
CT: control target
= control target key end

     0   :  { %s1024_s12 = smov 0   ;;  %s1194_s0 = inlined_call_operand.vmem [shape: f32[8,5,5,128], index: 0, kind: input, shape index: {}]   ;;  %s1195_s1 = inlined_call_operand.vmem [shape: bf16[4,128,32], index: 1, kind: input, shape index: {}]   ;;  %s1196_s2 = inlined_call_operand.vmem [shape: f32[1,32], index: 2, kind: input, shape index: {}]   ;;  %s1197_s3 = inlined_call_operand.vmem [shape: f32[8,4,4,32], index: 3, kind: output, shape index: {}]  }
   0x1 LB: > { %s727_s13 = sadd.s32 4294967295, %s1000_s12   ;;  %p731_p0 = scmp.ge.s32.totalorder %s1000_s12, 1  ;;  %s1000_s12 = sphi %s1024_s12, %s13_s12  }
   0x2   : > { %p137_p1 = scmp.lt.s32.totalorder %s1000_s12, 9 }
   0x4   : > { %p138_p2 = pnand %p731_p0, %p137_p1 }
   0x5   : > { %v954_v0 = vld [vmem:[%s1195_s1 + $0x40] sm:$0xff] (!%p138_p2)   ;;  %v1002_v1 = vmov (!%p138_p2), 0.0   ;;  %v956_v3 = vld [vmem:[%s1195_s1 + $0x48] sm:$0xff] (!%p138_p2)   ;;  %vm1003_vm0 = vmmov (!%p138_p2), 0   ;;  %p161_p3 = scmp.lt.s32.totalorder (!%p138_p2), %s727_s13, 7  ;;  %v958_v5 = vld [vmem:[%s1195_s1 + $0x50] sm:$0xff] (!%p138_p2)  }
   0x6   : > { %141 = sbr.rel (%p138_p2) target bundleno = 293 (0x125), region = 32  ;;  %863 = vmatprep.subr.bf16.mxu0 (!%p138_p2), %v1002_v1  ;;  %883 = vmatprep.subr.bf16.mxu1 (!%p138_p2), %v1002_v1  ;;  %v955_v2 = vld [vmem:[%s1195_s1] sm:$0xff] (!%p138_p2)   ;;  %v957_v4 = vld [vmem:[%s1195_s1 + $0x8] sm:$0xff] (!%p138_p2)   ;;  %v959_v6 = vld [vmem:[%s1195_s1 + $0x10] sm:$0xff] (!%p138_p2)   ;;  %vm667_vm1 = vcmask (!%p138_p2), 257024  }
   0x7   : > { %864 = vmatpush3.bf16.msra.mxu0 (!%p138_p2), %v954_v0  ;;  %879 = vmatprep.mubr.msk.bf16.mxu0 (!%p138_p2), %vm1003_vm0, %v1002_v1  ;;  %v960_v7 = vld [vmem:[%s1195_s1 + $0x58] sm:$0xff] (!%p138_p2)   ;;  %v962_v9 = vld [vmem:[%s1195_s1 + $0x60] sm:$0xff] (!%p138_p2)   ;;  %v964_v11 = vld [vmem:[%s1195_s1 + $0x68] sm:$0xff] (!%p138_p2)  }
   0x8   : > { %884 = vmatpush3.bf16.msra.mxu1 (!%p138_p2), %v955_v2  ;;  %865 = vmatprep.subr.bf16.mxu0 (!%p138_p2), %v1002_v1  ;;  %v961_v8 = vld [vmem:[%s1195_s1 + $0x18] sm:$0xff] (!%p138_p2)   ;;  %v963_v10 = vld [vmem:[%s1195_s1 + $0x20] sm:$0xff] (!%p138_p2)   ;;  %v965_v12 = vld [vmem:[%s1195_s1 + $0x28] sm:$0xff] (!%p138_p2)  }
   0x9   : > { %885 = vmatprep.subr.bf16.mxu1 (!%p138_p2), %v1002_v1  ;;  %899 = vmatprep.mubr.msk.bf16.mxu1 (!%p138_p2), %vm1003_vm0, %v1002_v1  ;;  %v966_v13 = vld [vmem:[%s1195_s1 + $0x70] sm:$0xff] (!%p138_p2)   ;;  %v968_v16 = vld [vmem:[%s1195_s1 + $0x78] sm:$0xff] (!%p138_p2)   ;;  %v974_v23 = vld [vmem:[%s1195_s1 + $0x80] sm:$0xff] (!%p138_p2)  }
   0xa   : > { %v967_v14 = vld [vmem:[%s1195_s1 + $0x30] sm:$0xff] (!%p138_p2)   ;;  %v969_v20 = vld [vmem:[%s1195_s1 + $0x38] sm:$0xff] (!%p138_p2)   ;;  %v975_v24 = vld [vmem:[%s1195_s1 + $0xc0] sm:$0xff] (!%p138_p2)  }
   0xb   : > { %866 = vmatpush3.bf16.msra.mxu0 (!%p138_p2), %v956_v3  ;;  %v976_v25 = vld [vmem:[%s1195_s1 + $0x88] sm:$0xff] (!%p138_p2)   ;;  %v978_v27 = vld [vmem:[%s1195_s1 + $0x90] sm:$0xff] (!%p138_p2)   ;;  %v980_v29 = vld [vmem:[%s1195_s1 + $0x98] sm:$0xff] (!%p138_p2)  }
   0xc   : > { %886 = vmatpush3.bf16.msra.mxu1 (!%p138_p2), %v957_v4  ;;  %867 = vmatprep.subr.bf16.mxu0 (!%p138_p2), %v1002_v1  ;;  %v977_v26 = vld [vmem:[%s1195_s1 + $0xc8] sm:$0xff] (!%p138_p2)   ;;  %v979_v28 = vld [vmem:[%s1195_s1 + $0xd0] sm:$0xff] (!%p138_p2)   ;;  %v981_v30 = vld [vmem:[%s1195_s1 + $0xd8] sm:$0xff] (!%p138_p2)  }
   0xd   : > { %s1199_s13 = smov (!%p161_p3, %s727_s13), 7  ;;  %887 = vmatprep.subr.bf16.mxu1 %v1002_v1  ;;  %v982_v31 = vld [vmem:[%s1195_s1 + $0xa0] sm:$0xff]   ;;  %v984_v33 = vld [vmem:[%s1195_s1 + $0xa8] sm:$0xff]   ;;  %v986_v35 = vld [vmem:[%s1195_s1 + $0xb0] sm:$0xff]  }
   0xe   : > { %s943_s30 = smul.u32 40, %s1199_s13  ;;  %v983_v32 = vld [vmem:[%s1195_s1 + $0xe0] sm:$0xff]   ;;  %v985_v34 = vld [vmem:[%s1195_s1 + $0xe8] sm:$0xff]   ;;  %v987_v36 = vld [vmem:[%s1195_s1 + $0xf0] sm:$0xff]  }
   0xf   : > { %868 = vmatpush3.bf16.msra.mxu0 %v958_v5  ;;  %v988_v39 = vld [vmem:[%s1195_s1 + $0xb8] sm:$0xff]   ;;  %v823_v59 = vld [vmem:[%s1196_s2] ss:$0 sm:$0xff] }
  0x10   : > { %888 = vmatpush3.bf16.msra.mxu1 %v959_v6  ;;  %869 = vmatprep.subr.bf16.mxu0 %v1002_v1  ;;  %s1081_s10 = scalar_lea.vmem %s1194_s0, %s943_s30  ;;  %v989_v42 = vld [vmem:[%s1195_s1 + $0xf8] sm:$0xff]  }
  0x11   : > { %889 = vmatprep.subr.bf16.mxu1 %v1002_v1  ;;  %v970_v15 = vld [vmem:[%s1081_s10 + $0x1] ss:$8 sps:$4 sm:$0xff]   ;;  %v971_v17 = vld [vmem:[%s1081_s10 + $0x11] ss:$8 sps:$4 sm:$0xff]  }
  0x12   : > { %v972_v18 = vld [vmem:[%s1081_s10] ss:$8 sps:$4 sm:$0xff]   ;;  %v973_v19 = vld [vmem:[%s1081_s10 + $0x10] ss:$8 sps:$4 sm:$0xff]   ;;  %v213_v21 = vpack.c.bf16 %v971_v17, %v970_v15 }
  0x13   : > { %870 = vmatpush3.bf16.msra.mxu0 %v960_v7  ;;  %v184_v22 = vpack.c.bf16 %v973_v19, %v972_v18  ;;  %v990_v37 = vld [vmem:[%s1081_s10 + $0x8] ss:$8 sps:$4 sm:$0xff]   ;;  %v991_v38 = vld [vmem:[%s1081_s10 + $0x18] ss:$8 sps:$4 sm:$0xff]  }
  0x14   : > { %890 = vmatpush3.bf16.msra.mxu1 %v961_v8  ;;  %871 = vmatprep.subr.bf16.mxu0 %v1002_v1  ;;  %v992_v40 = vld [vmem:[%s1081_s10 + $0x9] ss:$8 sps:$4 sm:$0xff]   ;;  %v993_v41 = vld [vmem:[%s1081_s10 + $0x19] ss:$8 sps:$4 sm:$0xff]   ;;  %v422_v43 = vpack.c.bf16 %v991_v38, %v990_v37  ;;  %s826_s10 = sshll.u32 %s1199_s13, 4 }
  0x15   : > { %891 = vmatprep.subr.bf16.mxu1 %v1002_v1  ;;  %v543_v44 = vpack.c.bf16 %v993_v41, %v992_v40  ;;  %s170_s11 = scalar_lea.vmem %s1197_s3, %s826_s10 }
  0x17   : > { %872 = vmatpush3.bf16.msra.mxu0 %v962_v9 }
  0x18   : > { %892 = vmatpush3.bf16.msra.mxu1 %v963_v10  ;;  %873 = vmatprep.subr.bf16.mxu0 %v1002_v1 }
  0x19   : > { %893 = vmatprep.subr.bf16.mxu1 %v1002_v1 }
  0x1b   : > { %874 = vmatpush3.bf16.msra.mxu0 %v964_v11 }
  0x1c   : > { %894 = vmatpush3.bf16.msra.mxu1 %v965_v12  ;;  %875 = vmatprep.subr.bf16.mxu0 %v1002_v1 }
  0x1d   : > { %895 = vmatprep.subr.bf16.mxu1 %v1002_v1 }
  0x1f   : > { %876 = vmatpush3.bf16.msra.mxu0 %v966_v13 }
  0x20   : > { %896 = vmatpush3.bf16.msra.mxu1 %v967_v14  ;;  %877 = vmatprep.subr.bf16.mxu0 %v1002_v1 }
  0x21   : > { %897 = vmatprep.subr.bf16.mxu1 %v1002_v1 }
  0x23   : > { %878 = vmatpush3.bf16.msra.mxu0 %v968_v16 }
  0x24   : > { %898 = vmatpush3.bf16.msra.mxu1 %v969_v20  ;;  %903 = vmatprep.subr.bf16.mxu0 %v1002_v1 }
  0x25   : > { %923 = vmatprep.subr.bf16.mxu1 %v1002_v1 }
  0x26   : > { %880 = vmatmul.mubr.bf16.vlgmr.msra.gmra.mrb[0].mxu0 %v213_v21 }
  0x27   : > { %900 = vmatmul.mubr.bf16.vlgmr.msra.gmra.mrb[0].mxu1 %v184_v22  ;;  %904 = vmatpush3.bf16.msra.mxu0 %v974_v23 }
  0x28   : > { %924 = vmatpush3.bf16.msra.mxu1 %v975_v24  ;;  %905 = vmatprep.subr.bf16.mxu0 %v1002_v1 }
  0x29   : > { %925 = vmatprep.subr.bf16.mxu1 %v1002_v1  ;;  %919 = vmatprep.mubr.msk.bf16.mxu0 %vm1003_vm0, %v1002_v1 }
  0x2a   : > { %939 = vmatprep.mubr.msk.bf16.mxu1 %vm1003_vm0, %v1002_v1 }
  0x2b   : > { %906 = vmatpush3.bf16.msra.mxu0 %v976_v25 }
  0x2c   : > { %926 = vmatpush3.bf16.msra.mxu1 %v977_v26  ;;  %907 = vmatprep.subr.bf16.mxu0 %v1002_v1 }
  0x2d   : > { %927 = vmatprep.subr.bf16.mxu1 %v1002_v1 }
  0x2f   : > { %908 = vmatpush3.bf16.msra.mxu0 %v978_v27 }
  0x30   : > { %928 = vmatpush3.bf16.msra.mxu1 %v979_v28  ;;  %909 = vmatprep.subr.bf16.mxu0 %v1002_v1 }
  0x31   : > { %929 = vmatprep.subr.bf16.mxu1 %v1002_v1 }
  0x33   : > { %910 = vmatpush3.bf16.msra.mxu0 %v980_v29 }
  0x34   : > { %930 = vmatpush3.bf16.msra.mxu1 %v981_v30  ;;  %911 = vmatprep.subr.bf16.mxu0 %v1002_v1 }
  0x35   : > { %931 = vmatprep.subr.bf16.mxu1 %v1002_v1 }
  0x37   : > { %912 = vmatpush3.bf16.msra.mxu0 %v982_v31 }
  0x38   : > { %932 = vmatpush3.bf16.msra.mxu1 %v983_v32  ;;  %913 = vmatprep.subr.bf16.mxu0 %v1002_v1 }
  0x39   : > { %933 = vmatprep.subr.bf16.mxu1 %v1002_v1 }
  0x3b   : > { %914 = vmatpush3.bf16.msra.mxu0 %v984_v33 }
  0x3c   : > { %934 = vmatpush3.bf16.msra.mxu1 %v985_v34  ;;  %915 = vmatprep.subr.bf16.mxu0 %v1002_v1 }
  0x3d   : > { %935 = vmatprep.subr.bf16.mxu1 %v1002_v1 }
  0x3f   : > { %916 = vmatpush3.bf16.msra.mxu0 %v986_v35 }
  0x40   : > { %936 = vmatpush3.bf16.msra.mxu1 %v987_v36  ;;  %917 = vmatprep.subr.bf16.mxu0 %v1002_v1 }
  0x41   : > { %937 = vmatprep.subr.bf16.mxu1 %v1002_v1 }
  0x43   : > { %918 = vmatpush3.bf16.msra.mxu0 %v988_v39 }
  0x44   : > { %938 = vmatpush3.bf16.msra.mxu1 %v989_v42 }
  0x46   : > { %920 = vmatmul.mubr.bf16.vlgmr.msra.gmra.mrb[4].mxu0 %v422_v43 }
  0x47   : > { %940 = vmatmul.mubr.bf16.vlgmr.msra.gmra.mrb[4].mxu1 %v543_v44 }
  0xf9   : > { %v313_v45 = vpop.f32.mrb[0].mxu0 }
  0xfa   : > { %v402_v46 = vpop.f32.mrb[0].mxu1  ;;  %v881_v47 = vpop.f32.mrb[1].mxu0 }
  0xfb   : > { %v403_v48 = vadd.f32 %v402_v46, %v313_v45  ;;  %v901_v49 = vpop.f32.mrb[1].mxu1  ;;  %v316_v50 = vpop.f32.mrb[2].mxu0 }
  0xfc   : > { %v405_v51 = vpop.f32.mrb[2].mxu1  ;;  %v882_v52 = vpop.f32.mrb[3].mxu0 }
  0xfd   : > { %v406_v53 = vadd.f32 %v405_v51, %v316_v50  ;;  %v902_v54 = vpop.f32.mrb[3].mxu1 }
 0x119   : > { %v522_v55 = vpop.f32.mrb[4].mxu0 }
 0x11a   : > { %v529_v56 = vadd.f32 %v522_v55, %v403_v48  ;;  %v643_v57 = vpop.f32.mrb[4].mxu1  ;;  %v921_v58 = vpop.f32.mrb[5].mxu0 }
 0x11b   : > { %v941_v60 = vpop.f32.mrb[5].mxu1  ;;  %v525_v61 = vpop.f32.mrb[6].mxu0 }
 0x11c   : > { %v650_v62 = vadd.f32 %v643_v57, %v529_v56  ;;  %v530_v63 = vadd.f32 %v525_v61, %v406_v53  ;;  %v646_v0 = vpop.f32.mrb[6].mxu1  ;;  %v922_v1 = vpop.f32.mrb[7].mxu0 }
 0x11d   : > { %v942_v2 = vpop.f32.mrb[7].mxu1 }
 0x11e   : > { %v659_v3 = vadd.f32 %v823_v59, %v650_v62  ;;  %v651_v4 = vadd.f32 %v646_v0, %v530_v63 }
 0x120   : > { %v663_v5 = vcombine.high %v659_v3, %v659_v3  ;;  %668 = vst.msk [vmem:[%s170_s11] sm:$0xf] %vm667_vm1, %v659_v3  ;;  %v660_v6 = vadd.f32 %v823_v59, %v651_v4 }
 0x122   : > { %669 = vst.msk [vmem:[%s170_s11 + $0x4] sm:$0xf] %vm667_vm1, %v663_v5  ;;  %v664_v7 = vcombine.high %v660_v6, %v660_v6  ;;  %670 = vst.msk [vmem:[%s170_s11 + $0x8] sm:$0xf] %vm667_vm1, %v660_v6 }
 0x124   : > { %671 = vst.msk [vmem:[%s170_s11 + $0xc] sm:$0xf] %vm667_vm1, %v664_v7 }
 0x125 PF: > { %s13_s12 = sadd.s32 1, %s1000_s12  }
 0x126   : > { %p10_p4 = scmp.ge.s32.totalorder %s13_s12, 10  }
 0x128   :  { %12 = sbr.rel (!%p10_p4) target bundleno = 1 (0x1), region = 66 }

// kernel: _lambda_.13
= control target key start
LH: loop header
LB: loop body
LE: loop exit
PB: predicated region body
PF: predicated region fallthrough
CT: control target
= control target key end

     0   :  { %v586_v41 = vmov 0.0   ;;  %vm587_vm0 = vmmov 0   ;;  %vm397_vm1 = vcmask 261120   ;;  %vm447_vm2 = vcmask 15360   ;;  %s741_s1 = inlined_call_operand.vmem [shape: bf16[512,32], index: 1, kind: input, shape index: {}]   ;;  %s742_s0 = inlined_call_operand.vmem [shape: f32[8,512], index: 0, kind: input, shape index: {}]   ;;  %s743_s3 = inlined_call_operand.vmem [shape: bf16[32,2], index: 3, kind: input, shape index: {}]   ;;  %s744_s2 = inlined_call_operand.vmem [shape: f32[1,32], index: 2, kind: input, shape index: {}]   ;;  %s745_s4 = inlined_call_operand.vmem [shape: f32[1,2], index: 4, kind: input, shape index: {}]   ;;  %s746_s5 = inlined_call_operand.vmem [shape: f32[8,2], index: 5, kind: output, shape index: {}]  }
   0x1   :  { %v548_v0 = vld [vmem:[%s741_s1 + $0x40] sm:$0xff]   ;;  %v552_v4 = vld [vmem:[%s741_s1 + $0x48] sm:$0xff]   ;;  %v556_v8 = vld [vmem:[%s741_s1 + $0x50] sm:$0xff]  }
   0x2   :  { %v549_v1 = vld [vmem:[%s741_s1 + $0xc0] sm:$0xff]   ;;  %491 = vmatprep.subr.bf16.mxu0 %v548_v0  ;;  %v553_v5 = vld [vmem:[%s741_s1 + $0xc8] sm:$0xff]   ;;  %v557_v9 = vld [vmem:[%s741_s1 + $0xd0] sm:$0xff]  }
   0x3   :  { %v550_v2 = vld [vmem:[%s741_s1] sm:$0xff]   ;;  %513 = vmatprep.subr.bf16.mxu1 %v549_v1  ;;  %v554_v6 = vld [vmem:[%s741_s1 + $0x8] sm:$0xff]   ;;  %v558_v10 = vld [vmem:[%s741_s1 + $0x10] sm:$0xff]  }
   0x4   :  { %v551_v3 = vld [vmem:[%s741_s1 + $0x80] sm:$0xff]   ;;  %492 = vmatpush3.bf16.msra.mxu0 %v550_v2  ;;  %v555_v7 = vld [vmem:[%s741_s1 + $0x88] sm:$0xff]   ;;  %v559_v11 = vld [vmem:[%s741_s1 + $0x90] sm:$0xff]  }
   0x5   :  { %514 = vmatpush3.bf16.msra.mxu1 %v551_v3  ;;  %493 = vmatprep.subr.bf16.mxu0 %v552_v4  ;;  %v560_v12 = vld [vmem:[%s741_s1 + $0x58] sm:$0xff]   ;;  %v564_v16 = vld [vmem:[%s741_s1 + $0x60] sm:$0xff]   ;;  %v568_v20 = vld [vmem:[%s741_s1 + $0x68] sm:$0xff]  }
   0x6   :  { %515 = vmatprep.subr.bf16.mxu1 %v553_v5  ;;  %v561_v13 = vld [vmem:[%s741_s1 + $0xd8] sm:$0xff]   ;;  %v565_v17 = vld [vmem:[%s741_s1 + $0xe0] sm:$0xff]   ;;  %v569_v21 = vld [vmem:[%s741_s1 + $0xe8] sm:$0xff]  }
   0x7   :  { %v562_v14 = vld [vmem:[%s741_s1 + $0x18] sm:$0xff]   ;;  %v566_v18 = vld [vmem:[%s741_s1 + $0x20] sm:$0xff]   ;;  %v570_v22 = vld [vmem:[%s741_s1 + $0x28] sm:$0xff]  }
   0x8   :  { %494 = vmatpush3.bf16.msra.mxu0 %v554_v6  ;;  %v563_v15 = vld [vmem:[%s741_s1 + $0x98] sm:$0xff]   ;;  %v567_v19 = vld [vmem:[%s741_s1 + $0xa0] sm:$0xff]   ;;  %v571_v23 = vld [vmem:[%s741_s1 + $0xa8] sm:$0xff]  }
   0x9   :  { %516 = vmatpush3.bf16.msra.mxu1 %v555_v7  ;;  %495 = vmatprep.subr.bf16.mxu0 %v556_v8  ;;  %v572_v24 = vld [vmem:[%s741_s1 + $0x70] sm:$0xff]   ;;  %v576_v28 = vld [vmem:[%s741_s1 + $0x78] sm:$0xff]   ;;  %v22_v32 = vld [vmem:[%s742_s0 + $0x8] sm:$0xff] }
   0xa   :  { %517 = vmatprep.subr.bf16.mxu1 %v557_v9  ;;  %v573_v25 = vld [vmem:[%s741_s1 + $0xf0] sm:$0xff]   ;;  %v577_v29 = vld [vmem:[%s741_s1 + $0xf8] sm:$0xff]   ;;  %v21_v34 = vld [vmem:[%s742_s0] sm:$0xff]  ;;  %v26_v35 = vpack.c.bf16 %v22_v32, %v22_v32 }
   0xb   :  { %v574_v26 = vld [vmem:[%s741_s1 + $0x30] sm:$0xff]   ;;  %v578_v30 = vld [vmem:[%s741_s1 + $0x38] sm:$0xff]   ;;  %v25_v37 = vpack.c.bf16 %v21_v34, %v21_v34  ;;  %v580_v40 = vld [vmem:[%s743_s3] sm:$0xff]  }
   0xc   :  { %496 = vmatpush3.bf16.msra.mxu0 %v558_v10  ;;  %v575_v27 = vld [vmem:[%s741_s1 + $0xb0] sm:$0xff]   ;;  %v579_v31 = vld [vmem:[%s741_s1 + $0xb8] sm:$0xff]   ;;  %324 = vmatprep.mubr.bf16.mxu0 %v26_v35  ;;  %v581_v42 = vld [vmem:[%s743_s3 + $0x8] sm:$0xff]  }
   0xd   :  { %518 = vmatpush3.bf16.msra.mxu1 %v559_v11  ;;  %497 = vmatprep.subr.bf16.mxu0 %v560_v12  ;;  %v24_v33 = vld [vmem:[%s742_s0 + $0x18] sm:$0xff]  ;;  %v23_v38 = vld [vmem:[%s742_s0 + $0x10] sm:$0xff]  ;;  %v453_v45 = vld [vmem:[%s744_s2] ss:$0 sm:$0xff] }
   0xe   :  { %519 = vmatprep.subr.bf16.mxu1 %v561_v13  ;;  %v28_v36 = vpack.c.bf16 %v24_v33, %v24_v33  ;;  %v27_v39 = vpack.c.bf16 %v23_v38, %v23_v38  ;;  %v486_v58 = vld [vmem:[%s745_s4] ss:$0 sm:$0xff] }
  0x10   :  { %498 = vmatpush3.bf16.msra.mxu0 %v562_v14  ;;  %364 = vmatprep.mubr.bf16.mxu1 %v28_v36 }
  0x11   :  { %520 = vmatpush3.bf16.msra.mxu1 %v563_v15  ;;  %499 = vmatprep.subr.bf16.mxu0 %v564_v16 }
  0x12   :  { %521 = vmatprep.subr.bf16.mxu1 %v565_v17 }
  0x14   :  { %500 = vmatpush3.bf16.msra.mxu0 %v566_v18 }
  0x15   :  { %522 = vmatpush3.bf16.msra.mxu1 %v567_v19  ;;  %501 = vmatprep.subr.bf16.mxu0 %v568_v20 }
  0x16   :  { %523 = vmatprep.subr.bf16.mxu1 %v569_v21 }
  0x18   :  { %502 = vmatpush3.bf16.msra.mxu0 %v570_v22 }
  0x19   :  { %524 = vmatpush3.bf16.msra.mxu1 %v571_v23  ;;  %503 = vmatprep.subr.bf16.mxu0 %v572_v24 }
  0x1a   :  { %525 = vmatprep.subr.bf16.mxu1 %v573_v25 }
  0x1c   :  { %504 = vmatpush3.bf16.msra.mxu0 %v574_v26 }
  0x1d   :  { %526 = vmatpush3.bf16.msra.mxu1 %v575_v27  ;;  %505 = vmatprep.subr.bf16.mxu0 %v576_v28 }
  0x1e   :  { %527 = vmatprep.subr.bf16.mxu1 %v577_v29 }
  0x20   :  { %506 = vmatpush3.bf16.msra.mxu0 %v578_v30 }
  0x21   :  { %528 = vmatpush3.bf16.msra.mxu1 %v579_v31  ;;  %538 = vmatprep.subr.bf16.mxu0 %v586_v41 }
  0x23   :  { %325 = vmatmul.mubr.bf16.vlgmr.msra.gmra.mrb[0].mxu0 %v25_v37 }
  0x24   :  { %365 = vmatmul.mubr.bf16.vlgmr.msra.gmra.mrb[0].mxu1 %v27_v39  ;;  %539 = vmatpush3.bf16.msra.mxu0 %v580_v40 }
  0x25   :  { %540 = vmatprep.subr.bf16.mxu0 %v586_v41  ;;  %542 = vmatprep.mubr.msk.bf16.mxu0 %vm587_vm0, %v586_v41 }
  0x28   :  { %541 = vmatpush3.bf16.msra.mxu0 %v581_v42 }
  0xf6   :  { %v507_v43 = vpop.f32.mrb[0].mxu0 }
  0xf7   :  { %v529_v44 = vpop.f32.mrb[0].mxu1  ;;  %v508_v46 = vpop.f32.mrb[1].mxu0 }
  0xf8   :  { %v530_v47 = vpop.f32.mrb[1].mxu1  ;;  %v509_v48 = vadd.f32 %v508_v46, %v507_v43  ;;  %v510_v50 = vpop.f32.mrb[2].mxu0 }
  0xf9   :  { %v531_v49 = vadd.f32 %v530_v47, %v529_v44  ;;  %v532_v51 = vpop.f32.mrb[2].mxu1  ;;  %v511_v52 = vpop.f32.mrb[3].mxu0 }
  0xfa   :  { %v533_v53 = vpop.f32.mrb[3].mxu1  ;;  %v327_v54 = vadd.f32 %v509_v48, %v453_v45 }
  0xfc   :  { %v367_v55 = vadd.f32 %v531_v49, %v327_v54 }
  0xfe   :  { %v372_v56 = vmax.f32 %v367_v55, 0.0 }
 0x100   :  { %v373_v57 = vpack.c.bf16 %v372_v56, %v372_v56 }
 0x102   :  { %543 = vmatmul.mubr.msk.bf16.vlgmr.msra.gmra.mrb[4].mxu0 %vm397_vm1, %v373_v57 }
 0x1d5   :  { %v435_v59 = vpop.f32.mrb[4].mxu0 }
 0x1d6   :  { %v436_v60 = vadd.f32 %v486_v58, %v435_v59  ;;  %v544_v61 = vpop.f32.mrb[5].mxu0 }
 0x1d7   :  { %v438_v62 = vpop.f32.mrb[6].mxu0 }
 0x1d8   :  { %v490_v63 = vmul.f32 -1.442695, %v436_v60  ;;  %v545_v0 = vpop.f32.mrb[7].mxu0 }
 0x1da   :  { %582 = vpow2.f32 %v490_v63 }
 0x1e4   :  { %v583_v1 = vpop.eup %582 }
 0x1e5   :  { %v444_v2 = vadd.f32 1.0, %v583_v1 }
 0x1e7   :  { %584 = vrcp.f32 %v444_v2 }
 0x1f1   :  { %v585_v3 = vpop.eup %584 }
 0x1f2   :  { %448 = vst.msk [vmem:[%s746_s5] sm:$0xff] %vm447_vm2, %v585_v3 }

</bundles_post_ra>
